<compile_context>
chip_gen: v7x
topology: tpu7x:2x2x1
jax: 0.10.0
libtpu: 0.0.40
codegen_flags: <defaults>
</compile_context>

<pallas_src>
import numpy as np

import jax
import jax.numpy as jnp
from jax.experimental import pallas as pl
from jax.experimental.pallas import tpu as pltpu


# ----------------------------------------------------------------------------- kernel
def _fused_kernel(x_ref, w1_ref, b1_ref, w2_ref, b2_ref, rsel_ref, csel_ref,
                  fw1_ref, fb1_ref, fw2_ref, fb2_ref, fw3_ref, fb3_ref,
                  fw4_ref, fb4_ref, o_ref):
    """TI images per step: conv1+ReLU, conv2+ReLU, maxpool2x2, fused MLP head."""
    x = x_ref[0]                                    # (TI*28+8, 84) bf16
    rows = x.shape[0] - 8                           # TI*28  (static)
    ti = rows // 28

    # conv1 (+bias+ReLU): single banded matmul, all 3 dy offsets folded into K=84.
    h1 = jnp.dot(x, w1_ref[...], preferred_element_type=jnp.float32)
    h1 = jnp.maximum(h1 + b1_ref[...], 0.0)         # (TI*28+8, 832) f32
    h1b = h1.astype(jnp.bfloat16)                   # cast once (hoisted out of dz loop)

    # conv2 (+bias+ReLU): 3 banded matmuls accumulated over the kernel-row offset dz.
    # TODO(synk): the dz=1,2 sublane slices could become pltpu.roll()s (XLU) if the
    #   in-VMEM relayout copies ever show up on the critical path.
    h2 = jnp.dot(h1b[0:rows], w2_ref[0], preferred_element_type=jnp.float32)
    h2 = h2 + jnp.dot(h1b[1:rows + 1], w2_ref[1], preferred_element_type=jnp.float32)
    h2 = h2 + jnp.dot(h1b[2:rows + 2], w2_ref[2], preferred_element_type=jnp.float32)
    h2 = jnp.maximum(h2 + b2_ref[...], 0.0)         # (TI*28, 768) f32
    h2b = h2.astype(jnp.bfloat16)

    # 2x2 max-pool.  Row pool + row compaction via block-diagonal 0/1 selection matmuls
    # (output rows ordered hp*TI+n), then lane-dense column-selection matmuls.
    r0 = jnp.dot(rsel_ref[0], h2b, preferred_element_type=jnp.float32)
    r1 = jnp.dot(rsel_ref[1], h2b, preferred_element_type=jnp.float32)
    rmax = jnp.maximum(r0, r1).astype(jnp.bfloat16)              # (TI*12, 768)
    c0 = jnp.dot(rmax, csel_ref[0], preferred_element_type=jnp.float32)
    c1 = jnp.dot(rmax, csel_ref[1], preferred_element_type=jnp.float32)
    pooled = jnp.maximum(c0, c1).astype(jnp.bfloat16)            # (TI*12, 384)

    # Per-image feature rows (TI, 4608): aligned row blocks concatenated along lanes
    # (offsets are multiples of 384 = 3 lane tiles -> no relayout).
    feats = jnp.concatenate([pooled[hp * ti:(hp + 1) * ti, :] for hp in range(12)],
                            axis=1)                              # (TI, 4608) bf16

    # Fused MLP head: 4608->128->128->64->1 (padded to 128 lanes), bf16 x bf16, f32 acc.
    h = jnp.dot(feats, fw1_ref[...], preferred_element_type=jnp.float32)
    h = jnp.maximum(h + fb1_ref[...], 0.0).astype(jnp.bfloat16)
    h = jnp.dot(h, fw2_ref[...], preferred_element_type=jnp.float32)
    h = jnp.maximum(h + fb2_ref[...], 0.0).astype(jnp.bfloat16)
    h = jnp.dot(h, fw3_ref[...], preferred_element_type=jnp.float32)
    h = jnp.maximum(h + fb3_ref[...], 0.0).astype(jnp.bfloat16)
    y = jnp.dot(h, fw4_ref[...], preferred_element_type=jnp.float32) + fb4_ref[...]
    o_ref[0] = y                                    # (TI, 128) f32, column 0 = logit


# ----------------------------------------------------------------------------- wrapper
def _pick_images_per_block(n):
    """TI=16 fills the MXU everywhere; for tiny n keep >=2 grid steps (v7x dual-TC)."""
    if n >= 32:
        return 16
    ti = (n + 1) // 2
    ti = ti + (ti % 2)                               # even so TI*28 % 8 == 0
    return max(2, min(ti, 16))


def _row_pool_selectors(ti):
    """0/1 (2, TI*12, TI*28) matrices: pool rows 2hp/2hp+1 of image n into row hp*TI+n."""
    r = np.zeros((2, ti * 12, ti * 28), np.float32)
    for hp in range(12):
        for n in range(ti):
            r[0, hp * ti + n, n * 28 + 2 * hp] = 1.0
            r[1, hp * ti + n, n * 28 + 2 * hp + 1] = 1.0
    return jnp.asarray(r, dtype=jnp.bfloat16)


def _run_fused(x3_blocks, rsel, p, n_blocks, ti):
    r8 = ti * 28 + 8
    flops = 2 * n_blocks * (
        r8 * 84 * 832 + 3 * ti * 28 * 832 * 768
        + 2 * ti * 12 * ti * 28 * 768 + 2 * ti * 12 * 768 * 384
        + ti * (4608 * 128 + 128 * 128 + 128 * 64 + 64 * 128))
    bytes_acc = (x3_blocks.size * 2 + n_blocks * ti * 128 * 4
                 + (84 * 832 + 3 * 832 * 768 + 2 * ti * 12 * ti * 28 + 2 * 768 * 384
                    + 4608 * 128 + 128 * 128 + 128 * 64 + 64 * 128) * 2
                 + (832 + 768 + 128 + 128 + 64 + 128) * 4)
    return pl.pallas_call(
        _fused_kernel,
        out_shape=jax.ShapeDtypeStruct((n_blocks, ti, 128), jnp.float32),
        grid=(n_blocks,),
        in_specs=[
            pl.BlockSpec((1, r8, 84), lambda i: (i, 0, 0)),          # TI images (84-wide rows)
            pl.BlockSpec((84, 832), lambda i: (0, 0)),               # conv1 band (dy folded)
            pl.BlockSpec((1, 832), lambda i: (0, 0)),                # conv1 bias (tiled)
            pl.BlockSpec((3, 832, 768), lambda i: (0, 0, 0)),        # conv2 bands (per dz)
            pl.BlockSpec((1, 768), lambda i: (0, 0)),                # conv2 bias (tiled)
            pl.BlockSpec((2, ti * 12, ti * 28), lambda i: (0, 0, 0)),  # pool row selectors
            pl.BlockSpec((2, 768, 384), lambda i: (0, 0, 0)),        # pool col selectors
            pl.BlockSpec((4608, 128), lambda i: (0, 0)),             # fc1 (HWC-permuted)
            pl.BlockSpec((1, 128), lambda i: (0, 0)),
            pl.BlockSpec((128, 128), lambda i: (0, 0)),              # fc2
            pl.BlockSpec((1, 128), lambda i: (0, 0)),
            pl.BlockSpec((128, 64), lambda i: (0, 0)),               # fc3
            pl.BlockSpec((1, 64), lambda i: (0, 0)),
            pl.BlockSpec((64, 128), lambda i: (0, 0)),               # fc4 (lane-padded)
            pl.BlockSpec((1, 128), lambda i: (0, 0)),
        ],
        out_specs=pl.BlockSpec((1, ti, 128), lambda i: (i, 0, 0)),
        compiler_params=pltpu.CompilerParams(
            dimension_semantics=("parallel",),
            vmem_limit_bytes=40 << 20,                               # fits v7x's 64 MiB
        ),
        cost_estimate=pl.CostEstimate(flops=flops, transcendentals=0,
                                      bytes_accessed=bytes_acc),
    )(x3_blocks, p["conv1_band"], p["conv1_bvec"], p["conv2_band"], p["conv2_bvec"],
      rsel, p["pool_colsel"], p["fc1_w"], p["fc1_b"], p["fc2_w"], p["fc2_b"],
      p["fc3_w"], p["fc3_b"], p["fc4_w"], p["fc4_b"])


# ----------------------------------------------------------------------------- init glue
def conv_band_matrices(w, win, wout):
    """Fold a (3,3,Cin,Cout) conv kernel into 3 banded matrices (one per row offset dy):
    A[dy][(j+dx)*Cin + ci, j*Cout + co] = w[dy, dx, ci, co]."""
    kh, kw, cin, cout = w.shape
    eye = jnp.eye(wout, dtype=jnp.float32)
    mats = []
    for dy in range(kh):
        m = jnp.zeros((win, cin, wout, cout), jnp.float32)
        for dx in range(kw):
            shift = jnp.zeros((win, wout), jnp.float32).at[dx:dx + wout, :].set(eye)
            m = m + shift[:, None, :, None] * w[dy, dx][None, :, None, :]
        mats.append(m.reshape(win * cin, wout * cout))
    return jnp.stack(mats)


def _col_pool_selectors():
    """0/1 (2, 768, 384) matrices implementing the width half of 2x2 max-pool."""
    c = np.zeros((2, 768, 384), np.float32)
    q = np.arange(384)
    p0 = q + (q // 32) * 32                          # column 2*wp*32 + ch
    c[0, p0, q] = 1.0
    c[1, p0 + 32, q] = 1.0                           # column (2*wp+1)*32 + ch
    return jnp.asarray(c, dtype=jnp.bfloat16)


def init_params(key):
    """Deterministic synthetic weights (PyTorch-style uniform init), pre-transformed."""
    ks = jax.random.split(key, 12)

    def u(k, shape, fan_in):
        bound = 1.0 / float(fan_in) ** 0.5
        return jax.random.uniform(k, shape, jnp.float32, -bound, bound)

    conv1_w = u(ks[0], (32, 1, 3, 3), 9)             # (Cout, Cin, kh, kw)
    conv1_b = u(ks[1], (32,), 9)
    conv2_w = u(ks[2], (32, 32, 3, 3), 288)
    conv2_b = u(ks[3], (32,), 288)
    fc1_w = u(ks[4], (4608, 128), 4608)              # synthetic weights already (in, out)
    fc1_b = u(ks[5], (128,), 4608)
    fc2_w = u(ks[6], (128, 128), 128)
    fc2_b = u(ks[7], (128,), 128)
    fc3_w = u(ks[8], (128, 64), 128)
    fc3_b = u(ks[9], (64,), 128)
    fc4_w = u(ks[10], (64, 1), 64)
    fc4_b = u(ks[11], (1,), 64)

    w1 = jnp.transpose(conv1_w, (2, 3, 1, 0))        # (dy, dx, Cin, Cout)
    w2 = jnp.transpose(conv2_w, (2, 3, 1, 0))

    p = {
        # conv1: stack the 3 dy bands along K (matches the wrapper's 84-wide rows).
        "conv1_band": conv_band_matrices(w1, 28, 26).reshape(84, 832).astype(jnp.bfloat16),
        "conv1_bvec": jnp.tile(conv1_b, 26).reshape(1, 832),
        "conv2_band": conv_band_matrices(w2, 26, 24).astype(jnp.bfloat16),   # (3, 832, 768)
        "conv2_bvec": jnp.tile(conv2_b, 24).reshape(1, 768),
        "pool_colsel": _col_pool_selectors(),
    }

    # fc1: permute rows once so the kernel's HWC flatten order matches PyTorch's
    # NCHW ElementFlatten order (no runtime activation transpose).
    hh, ww, cc = np.meshgrid(np.arange(12), np.arange(12), np.arange(32), indexing="ij")
    src = (cc * 144 + hh * 12 + ww).reshape(-1)
    p["fc1_w"] = fc1_w[jnp.asarray(src), :].astype(jnp.bfloat16)
    p["fc1_b"] = fc1_b.reshape(1, 128)
    p["fc2_w"] = fc2_w.astype(jnp.bfloat16)
    p["fc2_b"] = fc2_b.reshape(1, 128)
    p["fc3_w"] = fc3_w.astype(jnp.bfloat16)
    p["fc3_b"] = fc3_b.reshape(1, 64)
    # fc4 padded to 128 output lanes so the final store is lane-dense.
    p["fc4_w"] = jnp.zeros((64, 128), jnp.float32).at[:, 0:1].set(fc4_w).astype(jnp.bfloat16)
    p["fc4_b"] = jnp.zeros((1, 128), jnp.float32).at[0, 0].set(fc4_b[0])
    return p


# ----------------------------------------------------------------------------- forward
def set2subset_forward(params, x, logprobs=True):
    """x: (B, S, 1, 28, 28) float32 (PyTorch NCHW per set element) -> (B, S, 1)."""
    B, S, C, H, W = x.shape
    assert (C, H, W) == (1, 28, 28)
    n = B * S
    imgs = x.reshape(n, 28, 28)

    ti = _pick_images_per_block(n)
    n_blocks = -(-n // ti)
    n_pad = n_blocks * ti
    if n_pad > n:
        imgs = jnp.pad(imgs, ((0, n_pad - n), (0, 0), (0, 0)))

    # Fold conv1's 3 kernel-row offsets into the lane dim: each row carries its own 28
    # pixels plus the next two rows' pixels (zeros past the image bottom) -> 84 lanes.
    z1 = jnp.zeros((n_pad, 1, 28), imgs.dtype)
    z2 = jnp.zeros((n_pad, 2, 28), imgs.dtype)
    x3 = jnp.concatenate(
        [imgs,
         jnp.concatenate([imgs[:, 1:, :], z1], axis=1),
         jnp.concatenate([imgs[:, 2:, :], z2], axis=1)], axis=2)      # (n_pad, 28, 84)
    x3 = x3.astype(jnp.bfloat16).reshape(n_blocks, ti * 28, 84)
    x3 = jnp.pad(x3, ((0, 0), (0, 8), (0, 0)))                        # +8 pad rows / block

    rsel = _row_pool_selectors(ti)                                    # TI-dependent consts
    y = _run_fused(x3, rsel, params, n_blocks, ti)                    # (n_blocks, ti, 128)
    y = y.reshape(n_pad, 128)[:n, 0:1].reshape(B, S, 1)
    if not logprobs:
        y = jax.nn.sigmoid(y)
    return y


if __name__ == "__main__":
    key = jax.random.PRNGKey(0)
    pkey, xkey = jax.random.split(key)
    params = init_params(pkey)

    B, S = 2, 3                                       # small set of MNIST-sized digits
    x = jax.random.normal(xkey, (B, S, 1, 28, 28), jnp.float32)

    fwd = jax.jit(lambda p, xx: set2subset_forward(p, xx, logprobs=True))
    out = fwd(params, x)
    out = jax.block_until_ready(out)

    assert out.shape == (B, S, 1), out.shape
    assert out.dtype == jnp.float32
    assert bool(jnp.all(jnp.isfinite(out)))
    print("KERNEL_OK")
</pallas_src>

<mosaic_0001>
module attributes {stable_mosaic.version = 11 : i64} {
  func.func @_fused_kernel(%arg0: i32, %arg1: memref<1x120x84xbf16, #tpu.memory_space<vmem>>, %arg2: memref<84x832xbf16, #tpu.memory_space<vmem>>, %arg3: memref<1x832xf32, #tpu.memory_space<vmem>>, %arg4: memref<3x832x768xbf16, #tpu.memory_space<vmem>>, %arg5: memref<1x768xf32, #tpu.memory_space<vmem>>, %arg6: memref<2x48x112xbf16, #tpu.memory_space<vmem>>, %arg7: memref<2x768x384xbf16, #tpu.memory_space<vmem>>, %arg8: memref<4608x128xbf16, #tpu.memory_space<vmem>>, %arg9: memref<1x128xf32, #tpu.memory_space<vmem>>, %arg10: memref<128x128xbf16, #tpu.memory_space<vmem>>, %arg11: memref<1x128xf32, #tpu.memory_space<vmem>>, %arg12: memref<128x64xbf16, #tpu.memory_space<vmem>>, %arg13: memref<1x64xf32, #tpu.memory_space<vmem>>, %arg14: memref<64x128xbf16, #tpu.memory_space<vmem>>, %arg15: memref<1x128xf32, #tpu.memory_space<vmem>>, %arg16: memref<1x4x128xf32, #tpu.memory_space<vmem>>) attributes {dimension_semantics = [#tpu.dimension_semantics<parallel>], iteration_bounds = array<i64: 2>, scalar_prefetch = 0 : i64, scratch_operands = 0 : i64, tpu.core_type = #tpu.core_type<tc>, window_params = [{transform_indices = @transform_0, window_bounds = array<i64: 1, 120, 84>}, {pipeline_mode = #tpu.pipeline_mode<synchronous>, transform_indices = @transform_1, window_bounds = array<i64: 84, 832>}, {pipeline_mode = #tpu.pipeline_mode<synchronous>, transform_indices = @transform_2, window_bounds = array<i64: 1, 832>}, {pipeline_mode = #tpu.pipeline_mode<synchronous>, transform_indices = @transform_3, window_bounds = array<i64: 3, 832, 768>}, {pipeline_mode = #tpu.pipeline_mode<synchronous>, transform_indices = @transform_4, window_bounds = array<i64: 1, 768>}, {pipeline_mode = #tpu.pipeline_mode<synchronous>, transform_indices = @transform_5, window_bounds = array<i64: 2, 48, 112>}, {pipeline_mode = #tpu.pipeline_mode<synchronous>, transform_indices = @transform_6, window_bounds = array<i64: 2, 768, 384>}, {pipeline_mode = #tpu.pipeline_mode<synchronous>, transform_indices = @transform_7, window_bounds = array<i64: 4608, 128>}, {pipeline_mode = #tpu.pipeline_mode<synchronous>, transform_indices = @transform_8, window_bounds = array<i64: 1, 128>}, {pipeline_mode = #tpu.pipeline_mode<synchronous>, transform_indices = @transform_9, window_bounds = array<i64: 128, 128>}, {pipeline_mode = #tpu.pipeline_mode<synchronous>, transform_indices = @transform_10, window_bounds = array<i64: 1, 128>}, {pipeline_mode = #tpu.pipeline_mode<synchronous>, transform_indices = @transform_11, window_bounds = array<i64: 128, 64>}, {pipeline_mode = #tpu.pipeline_mode<synchronous>, transform_indices = @transform_12, window_bounds = array<i64: 1, 64>}, {pipeline_mode = #tpu.pipeline_mode<synchronous>, transform_indices = @transform_13, window_bounds = array<i64: 64, 128>}, {pipeline_mode = #tpu.pipeline_mode<synchronous>, transform_indices = @transform_14, window_bounds = array<i64: 1, 128>}, {transform_indices = @transform_15, window_bounds = array<i64: 1, 4, 128>}]} {
    %c0 = arith.constant 0 : index
    %c0_0 = arith.constant 0 : index
    %c0_1 = arith.constant 0 : index
    %0 = vector.load %arg1[%c0, %c0_0, %c0_1] : memref<1x120x84xbf16, #tpu.memory_space<vmem>>, vector<1x120x84xbf16>
    %1 = vector.shape_cast %0 : vector<1x120x84xbf16> to vector<120x84xbf16>
    %c0_2 = arith.constant 0 : index
    %c0_3 = arith.constant 0 : index
    %2 = vector.load %arg2[%c0_2, %c0_3] : memref<84x832xbf16, #tpu.memory_space<vmem>>, vector<84x832xbf16>
    %cst = arith.constant dense<0.000000e+00> : vector<120x832xf32>
    %3 = tpu.matmul %1, %2, %cst {dimension_numbers = #tpu.dot_dimension_numbers<[1], [0], [0], [1], [0, 0, 1, 1], [], []>} : vector<120x84xbf16>, vector<84x832xbf16>, vector<120x832xf32> -> vector<120x832xf32>
    %c0_4 = arith.constant 0 : index
    %c0_5 = arith.constant 0 : index
    %4 = vector.load %arg3[%c0_4, %c0_5] : memref<1x832xf32, #tpu.memory_space<vmem>>, vector<1x832xf32>
    %5 = vector.broadcast %4 : vector<1x832xf32> to vector<120x832xf32>
    %6 = arith.addf %3, %5 : vector<120x832xf32>
    %cst_6 = arith.constant 0.000000e+00 : f32
    %7 = vector.broadcast %cst_6 : f32 to vector<120x832xf32>
    %8 = arith.maximumf %6, %7 : vector<120x832xf32>
    %9 = arith.truncf %8 : vector<120x832xf32> to vector<120x832xbf16>
    %10 = vector.extract_strided_slice %9 {offsets = [0, 0], sizes = [112, 832], strides = [1, 1]} : vector<120x832xbf16> to vector<112x832xbf16>
    %c0_7 = arith.constant 0 : index
    %c0_8 = arith.constant 0 : index
    %c0_9 = arith.constant 0 : index
    %11 = vector.load %arg4[%c0_7, %c0_8, %c0_9] : memref<3x832x768xbf16, #tpu.memory_space<vmem>>, vector<1x832x768xbf16>
    %12 = vector.shape_cast %11 : vector<1x832x768xbf16> to vector<832x768xbf16>
    %cst_10 = arith.constant dense<0.000000e+00> : vector<112x768xf32>
    %13 = tpu.matmul %10, %12, %cst_10 {dimension_numbers = #tpu.dot_dimension_numbers<[1], [0], [0], [1], [0, 0, 1, 1], [], []>} : vector<112x832xbf16>, vector<832x768xbf16>, vector<112x768xf32> -> vector<112x768xf32>
    %14 = vector.extract_strided_slice %9 {offsets = [1, 0], sizes = [112, 832], strides = [1, 1]} : vector<120x832xbf16> to vector<112x832xbf16>
    %c1 = arith.constant 1 : index
    %c0_11 = arith.constant 0 : index
    %c0_12 = arith.constant 0 : index
    %15 = vector.load %arg4[%c1, %c0_11, %c0_12] : memref<3x832x768xbf16, #tpu.memory_space<vmem>>, vector<1x832x768xbf16>
    %16 = vector.shape_cast %15 : vector<1x832x768xbf16> to vector<832x768xbf16>
    %cst_13 = arith.constant dense<0.000000e+00> : vector<112x768xf32>
    %17 = tpu.matmul %14, %16, %cst_13 {dimension_numbers = #tpu.dot_dimension_numbers<[1], [0], [0], [1], [0, 0, 1, 1], [], []>} : vector<112x832xbf16>, vector<832x768xbf16>, vector<112x768xf32> -> vector<112x768xf32>
    %18 = arith.addf %13, %17 : vector<112x768xf32>
    %19 = vector.extract_strided_slice %9 {offsets = [2, 0], sizes = [112, 832], strides = [1, 1]} : vector<120x832xbf16> to vector<112x832xbf16>
    %c2 = arith.constant 2 : index
    %c0_14 = arith.constant 0 : index
    %c0_15 = arith.constant 0 : index
    %20 = vector.load %arg4[%c2, %c0_14, %c0_15] : memref<3x832x768xbf16, #tpu.memory_space<vmem>>, vector<1x832x768xbf16>
    %21 = vector.shape_cast %20 : vector<1x832x768xbf16> to vector<832x768xbf16>
    %cst_16 = arith.constant dense<0.000000e+00> : vector<112x768xf32>
    %22 = tpu.matmul %19, %21, %cst_16 {dimension_numbers = #tpu.dot_dimension_numbers<[1], [0], [0], [1], [0, 0, 1, 1], [], []>} : vector<112x832xbf16>, vector<832x768xbf16>, vector<112x768xf32> -> vector<112x768xf32>
    %23 = arith.addf %18, %22 : vector<112x768xf32>
    %c0_17 = arith.constant 0 : index
    %c0_18 = arith.constant 0 : index
    %24 = vector.load %arg5[%c0_17, %c0_18] : memref<1x768xf32, #tpu.memory_space<vmem>>, vector<1x768xf32>
    %25 = vector.broadcast %24 : vector<1x768xf32> to vector<112x768xf32>
    %26 = arith.addf %23, %25 : vector<112x768xf32>
    %cst_19 = arith.constant 0.000000e+00 : f32
    %27 = vector.broadcast %cst_19 : f32 to vector<112x768xf32>
    %28 = arith.maximumf %26, %27 : vector<112x768xf32>
    %29 = arith.truncf %28 : vector<112x768xf32> to vector<112x768xbf16>
    %c0_20 = arith.constant 0 : index
    %c0_21 = arith.constant 0 : index
    %c0_22 = arith.constant 0 : index
    %30 = vector.load %arg6[%c0_20, %c0_21, %c0_22] : memref<2x48x112xbf16, #tpu.memory_space<vmem>>, vector<1x48x112xbf16>
    %31 = vector.shape_cast %30 : vector<1x48x112xbf16> to vector<48x112xbf16>
    %cst_23 = arith.constant dense<0.000000e+00> : vector<48x768xf32>
    %32 = tpu.matmul %31, %29, %cst_23 {dimension_numbers = #tpu.dot_dimension_numbers<[1], [0], [0], [1], [0, 0, 1, 1], [], []>} : vector<48x112xbf16>, vector<112x768xbf16>, vector<48x768xf32> -> vector<48x768xf32>
    %c1_24 = arith.constant 1 : index
    %c0_25 = arith.constant 0 : index
    %c0_26 = arith.constant 0 : index
    %33 = vector.load %arg6[%c1_24, %c0_25, %c0_26] : memref<2x48x112xbf16, #tpu.memory_space<vmem>>, vector<1x48x112xbf16>
    %34 = vector.shape_cast %33 : vector<1x48x112xbf16> to vector<48x112xbf16>
    %cst_27 = arith.constant dense<0.000000e+00> : vector<48x768xf32>
    %35 = tpu.matmul %34, %29, %cst_27 {dimension_numbers = #tpu.dot_dimension_numbers<[1], [0], [0], [1], [0, 0, 1, 1], [], []>} : vector<48x112xbf16>, vector<112x768xbf16>, vector<48x768xf32> -> vector<48x768xf32>
    %36 = arith.maximumf %32, %35 : vector<48x768xf32>
    %37 = arith.truncf %36 : vector<48x768xf32> to vector<48x768xbf16>
    %c0_28 = arith.constant 0 : index
    %c0_29 = arith.constant 0 : index
    %c0_30 = arith.constant 0 : index
    %38 = vector.load %arg7[%c0_28, %c0_29, %c0_30] : memref<2x768x384xbf16, #tpu.memory_space<vmem>>, vector<1x768x384xbf16>
    %39 = vector.shape_cast %38 : vector<1x768x384xbf16> to vector<768x384xbf16>
    %cst_31 = arith.constant dense<0.000000e+00> : vector<48x384xf32>
    %40 = tpu.matmul %37, %39, %cst_31 {dimension_numbers = #tpu.dot_dimension_numbers<[1], [0], [0], [1], [0, 0, 1, 1], [], []>} : vector<48x768xbf16>, vector<768x384xbf16>, vector<48x384xf32> -> vector<48x384xf32>
    %c1_32 = arith.constant 1 : index
    %c0_33 = arith.constant 0 : index
    %c0_34 = arith.constant 0 : index
    %41 = vector.load %arg7[%c1_32, %c0_33, %c0_34] : memref<2x768x384xbf16, #tpu.memory_space<vmem>>, vector<1x768x384xbf16>
    %42 = vector.shape_cast %41 : vector<1x768x384xbf16> to vector<768x384xbf16>
    %cst_35 = arith.constant dense<0.000000e+00> : vector<48x384xf32>
    %43 = tpu.matmul %37, %42, %cst_35 {dimension_numbers = #tpu.dot_dimension_numbers<[1], [0], [0], [1], [0, 0, 1, 1], [], []>} : vector<48x768xbf16>, vector<768x384xbf16>, vector<48x384xf32> -> vector<48x384xf32>
    %44 = arith.maximumf %40, %43 : vector<48x384xf32>
    %45 = arith.truncf %44 : vector<48x384xf32> to vector<48x384xbf16>
    %46 = vector.extract_strided_slice %45 {offsets = [0, 0], sizes = [4, 384], strides = [1, 1]} : vector<48x384xbf16> to vector<4x384xbf16>
    %47 = vector.extract_strided_slice %45 {offsets = [4, 0], sizes = [4, 384], strides = [1, 1]} : vector<48x384xbf16> to vector<4x384xbf16>
    %48 = vector.extract_strided_slice %45 {offsets = [8, 0], sizes = [4, 384], strides = [1, 1]} : vector<48x384xbf16> to vector<4x384xbf16>
    %49 = vector.extract_strided_slice %45 {offsets = [12, 0], sizes = [4, 384], strides = [1, 1]} : vector<48x384xbf16> to vector<4x384xbf16>
    %50 = vector.extract_strided_slice %45 {offsets = [16, 0], sizes = [4, 384], strides = [1, 1]} : vector<48x384xbf16> to vector<4x384xbf16>
    %51 = vector.extract_strided_slice %45 {offsets = [20, 0], sizes = [4, 384], strides = [1, 1]} : vector<48x384xbf16> to vector<4x384xbf16>
    %52 = vector.extract_strided_slice %45 {offsets = [24, 0], sizes = [4, 384], strides = [1, 1]} : vector<48x384xbf16> to vector<4x384xbf16>
    %53 = vector.extract_strided_slice %45 {offsets = [28, 0], sizes = [4, 384], strides = [1, 1]} : vector<48x384xbf16> to vector<4x384xbf16>
    %54 = vector.extract_strided_slice %45 {offsets = [32, 0], sizes = [4, 384], strides = [1, 1]} : vector<48x384xbf16> to vector<4x384xbf16>
    %55 = vector.extract_strided_slice %45 {offsets = [36, 0], sizes = [4, 384], strides = [1, 1]} : vector<48x384xbf16> to vector<4x384xbf16>
    %56 = vector.extract_strided_slice %45 {offsets = [40, 0], sizes = [4, 384], strides = [1, 1]} : vector<48x384xbf16> to vector<4x384xbf16>
    %57 = vector.extract_strided_slice %45 {offsets = [44, 0], sizes = [4, 384], strides = [1, 1]} : vector<48x384xbf16> to vector<4x384xbf16>
    %58 = tpu.concatenate %46, %47, %48, %49, %50, %51, %52, %53, %54, %55, %56, %57 in 1 : vector<4x384xbf16>, vector<4x384xbf16>, vector<4x384xbf16>, vector<4x384xbf16>, vector<4x384xbf16>, vector<4x384xbf16>, vector<4x384xbf16>, vector<4x384xbf16>, vector<4x384xbf16>, vector<4x384xbf16>, vector<4x384xbf16>, vector<4x384xbf16> -> vector<4x4608xbf16>
    %c0_36 = arith.constant 0 : index
    %c0_37 = arith.constant 0 : index
    %59 = vector.load %arg8[%c0_36, %c0_37] : memref<4608x128xbf16, #tpu.memory_space<vmem>>, vector<4608x128xbf16>
    %cst_38 = arith.constant dense<0.000000e+00> : vector<4x128xf32>
    %60 = tpu.matmul %58, %59, %cst_38 {dimension_numbers = #tpu.dot_dimension_numbers<[1], [0], [0], [1], [0, 0, 1, 1], [], []>} : vector<4x4608xbf16>, vector<4608x128xbf16>, vector<4x128xf32> -> vector<4x128xf32>
    %c0_39 = arith.constant 0 : index
    %c0_40 = arith.constant 0 : index
    %61 = vector.load %arg9[%c0_39, %c0_40] : memref<1x128xf32, #tpu.memory_space<vmem>>, vector<1x128xf32>
    %62 = vector.broadcast %61 : vector<1x128xf32> to vector<4x128xf32>
    %63 = arith.addf %60, %62 : vector<4x128xf32>
    %cst_41 = arith.constant 0.000000e+00 : f32
    %64 = vector.broadcast %cst_41 : f32 to vector<4x128xf32>
    %65 = arith.maximumf %63, %64 : vector<4x128xf32>
    %66 = arith.truncf %65 : vector<4x128xf32> to vector<4x128xbf16>
    %c0_42 = arith.constant 0 : index
    %c0_43 = arith.constant 0 : index
    %67 = vector.load %arg10[%c0_42, %c0_43] : memref<128x128xbf16, #tpu.memory_space<vmem>>, vector<128x128xbf16>
    %cst_44 = arith.constant dense<0.000000e+00> : vector<4x128xf32>
    %68 = tpu.matmul %66, %67, %cst_44 {dimension_numbers = #tpu.dot_dimension_numbers<[1], [0], [0], [1], [0, 0, 1, 1], [], []>} : vector<4x128xbf16>, vector<128x128xbf16>, vector<4x128xf32> -> vector<4x128xf32>
    %c0_45 = arith.constant 0 : index
    %c0_46 = arith.constant 0 : index
    %69 = vector.load %arg11[%c0_45, %c0_46] : memref<1x128xf32, #tpu.memory_space<vmem>>, vector<1x128xf32>
    %70 = vector.broadcast %69 : vector<1x128xf32> to vector<4x128xf32>
    %71 = arith.addf %68, %70 : vector<4x128xf32>
    %cst_47 = arith.constant 0.000000e+00 : f32
    %72 = vector.broadcast %cst_47 : f32 to vector<4x128xf32>
    %73 = arith.maximumf %71, %72 : vector<4x128xf32>
    %74 = arith.truncf %73 : vector<4x128xf32> to vector<4x128xbf16>
    %c0_48 = arith.constant 0 : index
    %c0_49 = arith.constant 0 : index
    %75 = vector.load %arg12[%c0_48, %c0_49] : memref<128x64xbf16, #tpu.memory_space<vmem>>, vector<128x64xbf16>
    %cst_50 = arith.constant dense<0.000000e+00> : vector<4x64xf32>
    %76 = tpu.matmul %74, %75, %cst_50 {dimension_numbers = #tpu.dot_dimension_numbers<[1], [0], [0], [1], [0, 0, 1, 1], [], []>} : vector<4x128xbf16>, vector<128x64xbf16>, vector<4x64xf32> -> vector<4x64xf32>
    %c0_51 = arith.constant 0 : index
    %c0_52 = arith.constant 0 : index
    %77 = vector.load %arg13[%c0_51, %c0_52] : memref<1x64xf32, #tpu.memory_space<vmem>>, vector<1x64xf32>
    %78 = vector.broadcast %77 : vector<1x64xf32> to vector<4x64xf32>
    %79 = arith.addf %76, %78 : vector<4x64xf32>
    %cst_53 = arith.constant 0.000000e+00 : f32
    %80 = vector.broadcast %cst_53 : f32 to vector<4x64xf32>
    %81 = arith.maximumf %79, %80 : vector<4x64xf32>
    %82 = arith.truncf %81 : vector<4x64xf32> to vector<4x64xbf16>
    %c0_54 = arith.constant 0 : index
    %c0_55 = arith.constant 0 : index
    %83 = vector.load %arg14[%c0_54, %c0_55] : memref<64x128xbf16, #tpu.memory_space<vmem>>, vector<64x128xbf16>
    %cst_56 = arith.constant dense<0.000000e+00> : vector<4x128xf32>
    %84 = tpu.matmul %82, %83, %cst_56 {dimension_numbers = #tpu.dot_dimension_numbers<[1], [0], [0], [1], [0, 0, 1, 1], [], []>} : vector<4x64xbf16>, vector<64x128xbf16>, vector<4x128xf32> -> vector<4x128xf32>
    %c0_57 = arith.constant 0 : index
    %c0_58 = arith.constant 0 : index
    %85 = vector.load %arg15[%c0_57, %c0_58] : memref<1x128xf32, #tpu.memory_space<vmem>>, vector<1x128xf32>
    %86 = vector.broadcast %85 : vector<1x128xf32> to vector<4x128xf32>
    %87 = arith.addf %84, %86 : vector<4x128xf32>
    %c0_59 = arith.constant 0 : index
    %c0_60 = arith.constant 0 : index
    %c0_61 = arith.constant 0 : index
    %88 = vector.load %arg16[%c0_59, %c0_60, %c0_61] : memref<1x4x128xf32, #tpu.memory_space<vmem>>, vector<1x4x128xf32>
    %89 = vector.shape_cast %88 : vector<1x4x128xf32> to vector<4x128xf32>
    %90 = vector.shape_cast %87 : vector<4x128xf32> to vector<1x4x128xf32>
    tpu.vector_store %arg16[%c0_59, %c0_60, %c0_61], %90 {strides = array<i32>} : memref<1x4x128xf32, #tpu.memory_space<vmem>>, vector<1x4x128xf32>,
    return
  }
  func.func @transform_0(%arg0: i32) -> (i32, i32, i32) {
    %c0_i32 = arith.constant 0 : i32
    %c0_i32_0 = arith.constant 0 : i32
    %c0_i32_1 = arith.constant 0 : i32
    return %arg0, %c0_i32, %c0_i32_0 : i32, i32, i32
  }
  func.func @transform_1(%arg0: i32) -> (i32, i32) {
    %c0_i32 = arith.constant 0 : i32
    %c0_i32_0 = arith.constant 0 : i32
    %c0_i32_1 = arith.constant 0 : i32
    return %c0_i32, %c0_i32_0 : i32, i32
  }
  func.func @transform_2(%arg0: i32) -> (i32, i32) {
    %c0_i32 = arith.constant 0 : i32
    %c0_i32_0 = arith.constant 0 : i32
    %c0_i32_1 = arith.constant 0 : i32
    return %c0_i32, %c0_i32_0 : i32, i32
  }
  func.func @transform_3(%arg0: i32) -> (i32, i32, i32) {
    %c0_i32 = arith.constant 0 : i32
    %c0_i32_0 = arith.constant 0 : i32
    %c0_i32_1 = arith.constant 0 : i32
    %c0_i32_2 = arith.constant 0 : i32
    return %c0_i32, %c0_i32_0, %c0_i32_1 : i32, i32, i32
  }
  func.func @transform_4(%arg0: i32) -> (i32, i32) {
    %c0_i32 = arith.constant 0 : i32
    %c0_i32_0 = arith.constant 0 : i32
    %c0_i32_1 = arith.constant 0 : i32
    return %c0_i32, %c0_i32_0 : i32, i32
  }
  func.func @transform_5(%arg0: i32) -> (i32, i32, i32) {
    %c0_i32 = arith.constant 0 : i32
    %c0_i32_0 = arith.constant 0 : i32
    %c0_i32_1 = arith.constant 0 : i32
    %c0_i32_2 = arith.constant 0 : i32
    return %c0_i32, %c0_i32_0, %c0_i32_1 : i32, i32, i32
  }
  func.func @transform_6(%arg0: i32) -> (i32, i32, i32) {
    %c0_i32 = arith.constant 0 : i32
    %c0_i32_0 = arith.constant 0 : i32
    %c0_i32_1 = arith.constant 0 : i32
    %c0_i32_2 = arith.constant 0 : i32
    return %c0_i32, %c0_i32_0, %c0_i32_1 : i32, i32, i32
  }
  func.func @transform_7(%arg0: i32) -> (i32, i32) {
    %c0_i32 = arith.constant 0 : i32
    %c0_i32_0 = arith.constant 0 : i32
    %c0_i32_1 = arith.constant 0 : i32
    return %c0_i32, %c0_i32_0 : i32, i32
  }
  func.func @transform_8(%arg0: i32) -> (i32, i32) {
    %c0_i32 = arith.constant 0 : i32
    %c0_i32_0 = arith.constant 0 : i32
    %c0_i32_1 = arith.constant 0 : i32
    return %c0_i32, %c0_i32_0 : i32, i32
  }
  func.func @transform_9(%arg0: i32) -> (i32, i32) {
    %c0_i32 = arith.constant 0 : i32
    %c0_i32_0 = arith.constant 0 : i32
    %c0_i32_1 = arith.constant 0 : i32
    return %c0_i32, %c0_i32_0 : i32, i32
  }
  func.func @transform_10(%arg0: i32) -> (i32, i32) {
    %c0_i32 = arith.constant 0 : i32
    %c0_i32_0 = arith.constant 0 : i32
    %c0_i32_1 = arith.constant 0 : i32
    return %c0_i32, %c0_i32_0 : i32, i32
  }
  func.func @transform_11(%arg0: i32) -> (i32, i32) {
    %c0_i32 = arith.constant 0 : i32
    %c0_i32_0 = arith.constant 0 : i32
    %c0_i32_1 = arith.constant 0 : i32
    return %c0_i32, %c0_i32_0 : i32, i32
  }
  func.func @transform_12(%arg0: i32) -> (i32, i32) {
    %c0_i32 = arith.constant 0 : i32
    %c0_i32_0 = arith.constant 0 : i32
    %c0_i32_1 = arith.constant 0 : i32
    return %c0_i32, %c0_i32_0 : i32, i32
  }
  func.func @transform_13(%arg0: i32) -> (i32, i32) {
    %c0_i32 = arith.constant 0 : i32
    %c0_i32_0 = arith.constant 0 : i32
    %c0_i32_1 = arith.constant 0 : i32
    return %c0_i32, %c0_i32_0 : i32, i32
  }
  func.func @transform_14(%arg0: i32) -> (i32, i32) {
    %c0_i32 = arith.constant 0 : i32
    %c0_i32_0 = arith.constant 0 : i32
    %c0_i32_1 = arith.constant 0 : i32
    return %c0_i32, %c0_i32_0 : i32, i32
  }
  func.func @transform_15(%arg0: i32) -> (i32, i32, i32) {
    %c0_i32 = arith.constant 0 : i32
    %c0_i32_0 = arith.constant 0 : i32
    %c0_i32_1 = arith.constant 0 : i32
    return %arg0, %c0_i32, %c0_i32_0 : i32, i32, i32
  }
}

</mosaic_0001>

<bundles_post_ra>
// kernel: _lambda_.1
= control target key start
LH: loop header
LB: loop body
LE: loop exit
PB: predicated region body
PF: predicated region fallthrough
CT: control target
= control target key end

     0   :  { %s28069_s0 = inlined_call_operand.vmem [shape: bf16[2,120,84], index: 0, kind: input, shape index: {}]   ;;  %s28070_s1 = inlined_call_operand.vmem [shape: bf16[84,832], index: 1, kind: input, shape index: {}]   ;;  %s28071_s2 = inlined_call_operand.vmem [shape: f32[1,832], index: 2, kind: input, shape index: {}]   ;;  %s28072_s3 = inlined_call_operand.hbm [shape: bf16[3,832,768], index: 3, kind: input, shape index: {}]   ;;  %s28073_s4 = inlined_call_operand.vmem [shape: f32[1,768], index: 4, kind: input, shape index: {}]   ;;  %s28074_s5 = inlined_call_operand.vmem [shape: bf16[2,48,112], index: 5, kind: input, shape index: {}]   ;;  %s28075_s6 = inlined_call_operand.vmem [shape: bf16[2,768,384], index: 6, kind: input, shape index: {}]   ;;  %s28076_s7 = inlined_call_operand.hbm [shape: bf16[4608,128], index: 7, kind: input, shape index: {}]   ;;  %s28077_s8 = inlined_call_operand.vmem [shape: f32[1,128], index: 8, kind: input, shape index: {}]   ;;  %s28078_s9 = inlined_call_operand.vmem [shape: bf16[128,128], index: 9, kind: input, shape index: {}]   ;;  %s28079_s10 = inlined_call_operand.vmem [shape: f32[1,128], index: 10, kind: input, shape index: {}]   ;;  %s28080_s11 = inlined_call_operand.vmem [shape: bf16[128,64], index: 11, kind: input, shape index: {}]   ;;  %s28081_s12 = inlined_call_operand.vmem [shape: f32[1,64], index: 12, kind: input, shape index: {}]   ;;  %s28082_s13 = inlined_call_operand.vmem [shape: bf16[64,128], index: 13, kind: input, shape index: {}]   ;;  %s28083_s14 = inlined_call_operand.vmem [shape: f32[1,128], index: 14, kind: input, shape index: {}]   ;;  %s28084_s15 = inlined_call_operand.vmem [shape: f32[2,4,128], index: 15, kind: output, shape index: {}]  }
   0x1   :  { %28301 = sst [smem:[#allocation77_spill]] %s28084_s15 }
   0x2   :  { %20 = vsyncpa [#allocation3], 0 }
   0x3   :  { %21 = vsyncpa [#allocation5], 0  ;;  %s24488_s18 = smov 0  }
   0x4 LB: > { %28302 = sst [smem:[#allocation8_spill]] %s24397_s18  ;;  %s24399_s19 = smov [#allocation2]   ;;  %s24397_s18 = sphi %s24488_s18, %s27_s18  }
   0x5   : > { %s396_s20 = sshll.u32 %s24399_s19, 4  ;;  %s24494_s21 = sadd.s32 4294967295, %s24397_s18   ;;  %s397_s20 = int_to_ptr.vmem [resolvable:$true] %s396_s20 }
   0x6   : > { %p18513_p0 = scmp.ge.s32.totalorder %s24397_s18, 1  ;;  %p378_p1 = scmp.lt.s32.totalorder %s24397_s18, 3 }
   0x7   : > { %p28085_p3 = scmp.eq.s32.totalorder %s24494_s21, 0  ;;  %s24400_s23 = smov [#allocation4]  }
   0x8   : > { %p24498_p2 = pnand %p18513_p0, %p378_p1  ;;  %s418_s24 = sshll.u32 %s24400_s23, 4  ;;  %s24511_s24 = int_to_ptr.vmem [resolvable:$true] %s418_s24 }
   0x9   : > { %s24327_s28 = scalar_lea.hbm %s28072_s3, 119808 }
   0xa   : > { %s28303_s22 = scalar_select %p24498_p2, 1, 0 }
   0xb   : > { %p22130_p4 = pneg %p24498_p2  ;;  %p24328_p6 = scmp.ne.s32.totalorder %s28072_s3, %s24327_s28 }
   0xc   : > { %p24334_p10 = scmp.lt.u32.totalorder %s24327_s28, %s28072_s3 }
   0xd   : > { %p24507_p5 = pnand %p28085_p3, %p22130_p4 }
   0xf   : > { %p24329_p7 = pneg %p24507_p5 }
  0x11   : > { %p24330_p8 = pnand %p24329_p7, %p24328_p6 }
  0x13   : > { %p24331_p9 = pneg %p24330_p8 }
  0x15   : > { %p24336_p11 = pnand %p24334_p10, %p24331_p9 }
  0x17   : > { %24339 = shalt.err (!%p24336_p11)
}
  0x18   : > { %s24340_s19 = scalar_lea.vmem %s397_s20, 119808  ;;  %p24348_p1 = scmp.lt.s32.totalorder %s397_s20, %s397_s20 }
  0x19   : > { %p24341_p12 = scmp.ne.s32.totalorder %s397_s20, %s24340_s19  ;;  %p24349_p4 = scmp.lt.s32.totalorder %s24340_s19, %s24340_s19 }
  0x1b   : > { %p24343_p13 = pnand %p24341_p12, %p24329_p7  ;;  %p24350_p3 = por %p24349_p4, %p24348_p1 }
  0x1d   : > { %p24344_p0 = pneg %p24343_p13 }
  0x1f   : > { %p24351_p2 = pnand %p24350_p3, %p24344_p0 }
  0x21   : > { %24354 = shalt.err (!%p24351_p2)
}
  0x22   : > { %s24401_s23 = smov 384   ;;  %s24402_s26 = smov 24  }
  0x23   : > { %22133 = dma.hbm_to_vmem [thread:$0]  (!%p24507_p5), %s28072_s3, 119808, %s397_s20, [#allocation3], %s24401_s23, %s24401_s23, %s24402_s26  }
  0x24   : > { %s24355_s16 = scalar_lea.hbm %s28076_s7, 36864 }
  0x25   : > { %p24356_p6 = scmp.ne.s32.totalorder %s28076_s7, %s24355_s16  ;;  %p24362_p8 = scmp.lt.u32.totalorder %s24355_s16, %s28076_s7 }
  0x27   : > { %p24358_p2 = pnand %p24356_p6, %p24329_p7 }
  0x29   : > { %p24359_p3 = pneg %p24358_p2 }
  0x2b   : > { %p24364_p9 = pnand %p24362_p8, %p24359_p3 }
  0x2d   : > { %24367 = shalt.err (!%p24364_p9)
}
  0x2e   : > { %s24368_s20 = scalar_lea.vmem %s24511_s24, 36864  ;;  %p24376_p13 = scmp.lt.s32.totalorder %s24511_s24, %s24511_s24 }
  0x2f   : > { %p24369_p10 = scmp.ne.s32.totalorder %s24511_s24, %s24368_s20  ;;  %p24377_p0 = scmp.lt.s32.totalorder %s24368_s20, %s24368_s20 }
  0x31   : > { %p24371_p11 = pnand %p24369_p10, %p24329_p7  ;;  %p24378_p1 = por %p24377_p0, %p24376_p13 }
  0x33   : > { %p24372_p12 = pneg %p24371_p11 }
  0x35   : > { %p24379_p4 = pnand %p24378_p1, %p24372_p12 }
  0x37   : > { %24382 = shalt.err (!%p24379_p4)
}
  0x38   : > { %s24403_s15 = smov 64   ;;  %s24404_s18 = smov 4  }
  0x39   : > { %22136 = dma.hbm_to_vmem [thread:$0]  (!%p24507_p5), %s28076_s7, 36864, %s24511_s24, [#allocation5], %s24403_s15, %s24403_s15, %s24404_s18  }
  0x3a   : > { %p28305_p6 = scmp.ne.s32.totalorder %s28303_s22, 0 }
  0x3c   : > { %463 = sbr.rel (%p28305_p6) target bundleno = 4147 (0x1033), region = 80 }
  0x43   : > { %p28306_p7 = scmp.eq.s32.totalorder %s24494_s21, 0 }
  0x45   : > { %24388 = dma.done.wait (%p28306_p7), [#allocation3], 119808   ;;  %p28307_p2 = pmov %p28306_p7 }
  0x47   : > { %24390 = vsyncadd (%p28307_p2), [#allocation3], 4294847488  ;;  %p28308_p3 = pmov %p28307_p2 }
  0x48   : > { %p28309_p8 = pmov %p28307_p2 }
  0x49   : > { %24392 = dma.done.wait (%p28308_p3), [#allocation5], 36864  }
  0x4a   : > { %24394 = vsyncadd (%p28309_p8), [#allocation5], 4294930432  ;;  %v28092_v0 = vmov 0   ;;  %p514_p5 = scmp.lt.s32.totalorder %s24494_s21, 1  ;;  %v22158_v1 = vld [vmem:[%s28070_s1 + $0x4] ss:$28 sps:$4 sm:$0xff]  }
  0x4b   : > { %935 = vmatprep.mubr.bf16.mxu0 %v28092_v0  ;;  %1046 = vmatprep.mubr.bf16.mxu1 %v28092_v0  ;;  %v22160_v2 = vld [vmem:[%s28070_s1] ss:$28 sps:$4 sm:$0xff]   ;;  %v22163_v4 = vld [vmem:[%s28070_s1 + $0x38] ss:$28 sps:$4 sm:$0xff]   ;;  %v22166_v6 = vld [vmem:[%s28070_s1 + $0x70] ss:$28 sps:$4 sm:$0xff]  }
  0x4c   : > { %s28663_s21 = smov (!%p514_p5, %s24494_s21), 1  ;;  %903 = vmatprep.subr.bf16.mxu0 %v22158_v1  ;;  %v22161_v3 = vld [vmem:[%s28070_s1 + $0x3c] ss:$28 sps:$4 sm:$0xff]   ;;  %v22164_v5 = vld [vmem:[%s28070_s1 + $0x74] ss:$28 sps:$4 sm:$0xff]   ;;  %vm881_vm0 = vcmask 1041408  }
  0x4d   : > { %s22121_s30 = smul.u32 60, %s28663_s21  ;;  %904 = vmatpush1.bf16.msra.mxu0 %v22160_v2  ;;  %v22167_v7 = vld [vmem:[%s28070_s1 + $0xac] ss:$28 sps:$4 sm:$0xff]   ;;  %v22170_v9 = vld [vmem:[%s28070_s1 + $0xe4] ss:$28 sps:$4 sm:$0xff]   ;;  %vm856_vm1 = vcmask 687104  }
  0x4e   : > { %905 = vmatprep.subr.bf16.mxu0 %v22161_v3  ;;  %v22169_v8 = vld [vmem:[%s28070_s1 + $0xa8] ss:$28 sps:$4 sm:$0xff]   ;;  %v579_v12 = vld [vmem:[%s28070_s1 + $0x118] sm:$0x33]  ;;  %v22190_v20 = vld [vmem:[%s28070_s1 + $0xb4] ss:$28 sps:$4 sm:$0xff]  }
  0x4f   : > { %s24595_s23 = scalar_lea.vmem %s28069_s0, %s22121_s30  ;;  %v22179_v10 = vld [vmem:[%s28070_s1 + $0xc] ss:$28 sps:$4 sm:$0xff]   ;;  %v22183_v13 = vld [vmem:[%s28070_s1 + $0x44] ss:$28 sps:$4 sm:$0xff]   ;;  %v22186_v16 = vld [vmem:[%s28070_s1 + $0x7c] ss:$28 sps:$4 sm:$0xff]   ;;  %v18566_v17 = vcombine.high %v579_v12, %v579_v12  ;;  %v18565_v18 = vcombine.low %v579_v12, %v579_v12 }
  0x50   : > { %v22181_v11 = vld [vmem:[%s28070_s1 + $0x8] ss:$28 sps:$4 sm:$0xff]   ;;  %1014 = vmatprep.subr.bf16.mxu1 %v22179_v10  ;;  %v22185_v14 = vld [vmem:[%s28070_s1 + $0x40] ss:$28 sps:$4 sm:$0xff]   ;;  %v22188_v19 = vld [vmem:[%s28070_s1 + $0x78] ss:$28 sps:$4 sm:$0xff]  }
  0x51   : > { %906 = vmatpush1.bf16.msra.mxu0 %v22163_v4  ;;  %1015 = vmatpush1.bf16.msra.mxu1 %v22181_v11  ;;  %v22172_v15 = vld [vmem:[%s28070_s1 + $0xe0] ss:$28 sps:$4 sm:$0xff]   ;;  %v883_v21 = vsel %vm881_vm0, %v18565_v18, 0  ;;  %v22192_v23 = vld [vmem:[%s28070_s1 + $0xb0] ss:$28 sps:$4 sm:$0xff]   ;;  %vm4141_vm3 = vcmask 523264  }
  0x52   : > { %907 = vmatprep.subr.bf16.mxu0 %v22164_v5  ;;  %1016 = vmatprep.subr.bf16.mxu1 %v22183_v13  ;;  %v24639_v22 = vld [vmem:[%s24595_s23] sm:$0xff]   ;;  %v22193_v24 = vld [vmem:[%s28070_s1 + $0xec] ss:$28 sps:$4 sm:$0xff]   ;;  %v22202_v25 = vld [vmem:[%s28070_s1 + $0x14] ss:$28 sps:$4 sm:$0xff]   ;;  %vm8578_vm4 = vcmask 1046528  }
  0x53   : > { %v580_v26 = vld [vmem:[%s28070_s1 + $0x120] sm:$0x33]  ;;  %v22200_v27 = vld [vmem:[%s28070_s1 + $0x10] ss:$28 sps:$4 sm:$0xff]   ;;  %v22217_v36 = vld [vmem:[%s28070_s1 + $0x18] ss:$28 sps:$4 sm:$0xff]  }
  0x54   : > { %v22205_v28 = vld [vmem:[%s28070_s1 + $0x4c] ss:$28 sps:$4 sm:$0xff]   ;;  %v18568_v30 = vcombine.high %v580_v26, %v580_v26  ;;  %v18567_v31 = vcombine.low %v580_v26, %v580_v26  ;;  %v22208_v33 = vld [vmem:[%s28070_s1 + $0x84] ss:$28 sps:$4 sm:$0xff]   ;;  %v22211_v38 = vld [vmem:[%s28070_s1 + $0xbc] ss:$28 sps:$4 sm:$0xff]  }
  0x55   : > { %908 = vmatpush1.bf16.msra.mxu0 %v22166_v6  ;;  %1017 = vmatpush1.bf16.msra.mxu1 %v22185_v14  ;;  %v22195_v29 = vld [vmem:[%s28070_s1 + $0xe8] ss:$28 sps:$4 sm:$0xff]   ;;  %v22206_v37 = vld [vmem:[%s28070_s1 + $0x80] ss:$28 sps:$4 sm:$0xff]   ;;  %v22218_v39 = vld [vmem:[%s28070_s1 + $0x50] ss:$28 sps:$4 sm:$0xff]  }
  0x56   : > { %909 = vmatprep.subr.bf16.mxu0 %v22167_v7  ;;  %1018 = vmatprep.subr.bf16.mxu1 %v22186_v16  ;;  %v22203_v32 = vld [vmem:[%s28070_s1 + $0x48] ss:$28 sps:$4 sm:$0xff]   ;;  %v889_v35 = vsel %vm881_vm0, %v18567_v31, 0  ;;  %v24692_v40 = vld [vmem:[%s24595_s23 + $0x10] sm:$0xff]   ;;  %v22220_v48 = vld [vmem:[%s28070_s1 + $0xc0] ss:$28 sps:$4 sm:$0xff]  }
  0x57   : > { %v24672_v34 = vld [vmem:[%s24595_s23 + $0x8] sm:$0xff]   ;;  %v22209_v41 = vld [vmem:[%s28070_s1 + $0xb8] ss:$28 sps:$4 sm:$0xff]   ;;  %v22225_v50 = vld [vmem:[#allocation2 + $0x9c4] ss:$24 sps:$4 sm:$0xff]   ;;  %vm11890_vm5 = vcmask 916480  }
  0x58   : > { %v22214_v42 = vld [vmem:[%s28070_s1 + $0xf4] ss:$28 sps:$4 sm:$0xff]   ;;  %v581_v43 = vld [vmem:[%s28070_s1 + $0x128] sm:$0x33]  ;;  %v24723_v51 = vld [vmem:[%s24595_s23 + $0x18] sm:$0xff]   ;;  %vm24407_vm6 = vmmov 0  }
  0x59   : > { %910 = vmatpush1.bf16.msra.mxu0 %v22169_v8  ;;  %1019 = vmatpush1.bf16.msra.mxu1 %v22188_v19  ;;  %v22219_v44 = vld [vmem:[%s28070_s1 + $0x88] ss:$28 sps:$4 sm:$0xff]   ;;  %v22212_v45 = vld [vmem:[%s28070_s1 + $0xf0] ss:$28 sps:$4 sm:$0xff]   ;;  %v18570_v46 = vcombine.high %v581_v43, %v581_v43  ;;  %v18569_v47 = vcombine.low %v581_v43, %v581_v43  ;;  %v22221_v52 = vld [vmem:[%s28070_s1 + $0xf8] ss:$28 sps:$4 sm:$0xff]  }
  0x5a   : > { %911 = vmatprep.subr.bf16.mxu0 %v22170_v9  ;;  %1020 = vmatprep.subr.bf16.mxu1 %v22190_v20  ;;  %v22222_v53 = vld [vmem:[%s28070_s1 + $0x130] ss:$0 sps:$4 sm:$0x33]   ;;  %v24738_v54 = vld [vmem:[%s24595_s23 + $0x20] sm:$0xff]   ;;  %v24749_v57 = vld [vmem:[%s24595_s23 + $0x28] sm:$0xff]   ;;  %s18521_s17 = sshll.u32 %s28663_s21, 2 }
  0x5b   : > { %v895_v49 = vsel %vm881_vm0, %v18569_v47, 0  ;;  %v901_v55 = vsel %vm881_vm0, %v22222_v53, 0  ;;  %v22228_v56 = vld [vmem:[#allocation2 + $0x9cc] ss:$24 sps:$4 sm:$0xff]   ;;  %v24756_v58 = vld [vmem:[%s24595_s23 + $0x30] sm:$0xff]   ;;  %s28660_s18 = sld [smem:[#allocation77_spill]] }
  0x5c   : > { %v24765_v59 = vld [vmem:[%s24595_s23 + $0x38] ss:$0 sps:$4 sm:$0xff]   ;;  %v22231_v61 = vld [vmem:[#allocation2 + $0x9f4] ss:$24 sps:$4 sm:$0xff]   ;;  %v22229_v62 = vld [vmem:[#allocation2 + $0x9f0] ss:$24 sps:$4 sm:$0xff]  }
  0x5d   : > { %912 = vmatpush1.bf16.msra.mxu0 %v22172_v15  ;;  %1021 = vmatpush1.bf16.msra.mxu1 %v22192_v23  ;;  %v22223_v60 = vld [vmem:[#allocation2 + $0x9c0] ss:$24 sps:$4 sm:$0xff]   ;;  %v22237_v63 = vld [vmem:[#allocation2 + $0xa24] ss:$24 sps:$4 sm:$0xff]   ;;  %v22243_v2 = vld [vmem:[#allocation2 + $0xa54] ss:$24 sps:$4 sm:$0xff]  }
  0x5e   : > { %18572 = vmatprep.subr.msk.bf16.mxu0 %vm881_vm0, %v18566_v17  ;;  %1022 = vmatprep.subr.bf16.mxu1 %v22193_v24  ;;  %v22235_v1 = vld [vmem:[#allocation2 + $0xa20] ss:$24 sps:$4 sm:$0xff]   ;;  %v22234_v4 = vld [vmem:[#allocation2 + $0x9fc] ss:$24 sps:$4 sm:$0xff]   ;;  %v22241_v5 = vld [vmem:[#allocation2 + $0xa50] ss:$24 sps:$4 sm:$0xff]  }
  0x5f   : > { %v22226_v3 = vld [vmem:[#allocation2 + $0x9c8] ss:$24 sps:$4 sm:$0xff]   ;;  %v22249_v6 = vld [vmem:[#allocation2 + $0xa84] ss:$24 sps:$4 sm:$0xff]   ;;  %v22232_v7 = vld [vmem:[#allocation2 + $0x9f8] ss:$24 sps:$4 sm:$0xff]  }
  0x60   : > { %v22240_v8 = vld [vmem:[#allocation2 + $0xa2c] ss:$24 sps:$4 sm:$0xff]   ;;  %v22247_v9 = vld [vmem:[#allocation2 + $0xa80] ss:$24 sps:$4 sm:$0xff]   ;;  %v22246_v12 = vld [vmem:[#allocation2 + $0xa5c] ss:$24 sps:$4 sm:$0xff]  }
  0x61   : > { %914 = vmatpush1.bf16.msra.mxu0 %v883_v21  ;;  %1023 = vmatpush1.bf16.msra.mxu1 %v22195_v29  ;;  %v22255_v10 = vld [vmem:[#allocation2 + $0xab4] ss:$24 sps:$4 sm:$0xff]   ;;  %v22238_v11 = vld [vmem:[#allocation2 + $0xa28] ss:$24 sps:$4 sm:$0xff]   ;;  %v22261_v14 = vld [vmem:[#allocation2 + $0xae4] ss:$24 sps:$4 sm:$0xff]   ;;  %s522_s26 = scalar_lea.vmem %s28660_s18, %s18521_s17 }
  0x62   : > { %1125 = vmatprep.subr.bf16.mxu0 %v22202_v25  ;;  %18581 = vmatprep.subr.msk.bf16.mxu1 %vm881_vm0, %v18568_v30  ;;  %v22253_v13 = vld [vmem:[#allocation2 + $0xab0] ss:$24 sps:$4 sm:$0xff]   ;;  %v22252_v16 = vld [vmem:[#allocation2 + $0xa8c] ss:$24 sps:$4 sm:$0xff]   ;;  %v22259_v17 = vld [vmem:[#allocation2 + $0xae0] ss:$24 sps:$4 sm:$0xff]  }
  0x63   : > { %v22244_v15 = vld [vmem:[#allocation2 + $0xa58] ss:$24 sps:$4 sm:$0xff]   ;;  %v22267_v18 = vld [vmem:[#allocation2 + $0xb14] ss:$24 sps:$4 sm:$0xff]   ;;  %v22250_v19 = vld [vmem:[#allocation2 + $0xa88] ss:$24 sps:$4 sm:$0xff]  }
  0x64   : > { %18573 = vmatmul.mubr.msk.bf16.vlgmr.msra.gmra.mrb[0].mxu0 %vm856_vm1, %v24639_v22  ;;  %v22258_v20 = vld [vmem:[#allocation2 + $0xabc] ss:$24 sps:$4 sm:$0xff]   ;;  %v22265_v21 = vld [vmem:[#allocation2 + $0xb10] ss:$24 sps:$4 sm:$0xff]   ;;  %v22264_v24 = vld [vmem:[#allocation2 + $0xaec] ss:$24 sps:$4 sm:$0xff]  }
  0x65   : > { %945 = vmatprep.mubr.bf16.mxu0 %v28092_v0  ;;  %1126 = vmatpush1.bf16.msra.mxu0 %v22200_v27  ;;  %v22256_v23 = vld [vmem:[#allocation2 + $0xab8] ss:$24 sps:$4 sm:$0xff]   ;;  %v22279_v26 = vld [vmem:[#allocation2 + $0xb74] ss:$24 sps:$4 sm:$0xff]   ;;  %v22262_v27 = vld [vmem:[#allocation2 + $0xae8] ss:$24 sps:$4 sm:$0xff]  }
  0x66   : > { %1127 = vmatprep.subr.bf16.mxu0 %v22205_v28  ;;  %1025 = vmatpush1.bf16.msra.mxu1 %v889_v35  ;;  %v22271_v25 = vld [vmem:[#allocation2 + $0xb40] ss:$24 sps:$4 sm:$0xff]   ;;  %v22270_v28 = vld [vmem:[#allocation2 + $0xb1c] ss:$24 sps:$4 sm:$0xff]   ;;  %v22277_v29 = vld [vmem:[#allocation2 + $0xb70] ss:$24 sps:$4 sm:$0xff]  }
  0x67   : > { %21068 = vmatprep.subr.bf16.mxu1 %v22217_v36  ;;  %v22285_v30 = vld [vmem:[#allocation2 + $0xba4] ss:$24 sps:$4 sm:$0xff]   ;;  %v22268_v31 = vld [vmem:[#allocation2 + $0xb18] ss:$24 sps:$4 sm:$0xff]   ;;  %v22274_v35 = vld [vmem:[#allocation2 + $0xb48] ss:$24 sps:$4 sm:$0xff]  }
  0x68   : > { %v22303_v43 = vld [vmem:[#allocation2 + $0xc34] ss:$24 sps:$4 sm:$0xff]   ;;  %v22309_v47 = vld [vmem:[#allocation2 + $0xc64] ss:$24 sps:$4 sm:$0xff]   ;;  %vm2118_vm2 = vsmask.f32 7424 }
  0x69   : > { %1128 = vmatpush1.bf16.msra.mxu0 %v22203_v32  ;;  %18582 = vmatmul.mubr.msk.bf16.vlgmr.msra.gmra.mrb[0].mxu1 %vm856_vm1, %v24639_v22  ;;  %v22276_v32 = vld [vmem:[#allocation2 + $0xb4c] ss:$24 sps:$4 sm:$0xff]  }
  0x6a   : > { %1129 = vmatprep.subr.bf16.mxu0 %v22208_v33  ;;  %1056 = vmatprep.mubr.bf16.mxu1 %v28092_v0  ;;  %v22283_v33 = vld [vmem:[#allocation2 + $0xba0] ss:$24 sps:$4 sm:$0xff]  }
  0x6b   : > { %21069 = vmatpush3.bf16.msra.mxu1 %v22217_v36  ;;  %v22282_v36 = vld [vmem:[#allocation2 + $0xb7c] ss:$24 sps:$4 sm:$0xff]  }
  0x6c   : > { %18574 = vmatmul.mubr.msk.bf16.gmra.mrb[4].mxu0 %vm856_vm1, %v24672_v34  ;;  %21070 = vmatprep.subr.bf16.mxu1 %v22218_v39 }
  0x6d   : > { %955 = vmatprep.mubr.bf16.mxu0 %v28092_v0  ;;  %1130 = vmatpush1.bf16.msra.mxu0 %v22206_v37  ;;  %v22289_v37 = vld [vmem:[#allocation2 + $0xbd0] ss:$24 sps:$4 sm:$0xff]  }
  0x6e   : > { %1131 = vmatprep.subr.bf16.mxu0 %v22211_v38  ;;  %v22297_v38 = vld [vmem:[#allocation2 + $0xc04] ss:$24 sps:$4 sm:$0xff]  }
  0x6f   : > { %21071 = vmatpush3.bf16.msra.mxu1 %v22218_v39  ;;  %v22280_v39 = vld [vmem:[#allocation2 + $0xb78] ss:$24 sps:$4 sm:$0xff]  }
  0x70   : > { %21072 = vmatprep.subr.bf16.mxu1 %v22219_v44 }
  0x71   : > { %1132 = vmatpush1.bf16.msra.mxu0 %v22209_v41  ;;  %18583 = vmatmul.mubr.msk.bf16.gmra.mrb[4].mxu1 %vm856_vm1, %v24672_v34  ;;  %v22286_v41 = vld [vmem:[#allocation2 + $0xba8] ss:$24 sps:$4 sm:$0xff]  }
  0x72   : > { %1133 = vmatprep.subr.bf16.mxu0 %v22214_v42  ;;  %1066 = vmatprep.mubr.bf16.mxu1 %v28092_v0  ;;  %v22295_v42 = vld [vmem:[#allocation2 + $0xc00] ss:$24 sps:$4 sm:$0xff]  }
  0x73   : > { %21073 = vmatpush3.bf16.msra.mxu1 %v22219_v44  ;;  %v22294_v44 = vld [vmem:[#allocation2 + $0xbdc] ss:$24 sps:$4 sm:$0xff]  }
  0x74   : > { %18575 = vmatmul.mubr.msk.bf16.gmra.mrb[8].mxu0 %vm856_vm1, %v24692_v40  ;;  %21074 = vmatprep.subr.bf16.mxu1 %v22220_v48 }
  0x75   : > { %965 = vmatprep.mubr.bf16.mxu0 %v28092_v0  ;;  %1134 = vmatpush1.bf16.msra.mxu0 %v22212_v45  ;;  %v22292_v45 = vld [vmem:[#allocation2 + $0xbd8] ss:$24 sps:$4 sm:$0xff]  }
  0x76   : > { %18590 = vmatprep.subr.msk.bf16.mxu0 %vm881_vm0, %v18570_v46  ;;  %v22301_v46 = vld [vmem:[#allocation2 + $0xc30] ss:$24 sps:$4 sm:$0xff]  }
  0x77   : > { %21075 = vmatpush3.bf16.msra.mxu1 %v22220_v48  ;;  %v22300_v48 = vld [vmem:[#allocation2 + $0xc0c] ss:$24 sps:$4 sm:$0xff]  }
  0x78   : > { %21076 = vmatprep.subr.bf16.mxu1 %v22221_v52 }
  0x79   : > { %1136 = vmatpush1.bf16.msra.mxu0 %v895_v49  ;;  %18584 = vmatmul.mubr.msk.bf16.gmra.mrb[8].mxu1 %vm856_vm1, %v24692_v40  ;;  %v22298_v49 = vld [vmem:[#allocation2 + $0xc08] ss:$24 sps:$4 sm:$0xff]  }
  0x7a   : > { %4163 = vmatprep.subr.bf16.mxu0 %v22225_v50  ;;  %1076 = vmatprep.mubr.bf16.mxu1 %v28092_v0  ;;  %v22307_v50 = vld [vmem:[#allocation2 + $0xc60] ss:$24 sps:$4 sm:$0xff]  }
  0x7b   : > { %21077 = vmatpush3.bf16.msra.mxu1 %v22221_v52  ;;  %v22306_v52 = vld [vmem:[#allocation2 + $0xc3c] ss:$24 sps:$4 sm:$0xff]  }
  0x7c   : > { %18576 = vmatmul.mubr.msk.bf16.gmra.mrb[12].mxu0 %vm856_vm1, %v24723_v51  ;;  %22120 = vmatprep.subr.msk.bf16.mxu1 %vm881_vm0, %v22222_v53  ;;  %v22304_v53 = vld [vmem:[#allocation2 + $0xc38] ss:$24 sps:$4 sm:$0xff]  }
  0x7d   : > { %975 = vmatprep.mubr.bf16.mxu0 %v28092_v0 }
  0x7f   : > { %21079 = vmatpush3.bf16.msra.mxu1 %v901_v55  ;;  %v22321_v55 = vld [vmem:[#allocation2 + $0xcc4] ss:$24 sps:$4 sm:$0xff]  }
  0x80   : > { %4575 = vmatprep.subr.bf16.mxu1 %v22228_v56  ;;  %v22312_v56 = vld [vmem:[#allocation2 + $0xc6c] ss:$24 sps:$4 sm:$0xff]  }
  0x81   : > { %18585 = vmatmul.mubr.msk.bf16.gmra.mrb[12].mxu1 %vm856_vm1, %v24723_v51 }
  0x82   : > { %1086 = vmatprep.mubr.bf16.mxu1 %v28092_v0 }
  0x84   : > { %18577 = vmatmul.mubr.msk.bf16.gmra.mrb[16].mxu0 %vm856_vm1, %v24738_v54 }
  0x85   : > { %985 = vmatprep.mubr.bf16.mxu0 %v28092_v0 }
  0x89   : > { %18586 = vmatmul.mubr.msk.bf16.gmra.mrb[16].mxu1 %vm856_vm1, %v24738_v54 }
  0x8a   : > { %1096 = vmatprep.mubr.bf16.mxu1 %v28092_v0 }
  0x8c   : > { %18578 = vmatmul.mubr.msk.bf16.gmra.mrb[20].mxu0 %vm856_vm1, %v24749_v57 }
  0x8d   : > { %995 = vmatprep.mubr.bf16.mxu0 %v28092_v0 }
  0x91   : > { %18587 = vmatmul.mubr.msk.bf16.gmra.mrb[20].mxu1 %vm856_vm1, %v24749_v57 }
  0x92   : > { %1106 = vmatprep.mubr.bf16.mxu1 %v28092_v0 }
  0x94   : > { %18579 = vmatmul.mubr.msk.bf16.gmra.mrb[24].mxu0 %vm856_vm1, %v24756_v58 }
  0x95   : > { %1005 = vmatprep.mubr.bf16.mxu0 %v28092_v0 }
  0x99   : > { %18588 = vmatmul.mubr.msk.bf16.gmra.mrb[24].mxu1 %vm856_vm1, %v24756_v58 }
  0x9a   : > { %1116 = vmatprep.mubr.bf16.mxu1 %v28092_v0 }
  0x9c   : > { %18580 = vmatmul.mubr.msk.bf16.gmra.mrb[28].mxu0 %vm856_vm1, %v24765_v59 }
  0x9d   : > { %1157 = vmatprep.mubr.bf16.mxu0 %v28092_v0 }
  0xa1   : > { %18589 = vmatmul.mubr.msk.bf16.gmra.mrb[28].mxu1 %vm856_vm1, %v24765_v59 }
  0xa2   : > { %21080 = vmatprep.mubr.msk.bf16.mxu1 %vm856_vm1, %v24639_v22 }
  0xa4   : > { %18591 = vmatmul.mubr.msk.bf16.vlgmr.msra.gmra.mrb[32].mxu0 %vm856_vm1, %v24639_v22  ;;  %v22273_v22 = vld [vmem:[#allocation2 + $0xb44] ss:$24 sps:$4 sm:$0xff]  }
  0xa5   : > { %1167 = vmatprep.mubr.bf16.mxu0 %v28092_v0  ;;  %4164 = vmatpush1.bf16.msra.mxu0 %v22223_v60  ;;  %v22316_v60 = vld [vmem:[#allocation2 + $0xc98] ss:$24 sps:$4 sm:$0xff]  }
  0xa6   : > { %4165 = vmatprep.subr.bf16.mxu0 %v22231_v61  ;;  %v585_v61 = vlaneseq }
  0xa9   : > { %4166 = vmatpush1.bf16.msra.mxu0 %v22229_v62  ;;  %21081 = vmatmul.mubr.msk.bf16.vlgmr.msra.gmra.mrb[32].mxu1 %vm856_vm1, %v24672_v34  ;;  %v24817_v62 = vshrl.u32 %v585_v61, 7 }
  0xaa   : > { %4167 = vmatprep.subr.bf16.mxu0 %v22237_v63  ;;  %4576 = vmatpush1.bf16.msra.mxu1 %v22226_v3 }
  0xab   : > { %21084 = vmatprep.mubr.msk.bf16.mxu1 %vm856_vm1, %v24692_v40  ;;  %4577 = vmatprep.subr.bf16.mxu1 %v22234_v4  ;;  %28310 = vst [vmem:[#allocation9_spill] sm:$0xff] %v24817_v62  ;;  %v28089_v63 = vsub.s32 0, %v24817_v62 }
  0xac   : > { %18592 = vmatmul.mubr.msk.bf16.gmra.mrb[36].mxu0 %vm856_vm1, %v24672_v34  ;;  %v22291_v34 = vld [vmem:[#allocation2 + $0xbd4] ss:$24 sps:$4 sm:$0xff]  }
  0xad   : > { %1177 = vmatprep.mubr.bf16.mxu0 %v28092_v0  ;;  %4168 = vmatpush1.bf16.msra.mxu0 %v22235_v1  ;;  %v583_v1 = vld [vmem:[%s28071_s2] sm:$0x7f] }
  0xae   : > { %4169 = vmatprep.subr.bf16.mxu0 %v22243_v2  ;;  %4578 = vmatpush1.bf16.msra.mxu1 %v22232_v7  ;;  %v28088_v2 = vsub.s32 1, %v24817_v62  ;;  %v24826_v3 = vrot.slane %v583_v1, %v28089_v63 }
  0xaf   : > { %4579 = vmatprep.subr.bf16.mxu1 %v22240_v8 }
  0xb0   : > { %v24830_v4 = vrot.slane %v583_v1, %v28088_v2 }
  0xb1   : > { %4170 = vmatpush1.bf16.msra.mxu0 %v22241_v5  ;;  %21085 = vmatmul.mubr.msk.bf16.gmra.mrb[36].mxu1 %vm856_vm1, %v24723_v51 }
  0xb2   : > { %4171 = vmatprep.subr.bf16.mxu0 %v22249_v6  ;;  %4580 = vmatpush1.bf16.msra.mxu1 %v22238_v11 }
  0xb3   : > { %21088 = vmatprep.mubr.msk.bf16.mxu1 %vm856_vm1, %v24738_v54  ;;  %4581 = vmatprep.subr.bf16.mxu1 %v22246_v12 }
  0xb4   : > { %18593 = vmatmul.mubr.msk.bf16.gmra.mrb[40].mxu0 %vm856_vm1, %v24692_v40  ;;  %v22288_v40 = vld [vmem:[#allocation2 + $0xbac] ss:$24 sps:$4 sm:$0xff]  }
  0xb5   : > { %1187 = vmatprep.mubr.bf16.mxu0 %v28092_v0  ;;  %4172 = vmatpush1.bf16.msra.mxu0 %v22247_v9 }
  0xb6   : > { %4173 = vmatprep.subr.bf16.mxu0 %v22255_v10  ;;  %4582 = vmatpush1.bf16.msra.mxu1 %v22244_v15 }
  0xb7   : > { %4583 = vmatprep.subr.bf16.mxu1 %v22252_v16  ;;  %v28090_v16 = vsub.s32 3, %v24817_v62 }
  0xb9   : > { %4174 = vmatpush1.bf16.msra.mxu0 %v22253_v13  ;;  %21089 = vmatmul.mubr.msk.bf16.gmra.mrb[40].mxu1 %vm856_vm1, %v24749_v57  ;;  %v28091_v13 = vsub.s32 2, %v24817_v62 }
  0xba   : > { %4175 = vmatprep.subr.bf16.mxu0 %v22261_v14  ;;  %4584 = vmatpush1.bf16.msra.mxu1 %v22250_v19 }
  0xbb   : > { %21092 = vmatprep.mubr.msk.bf16.mxu1 %vm856_vm1, %v24756_v58  ;;  %4585 = vmatprep.subr.bf16.mxu1 %v22258_v20 }
  0xbc   : > { %18594 = vmatmul.mubr.msk.bf16.gmra.mrb[44].mxu0 %vm856_vm1, %v24723_v51  ;;  %v22315_v51 = vld [vmem:[#allocation2 + $0xc94] ss:$24 sps:$4 sm:$0xff]  }
  0xbd   : > { %1197 = vmatprep.mubr.bf16.mxu0 %v28092_v0  ;;  %4176 = vmatpush1.bf16.msra.mxu0 %v22259_v17 }
  0xbe   : > { %4177 = vmatprep.subr.bf16.mxu0 %v22267_v18  ;;  %4586 = vmatpush1.bf16.msra.mxu1 %v22256_v23 }
  0xbf   : > { %4587 = vmatprep.subr.bf16.mxu1 %v22264_v24 }
  0xc1   : > { %4178 = vmatpush1.bf16.msra.mxu0 %v22265_v21  ;;  %21093 = vmatmul.mubr.msk.bf16.gmra.mrb[44].mxu1 %vm856_vm1, %v24765_v59 }
  0xc2   : > { %4179 = vmatprep.subr.bf16.mxu0 %v22273_v22  ;;  %4588 = vmatpush1.bf16.msra.mxu1 %v22262_v27  ;;  %v24844_v22 = vrot.slane %v583_v1, %v28091_v13 }
  0xc3   : > { %4589 = vmatprep.subr.bf16.mxu1 %v22270_v28 }
  0xc4   : > { %18595 = vmatmul.mubr.msk.bf16.gmra.mrb[48].mxu0 %vm856_vm1, %v24738_v54  ;;  %v22313_v54 = vld [vmem:[#allocation2 + $0xc90] ss:$24 sps:$4 sm:$0xff]  }
  0xc5   : > { %1207 = vmatprep.mubr.bf16.mxu0 %v28092_v0  ;;  %4180 = vmatpush1.bf16.msra.mxu0 %v22271_v25 }
  0xc6   : > { %4181 = vmatprep.subr.bf16.mxu0 %v22279_v26  ;;  %4590 = vmatpush1.bf16.msra.mxu1 %v22268_v31  ;;  %v24850_v26 = vrot.slane %v583_v1, %v28090_v16 }
  0xc7   : > { %4591 = vmatprep.subr.bf16.mxu1 %v22276_v32 }
  0xc9   : > { %4182 = vmatpush1.bf16.msra.mxu0 %v22277_v29 }
  0xca   : > { %4183 = vmatprep.subr.bf16.mxu0 %v22285_v30  ;;  %4592 = vmatpush1.bf16.msra.mxu1 %v22274_v35 }
  0xcb   : > { %4593 = vmatprep.subr.bf16.mxu1 %v22282_v36 }
  0xcc   : > { %18596 = vmatmul.mubr.msk.bf16.gmra.mrb[52].mxu0 %vm856_vm1, %v24749_v57  ;;  %v22310_v57 = vld [vmem:[#allocation2 + $0xc68] ss:$24 sps:$4 sm:$0xff]  }
  0xcd   : > { %1217 = vmatprep.mubr.bf16.mxu0 %v28092_v0  ;;  %4184 = vmatpush1.bf16.msra.mxu0 %v22283_v33 }
  0xce   : > { %4185 = vmatprep.subr.bf16.mxu0 %v22291_v34  ;;  %4594 = vmatpush1.bf16.msra.mxu1 %v22280_v39 }
  0xcf   : > { %4595 = vmatprep.subr.bf16.mxu1 %v22288_v40 }
  0xd1   : > { %4186 = vmatpush1.bf16.msra.mxu0 %v22289_v37 }
  0xd2   : > { %4187 = vmatprep.subr.bf16.mxu0 %v22297_v38  ;;  %4596 = vmatpush1.bf16.msra.mxu1 %v22286_v41 }
  0xd3   : > { %4597 = vmatprep.subr.bf16.mxu1 %v22294_v44 }
  0xd4   : > { %18597 = vmatmul.mubr.msk.bf16.gmra.mrb[56].mxu0 %vm856_vm1, %v24756_v58  ;;  %v22318_v58 = vld [vmem:[#allocation2 + $0xc9c] ss:$24 sps:$4 sm:$0xff]  }
  0xd5   : > { %1227 = vmatprep.mubr.bf16.mxu0 %v28092_v0  ;;  %4188 = vmatpush1.bf16.msra.mxu0 %v22295_v42  ;;  %v22378_v0 = vld [vmem:[#allocation2 + $0xe7c] ss:$24 sps:$4 sm:$0xff]  }
  0xd6   : > { %4189 = vmatprep.subr.bf16.mxu0 %v22303_v43  ;;  %4598 = vmatpush1.bf16.msra.mxu1 %v22292_v45 }
  0xd7   : > { %4599 = vmatprep.subr.bf16.mxu1 %v22300_v48 }
  0xd9   : > { %4190 = vmatpush1.bf16.msra.mxu0 %v22301_v46 }
  0xda   : > { %4191 = vmatprep.subr.bf16.mxu0 %v22309_v47  ;;  %4600 = vmatpush1.bf16.msra.mxu1 %v22298_v49 }
  0xdb   : > { %4601 = vmatprep.subr.bf16.mxu1 %v22306_v52 }
  0xdc   : > { %18598 = vmatmul.mubr.msk.bf16.gmra.mrb[60].mxu0 %vm856_vm1, %v24765_v59  ;;  %v22324_v59 = vld [vmem:[#allocation2 + $0xccc] ss:$24 sps:$4 sm:$0xff]  }
  0xdd   : > { %4192 = vmatpush1.bf16.msra.mxu0 %v22307_v50 }
  0xde   : > { %4193 = vmatprep.subr.bf16.mxu0 %v22315_v51  ;;  %4602 = vmatpush1.bf16.msra.mxu1 %v22304_v53 }
  0xdf   : > { %4603 = vmatprep.subr.bf16.mxu1 %v22312_v56 }
  0xe1   : > { %4194 = vmatpush1.bf16.msra.mxu0 %v22313_v54 }
  0xe2   : > { %4266 = vmatprep.subr.bf16.mxu0 %v22321_v55  ;;  %4604 = vmatpush1.bf16.msra.mxu1 %v22310_v57 }
  0xe3   : > { %4605 = vmatprep.subr.bf16.mxu1 %v22318_v58 }
  0xe6   : > { %4606 = vmatpush1.bf16.msra.mxu1 %v22316_v60 }
  0xe7   : > { %4678 = vmatprep.subr.bf16.mxu1 %v22324_v59 }
 0x137   : > { %v937_v5 = vpop.f32.mrb[0].mxu0 }
 0x138   : > { %v938_v6 = vadd.f32 %v937_v5, %v24826_v3  ;;  %v939_v7 = vpop.f32.mrb[1].mxu0 }
 0x139   : > { %v940_v8 = vadd.f32 %v939_v7, %v24830_v4  ;;  %v941_v9 = vpop.f32.mrb[2].mxu0 }
 0x13a   : > { %v942_v10 = vadd.f32 %v941_v9, %v24826_v3  ;;  %v943_v11 = vpop.f32.mrb[3].mxu0  ;;  %v1332_v14 = vmax.f32 %v938_v6, 0.0 }
 0x13b   : > { %v944_v12 = vadd.f32 %v943_v11, %v24830_v4  ;;  %v1333_v17 = vmax.f32 %v940_v8, 0.0  ;;  %v22322_v11 = vld [vmem:[#allocation2 + $0xcc8] ss:$24 sps:$4 sm:$0xff]  }
 0x13c   : > { %v1339_v15 = vmax.f32 %v942_v10, 0.0  ;;  %v1048_v32 = vpop.f32.mrb[0].mxu1  ;;  %v22319_v10 = vld [vmem:[#allocation2 + $0xcc0] ss:$24 sps:$4 sm:$0xff]  }
 0x13d   : > { %v1340_v18 = vmax.f32 %v944_v12, 0.0  ;;  %v1049_v35 = vadd.f32 %v1048_v32, %v24844_v22  ;;  %v1050_v36 = vpop.f32.mrb[1].mxu1 }
 0x13e   : > { %v24838_v19 = vpack.c.bf16 %v1339_v15, %v1332_v14  ;;  %v1051_v40 = vadd.f32 %v1050_v36, %v24850_v26  ;;  %v1052_v41 = vpop.f32.mrb[2].mxu1 }
 0x13f   : > { %v24840_v20 = vpack.c.bf16 %v1340_v18, %v1333_v17  ;;  %v947_v21 = vpop.f32.mrb[4].mxu0  ;;  %v1334_v44 = vmax.f32 %v1049_v35, 0.0  ;;  %v1053_v45 = vadd.f32 %v1052_v41, %v24844_v22  ;;  %v1054_v46 = vpop.f32.mrb[3].mxu1 }
 0x140   : > { %28311 = vst [vmem:[#allocation10_spill] sm:$0xff] %v24838_v19  ;;  %v948_v23 = vadd.f32 %v947_v21, %v24826_v3  ;;  %v949_v24 = vpop.f32.mrb[5].mxu0  ;;  %v2122_v25 = vshll.u32 %v24838_v19, 16  ;;  %v2120_v48 = vshrl.u32 %v24838_v19, 16  ;;  %v1335_v49 = vmax.f32 %v1051_v40, 0.0 }
 0x141   : > { %28312 = vst [vmem:[#allocation11_spill] sm:$0xff] %v24840_v20  ;;  %v950_v27 = vadd.f32 %v949_v24, %v24830_v4  ;;  %v951_v28 = vpop.f32.mrb[6].mxu0  ;;  %v2134_v29 = vshll.u32 %v24840_v20, 16  ;;  %v1055_v50 = vadd.f32 %v1054_v46, %v24850_v26  ;;  %v2132_v53 = vshrl.u32 %v24840_v20, 16  ;;  %v22330_v24 = vld [vmem:[#allocation2 + $0xcfc] ss:$24 sps:$4 sm:$0xff]  }
 0x142   : > { %v952_v30 = vadd.f32 %v951_v28, %v24826_v3  ;;  %v953_v31 = vpop.f32.mrb[7].mxu0  ;;  %v1346_v33 = vmax.f32 %v948_v23, 0.0  ;;  %v2124_v39 = vrot.slane %v2122_v25, 1  ;;  %v1341_v54 = vmax.f32 %v1053_v45, 0.0  ;;  %v22327_v23 = vld [vmem:[#allocation2 + $0xcf4] ss:$24 sps:$4 sm:$0xff]  }
 0x143   : > { %v954_v34 = vadd.f32 %v953_v31, %v24830_v4  ;;  %v1347_v37 = vmax.f32 %v950_v27, 0.0  ;;  %v2136_v43 = vrot.slane %v2134_v29, 1  ;;  %v1342_v60 = vmax.f32 %v1055_v50, 0.0  ;;  %v22333_v45 = vld [vmem:[#allocation2 + $0xd24] ss:$24 sps:$4 sm:$0xff]  }
 0x144   : > { %v1353_v38 = vmax.f32 %v952_v30, 0.0  ;;  %v2125_v57 = vor.u32 %v2124_v39, %v2120_v48  ;;  %v24870_v6 = vpack.c.bf16 %v1341_v54, %v1334_v44  ;;  %v1058_v15 = vpop.f32.mrb[4].mxu1  ;;  %v22328_v44 = vld [vmem:[#allocation2 + $0xcf8] ss:$24 sps:$4 sm:$0xff]  }
 0x145   : > { %v1354_v42 = vmax.f32 %v954_v34, 0.0  ;;  %v2137_v1 = vor.u32 %v2136_v43, %v2132_v53  ;;  %v24873_v14 = vpack.c.bf16 %v1342_v60, %v1335_v49  ;;  %v1059_v25 = vadd.f32 %v1058_v15, %v24844_v22  ;;  %v1060_v27 = vpop.f32.mrb[5].mxu1  ;;  %v22336_v53 = vld [vmem:[#allocation2 + $0xd2c] ss:$24 sps:$4 sm:$0xff]  }
 0x146   : > { %v24859_v47 = vpack.c.bf16 %v1353_v38, %v1346_v33  ;;  %28315 = vst [vmem:[#allocation14_spill] sm:$0xff] %v24870_v6  ;;  %v1061_v30 = vadd.f32 %v1060_v27, %v24850_v26  ;;  %v1062_v31 = vpop.f32.mrb[6].mxu1  ;;  %v22325_v38 = vld [vmem:[#allocation2 + $0xcf0] ss:$24 sps:$4 sm:$0xff]  }
 0x147   : > { %v24863_v51 = vpack.c.bf16 %v1354_v42, %v1347_v37  ;;  %v957_v52 = vpop.f32.mrb[8].mxu0  ;;  %28316 = vst [vmem:[#allocation15_spill] sm:$0xff] %v24873_v14  ;;  %v1064_v36 = vpop.f32.mrb[7].mxu1  ;;  %v1348_v39 = vmax.f32 %v1059_v25, 0.0  ;;  %v1063_v40 = vadd.f32 %v1062_v31, %v24844_v22 }
 0x148   : > { %28313 = vst [vmem:[#allocation12_spill] sm:$0xff] %v24859_v47  ;;  %v958_v55 = vadd.f32 %v957_v52, %v24826_v3  ;;  %v959_v56 = vpop.f32.mrb[9].mxu0  ;;  %v2127_v58 = vshll.u32 %v24859_v47, 16  ;;  %v2203_v29 = vshrl.u32 %v24859_v47, 16  ;;  %v1065_v41 = vadd.f32 %v1064_v36, %v24850_v26 }
 0x149   : > { %28314 = vst [vmem:[#allocation13_spill] sm:$0xff] %v24863_v51  ;;  %v960_v59 = vadd.f32 %v959_v56, %v24830_v4  ;;  %v961_v61 = vpop.f32.mrb[10].mxu0  ;;  %v2139_v5 = vshll.u32 %v24863_v51, 16  ;;  %v2211_v35 = vshrl.u32 %v24863_v51, 16  ;;  %v1349_v48 = vmax.f32 %v1061_v30, 0.0 }
 0x14a   : > { %v1360_v7 = vmax.f32 %v958_v55, 0.0  ;;  %v962_v8 = vadd.f32 %v961_v61, %v24826_v3  ;;  %v963_v9 = vpop.f32.mrb[11].mxu0  ;;  %v2129_v12 = vrot.slane %v2127_v58, 1  ;;  %v1355_v55 = vmax.f32 %v1063_v40, 0.0  ;;  %v22340_v40 = vld [vmem:[#allocation2 + $0xd58] ss:$24 sps:$4 sm:$0xff]  }
 0x14b   : > { %v1361_v17 = vmax.f32 %v960_v59, 0.0  ;;  %v964_v18 = vadd.f32 %v963_v9, %v24830_v4  ;;  %v2141_v21 = vrot.slane %v2139_v5, 1  ;;  %v1356_v59 = vmax.f32 %v1065_v41, 0.0 }
 0x14c   : > { %v1367_v28 = vmax.f32 %v962_v8, 0.0  ;;  %v24883_v34 = vsel %vm2118_vm2, %v2125_v57, %v2129_v12  ;;  %v2205_v46 = vor.u32 %v2203_v29, %v2129_v12  ;;  %v22334_v8 = vld [vmem:[#allocation2 + $0xd28] ss:$24 sps:$4 sm:$0xff]  }
 0x14d   : > { %v1368_v32 = vmax.f32 %v964_v18, 0.0  ;;  %v24880_v33 = vsel %vm2118_vm2, %v2137_v1, %v2141_v21  ;;  %28318 = vst [vmem:[#allocation17_spill] sm:$0xff] %v24883_v34  ;;  %v2213_v52 = vor.u32 %v2211_v35, %v2141_v21  ;;  %v22339_v18 = vld [vmem:[#allocation2 + $0xd54] ss:$24 sps:$4 sm:$0xff]  }
 0x14e   : > { %28317 = vst [vmem:[#allocation16_spill] sm:$0xff] %v24880_v33  ;;  %v24886_v37 = vpack.c.bf16 %v1367_v28, %v1360_v7  ;;  %4195 = vmatprep.mubr.bf16.mxu0 %v24880_v33  ;;  %4607 = vmatprep.mubr.bf16.mxu1 %v24880_v33  ;;  %v22331_v7 = vld [vmem:[#allocation2 + $0xd20] ss:$24 sps:$4 sm:$0xff]   ;;  %v22342_v21 = vld [vmem:[#allocation2 + $0xd5c] ss:$24 sps:$4 sm:$0xff]  }
 0x14f   : > { %v24892_v42 = vpack.c.bf16 %v1368_v32, %v1361_v17  ;;  %v967_v43 = vpop.f32.mrb[12].mxu0  ;;  %4196 = vmatmul.mubr.bf16.vlgmr.msra.gmra.mrb[64].mxu0 %v24883_v34  ;;  %4608 = vmatmul.mubr.bf16.vlgmr.msra.gmra.mrb[48].mxu1 %v24883_v34 }
 0x150   : > { %28319 = vst [vmem:[#allocation18_spill] sm:$0xff] %v24886_v37  ;;  %v968_v49 = vadd.f32 %v967_v43, %v24826_v3  ;;  %4267 = vmatpush1.bf16.msra.mxu0 %v22319_v10  ;;  %4679 = vmatpush1.bf16.msra.mxu1 %v22322_v11  ;;  %v969_v50 = vpop.f32.mrb[13].mxu0  ;;  %v2207_v54 = vshll.u32 %v24886_v37, 16  ;;  %v2259_v60 = vshrl.u32 %v24886_v37, 16  ;;  %v24902_v10 = vpack.c.bf16 %v1355_v55, %v1348_v39  ;;  %v1068_v11 = vpop.f32.mrb[8].mxu1 }
 0x151   : > { %28320 = vst [vmem:[#allocation19_spill] sm:$0xff] %v24892_v42  ;;  %v970_v56 = vadd.f32 %v969_v50, %v24830_v4  ;;  %v971_v57 = vpop.f32.mrb[14].mxu0  ;;  %4268 = vmatprep.subr.bf16.mxu0 %v22327_v23  ;;  %4680 = vmatprep.subr.bf16.mxu1 %v22330_v24  ;;  %v2215_v58 = vshll.u32 %v24892_v42, 16  ;;  %v24905_v23 = vpack.c.bf16 %v1356_v59, %v1349_v48  ;;  %v1070_v24 = vpop.f32.mrb[9].mxu1  ;;  %v2267_v27 = vshrl.u32 %v24892_v42, 16 }
 0x152   : > { %v1374_v61 = vmax.f32 %v968_v49, 0.0  ;;  %v972_v1 = vadd.f32 %v971_v57, %v24826_v3  ;;  %v973_v5 = vpop.f32.mrb[15].mxu0  ;;  %v2209_v9 = vrot.slane %v2207_v54, 1  ;;  %28321 = vst [vmem:[#allocation20_spill] sm:$0xff] %v24902_v10  ;;  %v1069_v28 = vadd.f32 %v1068_v11, %v24844_v22  ;;  %v1072_v29 = vpop.f32.mrb[10].mxu1 }
 0x153   : > { %v1375_v12 = vmax.f32 %v970_v56, 0.0  ;;  %v974_v15 = vadd.f32 %v973_v5, %v24830_v4  ;;  %v2217_v17 = vrot.slane %v2215_v58, 1  ;;  %28322 = vst [vmem:[#allocation21_spill] sm:$0xff] %v24905_v23  ;;  %v1071_v35 = vadd.f32 %v1070_v24, %v24850_v26  ;;  %v1074_v36 = vpop.f32.mrb[11].mxu1  ;;  %v22345_v48 = vld [vmem:[#allocation2 + $0xd84] ss:$24 sps:$4 sm:$0xff]  }
 0x154   : > { %v1381_v25 = vmax.f32 %v972_v1, 0.0  ;;  %4269 = vmatpush1.bf16.msra.mxu0 %v22325_v38  ;;  %4681 = vmatpush1.bf16.msra.mxu1 %v22328_v44  ;;  %v24913_v32 = vsel %vm2118_vm2, %v2205_v46, %v2209_v9  ;;  %v22337_v38 = vld [vmem:[#allocation2 + $0xd50] ss:$24 sps:$4 sm:$0xff]   ;;  %v1362_v41 = vmax.f32 %v1069_v28, 0.0  ;;  %v1073_v43 = vadd.f32 %v1072_v29, %v24844_v22 }
 0x155   : > { %v1382_v30 = vmax.f32 %v974_v15, 0.0  ;;  %v24910_v31 = vsel %vm2118_vm2, %v2213_v52, %v2217_v17  ;;  %4270 = vmatprep.subr.bf16.mxu0 %v22333_v45  ;;  %4682 = vmatprep.subr.bf16.mxu1 %v22336_v53  ;;  %28324 = vst [vmem:[#allocation23_spill] sm:$0xff] %v24913_v32  ;;  %v1075_v44 = vadd.f32 %v1074_v36, %v24850_v26  ;;  %v1363_v49 = vmax.f32 %v1071_v35, 0.0  ;;  %v1078_v15 = vpop.f32.mrb[12].mxu1 }
 0x156   : > { %28323 = vst [vmem:[#allocation22_spill] sm:$0xff] %v24910_v31  ;;  %v24916_v39 = vpack.c.bf16 %v1381_v25, %v1374_v61  ;;  %4205 = vmatprep.mubr.bf16.mxu0 %v24910_v31  ;;  %4617 = vmatprep.mubr.bf16.mxu1 %v24910_v31  ;;  %v2261_v53 = vor.u32 %v2259_v60, %v2209_v9  ;;  %v1369_v55 = vmax.f32 %v1073_v43, 0.0  ;;  %v22348_v61 = vld [vmem:[#allocation2 + $0xd8c] ss:$24 sps:$4 sm:$0xff]   ;;  %v22354_v25 = vld [vmem:[#allocation2 + $0xdbc] ss:$24 sps:$4 sm:$0xff]  }
 0x157   : > { %v24922_v45 = vpack.c.bf16 %v1382_v30, %v1375_v12  ;;  %v977_v46 = vpop.f32.mrb[16].mxu0  ;;  %4206 = vmatmul.mubr.bf16.gmra.mrb[68].mxu0 %v24913_v32  ;;  %4618 = vmatmul.mubr.bf16.gmra.mrb[52].mxu1 %v24913_v32  ;;  %v2269_v58 = vor.u32 %v2267_v27, %v2217_v17  ;;  %v1370_v1 = vmax.f32 %v1075_v44, 0.0  ;;  %v22346_v12 = vld [vmem:[#allocation2 + $0xd88] ss:$24 sps:$4 sm:$0xff]   ;;  %v22351_v17 = vld [vmem:[#allocation2 + $0xdb4] ss:$24 sps:$4 sm:$0xff]  }
 0x158   : > { %28325 = vst [vmem:[#allocation24_spill] sm:$0xff] %v24916_v39  ;;  %v978_v50 = vadd.f32 %v977_v46, %v24826_v3  ;;  %4271 = vmatpush1.bf16.msra.mxu0 %v22331_v7  ;;  %4683 = vmatpush1.bf16.msra.mxu1 %v22334_v8  ;;  %v979_v52 = vpop.f32.mrb[17].mxu0  ;;  %v2263_v54 = vshll.u32 %v24916_v39, 16  ;;  %v22343_v8 = vld [vmem:[#allocation2 + $0xd80] ss:$24 sps:$4 sm:$0xff]   ;;  %v24933_v9 = vpack.c.bf16 %v1369_v55, %v1362_v41  ;;  %v1080_v28 = vpop.f32.mrb[13].mxu1 }
 0x159   : > { %28326 = vst [vmem:[#allocation25_spill] sm:$0xff] %v24922_v45  ;;  %v980_v56 = vadd.f32 %v979_v52, %v24830_v4  ;;  %v981_v57 = vpop.f32.mrb[18].mxu0  ;;  %4272 = vmatprep.subr.bf16.mxu0 %v22339_v18  ;;  %4684 = vmatprep.subr.bf16.mxu1 %v22342_v21  ;;  %v2271_v59 = vshll.u32 %v24922_v45, 16  ;;  %v24936_v27 = vpack.c.bf16 %v1370_v1, %v1363_v49  ;;  %v1082_v30 = vpop.f32.mrb[14].mxu1  ;;  %v2323_v43 = vshrl.u32 %v24922_v45, 16 }
 0x15a   : > { %v1388_v5 = vmax.f32 %v978_v50, 0.0  ;;  %v982_v11 = vadd.f32 %v981_v57, %v24826_v3  ;;  %v983_v7 = vpop.f32.mrb[19].mxu0  ;;  %v24931_v60 = vrot.slane %v2263_v54, 1  ;;  %28327 = vst [vmem:[#allocation26_spill] sm:$0xff] %v24933_v9  ;;  %v1084_v44 = vpop.f32.mrb[15].mxu1  ;;  %v1079_v49 = vadd.f32 %v1078_v15, %v24844_v22 }
 0x15b   : > { %v1389_v24 = vmax.f32 %v980_v56, 0.0  ;;  %v984_v18 = vadd.f32 %v983_v7, %v24830_v4  ;;  %v2273_v21 = vrot.slane %v2271_v59, 1  ;;  %28328 = vst [vmem:[#allocation27_spill] sm:$0xff] %v24936_v27  ;;  %v22360_v54 = vld [vmem:[#allocation2 + $0xdec] ss:$24 sps:$4 sm:$0xff]   ;;  %v1083_v55 = vadd.f32 %v1082_v30, %v24844_v22 }
 0x15c   : > { %v1395_v29 = vmax.f32 %v982_v11, 0.0  ;;  %4273 = vmatpush1.bf16.msra.mxu0 %v22337_v38  ;;  %4685 = vmatpush1.bf16.msra.mxu1 %v22340_v40  ;;  %v24943_v41 = vsel %vm2118_vm2, %v2261_v53, %v24931_v60  ;;  %v22349_v38 = vld [vmem:[#allocation2 + $0xdb0] ss:$24 sps:$4 sm:$0xff]   ;;  %v22357_v53 = vld [vmem:[#allocation2 + $0xde4] ss:$24 sps:$4 sm:$0xff]  }
 0x15d   : > { %v1396_v35 = vmax.f32 %v984_v18, 0.0  ;;  %v24939_v36 = vsel %vm2118_vm2, %v2269_v58, %v2273_v21  ;;  %4274 = vmatprep.subr.bf16.mxu0 %v22345_v48  ;;  %4686 = vmatprep.subr.bf16.mxu1 %v22348_v61  ;;  %28330 = vst [vmem:[#allocation29_spill] sm:$0xff] %v24943_v41  ;;  %v22352_v40 = vld [vmem:[#allocation2 + $0xdb8] ss:$24 sps:$4 sm:$0xff]   ;;  %v24952_v48 = vadd.f32 %v1080_v28, %v24850_v26  ;;  %v2315_v58 = vshrl.u32 %v24916_v39, 16 }
 0x15e   : > { %28329 = vst [vmem:[#allocation28_spill] sm:$0xff] %v24939_v36  ;;  %v24946_v46 = vpack.c.bf16 %v1395_v29, %v1388_v5  ;;  %4215 = vmatprep.mubr.bf16.mxu0 %v24939_v36  ;;  %4627 = vmatprep.mubr.bf16.mxu1 %v24939_v36  ;;  %v1376_v61 = vmax.f32 %v1079_v49, 0.0  ;;  %v2325_v11 = vor.u32 %v2323_v43, %v2273_v21  ;;  %v22355_v18 = vld [vmem:[#allocation2 + $0xde0] ss:$24 sps:$4 sm:$0xff]   ;;  %v1383_v30 = vmax.f32 %v1083_v55, 0.0 }
 0x15f   : > { %v24954_v50 = vpack.c.bf16 %v1396_v35, %v1389_v24  ;;  %v987_v52 = vpop.f32.mrb[20].mxu0  ;;  %4216 = vmatmul.mubr.bf16.gmra.mrb[72].mxu0 %v24943_v41  ;;  %4628 = vmatmul.mubr.bf16.gmra.mrb[56].mxu1 %v24943_v41  ;;  %v1377_v15 = vmax.f32 %v24952_v48, 0.0  ;;  %v22358_v28 = vld [vmem:[#allocation2 + $0xde8] ss:$24 sps:$4 sm:$0xff]   ;;  %v1088_v35 = vpop.f32.mrb[16].mxu1  ;;  %v1085_v21 = vadd.f32 %v1084_v44, %v24850_v26 }
 0x160   : > { %28331 = vst [vmem:[#allocation30_spill] sm:$0xff] %v24946_v46  ;;  %v988_v56 = vadd.f32 %v987_v52, %v24826_v3  ;;  %4275 = vmatpush1.bf16.msra.mxu0 %v22343_v8  ;;  %4687 = vmatpush1.bf16.msra.mxu1 %v22346_v12  ;;  %v989_v57 = vpop.f32.mrb[21].mxu0  ;;  %v2319_v59 = vshll.u32 %v24946_v46, 16  ;;  %v24968_v43 = vpop.f32.mrb[17].mxu1  ;;  %v22420_v41 = vld [vmem:[#allocation2 + $0xfcc] ss:$24 sps:$4 sm:$0xff]  }
 0x161   : > { %28332 = vst [vmem:[#allocation31_spill] sm:$0xff] %v24954_v50  ;;  %v990_v1 = vadd.f32 %v989_v57, %v24830_v4  ;;  %v991_v5 = vpop.f32.mrb[22].mxu0  ;;  %4276 = vmatprep.subr.bf16.mxu0 %v22351_v17  ;;  %4688 = vmatprep.subr.bf16.mxu1 %v22354_v25  ;;  %v2327_v7 = vshll.u32 %v24954_v50, 16  ;;  %v22363_v17 = vld [vmem:[#allocation2 + $0xe14] ss:$24 sps:$4 sm:$0xff]   ;;  %v24974_v55 = vpop.f32.mrb[18].mxu1 }
 0x162   : > { %v1402_v24 = vmax.f32 %v988_v56, 0.0  ;;  %v992_v8 = vadd.f32 %v991_v5, %v24826_v3  ;;  %v993_v12 = vpop.f32.mrb[23].mxu0  ;;  %v2321_v29 = vrot.slane %v2319_v59, 1  ;;  %v22366_v25 = vld [vmem:[#allocation2 + $0xe1c] ss:$24 sps:$4 sm:$0xff]   ;;  %v2317_v56 = vor.u32 %v2315_v58, %v24931_v60 }
 0x163   : > { %v1403_v49 = vmax.f32 %v990_v1, 0.0  ;;  %v994_v52 = vadd.f32 %v993_v12, %v24830_v4  ;;  %v2329_v57 = vrot.slane %v2327_v7, 1  ;;  %v2371_v5 = vshrl.u32 %v24946_v46, 16  ;;  %v24979_v12 = vpop.f32.mrb[19].mxu1  ;;  %v22415_v36 = vld [vmem:[#allocation2 + $0xfc0] ss:$24 sps:$4 sm:$0xff]  }
 0x164   : > { %v1409_v48 = vmax.f32 %v992_v8, 0.0  ;;  %4277 = vmatpush1.bf16.msra.mxu0 %v22349_v38  ;;  %4689 = vmatpush1.bf16.msra.mxu1 %v22352_v40  ;;  %v24972_v59 = vpack.c.bf16 %v1383_v30, %v1376_v61  ;;  %v1384_v44 = vmax.f32 %v1085_v21, 0.0  ;;  %v24986_v60 = vsel %vm2118_vm2, %v2317_v56, %v2321_v29  ;;  %v22361_v38 = vld [vmem:[#allocation2 + $0xe10] ss:$24 sps:$4 sm:$0xff]   ;;  %v22372_v56 = vld [vmem:[#allocation2 + $0xe4c] ss:$24 sps:$4 sm:$0xff]  }
 0x165   : > { %v1410_v1 = vmax.f32 %v994_v52, 0.0  ;;  %v24977_v7 = vsel %vm2118_vm2, %v2325_v11, %v2329_v57  ;;  %4278 = vmatprep.subr.bf16.mxu0 %v22357_v53  ;;  %4690 = vmatprep.subr.bf16.mxu1 %v22360_v54  ;;  %28336 = vst [vmem:[#allocation35_spill] sm:$0xff] %v24986_v60  ;;  %v22364_v40 = vld [vmem:[#allocation2 + $0xe18] ss:$24 sps:$4 sm:$0xff]   ;;  %v2379_v58 = vshrl.u32 %v24954_v50, 16  ;;  %v25002_v16 = vpop.f32.mrb[20].mxu1  ;;  %v1089_v46 = vadd.f32 %v1088_v35, %v24844_v22 }
 0x166   : > { %28333 = vst [vmem:[#allocation32_spill] sm:$0xff] %v24972_v59  ;;  %28334 = vst [vmem:[#allocation33_spill] sm:$0xff] %v24977_v7  ;;  %v24981_v8 = vpack.c.bf16 %v1409_v48, %v1402_v24  ;;  %4225 = vmatprep.mubr.bf16.mxu0 %v24977_v7  ;;  %4637 = vmatprep.mubr.bf16.mxu1 %v24977_v7  ;;  %v22369_v54 = vld [vmem:[#allocation2 + $0xe44] ss:$24 sps:$4 sm:$0xff]   ;;  %v24993_v11 = vpack.c.bf16 %v1384_v44, %v1377_v15 }
 0x167   : > { %v24989_v61 = vpack.c.bf16 %v1410_v1, %v1403_v49  ;;  %v997_v53 = vpop.f32.mrb[24].mxu0  ;;  %4226 = vmatmul.mubr.bf16.gmra.mrb[76].mxu0 %v24986_v60  ;;  %4638 = vmatmul.mubr.bf16.gmra.mrb[60].mxu1 %v24986_v60  ;;  %v2373_v1 = vor.u32 %v2371_v5, %v2321_v29  ;;  %v2381_v63 = vor.u32 %v2379_v58, %v2329_v57  ;;  %v25006_v29 = vpop.f32.mrb[21].mxu1 }
 0x168   : > { %28335 = vst [vmem:[#allocation34_spill] sm:$0xff] %v24981_v8  ;;  %28338 = vst [vmem:[#allocation37_spill] sm:$0xff] %v24993_v11  ;;  %v998_v24 = vadd.f32 %v997_v53, %v24826_v3  ;;  %4279 = vmatpush1.bf16.msra.mxu0 %v22355_v18  ;;  %4691 = vmatpush1.bf16.msra.mxu1 %v22358_v28  ;;  %v999_v30 = vpop.f32.mrb[25].mxu0  ;;  %v2375_v52 = vshll.u32 %v24981_v8, 16  ;;  %v22367_v53 = vld [vmem:[#allocation2 + $0xe40] ss:$24 sps:$4 sm:$0xff]  }
 0x169   : > { %28337 = vst [vmem:[#allocation36_spill] sm:$0xff] %v24989_v61  ;;  %v1000_v21 = vadd.f32 %v999_v30, %v24830_v4  ;;  %v1001_v48 = vpop.f32.mrb[26].mxu0  ;;  %4280 = vmatprep.subr.bf16.mxu0 %v22363_v17  ;;  %4692 = vmatprep.subr.bf16.mxu1 %v22366_v25  ;;  %v2383_v49 = vshll.u32 %v24989_v61, 16  ;;  %v22370_v18 = vld [vmem:[#allocation2 + $0xe48] ss:$24 sps:$4 sm:$0xff]   ;;  %v25008_v57 = vpop.f32.mrb[22].mxu1 }
 0x16a   : > { %v1416_v2 = vmax.f32 %v998_v24, 0.0  ;;  %v1002_v15 = vadd.f32 %v1001_v48, %v24826_v3  ;;  %v1003_v44 = vpop.f32.mrb[27].mxu0  ;;  %v25000_v28 = vrot.slane %v2375_v52, 1  ;;  %v22375_v25 = vld [vmem:[#allocation2 + $0xe74] ss:$24 sps:$4 sm:$0xff]   ;;  %v2435_v48 = vshrl.u32 %v24989_v61, 16 }
 0x16b   : > { %v1417_v13 = vmax.f32 %v1000_v21, 0.0  ;;  %v1004_v30 = vadd.f32 %v1003_v44, %v24830_v4  ;;  %v2385_v17 = vrot.slane %v2383_v49, 1  ;;  %v25017_v21 = vpop.f32.mrb[23].mxu1 }
 0x16c   : > { %v1423_v5 = vmax.f32 %v1002_v15, 0.0  ;;  %4281 = vmatpush1.bf16.msra.mxu0 %v22361_v38  ;;  %4693 = vmatpush1.bf16.msra.mxu1 %v22364_v40  ;;  %v25015_v52 = vsel %vm2118_vm2, %v2373_v1, %v25000_v28  ;;  %v22373_v38 = vld [vmem:[#allocation2 + $0xe70] ss:$24 sps:$4 sm:$0xff]   ;;  %v1390_v1 = vmax.f32 %v1089_v46, 0.0  ;;  %v1095_v15 = vadd.f32 %v24979_v12, %v24850_v26  ;;  %v25040_v39 = vpop.f32.mrb[24].mxu1 }
 0x16d   : > { %v1424_v58 = vmax.f32 %v1004_v30, 0.0  ;;  %v25011_v24 = vsel %vm2118_vm2, %v2381_v63, %v2385_v17  ;;  %4282 = vmatprep.subr.bf16.mxu0 %v22369_v54  ;;  %4694 = vmatprep.subr.bf16.mxu1 %v22372_v56  ;;  %28340 = vst [vmem:[#allocation39_spill] sm:$0xff] %v25015_v52  ;;  %v22376_v40 = vld [vmem:[#allocation2 + $0xe78] ss:$24 sps:$4 sm:$0xff]   ;;  %v1091_v63 = vadd.f32 %v24968_v43, %v24850_v26  ;;  %v2427_v30 = vshrl.u32 %v24981_v8, 16 }
 0x16e   : > { %28339 = vst [vmem:[#allocation38_spill] sm:$0xff] %v25011_v24  ;;  %v25019_v35 = vpack.c.bf16 %v1423_v5, %v1416_v2  ;;  %4235 = vmatprep.mubr.bf16.mxu0 %v25011_v24  ;;  %4647 = vmatprep.mubr.bf16.mxu1 %v25011_v24  ;;  %v1093_v54 = vadd.f32 %v24974_v55, %v24844_v22  ;;  %v22381_v2 = vld [vmem:[#allocation2 + $0xea4] ss:$24 sps:$4 sm:$0xff]   ;;  %v2158_v55 = vshll.u32 %v24873_v14, 16  ;;  %v1398_v24 = vmax.f32 %v1095_v15, 0.0 }
 0x16f   : > { %v25028_v49 = vpack.c.bf16 %v1424_v58, %v1417_v13  ;;  %v1007_v56 = vpop.f32.mrb[28].mxu0  ;;  %4236 = vmatmul.mubr.bf16.gmra.mrb[80].mxu0 %v25015_v52  ;;  %4648 = vmatmul.mubr.bf16.gmra.mrb[64].mxu1 %v25015_v52  ;;  %v22384_v58 = vld [vmem:[#allocation2 + $0xeac] ss:$24 sps:$4 sm:$0xff]   ;;  %v1391_v12 = vmax.f32 %v1091_v63, 0.0  ;;  %v2156_v15 = vshrl.u32 %v24873_v14, 16 }
 0x170   : > { %28341 = vst [vmem:[#allocation40_spill] sm:$0xff] %v25019_v35  ;;  %v1008_v44 = vadd.f32 %v1007_v56, %v24826_v3  ;;  %4283 = vmatpush1.bf16.msra.mxu0 %v22367_v53  ;;  %4695 = vmatpush1.bf16.msra.mxu1 %v22370_v18  ;;  %v1009_v43 = vpop.f32.mrb[29].mxu0  ;;  %v2431_v13 = vshll.u32 %v25019_v35, 16  ;;  %v1397_v52 = vmax.f32 %v1093_v54, 0.0  ;;  %v2437_v53 = vor.u32 %v2435_v48, %v2385_v17  ;;  %v22379_v18 = vld [vmem:[#allocation2 + $0xea0] ss:$24 sps:$4 sm:$0xff]  }
 0x171   : > { %28342 = vst [vmem:[#allocation41_spill] sm:$0xff] %v25028_v49  ;;  %v1010_v5 = vadd.f32 %v1009_v43, %v24830_v4  ;;  %4284 = vmatprep.subr.bf16.mxu0 %v22375_v25  ;;  %4696 = vmatprep.subr.bf16.mxu1 %v22378_v0  ;;  %v2439_v46 = vshll.u32 %v25028_v49, 16  ;;  %v1011_v61 = vpop.f32.mrb[30].mxu0  ;;  %v22382_v56 = vld [vmem:[#allocation2 + $0xea8] ss:$24 sps:$4 sm:$0xff]   ;;  %v2491_v0 = vshrl.u32 %v25028_v49, 16  ;;  %v2429_v17 = vor.u32 %v2427_v30, %v25000_v28 }
 0x172   : > { %v1430_v3 = vmax.f32 %v1008_v44, 0.0  ;;  %v2433_v50 = vrot.slane %v2431_v13, 1  ;;  %v1012_v8 = vpop.f32.mrb[31].mxu0  ;;  %v22387_v4 = vld [vmem:[#allocation2 + $0xed4] ss:$24 sps:$4 sm:$0xff]   ;;  %v25043_v43 = vpack.c.bf16 %v1397_v52, %v1390_v1  ;;  %v1110_v61 = vpop.f32.mrb[25].mxu1  ;;  %v25063_v1 = vpack.c.bf16 %v1398_v24, %v1391_v12 }
 0x173   : > { %v1431_v60 = vmax.f32 %v1010_v5, 0.0  ;;  %v2441_v45 = vrot.slane %v2439_v46, 1  ;;  %v22390_v25 = vld [vmem:[#allocation2 + $0xedc] ss:$24 sps:$4 sm:$0xff]   ;;  %v1112_v48 = vpop.f32.mrb[26].mxu1  ;;  %v2160_v13 = vrot.slane %v2158_v55, 1  ;;  %v1101_v24 = vadd.f32 %v25006_v29, %v24850_v26 }
 0x174   : > { %28343 = vst [vmem:[#allocation42_spill] sm:$0xff] %v25043_v43  ;;  %v25045_v63 = vpack.c.bf16 %v1430_v3, %v1430_v3  ;;  %4285 = vmatpush1.bf16.msra.mxu0 %v22373_v38  ;;  %4697 = vmatpush1.bf16.msra.mxu1 %v22376_v40  ;;  %v25054_v44 = vpop.f32.mrb[27].mxu1  ;;  %v25060_v28 = vsel %vm2118_vm2, %v2429_v17, %v2433_v50  ;;  %v22388_v38 = vld [vmem:[#allocation2 + $0xed8] ss:$24 sps:$4 sm:$0xff]   ;;  %v2483_v40 = vshrl.u32 %v25019_v35, 16  ;;  %28348 = vst [vmem:[#allocation47_spill] sm:$0xff] %v25063_v1 }
 0x175   : > { %v25048_v8 = vpack.c.bf16 %v1431_v60, %v1431_v60  ;;  %v25051_v54 = vsel %vm2118_vm2, %v2437_v53, %v2441_v45  ;;  %4286 = vmatprep.subr.bf16.mxu0 %v22381_v2  ;;  %4698 = vmatprep.subr.bf16.mxu1 %v22384_v58  ;;  %28347 = vst [vmem:[#allocation46_spill] sm:$0xff] %v25060_v28  ;;  %v22385_v60 = vld [vmem:[#allocation2 + $0xed0] ss:$24 sps:$4 sm:$0xff]   ;;  %v2163_v5 = vshll.u32 %v24905_v23, 16  ;;  %v22393_v58 = vld [vmem:[#allocation2 + $0xf04] ss:$24 sps:$4 sm:$0xff]  }
 0x176   : > { %28344 = vst [vmem:[#allocation43_spill] sm:$0xff] %v25045_v63  ;;  %28346 = vst [vmem:[#allocation45_spill] sm:$0xff] %v25051_v54  ;;  %v2487_v52 = vshll.u32 %v25045_v63, 16  ;;  %4245 = vmatprep.mubr.bf16.mxu0 %v25051_v54  ;;  %4657 = vmatprep.mubr.bf16.mxu1 %v25051_v54  ;;  %v2493_v30 = vor.u32 %v2491_v0, %v2441_v45  ;;  %v1099_v3 = vadd.f32 %v25002_v16, %v24844_v22  ;;  %v22396_v0 = vld [vmem:[#allocation2 + $0xf0c] ss:$24 sps:$4 sm:$0xff]   ;;  %v25084_v14 = vpop.f32.mrb[28].mxu1 }
 0x177   : > { %28345 = vst [vmem:[#allocation44_spill] sm:$0xff] %v25048_v8  ;;  %v2495_v2 = vshll.u32 %v25048_v8, 16  ;;  %4246 = vmatmul.mubr.bf16.gmra.mrb[84].mxu0 %v25060_v28  ;;  %4658 = vmatmul.mubr.bf16.gmra.mrb[68].mxu1 %v25060_v28  ;;  %v25069_v46 = vpop.f32.mrb[32].mxu0  ;;  %v1103_v12 = vadd.f32 %v25008_v57, %v24844_v22  ;;  %v2485_v16 = vor.u32 %v2483_v40, %v2433_v50  ;;  %v1405_v29 = vmax.f32 %v1101_v24, 0.0  ;;  %v25093_v35 = vpop.f32.mrb[29].mxu1 }
 0x178   : > { %4287 = vmatpush1.bf16.msra.mxu0 %v22379_v18  ;;  %4699 = vmatpush1.bf16.msra.mxu1 %v22382_v56  ;;  %v25077_v53 = vpop.f32.mrb[33].mxu0  ;;  %v2489_v45 = vrot.slane %v2487_v52, 1  ;;  %v1105_v18 = vadd.f32 %v25017_v21, %v24850_v26  ;;  %v28118_v56 = vsub.s32 4, %v24817_v62  ;;  %v1404_v8 = vmax.f32 %v1099_v3, 0.0  ;;  %v22394_v50 = vld [vmem:[#allocation2 + $0xf08] ss:$24 sps:$4 sm:$0xff]  }
 0x179   : > { %v2497_v55 = vrot.slane %v2495_v2, 1  ;;  %4288 = vmatprep.subr.bf16.mxu0 %v22387_v4  ;;  %4700 = vmatprep.subr.bf16.mxu1 %v22390_v25  ;;  %v25082_v17 = vpop.f32.mrb[34].mxu0  ;;  %v1411_v63 = vmax.f32 %v1103_v12, 0.0  ;;  %v22391_v4 = vld [vmem:[#allocation2 + $0xf00] ss:$24 sps:$4 sm:$0xff]   ;;  %v2161_v25 = vor.u32 %v2160_v13, %v2156_v15  ;;  %v25091_v2 = vrot.slane %v2163_v5, 1 }
 0x17a   : > { %v25086_v57 = vpop.f32.mrb[35].mxu0  ;;  %v1412_v21 = vmax.f32 %v1105_v18, 0.0  ;;  %v22399_v40 = vld [vmem:[#allocation2 + $0xf34] ss:$24 sps:$4 sm:$0xff]   ;;  %v1109_v24 = vadd.f32 %v25040_v39, %v24844_v22  ;;  %v1111_v12 = vadd.f32 %v1110_v61, %v24850_v26  ;;  %v2227_v49 = vshrl.u32 %v24905_v23, 16 }
 0x17b   : > { %v25089_v52 = vsel %vm2118_vm2, %v2493_v30, %v2497_v55  ;;  %v25095_v3 = vpack.c.bf16 %v1411_v63, %v1404_v8  ;;  %v28117_v30 = vsub.s32 5, %v24817_v62  ;;  %v1122_v55 = vpop.f32.mrb[30].mxu1  ;;  %v22402_v15 = vld [vmem:[#allocation2 + $0xf3c] ss:$24 sps:$4 sm:$0xff]   ;;  %v25107_v63 = vsel %vm2118_vm2, %v2485_v16, %v2489_v45  ;;  %v22400_v45 = vld [vmem:[#allocation2 + $0xf38] ss:$24 sps:$4 sm:$0xff]  }
 0x17c   : > { %28349 = vst [vmem:[#allocation48_spill] sm:$0xff] %v25089_v52  ;;  %4289 = vmatpush1.bf16.msra.mxu0 %v22385_v60  ;;  %4701 = vmatpush1.bf16.msra.mxu1 %v22388_v38  ;;  %v25103_v13 = vpack.c.bf16 %v1412_v21, %v1405_v29  ;;  %v1113_v60 = vadd.f32 %v1112_v48, %v24844_v22  ;;  %v1123_v38 = vpop.f32.mrb[31].mxu1  ;;  %28350 = vst [vmem:[#allocation49_spill] sm:$0xff] %v25107_v63  ;;  %v1418_v39 = vmax.f32 %v1109_v24, 0.0  ;;  %v25120_v16 = vld [vmem:[%s28071_s2] sm:$0x7f] }
 0x17d   : > { %4255 = vmatprep.mubr.bf16.mxu0 %v25089_v52  ;;  %4667 = vmatprep.mubr.bf16.mxu1 %v25089_v52  ;;  %v1419_v61 = vmax.f32 %v1111_v12, 0.0  ;;  %v1115_v8 = vadd.f32 %v25054_v44, %v24850_v26  ;;  %v25115_v5 = vsel %vm2118_vm2, %v2161_v25, %v25091_v2  ;;  %v25125_v44 = vrot.slane %v25120_v16, %v28118_v56  ;;  %v22405_v25 = vld [vmem:[#allocation2 + $0xf64] ss:$24 sps:$4 sm:$0xff]   ;;  %v22403_v55 = vld [vmem:[#allocation2 + $0xf60] ss:$24 sps:$4 sm:$0xff]  }
 0x17e   : > { %4290 = vmatprep.subr.bf16.mxu0 %v22393_v58  ;;  %4702 = vmatprep.subr.bf16.mxu1 %v22396_v0  ;;  %28351 = vst [vmem:[#allocation50_spill] sm:$0xff] %v25115_v5  ;;  %v1425_v48 = vmax.f32 %v1113_v60, 0.0  ;;  %v22397_v58 = vld [vmem:[#allocation2 + $0xf30] ss:$24 sps:$4 sm:$0xff]   ;;  %v25130_v29 = vrot.slane %v25120_v16, %v28117_v30  ;;  %v22408_v21 = vld [vmem:[#allocation2 + $0xf6c] ss:$24 sps:$4 sm:$0xff]  }
 0x17f   : > { %4256 = vmatmul.mubr.bf16.gmra.mrb[88].mxu0 %v25107_v63  ;;  %4668 = vmatmul.mubr.bf16.gmra.mrb[72].mxu1 %v25107_v63  ;;  %v1169_v18 = vpop.f32.mrb[36].mxu0  ;;  %v1426_v0 = vmax.f32 %v1115_v8, 0.0  ;;  %v22406_v60 = vld [vmem:[#allocation2 + $0xf68] ss:$24 sps:$4 sm:$0xff]   ;;  %v25139_v30 = vpop.f32.mrb[32].mxu1  ;;  %v2231_v52 = vshll.u32 %v24936_v27, 16 }
 0x180   : > { %4291 = vmatpush1.bf16.msra.mxu0 %v22391_v4  ;;  %4703 = vmatpush1.bf16.msra.mxu1 %v22394_v50  ;;  %v1171_v4 = vpop.f32.mrb[37].mxu0  ;;  %v2146_v50 = vshll.u32 %v24870_v6, 16  ;;  %v25133_v24 = vpack.c.bf16 %v1425_v48, %v1418_v39  ;;  %v25141_v56 = vpop.f32.mrb[33].mxu1  ;;  %v2144_v39 = vshrl.u32 %v24870_v6, 16  ;;  %v2151_v48 = vshll.u32 %v24902_v10, 16 }
 0x181   : > { %4292 = vmatprep.subr.bf16.mxu0 %v22399_v40  ;;  %4704 = vmatprep.subr.bf16.mxu1 %v22402_v15  ;;  %v1173_v12 = vpop.f32.mrb[38].mxu0  ;;  %v25137_v38 = vpack.c.bf16 %v1426_v0, %v1419_v61  ;;  %v22411_v40 = vld [vmem:[#allocation2 + $0xf94] ss:$24 sps:$4 sm:$0xff]   ;;  %v1162_v61 = vadd.f32 %v25077_v53, %v25130_v29  ;;  %v25149_v0 = vpop.f32.mrb[34].mxu1  ;;  %v22409_v6 = vld [vmem:[#allocation2 + $0xf90] ss:$24 sps:$4 sm:$0xff]   ;;  %v1166_v53 = vadd.f32 %v25086_v57, %v25130_v29 }
 0x182   : > { %4298 = vmatprep.mubr.bf16.mxu0 %v25115_v5  ;;  %4710 = vmatprep.mubr.bf16.mxu1 %v25115_v5  ;;  %v1175_v8 = vpop.f32.mrb[39].mxu0  ;;  %v22414_v15 = vld [vmem:[#allocation2 + $0xf9c] ss:$24 sps:$4 sm:$0xff]   ;;  %v1160_v5 = vadd.f32 %v25069_v46, %v25125_v44  ;;  %v2148_v63 = vrot.slane %v2146_v50, 1  ;;  %v22412_v54 = vld [vmem:[#allocation2 + $0xf98] ss:$24 sps:$4 sm:$0xff]   ;;  %v2229_v57 = vor.u32 %v2227_v49, %v25091_v2 }
 0x183   : > { %v1337_v46 = vmax.f32 %v1162_v61, 0.0  ;;  %v1344_v50 = vmax.f32 %v1166_v53, 0.0  ;;  %v2153_v37 = vrot.slane %v2151_v48, 1  ;;  %v2283_v49 = vshrl.u32 %v24936_v27, 16 }
 0x184   : > { %4293 = vmatpush1.bf16.msra.mxu0 %v22397_v58  ;;  %4705 = vmatpush1.bf16.msra.mxu1 %v22400_v45  ;;  %v1164_v58 = vadd.f32 %v25082_v17, %v25125_v44  ;;  %v25154_v45 = vpop.f32.mrb[35].mxu1  ;;  %v1336_v28 = vmax.f32 %v1160_v5, 0.0  ;;  %v2149_v17 = vor.u32 %v2148_v63, %v2144_v39  ;;  %v1170_v5 = vadd.f32 %v1169_v18, %v25125_v44 }
 0x185   : > { %4294 = vmatprep.subr.bf16.mxu0 %v22405_v25  ;;  %4706 = vmatprep.subr.bf16.mxu1 %v22408_v21  ;;  %v22417_v21 = vld [vmem:[#allocation2 + $0xfc4] ss:$24 sps:$4 sm:$0xff]   ;;  %v25163_v47 = vpack.c.bf16 %v1344_v50, %v1337_v46  ;;  %v25166_v53 = vpop.f32.mrb[36].mxu1  ;;  %v22423_v46 = vld [vmem:[#allocation2 + $0xff4] ss:$24 sps:$4 sm:$0xff]  }
 0x186   : > { %v1343_v7 = vmax.f32 %v1164_v58, 0.0  ;;  %v2233_v58 = vrot.slane %v2231_v52, 1  ;;  %v1350_v63 = vmax.f32 %v1170_v5, 0.0  ;;  %v2287_v52 = vshll.u32 %v24993_v11, 16  ;;  %v22426_v50 = vld [vmem:[#allocation2 + $0xffc] ss:$24 sps:$4 sm:$0xff]  }
 0x187   : > { %v1179_v25 = vpop.f32.mrb[40].mxu0  ;;  %v2223_v5 = vshll.u32 %v24933_v9, 16 }
 0x188   : > { %4295 = vmatpush1.bf16.msra.mxu0 %v22403_v55  ;;  %4707 = vmatpush1.bf16.msra.mxu1 %v22406_v60  ;;  %v1181_v23 = vpop.f32.mrb[41].mxu0  ;;  %v25159_v42 = vpack.c.bf16 %v1343_v7, %v1336_v28  ;;  %v1172_v55 = vadd.f32 %v1171_v4, %v25130_v29  ;;  %v1176_v7 = vadd.f32 %v1175_v8, %v25130_v29  ;;  %v25170_v28 = vpop.f32.mrb[37].mxu1  ;;  %v2219_v4 = vshrl.u32 %v24902_v10, 16 }
 0x189   : > { %4296 = vmatprep.subr.bf16.mxu0 %v22411_v40  ;;  %4708 = vmatprep.subr.bf16.mxu1 %v22414_v15  ;;  %v1183_v61 = vpop.f32.mrb[42].mxu0  ;;  %v22418_v40 = vld [vmem:[#allocation2 + $0xfc8] ss:$24 sps:$4 sm:$0xff]   ;;  %v1174_v15 = vadd.f32 %v1173_v12, %v25125_v44  ;;  %v25174_v18 = vpop.f32.mrb[38].mxu1  ;;  %v1180_v12 = vadd.f32 %v1179_v25, %v25125_v44  ;;  %v22424_v25 = vld [vmem:[#allocation2 + $0xff8] ss:$24 sps:$4 sm:$0xff]   ;;  %v2285_v27 = vor.u32 %v2283_v49, %v2233_v58 }
 0x18a   : > { %v1185_v60 = vpop.f32.mrb[43].mxu0  ;;  %v1351_v2 = vmax.f32 %v1172_v55, 0.0  ;;  %v1358_v48 = vmax.f32 %v1176_v7, 0.0  ;;  %v25178_v8 = vpop.f32.mrb[39].mxu1  ;;  %v2289_v10 = vrot.slane %v2287_v52, 1 }
 0x18b   : > { %v1357_v39 = vmax.f32 %v1174_v15, 0.0  ;;  %v1186_v32 = vadd.f32 %v1185_v60, %v25130_v29  ;;  %v22427_v60 = vld [vmem:[#allocation2 + $0x1020] ss:$24 sps:$4 sm:$0xff]  }
 0x18c   : > { %4297 = vmatpush1.bf16.msra.mxu0 %v22409_v6  ;;  %4709 = vmatpush1.bf16.msra.mxu1 %v22412_v54  ;;  %v25181_v6 = vsel %vm2118_vm2, %v2149_v17, %v2153_v37  ;;  %v25184_v54 = vsel %vm2118_vm2, %v2229_v57, %v2233_v58  ;;  %v25192_v15 = vpack.c.bf16 %v1358_v48, %v1351_v2  ;;  %v1364_v17 = vmax.f32 %v1180_v12, 0.0  ;;  %v22432_v12 = vld [vmem:[#allocation2 + $0x102c] ss:$24 sps:$4 sm:$0xff]   ;;  %v25200_v52 = vpop.f32.mrb[40].mxu1 }
 0x18d   : > { %4369 = vmatprep.subr.bf16.mxu0 %v22417_v21  ;;  %4781 = vmatprep.subr.bf16.mxu1 %v22420_v41  ;;  %28352 = vst [vmem:[#allocation51_spill] sm:$0xff] %v25181_v6  ;;  %28353 = vst [vmem:[#allocation52_spill] sm:$0xff] %v25184_v54  ;;  %v1182_v41 = vadd.f32 %v1181_v23, %v25130_v29  ;;  %v22421_v21 = vld [vmem:[#allocation2 + $0xff0] ss:$24 sps:$4 sm:$0xff]   ;;  %v25190_v55 = vpack.c.bf16 %v1357_v39, %v1350_v63  ;;  %v22429_v39 = vld [vmem:[#allocation2 + $0x1024] ss:$24 sps:$4 sm:$0xff]  }
 0x18e   : > { %v1184_v57 = vadd.f32 %v1183_v61, %v25125_v44  ;;  %v2221_v63 = vor.u32 %v2219_v4, %v2153_v37  ;;  %v2225_v61 = vrot.slane %v2223_v5, 1  ;;  %v22430_v4 = vld [vmem:[#allocation2 + $0x1028] ss:$24 sps:$4 sm:$0xff]  }
 0x18f   : > { %4299 = vmatmul.mubr.bf16.vlgmr.msra.gmra.mrb[64].mxu0 %v25181_v6  ;;  %4711 = vmatmul.mubr.bf16.vlgmr.msra.gmra.mrb[48].mxu1 %v25181_v6  ;;  %v1189_v7 = vpop.f32.mrb[44].mxu0  ;;  %v1365_v23 = vmax.f32 %v1182_v41, 0.0  ;;  %v1372_v6 = vmax.f32 %v1186_v32, 0.0  ;;  %v2339_v32 = vshrl.u32 %v24993_v11, 16 }
 0x190   : > { %4308 = vmatprep.mubr.bf16.mxu0 %v25184_v54  ;;  %4370 = vmatpush1.bf16.msra.mxu0 %v22415_v36  ;;  %v1191_v51 = vpop.f32.mrb[45].mxu0  ;;  %v1371_v2 = vmax.f32 %v1184_v57, 0.0  ;;  %v1190_v36 = vadd.f32 %v1189_v7, %v25125_v44  ;;  %v2343_v57 = vshll.u32 %v25063_v1, 16 }
 0x191   : > { %4720 = vmatprep.mubr.bf16.mxu1 %v25184_v54  ;;  %4782 = vmatpush1.bf16.msra.mxu1 %v22418_v40  ;;  %v1193_v48 = vpop.f32.mrb[46].mxu0  ;;  %v1192_v58 = vadd.f32 %v1191_v51, %v25130_v29  ;;  %v25205_v40 = vpop.f32.mrb[41].mxu1  ;;  %v2341_v54 = vor.u32 %v2339_v32, %v2289_v10 }
 0x192   : > { %4371 = vmatprep.subr.bf16.mxu0 %v22423_v46  ;;  %4783 = vmatprep.subr.bf16.mxu1 %v22426_v50  ;;  %v1195_v49 = vpop.f32.mrb[47].mxu0  ;;  %v25202_v41 = vpack.c.bf16 %v1371_v2, %v1364_v17  ;;  %v1194_v37 = vadd.f32 %v1193_v48, %v25125_v44  ;;  %v25208_v46 = vsel %vm2118_vm2, %v2285_v27, %v2289_v10  ;;  %v1378_v51 = vmax.f32 %v1190_v36, 0.0  ;;  %v25213_v5 = vpop.f32.mrb[42].mxu1  ;;  %v22435_v17 = vld [vmem:[#allocation2 + $0x1054] ss:$24 sps:$4 sm:$0xff]  }
 0x193   : > { %28354 = vst [vmem:[#allocation53_spill] sm:$0xff] %v25208_v46  ;;  %v25211_v50 = vpack.c.bf16 %v1372_v6, %v1365_v23  ;;  %v1379_v7 = vmax.f32 %v1192_v58, 0.0  ;;  %v25217_v48 = vpop.f32.mrb[43].mxu1  ;;  %v25220_v27 = vsel %vm2118_vm2, %v2221_v63, %v2225_v61  ;;  %v22433_v6 = vld [vmem:[#allocation2 + $0x1050] ss:$24 sps:$4 sm:$0xff]   ;;  %v2275_v36 = vshrl.u32 %v24933_v9, 16 }
 0x194   : > { %4372 = vmatpush1.bf16.msra.mxu0 %v22421_v21  ;;  %v1385_v2 = vmax.f32 %v1194_v37, 0.0  ;;  %v1196_v21 = vadd.f32 %v1195_v49, %v25130_v29  ;;  %28355 = vst [vmem:[#allocation54_spill] sm:$0xff] %v25220_v27  ;;  %v22438_v23 = vld [vmem:[#allocation2 + $0x105c] ss:$24 sps:$4 sm:$0xff]   ;;  %v22444_v9 = vld [vmem:[#allocation2 + $0x108c] ss:$24 sps:$4 sm:$0xff]  }
 0x195   : > { %4784 = vmatpush1.bf16.msra.mxu1 %v22424_v25  ;;  %4373 = vmatprep.subr.bf16.mxu0 %v22429_v39  ;;  %v2279_v25 = vshll.u32 %v24972_v59, 16  ;;  %v22436_v39 = vld [vmem:[#allocation2 + $0x1058] ss:$24 sps:$4 sm:$0xff]   ;;  %v22441_v58 = vld [vmem:[#allocation2 + $0x1084] ss:$24 sps:$4 sm:$0xff]   ;;  %v2345_v31 = vrot.slane %v2343_v57, 1 }
 0x196   : > { %4785 = vmatprep.subr.bf16.mxu1 %v22432_v12  ;;  %v25226_v37 = vpack.c.bf16 %v1385_v2, %v1378_v51  ;;  %v1386_v49 = vmax.f32 %v1196_v21, 0.0  ;;  %v2277_v51 = vor.u32 %v2275_v36, %v2225_v61  ;;  %v22439_v2 = vld [vmem:[#allocation2 + $0x1080] ss:$24 sps:$4 sm:$0xff]   ;;  %v22447_v10 = vld [vmem:[#allocation2 + $0x10b4] ss:$24 sps:$4 sm:$0xff]  }
 0x197   : > { %4309 = vmatmul.mubr.bf16.gmra.mrb[68].mxu0 %v25220_v27  ;;  %4721 = vmatmul.mubr.bf16.gmra.mrb[52].mxu1 %v25220_v27  ;;  %v1199_v11 = vpop.f32.mrb[48].mxu0  ;;  %v25242_v36 = vsel %vm2118_vm2, %v2341_v54, %v2345_v31  ;;  %v22445_v54 = vld [vmem:[#allocation2 + $0x10b0] ss:$24 sps:$4 sm:$0xff]  }
 0x198   : > { %4374 = vmatpush1.bf16.msra.mxu0 %v22427_v60  ;;  %4318 = vmatprep.mubr.bf16.mxu0 %v25208_v46  ;;  %v1200_v63 = vadd.f32 %v1199_v11, %v25125_v44  ;;  %v1201_v12 = vpop.f32.mrb[49].mxu0  ;;  %v25230_v19 = vpack.c.bf16 %v1386_v49, %v1379_v7  ;;  %v2281_v60 = vrot.slane %v2279_v25, 1  ;;  %v2331_v49 = vshrl.u32 %v24972_v59, 16 }
 0x199   : > { %4786 = vmatpush1.bf16.msra.mxu1 %v22430_v4  ;;  %4375 = vmatprep.subr.bf16.mxu0 %v22435_v17  ;;  %v1202_v27 = vadd.f32 %v1201_v12, %v25130_v29  ;;  %v1203_v34 = vpop.f32.mrb[50].mxu0  ;;  %v25235_v4 = vpop.f32.mrb[44].mxu1  ;;  %v22442_v17 = vld [vmem:[#allocation2 + $0x1088] ss:$24 sps:$4 sm:$0xff]   ;;  %v2399_v25 = vshll.u32 %v25103_v13, 16  ;;  %v2335_v12 = vshll.u32 %v25043_v43, 16 }
 0x19a   : > { %4730 = vmatprep.mubr.bf16.mxu1 %v25208_v46  ;;  %4787 = vmatprep.subr.bf16.mxu1 %v22438_v23  ;;  %v1392_v21 = vmax.f32 %v1200_v63, 0.0  ;;  %v1204_v11 = vadd.f32 %v1203_v34, %v25125_v44  ;;  %v1205_v20 = vpop.f32.mrb[51].mxu0  ;;  %28356 = vst [vmem:[#allocation55_spill] sm:$0xff] %v25235_v4  ;;  %v25238_v7 = vpop.f32.mrb[45].mxu1  ;;  %v2395_v34 = vshrl.u32 %v25063_v1, 16 }
 0x19b   : > { %v1393_v32 = vmax.f32 %v1202_v27, 0.0  ;;  %v1206_v57 = vadd.f32 %v1205_v20, %v25130_v29  ;;  %v21095_v61 = vpop.f32.mrb[46].mxu1  ;;  %v25249_v20 = vsel %vm2118_vm2, %v2277_v51, %v2281_v60  ;;  %v2387_v51 = vshrl.u32 %v25043_v43, 16  ;;  %v22453_v1 = vld [vmem:[#allocation2 + $0x10e4] ss:$24 sps:$4 sm:$0xff]  }
 0x19c   : > { %4376 = vmatpush1.bf16.msra.mxu0 %v22433_v6  ;;  %v1399_v23 = vmax.f32 %v1204_v11, 0.0  ;;  %v25246_v27 = vpop.f32.mrb[47].mxu1  ;;  %28357 = vst [vmem:[#allocation56_spill] sm:$0xff] %v25249_v20  ;;  %v22450_v6 = vld [vmem:[#allocation2 + $0x10bc] ss:$24 sps:$4 sm:$0xff]   ;;  %v2391_v61 = vshll.u32 %v25095_v3, 16 }
 0x19d   : > { %4788 = vmatpush1.bf16.msra.mxu1 %v22436_v39  ;;  %4377 = vmatprep.subr.bf16.mxu0 %v22441_v58  ;;  %v1400_v63 = vmax.f32 %v1206_v57, 0.0  ;;  %v1121_v39 = vadd.f32 %v25093_v35, %v24850_v26  ;;  %v2401_v59 = vrot.slane %v2399_v25, 1  ;;  %v2337_v43 = vrot.slane %v2335_v12, 1  ;;  %v22451_v46 = vld [vmem:[#allocation2 + $0x10e0] ss:$24 sps:$4 sm:$0xff]  }
 0x19e   : > { %4789 = vmatprep.subr.bf16.mxu1 %v22444_v9  ;;  %v25254_v58 = vpack.c.bf16 %v1399_v23, %v1392_v21  ;;  %v22448_v9 = vld [vmem:[#allocation2 + $0x10b8] ss:$24 sps:$4 sm:$0xff]   ;;  %v611_v21 = vsub.s32 6, %v24817_v62  ;;  %v2333_v23 = vor.u32 %v2331_v49, %v2281_v60  ;;  %v25270_v60 = vadd.f32 %v25084_v14, %v24844_v22  ;;  %v22459_v12 = vld [vmem:[#allocation2 + $0x1114] ss:$24 sps:$4 sm:$0xff]  }
 0x19f   : > { %4319 = vmatmul.mubr.bf16.gmra.mrb[72].mxu0 %v25249_v20  ;;  %4731 = vmatmul.mubr.bf16.gmra.mrb[56].mxu1 %v25249_v20  ;;  %v25258_v11 = vpack.c.bf16 %v1400_v63, %v1393_v32  ;;  %v1209_v57 = vpop.f32.mrb[52].mxu0  ;;  %v22456_v32 = vld [vmem:[#allocation2 + $0x10ec] ss:$24 sps:$4 sm:$0xff]   ;;  %v2397_v63 = vor.u32 %v2395_v34, %v2345_v31  ;;  %v1433_v33 = vmax.f32 %v1121_v39, 0.0  ;;  %v2389_v49 = vor.u32 %v2387_v51, %v2337_v43 }
 0x1a0   : > { %4378 = vmatpush1.bf16.msra.mxu0 %v22439_v2  ;;  %4328 = vmatprep.mubr.bf16.mxu0 %v25242_v36  ;;  %v1210_v26 = vadd.f32 %v1209_v57, %v25125_v44  ;;  %v1211_v35 = vpop.f32.mrb[53].mxu0  ;;  %v25273_v34 = vrot.slane %v2391_v61, 1  ;;  %v2451_v22 = vshrl.u32 %v25103_v13, 16  ;;  %v2455_v14 = vshll.u32 %v25137_v38, 16  ;;  %v22474_v61 = vld [vmem:[#allocation2 + $0x117c] ss:$24 sps:$4 sm:$0xff]  }
 0x1a1   : > { %4790 = vmatpush1.bf16.msra.mxu1 %v22442_v17  ;;  %4379 = vmatprep.subr.bf16.mxu0 %v22447_v10  ;;  %v1212_v2 = vadd.f32 %v1211_v35, %v25130_v29  ;;  %v1213_v20 = vpop.f32.mrb[54].mxu0  ;;  %v22454_v17 = vld [vmem:[#allocation2 + $0x10e8] ss:$24 sps:$4 sm:$0xff]   ;;  %v25286_v51 = vpack.c.bf16 %v1433_v33, %v1433_v33 }
 0x1a2   : > { %4740 = vmatprep.mubr.bf16.mxu1 %v25242_v36  ;;  %4791 = vmatprep.subr.bf16.mxu1 %v22450_v6  ;;  %v1406_v57 = vmax.f32 %v1210_v26, 0.0  ;;  %v1214_v4 = vadd.f32 %v1213_v20, %v25125_v44  ;;  %v1215_v62 = vpop.f32.mrb[55].mxu0  ;;  %v25276_v6 = vrot.slane %v25120_v16, %v611_v21  ;;  %v25279_v20 = vsel %vm2118_vm2, %v2397_v63, %v2401_v59 }
 0x1a3   : > { %v1407_v31 = vmax.f32 %v1212_v2, 0.0  ;;  %v1216_v10 = vadd.f32 %v1215_v62, %v25130_v29  ;;  %v25284_v62 = vsel %vm2118_vm2, %v2333_v23, %v2337_v43  ;;  %28358 = vst [vmem:[#allocation57_spill] sm:$0xff] %v25286_v51  ;;  %v2453_v2 = vor.u32 %v2451_v22, %v2401_v59 }
 0x1a4   : > { %4380 = vmatpush1.bf16.msra.mxu0 %v22445_v54  ;;  %v1413_v25 = vmax.f32 %v1214_v4, 0.0  ;;  %v22457_v54 = vld [vmem:[#allocation2 + $0x1110] ss:$24 sps:$4 sm:$0xff]   ;;  %v22462_v4 = vld [vmem:[#allocation2 + $0x111c] ss:$24 sps:$4 sm:$0xff]   ;;  %v1271_v35 = vadd.f32 %v25141_v56, %v25276_v6  ;;  %v1282_v33 = vadd.f32 %v25149_v0, %v25276_v6  ;;  %v1274_v63 = vadd.f32 %v25154_v45, %v25276_v6 }
 0x1a5   : > { %4792 = vmatpush1.bf16.msra.mxu1 %v22448_v9  ;;  %4381 = vmatprep.subr.bf16.mxu0 %v22453_v1  ;;  %v1414_v39 = vmax.f32 %v1216_v10, 0.0  ;;  %v1279_v1 = vadd.f32 %v25139_v30, %v25276_v6  ;;  %v22460_v9 = vld [vmem:[#allocation2 + $0x1118] ss:$24 sps:$4 sm:$0xff]   ;;  %v25304_v30 = vsel %vm2118_vm2, %v2389_v49, %v25273_v34  ;;  %v22465_v56 = vld [vmem:[#allocation2 + $0x1144] ss:$24 sps:$4 sm:$0xff]   ;;  %v2511_v10 = vshll.u32 %v25286_v51, 16 }
 0x1a6   : > { %4793 = vmatprep.subr.bf16.mxu1 %v22456_v32  ;;  %v25288_v16 = vpack.c.bf16 %v1413_v25, %v1406_v57  ;;  %v2457_v57 = vrot.slane %v2455_v14, 1  ;;  %v22468_v49 = vld [vmem:[#allocation2 + $0x114c] ss:$24 sps:$4 sm:$0xff]   ;;  %v1359_v45 = vmax.f32 %v1282_v33, 0.0  ;;  %v1345_v14 = vmax.f32 %v1274_v63, 0.0 }
 0x1a7   : > { %4329 = vmatmul.mubr.bf16.gmra.mrb[76].mxu0 %v25284_v62  ;;  %4741 = vmatmul.mubr.bf16.gmra.mrb[60].mxu1 %v25284_v62  ;;  %v25295_v26 = vpack.c.bf16 %v1414_v39, %v1407_v31  ;;  %v1219_v43 = vpop.f32.mrb[56].mxu0  ;;  %v1352_v32 = vmax.f32 %v1279_v1, 0.0  ;;  %v1338_v31 = vmax.f32 %v1271_v35, 0.0  ;;  %v2447_v35 = vshll.u32 %v25133_v24, 16 }
 0x1a8   : > { %4382 = vmatpush1.bf16.msra.mxu0 %v22451_v46  ;;  %4338 = vmatprep.mubr.bf16.mxu0 %v25279_v20  ;;  %v1220_v21 = vadd.f32 %v1219_v43, %v25125_v44  ;;  %v1221_v23 = vpop.f32.mrb[57].mxu0  ;;  %v22466_v43 = vld [vmem:[#allocation2 + $0x1148] ss:$24 sps:$4 sm:$0xff]   ;;  %v25321_v33 = vsel %vm2118_vm2, %v2453_v2, %v2457_v57  ;;  %v22477_v2 = vld [vmem:[#allocation2 + $0x11a4] ss:$24 sps:$4 sm:$0xff]  }
 0x1a9   : > { %4794 = vmatpush1.bf16.msra.mxu1 %v22454_v17  ;;  %4383 = vmatprep.subr.bf16.mxu0 %v22459_v12  ;;  %v1222_v0 = vadd.f32 %v1221_v23, %v25130_v29  ;;  %v1223_v46 = vpop.f32.mrb[58].mxu0  ;;  %v22463_v17 = vld [vmem:[#allocation2 + $0x1140] ss:$24 sps:$4 sm:$0xff]   ;;  %v2443_v12 = vshrl.u32 %v25095_v3, 16  ;;  %v25316_v23 = vpack.c.bf16 %v1359_v45, %v1352_v32  ;;  %v25324_v63 = vpack.c.bf16 %v1345_v14, %v1338_v31 }
 0x1aa   : > { %4750 = vmatprep.mubr.bf16.mxu1 %v25279_v20  ;;  %4795 = vmatprep.subr.bf16.mxu1 %v22462_v4  ;;  %v1420_v25 = vmax.f32 %v1220_v21, 0.0  ;;  %v1224_v39 = vadd.f32 %v1223_v46, %v25125_v44  ;;  %v1225_v1 = vpop.f32.mrb[59].mxu0  ;;  %v1295_v21 = vadd.f32 %v25166_v53, %v25276_v6  ;;  %v22471_v46 = vld [vmem:[#allocation2 + $0x1174] ss:$24 sps:$4 sm:$0xff]   ;;  %v1287_v53 = vadd.f32 %v25170_v28, %v25276_v6 }
 0x1ab   : > { %v1421_v59 = vmax.f32 %v1222_v0, 0.0  ;;  %v1226_v22 = vadd.f32 %v1225_v1, %v25130_v29  ;;  %28359 = vst [vmem:[#allocation58_spill] sm:$0xff] %v25316_v23  ;;  %v2507_v0 = vshrl.u32 %v25137_v38, 16  ;;  %28360 = vst [vmem:[#allocation59_spill] sm:$0xff] %v25324_v63 }
 0x1ac   : > { %4384 = vmatpush1.bf16.msra.mxu0 %v22457_v54  ;;  %v1427_v4 = vmax.f32 %v1224_v39, 0.0  ;;  %v22469_v54 = vld [vmem:[#allocation2 + $0x1170] ss:$24 sps:$4 sm:$0xff]   ;;  %v1380_v32 = vmax.f32 %v1295_v21, 0.0  ;;  %v1366_v45 = vmax.f32 %v1287_v53, 0.0 }
 0x1ad   : > { %4796 = vmatpush1.bf16.msra.mxu1 %v22460_v9  ;;  %4385 = vmatprep.subr.bf16.mxu0 %v22465_v56  ;;  %v1428_v1 = vmax.f32 %v1226_v22, 0.0  ;;  %v1298_v9 = vadd.f32 %v25174_v18, %v25276_v6  ;;  %v22472_v56 = vld [vmem:[#allocation2 + $0x1178] ss:$24 sps:$4 sm:$0xff]   ;;  %v2513_v22 = vrot.slane %v2511_v10, 1  ;;  %v2509_v14 = vor.u32 %v2507_v0, %v2457_v57  ;;  %v22480_v53 = vld [vmem:[#allocation2 + $0x11ac] ss:$24 sps:$4 sm:$0xff]  }
 0x1ae   : > { %4797 = vmatprep.subr.bf16.mxu1 %v22468_v49  ;;  %v25326_v39 = vpack.c.bf16 %v1427_v4, %v1420_v25  ;;  %v1290_v25 = vadd.f32 %v25178_v8, %v25276_v6  ;;  %v2182_v4 = vshll.u32 %v25163_v47, 16  ;;  %v2445_v8 = vor.u32 %v2443_v12, %v25273_v34  ;;  %v22475_v57 = vld [vmem:[#allocation2 + $0x11a0] ss:$24 sps:$4 sm:$0xff]  }
 0x1af   : > { %4339 = vmatmul.mubr.bf16.gmra.mrb[80].mxu0 %v25304_v30  ;;  %4751 = vmatmul.mubr.bf16.gmra.mrb[64].mxu1 %v25304_v30  ;;  %v25334_v31 = vpack.c.bf16 %v1428_v1, %v1421_v59  ;;  %v25336_v49 = vpop.f32.mrb[60].mxu0  ;;  %v1387_v18 = vmax.f32 %v1298_v9, 0.0  ;;  %v28362_v1 = vmax.f32 %v25270_v60, 0.0  ;;  %v1311_v0 = vadd.f32 %v25200_v52, %v25276_v6  ;;  %v22478_v60 = vld [vmem:[#allocation2 + $0x11a8] ss:$24 sps:$4 sm:$0xff]  }
 0x1b0   : > { %28361 = vst [vmem:[#allocation60_spill] sm:$0xff] %v25326_v39  ;;  %4386 = vmatpush1.bf16.msra.mxu0 %v22463_v17  ;;  %4348 = vmatprep.mubr.bf16.mxu0 %v25321_v33  ;;  %v25341_v28 = vpop.f32.mrb[61].mxu0  ;;  %v1373_v21 = vmax.f32 %v1290_v25, 0.0  ;;  %v2449_v17 = vrot.slane %v2447_v35, 1  ;;  %v1303_v9 = vadd.f32 %v25205_v40, %v25276_v6  ;;  %v25360_v34 = vsel %vm2118_vm2, %v2509_v14, %v2513_v22 }
 0x1b1   : > { %4798 = vmatpush1.bf16.msra.mxu1 %v22466_v43  ;;  %4387 = vmatprep.subr.bf16.mxu0 %v22471_v46  ;;  %v1233_v59 = vpop.f32.mrb[62].mxu0  ;;  %v25347_v51 = vpack.c.bf16 %v28362_v1, %v28362_v1  ;;  %v25351_v43 = vpack.c.bf16 %v1387_v18, %v1380_v32  ;;  %v2180_v12 = vshrl.u32 %v25163_v47, 16  ;;  %v2184_v35 = vrot.slane %v2182_v4, 1  ;;  %v22489_v4 = vld [vmem:[#allocation2 + $0x1204] ss:$24 sps:$4 sm:$0xff]  }
 0x1b2   : > { %4760 = vmatprep.mubr.bf16.mxu1 %v25321_v33  ;;  %4799 = vmatprep.subr.bf16.mxu1 %v22474_v61  ;;  %v1234_v10 = vpop.f32.mrb[63].mxu0  ;;  %v25353_v46 = vpack.c.bf16 %v1373_v21, %v1366_v45  ;;  %v22483_v61 = vld [vmem:[#allocation2 + $0x11d4] ss:$24 sps:$4 sm:$0xff]   ;;  %v2187_v32 = vshll.u32 %v25192_v15, 16  ;;  %v25366_v52 = vsel %vm2118_vm2, %v2445_v8, %v2449_v17  ;;  %v2499_v40 = vshrl.u32 %v25133_v24, 16 }
 0x1b3   : > { %28363 = vst [vmem:[#allocation61_spill] sm:$0xff] %v25347_v51  ;;  %28364 = vst [vmem:[#allocation62_spill] sm:$0xff] %v25351_v43  ;;  %v2503_v25 = vshll.u32 %v25347_v51, 16  ;;  %v1408_v45 = vmax.f32 %v1311_v0, 0.0  ;;  %v1314_v18 = vadd.f32 %v25213_v5, %v25276_v6  ;;  %v1394_v22 = vmax.f32 %v1303_v9, 0.0 }
 0x1b4   : > { %28365 = vst [vmem:[#allocation63_spill] sm:$0xff] %v25353_v46  ;;  %4388 = vmatpush1.bf16.msra.mxu0 %v22469_v54  ;;  %v22486_v54 = vld [vmem:[#allocation2 + $0x11dc] ss:$24 sps:$4 sm:$0xff]   ;;  %v1306_v14 = vadd.f32 %v25217_v48, %v25276_v6  ;;  %v2185_v59 = vor.u32 %v2184_v35, %v2180_v12  ;;  %v2189_v21 = vrot.slane %v2187_v32, 1  ;;  %v22492_v10 = vld [vmem:[#allocation2 + $0x120c] ss:$24 sps:$4 sm:$0xff]   ;;  %v1319_v48 = vadd.f32 %v25238_v7, %v25276_v6 }
 0x1b5   : > { %4800 = vmatpush1.bf16.msra.mxu1 %v22472_v56  ;;  %4389 = vmatprep.subr.bf16.mxu0 %v22477_v2  ;;  %v22481_v56 = vld [vmem:[#allocation2 + $0x11d0] ss:$24 sps:$4 sm:$0xff]   ;;  %v1415_v1 = vmax.f32 %v1314_v18, 0.0  ;;  %v2505_v8 = vrot.slane %v2503_v25, 1  ;;  %v22498_v32 = vld [vmem:[#allocation2 + $0x123c] ss:$24 sps:$4 sm:$0xff]  }
 0x1b6   : > { %4801 = vmatprep.subr.bf16.mxu1 %v22480_v53  ;;  %v22484_v2 = vld [vmem:[#allocation2 + $0x11d8] ss:$24 sps:$4 sm:$0xff]   ;;  %v2501_v53 = vor.u32 %v2499_v40, %v2449_v17  ;;  %v1401_v5 = vmax.f32 %v1306_v14, 0.0  ;;  %v25384_v12 = vsel %vm2118_vm2, %v2185_v59, %v2189_v21  ;;  %v1322_v17 = vadd.f32 %v25246_v27, %v25276_v6  ;;  %v22507_v14 = vld [vmem:[#allocation2 + $0x1294] ss:$24 sps:$4 sm:$0xff]  }
 0x1b7   : > { %4349 = vmatmul.mubr.bf16.gmra.mrb[84].mxu0 %v25366_v52  ;;  %4761 = vmatmul.mubr.bf16.gmra.mrb[68].mxu1 %v25366_v52  ;;  %v25377_v0 = vpack.c.bf16 %v1415_v1, %v1408_v45  ;;  %v1422_v25 = vmax.f32 %v1319_v48, 0.0  ;;  %v22496_v40 = vld [vmem:[#allocation2 + $0x1238] ss:$24 sps:$4 sm:$0xff]   ;;  %v22504_v45 = vld [vmem:[#allocation2 + $0x126c] ss:$24 sps:$4 sm:$0xff]   ;;  %v2170_v18 = vshll.u32 %v25159_v42, 16 }
 0x1b8   : > { %4390 = vmatpush1.bf16.msra.mxu0 %v22475_v57  ;;  %4358 = vmatprep.mubr.bf16.mxu0 %v25360_v34  ;;  %v22487_v57 = vld [vmem:[#allocation2 + $0x1200] ss:$24 sps:$4 sm:$0xff]   ;;  %v25379_v9 = vpack.c.bf16 %v1401_v5, %v1394_v22  ;;  %v25389_v35 = vsel %vm2118_vm2, %v2501_v53, %v2505_v8  ;;  %v1429_v7 = vmax.f32 %v1322_v17, 0.0  ;;  %v22510_v59 = vld [vmem:[#allocation2 + $0x129c] ss:$24 sps:$4 sm:$0xff]   ;;  %v2168_v1 = vshrl.u32 %v25159_v42, 16 }
 0x1b9   : > { %4802 = vmatpush1.bf16.msra.mxu1 %v22478_v60  ;;  %4391 = vmatprep.subr.bf16.mxu0 %v22483_v61  ;;  %28366 = vst [vmem:[#allocation64_spill] sm:$0xff] %v25377_v0  ;;  %v22490_v60 = vld [vmem:[#allocation2 + $0x1208] ss:$24 sps:$4 sm:$0xff]   ;;  %v22495_v61 = vld [vmem:[#allocation2 + $0x1234] ss:$24 sps:$4 sm:$0xff]   ;;  %v2172_v8 = vrot.slane %v2170_v18, 1 }
 0x1ba   : > { %4770 = vmatprep.mubr.bf16.mxu1 %v25360_v34  ;;  %4803 = vmatprep.subr.bf16.mxu1 %v22486_v54  ;;  %28367 = vst [vmem:[#allocation65_spill] sm:$0xff] %v25379_v9  ;;  %v22493_v54 = vld [vmem:[#allocation2 + $0x1230] ss:$24 sps:$4 sm:$0xff]   ;;  %v25394_v27 = vpack.c.bf16 %v1429_v7, %v1422_v25  ;;  %v2175_v53 = vshll.u32 %v25190_v55, 16  ;;  %v22513_v5 = vld [vmem:[#allocation2 + $0x12c4] ss:$24 sps:$4 sm:$0xff]  }
 0x1bb   : > { %v22502_v22 = vld [vmem:[#allocation2 + $0x1268] ss:$24 sps:$4 sm:$0xff]   ;;  %v2247_v48 = vshll.u32 %v25211_v50, 16  ;;  %v22522_v17 = vld [vmem:[#allocation2 + $0x12cc] ss:$24 sps:$4 sm:$0xff]   ;;  %v2351_v51 = vshll.u32 %v25254_v58, 16 }
 0x1bc   : > { %4392 = vmatpush1.bf16.msra.mxu0 %v22481_v56  ;;  %v22501_v56 = vld [vmem:[#allocation2 + $0x1264] ss:$24 sps:$4 sm:$0xff]   ;;  %28368 = vst [vmem:[#allocation66_spill] sm:$0xff] %v25394_v27 }
 0x1bd   : > { %4804 = vmatpush1.bf16.msra.mxu1 %v22484_v2  ;;  %4393 = vmatprep.subr.bf16.mxu0 %v22489_v4  ;;  %v22499_v2 = vld [vmem:[#allocation2 + $0x1260] ss:$24 sps:$4 sm:$0xff]   ;;  %v22505_v4 = vld [vmem:[#allocation2 + $0x1290] ss:$24 sps:$4 sm:$0xff]   ;;  %v2249_v7 = vrot.slane %v2247_v48, 1 }
 0x1be   : > { %4805 = vmatprep.subr.bf16.mxu1 %v22492_v10  ;;  %v22508_v10 = vld [vmem:[#allocation2 + $0x1298] ss:$24 sps:$4 sm:$0xff]   ;;  %v22531_v48 = vld [vmem:[#allocation2 + $0x132c] ss:$24 sps:$4 sm:$0xff]  }
 0x1bf   : > { %4359 = vmatmul.mubr.bf16.gmra.mrb[88].mxu0 %v25389_v35  ;;  %4771 = vmatmul.mubr.bf16.gmra.mrb[72].mxu1 %v25389_v35 }
 0x1c0   : > { %4394 = vmatpush1.bf16.msra.mxu0 %v22487_v57  ;;  %4401 = vmatprep.mubr.bf16.mxu0 %v25384_v12  ;;  %v2243_v57 = vshrl.u32 %v25192_v15, 16 }
 0x1c1   : > { %4806 = vmatpush1.bf16.msra.mxu1 %v22490_v60  ;;  %4395 = vmatprep.subr.bf16.mxu0 %v22495_v61  ;;  %v2173_v60 = vor.u32 %v2172_v8, %v2168_v1  ;;  %v2177_v61 = vrot.slane %v2175_v53, 1  ;;  %v22519_v8 = vld [vmem:[#allocation2 + $0x1324] ss:$24 sps:$4 sm:$0xff]   ;;  %v22526_v53 = vld [vmem:[#allocation2 + $0x12f8] ss:$24 sps:$4 sm:$0xff]  }
 0x1c2   : > { %4807 = vmatprep.subr.bf16.mxu1 %v22498_v32  ;;  %4813 = vmatprep.mubr.bf16.mxu1 %v25384_v12  ;;  %v22511_v32 = vld [vmem:[#allocation2 + $0x12c0] ss:$24 sps:$4 sm:$0xff]   ;;  %v2245_v25 = vor.u32 %v2243_v57, %v2189_v21  ;;  %v2299_v21 = vshrl.u32 %v25211_v50, 16 }
 0x1c3   : > { %v22517_v57 = vld [vmem:[#allocation2 + $0x1320] ss:$24 sps:$4 sm:$0xff]  }
 0x1c4   : > { %4396 = vmatpush1.bf16.msra.mxu0 %v22493_v54  ;;  %v22516_v54 = vld [vmem:[#allocation2 + $0x12f4] ss:$24 sps:$4 sm:$0xff]   ;;  %v25409_v18 = vsel %vm2118_vm2, %v2245_v25, %v2249_v7 }
 0x1c5   : > { %4808 = vmatpush1.bf16.msra.mxu1 %v22496_v40  ;;  %4397 = vmatprep.subr.bf16.mxu0 %v22501_v56  ;;  %v22520_v40 = vld [vmem:[#allocation2 + $0x12c8] ss:$24 sps:$4 sm:$0xff]   ;;  %v25403_v56 = vsel %vm2118_vm2, %v2173_v60, %v2177_v61  ;;  %v22525_v60 = vld [vmem:[#allocation2 + $0x1354] ss:$24 sps:$4 sm:$0xff]  }
 0x1c6   : > { %4809 = vmatprep.subr.bf16.mxu1 %v22504_v45  ;;  %v2235_v45 = vshrl.u32 %v25190_v55, 16 }
 0x1c8   : > { %4398 = vmatpush1.bf16.msra.mxu0 %v22499_v2  ;;  %v2239_v2 = vshll.u32 %v25202_v41, 16 }
 0x1c9   : > { %4810 = vmatpush1.bf16.msra.mxu1 %v22502_v22  ;;  %4399 = vmatprep.subr.bf16.mxu0 %v22507_v14  ;;  %v2303_v22 = vshll.u32 %v25230_v19, 16  ;;  %v22528_v14 = vld [vmem:[#allocation2 + $0x12fc] ss:$24 sps:$4 sm:$0xff]  }
 0x1ca   : > { %4811 = vmatprep.subr.bf16.mxu1 %v22510_v59  ;;  %v2237_v59 = vor.u32 %v2235_v45, %v2177_v61  ;;  %v2241_v1 = vrot.slane %v2239_v2, 1  ;;  %v2295_v61 = vshll.u32 %v25226_v37, 16  ;;  %v22534_v45 = vld [vmem:[#allocation2 + $0x135c] ss:$24 sps:$4 sm:$0xff]   ;;  %v22523_v2 = vld [vmem:[#allocation2 + $0x1350] ss:$24 sps:$4 sm:$0xff]  }
 0x1cc   : > { %4400 = vmatpush1.bf16.msra.mxu0 %v22505_v4  ;;  %v22514_v4 = vld [vmem:[#allocation2 + $0x12f0] ss:$24 sps:$4 sm:$0xff]   ;;  %v25417_v25 = vsel %vm2118_vm2, %v2237_v59, %v2241_v1 }
 0x1cd   : > { %4812 = vmatpush1.bf16.msra.mxu1 %v22508_v10  ;;  %4472 = vmatprep.subr.bf16.mxu0 %v22513_v5  ;;  %v2301_v10 = vor.u32 %v2299_v21, %v2249_v7  ;;  %v2305_v5 = vrot.slane %v2303_v22, 1  ;;  %v2297_v22 = vrot.slane %v2295_v61, 1 }
 0x1ce   : > { %4884 = vmatprep.subr.bf16.mxu1 %v22522_v17  ;;  %v22529_v17 = vld [vmem:[#allocation2 + $0x1328] ss:$24 sps:$4 sm:$0xff]  }
 0x1cf   : > { %4402 = vmatmul.mubr.bf16.vlgmr.msra.gmra.mrb[64].mxu0 %v25403_v56  ;;  %v25423_v7 = vsel %vm2118_vm2, %v2301_v10, %v2305_v5 }
 0x1d0   : > { %4814 = vmatmul.mubr.bf16.vlgmr.msra.gmra.mrb[48].mxu1 %v25403_v56  ;;  %4411 = vmatprep.mubr.bf16.mxu0 %v25409_v18 }
 0x1d1   : > { %4473 = vmatpush1.bf16.msra.mxu0 %v22511_v32  ;;  %4823 = vmatprep.mubr.bf16.mxu1 %v25409_v18  ;;  %v2291_v32 = vshrl.u32 %v25202_v41, 16 }
 0x1d2   : > { %4474 = vmatprep.subr.bf16.mxu0 %v22516_v54  ;;  %4885 = vmatpush1.bf16.msra.mxu1 %v22520_v40  ;;  %v2355_v54 = vshrl.u32 %v25230_v19, 16  ;;  %v2359_v40 = vshll.u32 %v25258_v11, 16 }
 0x1d3   : > { %4886 = vmatprep.subr.bf16.mxu1 %v22528_v14  ;;  %v2293_v21 = vor.u32 %v2291_v32, %v2241_v1  ;;  %v22532_v14 = vld [vmem:[#allocation2 + $0x1358] ss:$24 sps:$4 sm:$0xff]   ;;  %v1232_v32 = vadd.f32 %v25341_v28, %v25130_v29  ;;  %v1230_v29 = vadd.f32 %v25336_v49, %v25125_v44  ;;  %v2523_v49 = vshrl.u32 %v25334_v31, 16 }
 0x1d4   : > { %v2357_v59 = vor.u32 %v2355_v54, %v2305_v5  ;;  %v2411_v5 = vshrl.u32 %v25258_v11, 16 }
 0x1d5   : > { %4475 = vmatpush1.bf16.msra.mxu0 %v22514_v4  ;;  %v22537_v4 = vld [vmem:[#allocation2 + $0x9d4] ss:$24 sps:$4 sm:$0xff]   ;;  %v25431_v10 = vsel %vm2118_vm2, %v2293_v21, %v2297_v22  ;;  %v1435_v21 = vmax.f32 %v1232_v32, 0.0 }
 0x1d6   : > { %4476 = vmatprep.subr.bf16.mxu0 %v22519_v8  ;;  %4887 = vmatpush1.bf16.msra.mxu1 %v22526_v53  ;;  %v2361_v8 = vrot.slane %v2359_v40, 1  ;;  %v22540_v53 = vld [vmem:[#allocation2 + $0xc] ss:$24 sps:$4 sm:$0xff]  }
 0x1d7   : > { %4412 = vmatmul.mubr.bf16.gmra.mrb[68].mxu0 %v25417_v25  ;;  %4888 = vmatprep.subr.bf16.mxu1 %v22531_v48  ;;  %v2347_v48 = vshrl.u32 %v25226_v37, 16 }
 0x1d8   : > { %4824 = vmatmul.mubr.bf16.gmra.mrb[52].mxu1 %v25417_v25  ;;  %4421 = vmatprep.mubr.bf16.mxu0 %v25423_v7  ;;  %v25437_v1 = vsel %vm2118_vm2, %v2357_v59, %v2361_v8  ;;  %v2413_v61 = vor.u32 %v2411_v5, %v2361_v8  ;;  %v25462_v59 = vpack.c.bf16 %v1435_v21, %v1435_v21 }
 0x1d9   : > { %4833 = vmatprep.mubr.bf16.mxu1 %v25423_v7  ;;  %4477 = vmatpush1.bf16.msra.mxu0 %v22517_v57  ;;  %v2415_v57 = vshll.u32 %v25295_v26, 16 }
 0x1da   : > { %4478 = vmatprep.subr.bf16.mxu0 %v22525_v60  ;;  %4889 = vmatpush1.bf16.msra.mxu1 %v22529_v17  ;;  %v2349_v60 = vor.u32 %v2347_v48, %v2297_v22  ;;  %v2353_v17 = vrot.slane %v2351_v51, 1  ;;  %v2467_v51 = vshrl.u32 %v25295_v26, 16  ;;  %v2471_v22 = vshll.u32 %v25334_v31, 16  ;;  %28369 = vst [vmem:[#allocation67_spill] sm:$0xff] %v25462_v59 }
 0x1db   : > { %4890 = vmatprep.subr.bf16.mxu1 %v22534_v45  ;;  %v2417_v54 = vrot.slane %v2415_v57, 1  ;;  %v2403_v45 = vshrl.u32 %v25254_v58, 16  ;;  %v1434_v48 = vmax.f32 %v1230_v29, 0.0  ;;  %v2459_v57 = vshrl.u32 %v25288_v16, 16 }
 0x1dc   : > { %v25447_v40 = vsel %vm2118_vm2, %v2349_v60, %v2353_v17  ;;  %v2463_v60 = vshll.u32 %v25326_v39, 16  ;;  %v2527_v32 = vshll.u32 %v25462_v59, 16  ;;  %v22547_v59 = vld [vmem:[#allocation2 + $0xa30] ss:$24 sps:$4 sm:$0xff]  }
 0x1dd   : > { %4479 = vmatpush1.bf16.msra.mxu0 %v22523_v2  ;;  %v2407_v2 = vshll.u32 %v25288_v16, 16  ;;  %v2405_v28 = vor.u32 %v2403_v45, %v2353_v17  ;;  %v2469_v8 = vor.u32 %v2467_v51, %v2417_v54  ;;  %v25478_v17 = vpack.c.bf16 %v1434_v48, %v1434_v48 }
 0x1de   : > { %4891 = vmatpush1.bf16.msra.mxu1 %v22532_v14  ;;  %4987 = vmatprep.subr.bf16.mxu0 %v22537_v4  ;;  %v25453_v14 = vsel %vm2118_vm2, %v2413_v61, %v2417_v54  ;;  %v2465_v54 = vrot.slane %v2463_v60, 1  ;;  %v2529_v45 = vrot.slane %v2527_v32, 1  ;;  %v2192_v48 = vshrl.u32 %v25324_v63, 16 }
 0x1df   : > { %4422 = vmatmul.mubr.bf16.gmra.mrb[72].mxu0 %v25431_v10  ;;  %7385 = vmatprep.subr.bf16.mxu1 %v22540_v53  ;;  %v2409_v4 = vrot.slane %v2407_v2, 1  ;;  %v2473_v53 = vrot.slane %v2471_v22, 1  ;;  %28370 = vst [vmem:[#allocation68_spill] sm:$0xff] %v25478_v17  ;;  %v2519_v21 = vshll.u32 %v25478_v17, 16  ;;  %v2515_v22 = vshrl.u32 %v25326_v39, 16 }
 0x1e0   : > { %4834 = vmatmul.mubr.bf16.gmra.mrb[56].mxu1 %v25431_v10  ;;  %4431 = vmatprep.mubr.bf16.mxu0 %v25437_v1  ;;  %v28372_v60 = vmov 0   ;;  %v2199_v32 = vshll.u32 %v25316_v23, 16  ;;  %v22544_v17 = vld [vmem:[#allocation2 + $0x38] ss:$24 sps:$4 sm:$0xff]   ;;  %v22558_v39 = vld [vmem:[#allocation2 + $0x9c] ss:$24 sps:$4 sm:$0xff]  }
 0x1e1   : > { %4843 = vmatprep.mubr.bf16.mxu1 %v25437_v1  ;;  %v25465_v5 = vsel %vm2118_vm2, %v2405_v28, %v2409_v4  ;;  %v25472_v44 = vsel %vm2118_vm2, %v2469_v8, %v2473_v53  ;;  %v2461_v61 = vor.u32 %v2459_v57, %v2409_v4  ;;  %v2525_v2 = vor.u32 %v2523_v49, %v2473_v53  ;;  %v22535_v49 = vld [vmem:[#allocation2 + $0x9d0] ss:$24 sps:$4 sm:$0xff]  }
 0x1e2   : > { %v2521_v28 = vrot.slane %v2519_v21, 1  ;;  %v2517_v4 = vor.u32 %v2515_v22, %v2465_v54  ;;  %v2194_v8 = vshll.u32 %v25324_v63, 16  ;;  %v22546_v21 = vld [vmem:[#allocation2 + $0x3c] ss:$24 sps:$4 sm:$0xff]  }
 0x1e3   : > { %v25482_v51 = vsel %vm2118_vm2, %v2461_v61, %v2465_v54  ;;  %v25487_v29 = vsel %vm2118_vm2, %v2525_v2, %v2529_v45  ;;  %v22538_v54 = vld [vmem:[#allocation2 + $0x8] ss:$24 sps:$4 sm:$0xff]   ;;  %v22543_v45 = vld [vmem:[#allocation2 + $0xa04] ss:$24 sps:$4 sm:$0xff]   ;;  %v2201_v2 = vrot.slane %v2199_v32, 1 }
 0x1e4   : > { %v25494_v53 = vsel %vm2118_vm2, %v2517_v4, %v2521_v28  ;;  %v2196_v57 = vrot.slane %v2194_v8, 1  ;;  %v2251_v28 = vshrl.u32 %v25316_v23, 16  ;;  %v2255_v4 = vshll.u32 %v25353_v46, 16  ;;  %v22541_v8 = vld [vmem:[#allocation2 + $0xa00] ss:$24 sps:$4 sm:$0xff]  }
 0x1e5   : > { %28371 = vst [vmem:[#allocation69_spill] sm:$0xff] %v25494_v53  ;;  %v22550_v23 = vld [vmem:[#allocation2 + $0x68] ss:$24 sps:$4 sm:$0xff]   ;;  %v22555_v63 = vld [vmem:[#allocation2 + $0xa64] ss:$24 sps:$4 sm:$0xff]  }
 0x1e6   : > { %v2197_v61 = vor.u32 %v2196_v57, %v2192_v48  ;;  %v22549_v48 = vld [vmem:[#allocation2 + $0xa34] ss:$24 sps:$4 sm:$0xff]   ;;  %v2253_v32 = vor.u32 %v2251_v28, %v2201_v2  ;;  %v2311_v28 = vshll.u32 %v25351_v43, 16 }
 0x1e7   : > { %4432 = vmatmul.mubr.bf16.gmra.mrb[76].mxu0 %v25447_v40  ;;  %v22552_v57 = vld [vmem:[#allocation2 + $0x6c] ss:$24 sps:$4 sm:$0xff]  }
 0x1e8   : > { %4844 = vmatmul.mubr.bf16.gmra.mrb[60].mxu1 %v25447_v40  ;;  %4441 = vmatprep.mubr.bf16.mxu0 %v25453_v14  ;;  %v25503_v22 = vsel %vm2118_vm2, %v2197_v61, %v2201_v2  ;;  %v2257_v61 = vrot.slane %v2255_v4, 1  ;;  %v22556_v2 = vld [vmem:[#allocation2 + $0x98] ss:$24 sps:$4 sm:$0xff]  }
 0x1e9   : > { %4853 = vmatprep.mubr.bf16.mxu1 %v25453_v14  ;;  %28373 = vst [vmem:[#allocation70_spill] sm:$0xff] %v25503_v22 }
 0x1ef   : > { %4442 = vmatmul.mubr.bf16.gmra.mrb[80].mxu0 %v25465_v5 }
 0x1f0   : > { %4854 = vmatmul.mubr.bf16.gmra.mrb[64].mxu1 %v25465_v5  ;;  %4451 = vmatprep.mubr.bf16.mxu0 %v25472_v44 }
 0x1f1   : > { %4863 = vmatprep.mubr.bf16.mxu1 %v25472_v44 }
 0x1f7   : > { %4452 = vmatmul.mubr.bf16.gmra.mrb[84].mxu0 %v25482_v51 }
 0x1f8   : > { %4864 = vmatmul.mubr.bf16.gmra.mrb[68].mxu1 %v25482_v51  ;;  %4461 = vmatprep.mubr.bf16.mxu0 %v25487_v29 }
 0x1f9   : > { %4873 = vmatprep.mubr.bf16.mxu1 %v25487_v29 }
 0x1ff   : > { %4462 = vmatmul.mubr.bf16.gmra.mrb[88].mxu0 %v25494_v53 }
 0x200   : > { %4874 = vmatmul.mubr.bf16.gmra.mrb[72].mxu1 %v25494_v53  ;;  %4504 = vmatprep.mubr.bf16.mxu0 %v28372_v60  ;;  %v28405_v53 = vld [vmem:[#allocation34_spill] sm:$0xff] }
 0x201   : > { %4916 = vmatprep.mubr.bf16.mxu1 %v28372_v60 }
 0x207   : > { %18919 = vmatmul.mubr.msk.bf16.vlgmr.msra.gmra.mrb[64].mxu0 %vm4141_vm3, %v25503_v22 }
 0x208   : > { %18926 = vmatmul.mubr.msk.bf16.vlgmr.msra.gmra.mrb[48].mxu1 %vm4141_vm3, %v25503_v22  ;;  %4988 = vmatpush1.bf16.msra.mxu0 %v22535_v49  ;;  %v25514_v49 = vsel %vm2118_vm2, %v2253_v32, %v2257_v61  ;;  %v2313_v32 = vrot.slane %v2311_v28, 1  ;;  %v22571_v28 = vld [vmem:[#allocation2 + $0xaf0] ss:$24 sps:$4 sm:$0xff]   ;;  %v22681_v22 = vld [vmem:[#allocation2 + $0xe54] ss:$24 sps:$4 sm:$0xff]  }
 0x209   : > { %7386 = vmatpush1.bf16.msra.mxu1 %v22538_v54  ;;  %4989 = vmatprep.subr.bf16.mxu0 %v22543_v45  ;;  %28374 = vst [vmem:[#allocation71_spill] sm:$0xff] %v25514_v49  ;;  %v22553_v54 = vld [vmem:[#allocation2 + $0xa60] ss:$24 sps:$4 sm:$0xff]   ;;  %v2307_v45 = vshrl.u32 %v25353_v46, 16  ;;  %v22570_v46 = vld [vmem:[#allocation2 + $0xfc] ss:$24 sps:$4 sm:$0xff]  }
 0x20a   : > { %7387 = vmatprep.subr.bf16.mxu1 %v22546_v21  ;;  %4514 = vmatprep.mubr.bf16.mxu0 %v28372_v60  ;;  %v22561_v21 = vld [vmem:[#allocation2 + $0xa94] ss:$24 sps:$4 sm:$0xff]  }
 0x20b   : > { %4926 = vmatprep.mubr.bf16.mxu1 %v28372_v60  ;;  %v2309_v4 = vor.u32 %v2307_v45, %v2257_v61  ;;  %v22568_v61 = vld [vmem:[#allocation2 + $0xf8] ss:$24 sps:$4 sm:$0xff]   ;;  %v22576_v45 = vld [vmem:[#allocation2 + $0x12c] ss:$24 sps:$4 sm:$0xff]  }
 0x20c   : > { %4990 = vmatpush1.bf16.msra.mxu0 %v22541_v8  ;;  %v22559_v8 = vld [vmem:[#allocation2 + $0xa90] ss:$24 sps:$4 sm:$0xff]  }
 0x20d   : > { %7388 = vmatpush1.bf16.msra.mxu1 %v22544_v17  ;;  %4991 = vmatprep.subr.bf16.mxu0 %v22549_v48  ;;  %v22564_v17 = vld [vmem:[#allocation2 + $0xcc] ss:$24 sps:$4 sm:$0xff]   ;;  %v22562_v48 = vld [vmem:[#allocation2 + $0xc8] ss:$24 sps:$4 sm:$0xff]  }
 0x20e   : > { %7389 = vmatprep.subr.bf16.mxu1 %v22552_v57  ;;  %v22567_v57 = vld [vmem:[#allocation2 + $0xac4] ss:$24 sps:$4 sm:$0xff]  }
 0x20f   : > { %18920 = vmatmul.mubr.msk.bf16.gmra.mrb[68].mxu0 %vm4141_vm3, %v25514_v49 }
 0x210   : > { %18927 = vmatmul.mubr.msk.bf16.gmra.mrb[52].mxu1 %vm4141_vm3, %v25514_v49  ;;  %4992 = vmatpush1.bf16.msra.mxu0 %v22547_v59  ;;  %v25525_v59 = vsel %vm2118_vm2, %v2309_v4, %v2313_v32  ;;  %v22579_v4 = vld [vmem:[#allocation2 + $0xb24] ss:$24 sps:$4 sm:$0xff]   ;;  %v22676_v49 = vld [vmem:[#allocation2 + $0x458] ss:$24 sps:$4 sm:$0xff]  }
 0x211   : > { %7390 = vmatpush1.bf16.msra.mxu1 %v22550_v23  ;;  %4993 = vmatprep.subr.bf16.mxu0 %v22555_v63  ;;  %28375 = vst [vmem:[#allocation72_spill] sm:$0xff] %v25525_v59  ;;  %v2363_v23 = vshrl.u32 %v25351_v43, 16  ;;  %v2367_v63 = vshll.u32 %v25379_v9, 16  ;;  %v22582_v43 = vld [vmem:[#allocation2 + $0x15c] ss:$24 sps:$4 sm:$0xff]  }
 0x212   : > { %7391 = vmatprep.subr.bf16.mxu1 %v22558_v39  ;;  %4524 = vmatprep.mubr.bf16.mxu0 %v28372_v60  ;;  %v22565_v39 = vld [vmem:[#allocation2 + $0xac0] ss:$24 sps:$4 sm:$0xff]  }
 0x213   : > { %4936 = vmatprep.mubr.bf16.mxu1 %v28372_v60 }
 0x214   : > { %4994 = vmatpush1.bf16.msra.mxu0 %v22553_v54  ;;  %v22573_v54 = vld [vmem:[#allocation2 + $0xaf4] ss:$24 sps:$4 sm:$0xff]  }
 0x215   : > { %7392 = vmatpush1.bf16.msra.mxu1 %v22556_v2  ;;  %4995 = vmatprep.subr.bf16.mxu0 %v22561_v21  ;;  %v2365_v2 = vor.u32 %v2363_v23, %v2313_v32  ;;  %v2369_v21 = vrot.slane %v2367_v63, 1  ;;  %v22585_v32 = vld [vmem:[#allocation2 + $0xb54] ss:$24 sps:$4 sm:$0xff]   ;;  %v2423_v23 = vshll.u32 %v25377_v0, 16 }
 0x216   : > { %7393 = vmatprep.subr.bf16.mxu1 %v22564_v17  ;;  %v22574_v17 = vld [vmem:[#allocation2 + $0x128] ss:$24 sps:$4 sm:$0xff]   ;;  %v22588_v63 = vld [vmem:[#allocation2 + $0x18c] ss:$24 sps:$4 sm:$0xff]  }
 0x217   : > { %18921 = vmatmul.mubr.msk.bf16.gmra.mrb[72].mxu0 %vm4141_vm3, %v25525_v59 }
 0x218   : > { %18928 = vmatmul.mubr.msk.bf16.gmra.mrb[56].mxu1 %vm4141_vm3, %v25525_v59  ;;  %4996 = vmatpush1.bf16.msra.mxu0 %v22559_v8  ;;  %v25536_v8 = vsel %vm2118_vm2, %v2365_v2, %v2369_v21  ;;  %v22586_v2 = vld [vmem:[#allocation2 + $0x188] ss:$24 sps:$4 sm:$0xff]   ;;  %v28397_v59 = vld [vmem:[#allocation24_spill] sm:$0xff] }
 0x219   : > { %7394 = vmatpush1.bf16.msra.mxu1 %v22562_v48  ;;  %4997 = vmatprep.subr.bf16.mxu0 %v22567_v57  ;;  %28376 = vst [vmem:[#allocation73_spill] sm:$0xff] %v25536_v8  ;;  %v22577_v48 = vld [vmem:[#allocation2 + $0xb20] ss:$24 sps:$4 sm:$0xff]  }
 0x21a   : > { %7395 = vmatprep.subr.bf16.mxu1 %v22570_v46  ;;  %4534 = vmatprep.mubr.bf16.mxu0 %v28372_v60  ;;  %v2419_v46 = vshrl.u32 %v25379_v9, 16  ;;  %v22580_v57 = vld [vmem:[#allocation2 + $0x158] ss:$24 sps:$4 sm:$0xff]   ;;  %v22591_v9 = vld [vmem:[#allocation2 + $0xb84] ss:$24 sps:$4 sm:$0xff]  }
 0x21b   : > { %4946 = vmatprep.mubr.bf16.mxu1 %v28372_v60 }
 0x21c   : > { %4998 = vmatpush1.bf16.msra.mxu0 %v22565_v39  ;;  %v28377_v39 = vld [vmem:[#allocation55_spill] sm:$0xff] }
 0x21d   : > { %7396 = vmatpush1.bf16.msra.mxu1 %v22568_v61  ;;  %4999 = vmatprep.subr.bf16.mxu0 %v22573_v54  ;;  %v1327_v61 = vadd.f32 %v28377_v39, %v25276_v6  ;;  %v2421_v54 = vor.u32 %v2419_v46, %v2369_v21  ;;  %v2475_v6 = vshrl.u32 %v25377_v0, 16  ;;  %v22589_v21 = vld [vmem:[#allocation2 + $0xb80] ss:$24 sps:$4 sm:$0xff]   ;;  %v22597_v46 = vld [vmem:[#allocation2 + $0xbb4] ss:$24 sps:$4 sm:$0xff]  }
 0x21e   : > { %7397 = vmatprep.subr.bf16.mxu1 %v22576_v45  ;;  %v22583_v45 = vld [vmem:[#allocation2 + $0xb50] ss:$24 sps:$4 sm:$0xff]  }
 0x21f   : > { %18922 = vmatmul.mubr.msk.bf16.gmra.mrb[76].mxu0 %vm4141_vm3, %v25536_v8  ;;  %v22595_v39 = vld [vmem:[#allocation2 + $0xbb0] ss:$24 sps:$4 sm:$0xff]  }
 0x220   : > { %18929 = vmatmul.mubr.msk.bf16.gmra.mrb[60].mxu1 %vm4141_vm3, %v25536_v8  ;;  %5000 = vmatpush1.bf16.msra.mxu0 %v22571_v28  ;;  %v2425_v28 = vrot.slane %v2423_v23, 1  ;;  %v22594_v8 = vld [vmem:[#allocation2 + $0x1bc] ss:$24 sps:$4 sm:$0xff]   ;;  %v22652_v0 = vld [vmem:[#allocation2 + $0x398] ss:$24 sps:$4 sm:$0xff]  }
 0x221   : > { %7398 = vmatpush1.bf16.msra.mxu1 %v22574_v17  ;;  %5001 = vmatprep.subr.bf16.mxu0 %v22579_v4  ;;  %v1436_v17 = vmax.f32 %v1327_v61, 0.0  ;;  %v22598_v61 = vld [vmem:[#allocation2 + $0x1e8] ss:$24 sps:$4 sm:$0xff]  }
 0x222   : > { %7399 = vmatprep.subr.bf16.mxu1 %v22582_v43  ;;  %4544 = vmatprep.mubr.bf16.mxu0 %v28372_v60  ;;  %v25549_v4 = vsel %vm2118_vm2, %v2421_v54, %v2425_v28  ;;  %v2479_v43 = vshll.u32 %v25394_v27, 16  ;;  %v2477_v23 = vor.u32 %v2475_v6, %v2425_v28  ;;  %v22603_v54 = vld [vmem:[#allocation2 + $0xbe4] ss:$24 sps:$4 sm:$0xff]   ;;  %v22601_v28 = vld [vmem:[#allocation2 + $0xbe0] ss:$24 sps:$4 sm:$0xff]  }
 0x223   : > { %4956 = vmatprep.mubr.bf16.mxu1 %v28372_v60  ;;  %28378 = vst [vmem:[#allocation55_spill] sm:$0xff] %v25549_v4  ;;  %v22609_v6 = vld [vmem:[#allocation2 + $0xc14] ss:$24 sps:$4 sm:$0xff]  }
 0x224   : > { %5002 = vmatpush1.bf16.msra.mxu0 %v22577_v48  ;;  %v22592_v48 = vld [vmem:[#allocation2 + $0x1b8] ss:$24 sps:$4 sm:$0xff]  }
 0x225   : > { %7400 = vmatpush1.bf16.msra.mxu1 %v22580_v57  ;;  %5003 = vmatprep.subr.bf16.mxu0 %v22585_v32  ;;  %v22600_v57 = vld [vmem:[#allocation2 + $0x1ec] ss:$24 sps:$4 sm:$0xff]   ;;  %v25557_v32 = vpack.c.bf16 %v1436_v17, %v1436_v17  ;;  %v22604_v17 = vld [vmem:[#allocation2 + $0x218] ss:$24 sps:$4 sm:$0xff]  }
 0x226   : > { %7401 = vmatprep.subr.bf16.mxu1 %v22588_v63  ;;  %v2481_v63 = vrot.slane %v2479_v43, 1  ;;  %v22612_v43 = vld [vmem:[#allocation2 + $0x24c] ss:$24 sps:$4 sm:$0xff]  }
 0x227   : > { %18923 = vmatmul.mubr.msk.bf16.gmra.mrb[80].mxu0 %vm4141_vm3, %v25549_v4  ;;  %28379 = vst [vmem:[#allocation74_spill] sm:$0xff] %v25557_v32 }
 0x228   : > { %18930 = vmatmul.mubr.msk.bf16.gmra.mrb[64].mxu1 %vm4141_vm3, %v25549_v4  ;;  %5004 = vmatpush1.bf16.msra.mxu0 %v22583_v45  ;;  %v22606_v45 = vld [vmem:[#allocation2 + $0x21c] ss:$24 sps:$4 sm:$0xff]   ;;  %v22664_v4 = vld [vmem:[#allocation2 + $0x3f8] ss:$24 sps:$4 sm:$0xff]  }
 0x229   : > { %7402 = vmatpush1.bf16.msra.mxu1 %v22586_v2  ;;  %5005 = vmatprep.subr.bf16.mxu0 %v22591_v9  ;;  %v2535_v2 = vshll.u32 %v25557_v32, 16  ;;  %v25563_v9 = vsel %vm2118_vm2, %v2477_v23, %v2481_v63  ;;  %v22615_v23 = vld [vmem:[#allocation2 + $0xc44] ss:$24 sps:$4 sm:$0xff]  }
 0x22a   : > { %7403 = vmatprep.subr.bf16.mxu1 %v22594_v8  ;;  %4554 = vmatprep.mubr.bf16.mxu0 %v28372_v60  ;;  %28380 = vst [vmem:[#allocation75_spill] sm:$0xff] %v25563_v9  ;;  %v2531_v8 = vshrl.u32 %v25394_v27, 16  ;;  %v22642_v27 = vld [vmem:[#allocation2 + $0x33c] ss:$24 sps:$4 sm:$0xff]  }
 0x22b   : > { %4966 = vmatprep.mubr.bf16.mxu1 %v28372_v60 }
 0x22c   : > { %5006 = vmatpush1.bf16.msra.mxu0 %v22589_v21  ;;  %v2537_v21 = vrot.slane %v2535_v2, 1  ;;  %v22624_v2 = vld [vmem:[#allocation2 + $0x2ac] ss:$24 sps:$4 sm:$0xff]  }
 0x22d   : > { %7404 = vmatpush1.bf16.msra.mxu1 %v22592_v48  ;;  %5007 = vmatprep.subr.bf16.mxu0 %v22597_v46  ;;  %v2533_v48 = vor.u32 %v2531_v8, %v2481_v63  ;;  %v22607_v46 = vld [vmem:[#allocation2 + $0xc10] ss:$24 sps:$4 sm:$0xff]   ;;  %v22613_v63 = vld [vmem:[#allocation2 + $0xc40] ss:$24 sps:$4 sm:$0xff]  }
 0x22e   : > { %7405 = vmatprep.subr.bf16.mxu1 %v22600_v57  ;;  %v22610_v57 = vld [vmem:[#allocation2 + $0x248] ss:$24 sps:$4 sm:$0xff]   ;;  %v28383_v8 = vld [vmem:[#allocation11_spill] sm:$0xff] }
 0x22f   : > { %18924 = vmatmul.mubr.msk.bf16.gmra.mrb[84].mxu0 %vm4141_vm3, %v25563_v9  ;;  %v25573_v32 = vsel %vm2118_vm2, %v2533_v48, %v2537_v21  ;;  %v22625_v21 = vld [vmem:[#allocation2 + $0xca0] ss:$24 sps:$4 sm:$0xff]  }
 0x230   : > { %18931 = vmatmul.mubr.msk.bf16.gmra.mrb[68].mxu1 %vm4141_vm3, %v25563_v9  ;;  %5008 = vmatpush1.bf16.msra.mxu0 %v22595_v39  ;;  %v22618_v39 = vld [vmem:[#allocation2 + $0x27c] ss:$24 sps:$4 sm:$0xff]   ;;  %28381 = vst [vmem:[#allocation76_spill] sm:$0xff] %v25573_v32  ;;  %v22628_v48 = vld [vmem:[#allocation2 + $0x2d8] ss:$24 sps:$4 sm:$0xff]  }
 0x231   : > { %7406 = vmatpush1.bf16.msra.mxu1 %v22598_v61  ;;  %5009 = vmatprep.subr.bf16.mxu0 %v22603_v54  ;;  %v22616_v61 = vld [vmem:[#allocation2 + $0x278] ss:$24 sps:$4 sm:$0xff]   ;;  %v22621_v54 = vld [vmem:[#allocation2 + $0xc74] ss:$24 sps:$4 sm:$0xff]  }
 0x232   : > { %7407 = vmatprep.subr.bf16.mxu1 %v22606_v45  ;;  %4564 = vmatprep.mubr.bf16.mxu0 %v28372_v60  ;;  %v28382_v45 = vld [vmem:[#allocation16_spill] sm:$0xff]  ;;  %v22657_v9 = vld [vmem:[#allocation2 + $0xd94] ss:$24 sps:$4 sm:$0xff]  }
 0x233   : > { %4976 = vmatprep.mubr.bf16.mxu1 %v28372_v60  ;;  %v22688_v60 = vld [vmem:[#allocation2 + $0x4b8] ss:$24 sps:$4 sm:$0xff]  }
 0x234   : > { %5010 = vmatpush1.bf16.msra.mxu0 %v22601_v28  ;;  %v22619_v28 = vld [vmem:[#allocation2 + $0xc70] ss:$24 sps:$4 sm:$0xff]  }
 0x235   : > { %7408 = vmatpush1.bf16.msra.mxu1 %v22604_v17  ;;  %5011 = vmatprep.subr.bf16.mxu0 %v22609_v6  ;;  %v22622_v17 = vld [vmem:[#allocation2 + $0x2a8] ss:$24 sps:$4 sm:$0xff]   ;;  %v22627_v6 = vld [vmem:[#allocation2 + $0xca4] ss:$24 sps:$4 sm:$0xff]  }
 0x236   : > { %7409 = vmatprep.subr.bf16.mxu1 %v22612_v43  ;;  %v22630_v43 = vld [vmem:[#allocation2 + $0x2dc] ss:$24 sps:$4 sm:$0xff]  }
 0x237   : > { %18925 = vmatmul.mubr.msk.bf16.gmra.mrb[88].mxu0 %vm4141_vm3, %v25573_v32 }
 0x238   : > { %18932 = vmatmul.mubr.msk.bf16.gmra.mrb[72].mxu1 %vm4141_vm3, %v25573_v32  ;;  %5012 = vmatpush1.bf16.msra.mxu0 %v22607_v46  ;;  %v22633_v46 = vld [vmem:[#allocation2 + $0xcd4] ss:$24 sps:$4 sm:$0xff]   ;;  %v28389_v32 = vld [vmem:[#allocation12_spill] sm:$0xff] }
 0x239   : > { %7410 = vmatpush1.bf16.msra.mxu1 %v22610_v57  ;;  %5019 = vmatprep.mubr.bf16.mxu0 %v28382_v45  ;;  %v22636_v57 = vld [vmem:[#allocation2 + $0x30c] ss:$24 sps:$4 sm:$0xff]   ;;  %v22631_v45 = vld [vmem:[#allocation2 + $0xcd0] ss:$24 sps:$4 sm:$0xff]  }
 0x23a   : > { %7417 = vmatprep.mubr.bf16.mxu1 %v28383_v8  ;;  %5013 = vmatprep.subr.bf16.mxu0 %v22615_v23  ;;  %v22634_v23 = vld [vmem:[#allocation2 + $0x308] ss:$24 sps:$4 sm:$0xff]  }
 0x23b   : > { %7411 = vmatprep.subr.bf16.mxu1 %v22618_v39  ;;  %v22639_v39 = vld [vmem:[#allocation2 + $0xd04] ss:$24 sps:$4 sm:$0xff]  }
 0x23c   : > { %5014 = vmatpush1.bf16.msra.mxu0 %v22613_v63  ;;  %v28384_v63 = vld [vmem:[#allocation17_spill] sm:$0xff] }
 0x23d   : > { %7412 = vmatpush1.bf16.msra.mxu1 %v22616_v61  ;;  %5015 = vmatprep.subr.bf16.mxu0 %v22621_v54  ;;  %v22637_v61 = vld [vmem:[#allocation2 + $0xd00] ss:$24 sps:$4 sm:$0xff]   ;;  %v28385_v54 = vld [vmem:[#allocation10_spill] sm:$0xff] }
 0x23e   : > { %7413 = vmatprep.subr.bf16.mxu1 %v22624_v2  ;;  %v28386_v2 = vld [vmem:[#allocation22_spill] sm:$0xff] }
 0x240   : > { %5016 = vmatpush1.bf16.msra.mxu0 %v22619_v28  ;;  %v22640_v28 = vld [vmem:[#allocation2 + $0x338] ss:$24 sps:$4 sm:$0xff]  }
 0x241   : > { %7414 = vmatpush1.bf16.msra.mxu1 %v22622_v17  ;;  %5017 = vmatprep.subr.bf16.mxu0 %v22627_v6  ;;  %v28387_v17 = vld [vmem:[#allocation13_spill] sm:$0xff]  ;;  %v22645_v6 = vld [vmem:[#allocation2 + $0xd34] ss:$24 sps:$4 sm:$0xff]  }
 0x242   : > { %7415 = vmatprep.subr.bf16.mxu1 %v22630_v43  ;;  %v22648_v43 = vld [vmem:[#allocation2 + $0x36c] ss:$24 sps:$4 sm:$0xff]  }
 0x244   : > { %5018 = vmatpush1.bf16.msra.mxu0 %v22625_v21  ;;  %v22643_v21 = vld [vmem:[#allocation2 + $0xd30] ss:$24 sps:$4 sm:$0xff]  }
 0x245   : > { %7416 = vmatpush1.bf16.msra.mxu1 %v22628_v48  ;;  %5090 = vmatprep.subr.bf16.mxu0 %v22633_v46  ;;  %v22646_v48 = vld [vmem:[#allocation2 + $0x368] ss:$24 sps:$4 sm:$0xff]   ;;  %v22651_v46 = vld [vmem:[#allocation2 + $0xd64] ss:$24 sps:$4 sm:$0xff]  }
 0x246   : > { %7488 = vmatprep.subr.bf16.mxu1 %v22636_v57  ;;  %v22654_v57 = vld [vmem:[#allocation2 + $0x39c] ss:$24 sps:$4 sm:$0xff]  }
 0x247   : > { %5020 = vmatmul.mubr.bf16.vlgmr.msra.gmra.mrb[92].mxu0 %v28384_v63  ;;  %v28388_v63 = vld [vmem:[#allocation23_spill] sm:$0xff] }
 0x248   : > { %7418 = vmatmul.mubr.bf16.vlgmr.msra.gmra.mrb[48].mxu1 %v28385_v54  ;;  %5029 = vmatprep.mubr.bf16.mxu0 %v28386_v2  ;;  %v22649_v2 = vld [vmem:[#allocation2 + $0xd60] ss:$24 sps:$4 sm:$0xff]  }
 0x249   : > { %5091 = vmatpush1.bf16.msra.mxu0 %v22631_v45  ;;  %7427 = vmatprep.mubr.bf16.mxu1 %v28387_v17  ;;  %v28390_v45 = vld [vmem:[#allocation28_spill] sm:$0xff] }
 0x24a   : > { %7489 = vmatpush1.bf16.msra.mxu1 %v22634_v23  ;;  %5092 = vmatprep.subr.bf16.mxu0 %v22639_v39  ;;  %v28391_v23 = vld [vmem:[#allocation19_spill] sm:$0xff]  ;;  %v22660_v39 = vld [vmem:[#allocation2 + $0x3cc] ss:$24 sps:$4 sm:$0xff]  }
 0x24b   : > { %7490 = vmatprep.subr.bf16.mxu1 %v22642_v27  ;;  %v22655_v27 = vld [vmem:[#allocation2 + $0xd90] ss:$24 sps:$4 sm:$0xff]  }
 0x24d   : > { %5093 = vmatpush1.bf16.msra.mxu0 %v22637_v61  ;;  %v22658_v61 = vld [vmem:[#allocation2 + $0x3c8] ss:$24 sps:$4 sm:$0xff]  }
 0x24e   : > { %7491 = vmatpush1.bf16.msra.mxu1 %v22640_v28  ;;  %5094 = vmatprep.subr.bf16.mxu0 %v22645_v6  ;;  %v22663_v28 = vld [vmem:[#allocation2 + $0xdc4] ss:$24 sps:$4 sm:$0xff]  }
 0x24f   : > { %5030 = vmatmul.mubr.bf16.gmra.mrb[96].mxu0 %v28388_v63  ;;  %7492 = vmatprep.subr.bf16.mxu1 %v22648_v43  ;;  %v22666_v6 = vld [vmem:[#allocation2 + $0x3fc] ss:$24 sps:$4 sm:$0xff]   ;;  %v28392_v43 = vld [vmem:[#allocation29_spill] sm:$0xff] }
 0x250   : > { %7428 = vmatmul.mubr.bf16.gmra.mrb[52].mxu1 %v28389_v32  ;;  %5039 = vmatprep.mubr.bf16.mxu0 %v28390_v45  ;;  %v22661_v63 = vld [vmem:[#allocation2 + $0xdc0] ss:$24 sps:$4 sm:$0xff]   ;;  %v28393_v45 = vld [vmem:[#allocation18_spill] sm:$0xff] }
 0x251   : > { %5095 = vmatpush1.bf16.msra.mxu0 %v22643_v21  ;;  %7437 = vmatprep.mubr.bf16.mxu1 %v28391_v23  ;;  %v28394_v21 = vld [vmem:[#allocation33_spill] sm:$0xff] }
 0x252   : > { %7493 = vmatpush1.bf16.msra.mxu1 %v22646_v48  ;;  %5096 = vmatprep.subr.bf16.mxu0 %v22651_v46  ;;  %v22669_v48 = vld [vmem:[#allocation2 + $0xdf4] ss:$24 sps:$4 sm:$0xff]   ;;  %v28395_v46 = vld [vmem:[#allocation25_spill] sm:$0xff] }
 0x253   : > { %7494 = vmatprep.subr.bf16.mxu1 %v22654_v57  ;;  %v22672_v57 = vld [vmem:[#allocation2 + $0x42c] ss:$24 sps:$4 sm:$0xff]  }
 0x255   : > { %5097 = vmatpush1.bf16.msra.mxu0 %v22649_v2  ;;  %v22667_v2 = vld [vmem:[#allocation2 + $0xdf0] ss:$24 sps:$4 sm:$0xff]  }
 0x256   : > { %7495 = vmatpush1.bf16.msra.mxu1 %v22652_v0  ;;  %5098 = vmatprep.subr.bf16.mxu0 %v22657_v9  ;;  %v22670_v0 = vld [vmem:[#allocation2 + $0x428] ss:$24 sps:$4 sm:$0xff]   ;;  %v22675_v9 = vld [vmem:[#allocation2 + $0xe24] ss:$24 sps:$4 sm:$0xff]  }
 0x257   : > { %5040 = vmatmul.mubr.bf16.gmra.mrb[100].mxu0 %v28392_v43  ;;  %7496 = vmatprep.subr.bf16.mxu1 %v22660_v39  ;;  %v22678_v43 = vld [vmem:[#allocation2 + $0x45c] ss:$24 sps:$4 sm:$0xff]  }
 0x258   : > { %7438 = vmatmul.mubr.bf16.gmra.mrb[56].mxu1 %v28393_v45  ;;  %5049 = vmatprep.mubr.bf16.mxu0 %v28394_v21  ;;  %v28396_v39 = vld [vmem:[#allocation35_spill] sm:$0xff]  ;;  %v22673_v21 = vld [vmem:[#allocation2 + $0xe20] ss:$24 sps:$4 sm:$0xff]  }
 0x259   : > { %5099 = vmatpush1.bf16.msra.mxu0 %v22655_v27  ;;  %7447 = vmatprep.mubr.bf16.mxu1 %v28395_v46  ;;  %v28398_v27 = vld [vmem:[#allocation38_spill] sm:$0xff] }
 0x25a   : > { %7497 = vmatpush1.bf16.msra.mxu1 %v22658_v61  ;;  %5100 = vmatprep.subr.bf16.mxu0 %v22663_v28  ;;  %v28399_v61 = vld [vmem:[#allocation31_spill] sm:$0xff] }
 0x25b   : > { %7498 = vmatprep.subr.bf16.mxu1 %v22666_v6  ;;  %v22679_v28 = vld [vmem:[#allocation2 + $0xe50] ss:$24 sps:$4 sm:$0xff]   ;;  %v22684_v6 = vld [vmem:[#allocation2 + $0x48c] ss:$24 sps:$4 sm:$0xff]  }
 0x25d   : > { %5101 = vmatpush1.bf16.msra.mxu0 %v22661_v63  ;;  %v22687_v63 = vld [vmem:[#allocation2 + $0xe84] ss:$24 sps:$4 sm:$0xff]  }
 0x25e   : > { %7499 = vmatpush1.bf16.msra.mxu1 %v22664_v4  ;;  %5102 = vmatprep.subr.bf16.mxu0 %v22669_v48  ;;  %v22682_v4 = vld [vmem:[#allocation2 + $0x488] ss:$24 sps:$4 sm:$0xff]   ;;  %v22690_v48 = vld [vmem:[#allocation2 + $0x4bc] ss:$24 sps:$4 sm:$0xff]  }
 0x25f   : > { %5050 = vmatmul.mubr.bf16.gmra.mrb[104].mxu0 %v28396_v39  ;;  %7500 = vmatprep.subr.bf16.mxu1 %v22672_v57  ;;  %v28400_v57 = vld [vmem:[#allocation39_spill] sm:$0xff]  ;;  %v22685_v39 = vld [vmem:[#allocation2 + $0xe80] ss:$24 sps:$4 sm:$0xff]  }
 0x260   : > { %7448 = vmatmul.mubr.bf16.gmra.mrb[60].mxu1 %v28397_v59  ;;  %5059 = vmatprep.mubr.bf16.mxu0 %v28398_v27  ;;  %v28401_v27 = vld [vmem:[#allocation30_spill] sm:$0xff] }
 0x261   : > { %5103 = vmatpush1.bf16.msra.mxu0 %v22667_v2  ;;  %7457 = vmatprep.mubr.bf16.mxu1 %v28399_v61  ;;  %v28402_v2 = vld [vmem:[#allocation45_spill] sm:$0xff] }
 0x262   : > { %7501 = vmatpush1.bf16.msra.mxu1 %v22670_v0  ;;  %5104 = vmatprep.subr.bf16.mxu0 %v22675_v9  ;;  %v22693_v0 = vld [vmem:[#allocation2 + $0xeb4] ss:$24 sps:$4 sm:$0xff]   ;;  %v28403_v9 = vld [vmem:[#allocation36_spill] sm:$0xff] }
 0x263   : > { %7502 = vmatprep.subr.bf16.mxu1 %v22678_v43  ;;  %v22691_v43 = vld [vmem:[#allocation2 + $0xeb0] ss:$24 sps:$4 sm:$0xff]  }
 0x265   : > { %5105 = vmatpush1.bf16.msra.mxu0 %v22673_v21  ;;  %v22696_v21 = vld [vmem:[#allocation2 + $0x4ec] ss:$24 sps:$4 sm:$0xff]  }
 0x266   : > { %7503 = vmatpush1.bf16.msra.mxu1 %v22676_v49  ;;  %5106 = vmatprep.subr.bf16.mxu0 %v22681_v22  ;;  %v22694_v49 = vld [vmem:[#allocation2 + $0x4e8] ss:$24 sps:$4 sm:$0xff]   ;;  %v22699_v22 = vld [vmem:[#allocation2 + $0xee4] ss:$24 sps:$4 sm:$0xff]  }
 0x267   : > { %5060 = vmatmul.mubr.bf16.gmra.mrb[108].mxu0 %v28400_v57  ;;  %7504 = vmatprep.subr.bf16.mxu1 %v22684_v6  ;;  %v22702_v57 = vld [vmem:[#allocation2 + $0x51c] ss:$24 sps:$4 sm:$0xff]   ;;  %v28404_v6 = vld [vmem:[#allocation46_spill] sm:$0xff] }
 0x268   : > { %7458 = vmatmul.mubr.bf16.gmra.mrb[64].mxu1 %v28401_v27  ;;  %5069 = vmatprep.mubr.bf16.mxu0 %v28402_v2  ;;  %v22697_v2 = vld [vmem:[#allocation2 + $0xee0] ss:$24 sps:$4 sm:$0xff]  }
 0x269   : > { %5107 = vmatpush1.bf16.msra.mxu0 %v22679_v28  ;;  %7467 = vmatprep.mubr.bf16.mxu1 %v28403_v9  ;;  %v28406_v28 = vld [vmem:[#allocation48_spill] sm:$0xff] }
 0x26a   : > { %7505 = vmatpush1.bf16.msra.mxu1 %v22682_v4  ;;  %5108 = vmatprep.subr.bf16.mxu0 %v22687_v63  ;;  %v22700_v9 = vld [vmem:[#allocation2 + $0x518] ss:$24 sps:$4 sm:$0xff]   ;;  %v22705_v4 = vld [vmem:[#allocation2 + $0xf14] ss:$24 sps:$4 sm:$0xff]   ;;  %v28407_v63 = vld [vmem:[#allocation41_spill] sm:$0xff] }
 0x26b   : > { %7506 = vmatprep.subr.bf16.mxu1 %v22690_v48  ;;  %v22708_v48 = vld [vmem:[#allocation2 + $0x54c] ss:$24 sps:$4 sm:$0xff]  }
 0x26d   : > { %5109 = vmatpush1.bf16.msra.mxu0 %v22685_v39  ;;  %v22703_v39 = vld [vmem:[#allocation2 + $0xf10] ss:$24 sps:$4 sm:$0xff]  }
 0x26e   : > { %7507 = vmatpush1.bf16.msra.mxu1 %v22688_v60  ;;  %5110 = vmatprep.subr.bf16.mxu0 %v22693_v0  ;;  %v22706_v60 = vld [vmem:[#allocation2 + $0x548] ss:$24 sps:$4 sm:$0xff]   ;;  %v22711_v0 = vld [vmem:[#allocation2 + $0xf44] ss:$24 sps:$4 sm:$0xff]  }
 0x26f   : > { %5070 = vmatmul.mubr.bf16.gmra.mrb[112].mxu0 %v28404_v6  ;;  %7508 = vmatprep.subr.bf16.mxu1 %v22696_v21  ;;  %v22714_v6 = vld [vmem:[#allocation2 + $0x57c] ss:$24 sps:$4 sm:$0xff]   ;;  %v28408_v21 = vld [vmem:[#allocation49_spill] sm:$0xff] }
 0x270   : > { %7468 = vmatmul.mubr.bf16.gmra.mrb[68].mxu1 %v28405_v53  ;;  %5079 = vmatprep.mubr.bf16.mxu0 %v28406_v28  ;;  %v22709_v28 = vld [vmem:[#allocation2 + $0xf40] ss:$24 sps:$4 sm:$0xff]  }
 0x271   : > { %5111 = vmatpush1.bf16.msra.mxu0 %v22691_v43  ;;  %7477 = vmatprep.mubr.bf16.mxu1 %v28407_v63  ;;  %v28409_v53 = vld [vmem:[#allocation40_spill] sm:$0xff]  ;;  %v28410_v43 = vld [vmem:[#allocation50_spill] sm:$0xff] }
 0x272   : > { %7509 = vmatpush1.bf16.msra.mxu1 %v22694_v49  ;;  %5112 = vmatprep.subr.bf16.mxu0 %v22699_v22  ;;  %v28411_v49 = vld [vmem:[#allocation15_spill] sm:$0xff]  ;;  %v22720_v63 = vld [vmem:[#allocation2 + $0x5ac] ss:$24 sps:$4 sm:$0xff]  }
 0x273   : > { %7510 = vmatprep.subr.bf16.mxu1 %v22702_v57  ;;  %v22712_v22 = vld [vmem:[#allocation2 + $0x578] ss:$24 sps:$4 sm:$0xff]   ;;  %v22717_v57 = vld [vmem:[#allocation2 + $0xf74] ss:$24 sps:$4 sm:$0xff]  }
 0x275   : > { %5113 = vmatpush1.bf16.msra.mxu0 %v22697_v2  ;;  %v22715_v2 = vld [vmem:[#allocation2 + $0xf70] ss:$24 sps:$4 sm:$0xff]  }
 0x276   : > { %7511 = vmatpush1.bf16.msra.mxu1 %v22700_v9  ;;  %5114 = vmatprep.subr.bf16.mxu0 %v22705_v4  ;;  %v22718_v9 = vld [vmem:[#allocation2 + $0x5a8] ss:$24 sps:$4 sm:$0xff]   ;;  %v22723_v4 = vld [vmem:[#allocation2 + $0xfa4] ss:$24 sps:$4 sm:$0xff]  }
 0x277   : > { %5080 = vmatmul.mubr.bf16.gmra.mrb[116].mxu0 %v28408_v21  ;;  %7512 = vmatprep.subr.bf16.mxu1 %v22708_v48  ;;  %v22726_v21 = vld [vmem:[#allocation2 + $0x5dc] ss:$24 sps:$4 sm:$0xff]   ;;  %v22721_v48 = vld [vmem:[#allocation2 + $0xfa0] ss:$24 sps:$4 sm:$0xff]  }
 0x278   : > { %7478 = vmatmul.mubr.bf16.gmra.mrb[72].mxu1 %v28409_v53  ;;  %5122 = vmatprep.mubr.bf16.mxu0 %v28410_v43  ;;  %v22724_v53 = vld [vmem:[#allocation2 + $0x5d8] ss:$24 sps:$4 sm:$0xff]   ;;  %v22729_v43 = vld [vmem:[#allocation2 + $0xfd4] ss:$24 sps:$4 sm:$0xff]  }
 0x279   : > { %5115 = vmatpush1.bf16.msra.mxu0 %v22703_v39  ;;  %7520 = vmatprep.mubr.bf16.mxu1 %v28411_v49  ;;  %v22732_v39 = vld [vmem:[#allocation2 + $0x60c] ss:$24 sps:$4 sm:$0xff]   ;;  %v28414_v49 = vld [vmem:[#allocation52_spill] sm:$0xff] }
 0x27a   : > { %7513 = vmatpush1.bf16.msra.mxu1 %v22706_v60  ;;  %5116 = vmatprep.subr.bf16.mxu0 %v22711_v0  ;;  %v22727_v60 = vld [vmem:[#allocation2 + $0xfd0] ss:$24 sps:$4 sm:$0xff]  }
 0x27b   : > { %7514 = vmatprep.subr.bf16.mxu1 %v22714_v6  ;;  %v22730_v0 = vld [vmem:[#allocation2 + $0x608] ss:$24 sps:$4 sm:$0xff]   ;;  %v22735_v6 = vld [vmem:[#allocation2 + $0x1004] ss:$24 sps:$4 sm:$0xff]  }
 0x27d   : > { %5117 = vmatpush1.bf16.msra.mxu0 %v22709_v28  ;;  %v28412_v28 = vld [vmem:[#allocation51_spill] sm:$0xff] }
 0x27e   : > { %7515 = vmatpush1.bf16.msra.mxu1 %v22712_v22  ;;  %5118 = vmatprep.subr.bf16.mxu0 %v22717_v57  ;;  %v22733_v22 = vld [vmem:[#allocation2 + $0x1000] ss:$24 sps:$4 sm:$0xff]   ;;  %v22738_v57 = vld [vmem:[#allocation2 + $0x63c] ss:$24 sps:$4 sm:$0xff]  }
 0x27f   : > { %7516 = vmatprep.subr.bf16.mxu1 %v22720_v63  ;;  %v28413_v63 = vld [vmem:[#allocation14_spill] sm:$0xff] }
 0x281   : > { %5119 = vmatpush1.bf16.msra.mxu0 %v22715_v2  ;;  %v28415_v2 = vld [vmem:[#allocation21_spill] sm:$0xff] }
 0x282   : > { %7517 = vmatpush1.bf16.msra.mxu1 %v22718_v9  ;;  %5120 = vmatprep.subr.bf16.mxu0 %v22723_v4  ;;  %v22736_v9 = vld [vmem:[#allocation2 + $0x638] ss:$24 sps:$4 sm:$0xff]   ;;  %v22741_v4 = vld [vmem:[#allocation2 + $0x1034] ss:$24 sps:$4 sm:$0xff]  }
 0x283   : > { %7518 = vmatprep.subr.bf16.mxu1 %v22726_v21  ;;  %v22744_v21 = vld [vmem:[#allocation2 + $0x66c] ss:$24 sps:$4 sm:$0xff]  }
 0x285   : > { %5121 = vmatpush1.bf16.msra.mxu0 %v22721_v48  ;;  %v22742_v48 = vld [vmem:[#allocation2 + $0x668] ss:$24 sps:$4 sm:$0xff]  }
 0x286   : > { %7519 = vmatpush1.bf16.msra.mxu1 %v22724_v53  ;;  %5193 = vmatprep.subr.bf16.mxu0 %v22729_v43  ;;  %v22739_v53 = vld [vmem:[#allocation2 + $0x1030] ss:$24 sps:$4 sm:$0xff]   ;;  %v22747_v43 = vld [vmem:[#allocation2 + $0x1064] ss:$24 sps:$4 sm:$0xff]  }
 0x287   : > { %7591 = vmatprep.subr.bf16.mxu1 %v22732_v39  ;;  %v28416_v39 = vld [vmem:[#allocation54_spill] sm:$0xff] }
 0x288   : > { %5123 = vmatmul.mubr.bf16.vlgmr.msra.gmra.mrb[92].mxu0 %v28412_v28  ;;  %v22745_v28 = vld [vmem:[#allocation2 + $0x1060] ss:$24 sps:$4 sm:$0xff]  }
 0x289   : > { %7521 = vmatmul.mubr.bf16.vlgmr.msra.gmra.mrb[48].mxu1 %v28413_v63  ;;  %5132 = vmatprep.mubr.bf16.mxu0 %v28414_v49  ;;  %v22750_v49 = vld [vmem:[#allocation2 + $0x69c] ss:$24 sps:$4 sm:$0xff]   ;;  %v28418_v63 = vld [vmem:[#allocation53_spill] sm:$0xff] }
 0x28a   : > { %5194 = vmatpush1.bf16.msra.mxu0 %v22727_v60  ;;  %7530 = vmatprep.mubr.bf16.mxu1 %v28415_v2  ;;  %v28417_v60 = vld [vmem:[#allocation20_spill] sm:$0xff] }
 0x28b   : > { %7592 = vmatpush1.bf16.msra.mxu1 %v22730_v0  ;;  %5195 = vmatprep.subr.bf16.mxu0 %v22735_v6  ;;  %v28419_v0 = vld [vmem:[#allocation27_spill] sm:$0xff] }
 0x28c   : > { %7593 = vmatprep.subr.bf16.mxu1 %v22738_v57  ;;  %v22748_v6 = vld [vmem:[#allocation2 + $0x698] ss:$24 sps:$4 sm:$0xff]  }
 0x28d   : > { %v22751_v57 = vld [vmem:[#allocation2 + $0x1090] ss:$24 sps:$4 sm:$0xff]  }
 0x28e   : > { %5196 = vmatpush1.bf16.msra.mxu0 %v22733_v22  ;;  %v22753_v22 = vld [vmem:[#allocation2 + $0x1094] ss:$24 sps:$4 sm:$0xff]  }
 0x28f   : > { %7594 = vmatpush1.bf16.msra.mxu1 %v22736_v9  ;;  %5197 = vmatprep.subr.bf16.mxu0 %v22741_v4  ;;  %v22756_v9 = vld [vmem:[#allocation2 + $0x6cc] ss:$24 sps:$4 sm:$0xff]   ;;  %v22754_v4 = vld [vmem:[#allocation2 + $0x6c8] ss:$24 sps:$4 sm:$0xff]  }
 0x290   : > { %5133 = vmatmul.mubr.bf16.gmra.mrb[96].mxu0 %v28416_v39  ;;  %7595 = vmatprep.subr.bf16.mxu1 %v22744_v21  ;;  %v22759_v21 = vld [vmem:[#allocation2 + $0x10c4] ss:$24 sps:$4 sm:$0xff]  }
 0x291   : > { %7531 = vmatmul.mubr.bf16.gmra.mrb[52].mxu1 %v28417_v60  ;;  %5142 = vmatprep.mubr.bf16.mxu0 %v28418_v63  ;;  %v28420_v39 = vld [vmem:[#allocation56_spill] sm:$0xff] }
 0x292   : > { %5198 = vmatpush1.bf16.msra.mxu0 %v22739_v53  ;;  %7540 = vmatprep.mubr.bf16.mxu1 %v28419_v0  ;;  %v22757_v60 = vld [vmem:[#allocation2 + $0x10c0] ss:$24 sps:$4 sm:$0xff]   ;;  %v22762_v63 = vld [vmem:[#allocation2 + $0x6fc] ss:$24 sps:$4 sm:$0xff]   ;;  %v28421_v53 = vld [vmem:[#allocation26_spill] sm:$0xff] }
 0x293   : > { %7596 = vmatpush1.bf16.msra.mxu1 %v22742_v48  ;;  %5199 = vmatprep.subr.bf16.mxu0 %v22747_v43  ;;  %v28422_v48 = vld [vmem:[#allocation37_spill] sm:$0xff]  ;;  %v22760_v43 = vld [vmem:[#allocation2 + $0x6f8] ss:$24 sps:$4 sm:$0xff]  }
 0x294   : > { %7597 = vmatprep.subr.bf16.mxu1 %v22750_v49  ;;  %v22763_v49 = vld [vmem:[#allocation2 + $0x10f0] ss:$24 sps:$4 sm:$0xff]  }
 0x296   : > { %5200 = vmatpush1.bf16.msra.mxu0 %v22745_v28  ;;  %v22765_v28 = vld [vmem:[#allocation2 + $0x10f4] ss:$24 sps:$4 sm:$0xff]  }
 0x297   : > { %7598 = vmatpush1.bf16.msra.mxu1 %v22748_v6  ;;  %5201 = vmatprep.subr.bf16.mxu0 %v22753_v22  ;;  %v22768_v6 = vld [vmem:[#allocation2 + $0x72c] ss:$24 sps:$4 sm:$0xff]   ;;  %v22766_v22 = vld [vmem:[#allocation2 + $0x728] ss:$24 sps:$4 sm:$0xff]  }
 0x298   : > { %5143 = vmatmul.mubr.bf16.gmra.mrb[100].mxu0 %v28420_v39  ;;  %7599 = vmatprep.subr.bf16.mxu1 %v22756_v9  ;;  %v22771_v9 = vld [vmem:[#allocation2 + $0x1124] ss:$24 sps:$4 sm:$0xff]   ;;  %v22769_v39 = vld [vmem:[#allocation2 + $0x1120] ss:$24 sps:$4 sm:$0xff]  }
 0x299   : > { %7541 = vmatmul.mubr.bf16.gmra.mrb[56].mxu1 %v28421_v53  ;;  %5152 = vmatprep.mubr.bf16.mxu0 %v25242_v36  ;;  %v22774_v36 = vld [vmem:[#allocation2 + $0x75c] ss:$24 sps:$4 sm:$0xff]  }
 0x29a   : > { %5202 = vmatpush1.bf16.msra.mxu0 %v22751_v57  ;;  %7550 = vmatprep.mubr.bf16.mxu1 %v28422_v48  ;;  %v28423_v57 = vld [vmem:[#allocation32_spill] sm:$0xff] }
 0x29b   : > { %7600 = vmatpush1.bf16.msra.mxu1 %v22754_v4  ;;  %5203 = vmatprep.subr.bf16.mxu0 %v22759_v21  ;;  %v28424_v4 = vld [vmem:[#allocation47_spill] sm:$0xff] }
 0x29c   : > { %7601 = vmatprep.subr.bf16.mxu1 %v22762_v63  ;;  %v22772_v21 = vld [vmem:[#allocation2 + $0x758] ss:$24 sps:$4 sm:$0xff]  }
 0x29d   : > { %v22775_v63 = vld [vmem:[#allocation2 + $0x1150] ss:$24 sps:$4 sm:$0xff]  }
 0x29e   : > { %5204 = vmatpush1.bf16.msra.mxu0 %v22757_v60  ;;  %v22777_v60 = vld [vmem:[#allocation2 + $0x1154] ss:$24 sps:$4 sm:$0xff]  }
 0x29f   : > { %7602 = vmatpush1.bf16.msra.mxu1 %v22760_v43  ;;  %5205 = vmatprep.subr.bf16.mxu0 %v22765_v28  ;;  %v22780_v43 = vld [vmem:[#allocation2 + $0x78c] ss:$24 sps:$4 sm:$0xff]  }
 0x2a0   : > { %5153 = vmatmul.mubr.bf16.gmra.mrb[104].mxu0 %v25284_v62  ;;  %7603 = vmatprep.subr.bf16.mxu1 %v22768_v6  ;;  %v22778_v62 = vld [vmem:[#allocation2 + $0x788] ss:$24 sps:$4 sm:$0xff]   ;;  %v22783_v28 = vld [vmem:[#allocation2 + $0x1184] ss:$24 sps:$4 sm:$0xff]  }
 0x2a1   : > { %7551 = vmatmul.mubr.bf16.gmra.mrb[60].mxu1 %v28423_v57  ;;  %5162 = vmatprep.mubr.bf16.mxu0 %v25279_v20  ;;  %v22781_v6 = vld [vmem:[#allocation2 + $0x1180] ss:$24 sps:$4 sm:$0xff]   ;;  %v22786_v20 = vld [vmem:[#allocation2 + $0x7bc] ss:$24 sps:$4 sm:$0xff]  }
 0x2a2   : > { %5206 = vmatpush1.bf16.msra.mxu0 %v22763_v49  ;;  %7560 = vmatprep.mubr.bf16.mxu1 %v28424_v4  ;;  %v28425_v49 = vld [vmem:[#allocation42_spill] sm:$0xff] }
 0x2a3   : > { %7604 = vmatpush1.bf16.msra.mxu1 %v22766_v22  ;;  %5207 = vmatprep.subr.bf16.mxu0 %v22771_v9  ;;  %v22784_v22 = vld [vmem:[#allocation2 + $0x7b8] ss:$24 sps:$4 sm:$0xff]   ;;  %v22789_v9 = vld [vmem:[#allocation2 + $0x11b4] ss:$24 sps:$4 sm:$0xff]  }
 0x2a4   : > { %7605 = vmatprep.subr.bf16.mxu1 %v22774_v36  ;;  %v22792_v36 = vld [vmem:[#allocation2 + $0x7ec] ss:$24 sps:$4 sm:$0xff]  }
 0x2a6   : > { %5208 = vmatpush1.bf16.msra.mxu0 %v22769_v39  ;;  %v22787_v39 = vld [vmem:[#allocation2 + $0x11b0] ss:$24 sps:$4 sm:$0xff]  }
 0x2a7   : > { %7606 = vmatpush1.bf16.msra.mxu1 %v22772_v21  ;;  %5209 = vmatprep.subr.bf16.mxu0 %v22777_v60  ;;  %v22795_v21 = vld [vmem:[#allocation2 + $0x11e4] ss:$24 sps:$4 sm:$0xff]   ;;  %v22793_v60 = vld [vmem:[#allocation2 + $0x11e0] ss:$24 sps:$4 sm:$0xff]  }
 0x2a8   : > { %5163 = vmatmul.mubr.bf16.gmra.mrb[108].mxu0 %v25304_v30  ;;  %7607 = vmatprep.subr.bf16.mxu1 %v22780_v43  ;;  %v22790_v30 = vld [vmem:[#allocation2 + $0x7e8] ss:$24 sps:$4 sm:$0xff]   ;;  %v22801_v43 = vld [vmem:[#allocation2 + $0x1214] ss:$24 sps:$4 sm:$0xff]  }
 0x2a9   : > { %7561 = vmatmul.mubr.bf16.gmra.mrb[64].mxu1 %v28425_v49  ;;  %5172 = vmatprep.mubr.bf16.mxu0 %v25321_v33  ;;  %v22798_v33 = vld [vmem:[#allocation2 + $0x81c] ss:$24 sps:$4 sm:$0xff]  }
 0x2aa   : > { %5210 = vmatpush1.bf16.msra.mxu0 %v22775_v63  ;;  %7570 = vmatprep.mubr.bf16.mxu1 %v25103_v13  ;;  %v22796_v63 = vld [vmem:[#allocation2 + $0x818] ss:$24 sps:$4 sm:$0xff]  }
 0x2ab   : > { %7608 = vmatpush1.bf16.msra.mxu1 %v22778_v62  ;;  %5211 = vmatprep.subr.bf16.mxu0 %v22783_v28  ;;  %v22804_v62 = vld [vmem:[#allocation2 + $0x84c] ss:$24 sps:$4 sm:$0xff]   ;;  %v22799_v28 = vld [vmem:[#allocation2 + $0x1210] ss:$24 sps:$4 sm:$0xff]  }
 0x2ac   : > { %7609 = vmatprep.subr.bf16.mxu1 %v22786_v20  ;;  %v22805_v20 = vld [vmem:[#allocation2 + $0x1240] ss:$24 sps:$4 sm:$0xff]  }
 0x2ae   : > { %5212 = vmatpush1.bf16.msra.mxu0 %v22781_v6  ;;  %v22807_v6 = vld [vmem:[#allocation2 + $0x1244] ss:$24 sps:$4 sm:$0xff]  }
 0x2af   : > { %7610 = vmatpush1.bf16.msra.mxu1 %v22784_v22  ;;  %5213 = vmatprep.subr.bf16.mxu0 %v22789_v9  ;;  %v22808_v22 = vld [vmem:[#allocation2 + $0x878] ss:$24 sps:$4 sm:$0xff]   ;;  %v22813_v9 = vld [vmem:[#allocation2 + $0x1274] ss:$24 sps:$4 sm:$0xff]  }
 0x2b0   : > { %5173 = vmatmul.mubr.bf16.gmra.mrb[112].mxu0 %v25366_v52  ;;  %7611 = vmatprep.subr.bf16.mxu1 %v22792_v36  ;;  %v22802_v52 = vld [vmem:[#allocation2 + $0x848] ss:$24 sps:$4 sm:$0xff]   ;;  %v22816_v36 = vld [vmem:[#allocation2 + $0x8ac] ss:$24 sps:$4 sm:$0xff]  }
 0x2b1   : > { %7571 = vmatmul.mubr.bf16.gmra.mrb[68].mxu1 %v25095_v3  ;;  %5182 = vmatprep.mubr.bf16.mxu0 %v25360_v34  ;;  %v22810_v34 = vld [vmem:[#allocation2 + $0x87c] ss:$24 sps:$4 sm:$0xff]  }
 0x2b2   : > { %5214 = vmatpush1.bf16.msra.mxu0 %v22787_v39  ;;  %7580 = vmatprep.mubr.bf16.mxu1 %v25137_v38  ;;  %v22811_v39 = vld [vmem:[#allocation2 + $0x1270] ss:$24 sps:$4 sm:$0xff]  }
 0x2b3   : > { %7612 = vmatpush1.bf16.msra.mxu1 %v22790_v30  ;;  %5215 = vmatprep.subr.bf16.mxu0 %v22795_v21  ;;  %v22814_v30 = vld [vmem:[#allocation2 + $0x8a8] ss:$24 sps:$4 sm:$0xff]   ;;  %v22819_v21 = vld [vmem:[#allocation2 + $0x12a4] ss:$24 sps:$4 sm:$0xff]  }
 0x2b4   : > { %7613 = vmatprep.subr.bf16.mxu1 %v22798_v33  ;;  %v22825_v33 = vld [vmem:[#allocation2 + $0x12d4] ss:$24 sps:$4 sm:$0xff]  }
 0x2b6   : > { %5216 = vmatpush1.bf16.msra.mxu0 %v22793_v60  ;;  %v22817_v60 = vld [vmem:[#allocation2 + $0x12a0] ss:$24 sps:$4 sm:$0xff]  }
 0x2b7   : > { %7614 = vmatpush1.bf16.msra.mxu1 %v22796_v63  ;;  %5217 = vmatprep.subr.bf16.mxu0 %v22801_v43  ;;  %v22834_v63 = vld [vmem:[#allocation2 + $0x90c] ss:$24 sps:$4 sm:$0xff]   ;;  %v22823_v43 = vld [vmem:[#allocation2 + $0x12d0] ss:$24 sps:$4 sm:$0xff]  }
 0x2b8   : > { %5183 = vmatmul.mubr.bf16.gmra.mrb[116].mxu0 %v25389_v35  ;;  %7615 = vmatprep.subr.bf16.mxu1 %v22804_v62  ;;  %v22822_v35 = vld [vmem:[#allocation2 + $0x8dc] ss:$24 sps:$4 sm:$0xff]  }
 0x2b9   : > { %7581 = vmatmul.mubr.bf16.gmra.mrb[72].mxu1 %v25133_v24  ;;  %5225 = vmatprep.mubr.bf16.mxu0 %v25384_v12  ;;  %v22820_v12 = vld [vmem:[#allocation2 + $0x8d8] ss:$24 sps:$4 sm:$0xff]   ;;  %v22828_v62 = vld [vmem:[#allocation2 + $0x1304] ss:$24 sps:$4 sm:$0xff]  }
 0x2ba   : > { %5218 = vmatpush1.bf16.msra.mxu0 %v22799_v28  ;;  %7623 = vmatprep.mubr.bf16.mxu1 %v25163_v47  ;;  %v22832_v28 = vld [vmem:[#allocation2 + $0x908] ss:$24 sps:$4 sm:$0xff]  }
 0x2bb   : > { %7616 = vmatpush1.bf16.msra.mxu1 %v22802_v52  ;;  %5219 = vmatprep.subr.bf16.mxu0 %v22807_v6  ;;  %v22840_v52 = vld [vmem:[#allocation2 + $0x93c] ss:$24 sps:$4 sm:$0xff]   ;;  %v22826_v6 = vld [vmem:[#allocation2 + $0x1300] ss:$24 sps:$4 sm:$0xff]  }
 0x2bc   : > { %7617 = vmatprep.subr.bf16.mxu1 %v22810_v34  ;;  %v22838_v34 = vld [vmem:[#allocation2 + $0x938] ss:$24 sps:$4 sm:$0xff]  }
 0x2be   : > { %5220 = vmatpush1.bf16.msra.mxu0 %v22805_v20  ;;  %v22831_v20 = vld [vmem:[#allocation2 + $0x1334] ss:$24 sps:$4 sm:$0xff]  }
 0x2bf   : > { %7618 = vmatpush1.bf16.msra.mxu1 %v22808_v22  ;;  %5221 = vmatprep.subr.bf16.mxu0 %v22813_v9  ;;  %v22829_v22 = vld [vmem:[#allocation2 + $0x1330] ss:$24 sps:$4 sm:$0xff]   ;;  %v22843_v9 = vld [vmem:[#allocation2 + $0x96c] ss:$24 sps:$4 sm:$0xff]  }
 0x2c0   : > { %7619 = vmatprep.subr.bf16.mxu1 %v22816_v36  ;;  %v22841_v36 = vld [vmem:[#allocation2 + $0x968] ss:$24 sps:$4 sm:$0xff]  }
 0x2c2   : > { %5222 = vmatpush1.bf16.msra.mxu0 %v22811_v39  ;;  %v22837_v39 = vld [vmem:[#allocation2 + $0x1364] ss:$24 sps:$4 sm:$0xff]  }
 0x2c3   : > { %7620 = vmatpush1.bf16.msra.mxu1 %v22814_v30  ;;  %5223 = vmatprep.subr.bf16.mxu0 %v22819_v21  ;;  %v22844_v30 = vld [vmem:[#allocation2 + $0x998] ss:$24 sps:$4 sm:$0xff]   ;;  %v22849_v21 = vld [vmem:[#allocation2 + $0x4] ss:$24 sps:$4 sm:$0xff]  }
 0x2c4   : > { %7621 = vmatprep.subr.bf16.mxu1 %v22822_v35  ;;  %v22852_v35 = vld [vmem:[#allocation2 + $0x138c] ss:$24 sps:$4 sm:$0xff]  }
 0x2c6   : > { %5224 = vmatpush1.bf16.msra.mxu0 %v22817_v60  ;;  %v28428_v60 = vld [vmem:[#allocation61_spill] sm:$0xff] }
 0x2c7   : > { %7622 = vmatpush1.bf16.msra.mxu1 %v22820_v12  ;;  %5296 = vmatprep.subr.bf16.mxu0 %v22825_v33  ;;  %v28429_v12 = vld [vmem:[#allocation57_spill] sm:$0xff]  ;;  %v28436_v33 = vld [vmem:[#allocation20_spill] sm:$0xff] }
 0x2c8   : > { %7694 = vmatprep.subr.bf16.mxu1 %v22834_v63  ;;  %v22873_v63 = vld [vmem:[#allocation2 + $0xc4] ss:$24 sps:$4 sm:$0xff]  }
 0x2c9   : > { %5226 = vmatmul.mubr.bf16.vlgmr.msra.gmra.mrb[92].mxu0 %v25403_v56  ;;  %v22846_v56 = vld [vmem:[#allocation2 + $0x99c] ss:$24 sps:$4 sm:$0xff]  }
 0x2ca   : > { %7624 = vmatmul.mubr.bf16.vlgmr.msra.gmra.mrb[48].mxu1 %v25159_v42  ;;  %5235 = vmatprep.mubr.bf16.mxu0 %v25409_v18  ;;  %v22835_v18 = vld [vmem:[#allocation2 + $0x1360] ss:$24 sps:$4 sm:$0xff]  }
 0x2cb   : > { %5297 = vmatpush1.bf16.msra.mxu0 %v22823_v43  ;;  %7633 = vmatprep.mubr.bf16.mxu1 %v25192_v15  ;;  %v22867_v43 = vld [vmem:[#allocation2 + $0x94] ss:$24 sps:$4 sm:$0xff]  }
 0x2cc   : > { %5298 = vmatprep.subr.bf16.mxu0 %v22828_v62  ;;  %7695 = vmatpush1.bf16.msra.mxu1 %v22832_v28  ;;  %v22853_v28 = vld [vmem:[#allocation2 + $0x30] ss:$24 sps:$4 sm:$0xff]  }
 0x2cd   : > { %7696 = vmatprep.subr.bf16.mxu1 %v22840_v52  ;;  %v28440_v52 = vld [vmem:[#allocation70_spill] sm:$0xff]  ;;  %v22856_v62 = vld [vmem:[#allocation2 + $0x13b8] ss:$24 sps:$4 sm:$0xff]  }
 0x2cf   : > { %5299 = vmatpush1.bf16.msra.mxu0 %v22826_v6  ;;  %v28438_v6 = vld [vmem:[#allocation60_spill] sm:$0xff] }
 0x2d0   : > { %5300 = vmatprep.subr.bf16.mxu0 %v22831_v20  ;;  %7697 = vmatpush1.bf16.msra.mxu1 %v22838_v34  ;;  %v28430_v20 = vld [vmem:[#allocation36_spill] sm:$0xff] }
 0x2d1   : > { %5236 = vmatmul.mubr.bf16.gmra.mrb[96].mxu0 %v25417_v25  ;;  %7698 = vmatprep.subr.bf16.mxu1 %v22843_v9  ;;  %v28426_v25 = vld [vmem:[#allocation43_spill] sm:$0xff] }
 0x2d2   : > { %7634 = vmatmul.mubr.bf16.gmra.mrb[52].mxu1 %v25190_v55  ;;  %5245 = vmatprep.mubr.bf16.mxu0 %v25423_v7  ;;  %v22858_v34 = vld [vmem:[#allocation2 + $0x13bc] ss:$24 sps:$4 sm:$0xff]   ;;  %v22862_v7 = vld [vmem:[#allocation2 + $0x13e8] ss:$24 sps:$4 sm:$0xff]  }
 0x2d3   : > { %7643 = vmatprep.mubr.bf16.mxu1 %v25211_v50  ;;  %5301 = vmatpush1.bf16.msra.mxu0 %v22829_v22  ;;  %v28431_v22 = vld [vmem:[#allocation34_spill] sm:$0xff]  ;;  %v28441_v9 = vld [vmem:[#allocation59_spill] sm:$0xff] }
 0x2d4   : > { %5302 = vmatprep.subr.bf16.mxu0 %v22837_v39  ;;  %7699 = vmatpush1.bf16.msra.mxu1 %v22841_v36  ;;  %v28432_v39 = vld [vmem:[#allocation41_spill] sm:$0xff]  ;;  %v28439_v36 = vmov 0  }
 0x2d5   : > { %7700 = vmatprep.subr.bf16.mxu1 %v22846_v56  ;;  %v28433_v56 = vld [vmem:[#allocation40_spill] sm:$0xff] }
 0x2d7   : > { %5303 = vmatpush1.bf16.msra.mxu0 %v22835_v18  ;;  %v28434_v18 = vld [vmem:[#allocation15_spill] sm:$0xff] }
 0x2d8   : > { %7701 = vmatpush1.bf16.msra.mxu1 %v22844_v30  ;;  %6973 = vmatprep.subr.bf16.mxu0 %v22849_v21  ;;  %v22847_v30 = vld [vmem:[#allocation2] ss:$24 sps:$4 sm:$0xff]   ;;  %v22861_v21 = vld [vmem:[#allocation2 + $0x64] ss:$24 sps:$4 sm:$0xff]  }
 0x2d9   : > { %5246 = vmatmul.mubr.bf16.gmra.mrb[100].mxu0 %v25431_v10  ;;  %10719 = vmatprep.subr.bf16.mxu1 %v22852_v35  ;;  %v28427_v10 = vld [vmem:[#allocation44_spill] sm:$0xff]  ;;  %v28435_v35 = vld [vmem:[#allocation14_spill] sm:$0xff] }
 0x2da   : > { %7644 = vmatmul.mubr.bf16.gmra.mrb[56].mxu1 %v25202_v41  ;;  %5255 = vmatprep.mubr.bf16.mxu0 %v25437_v1  ;;  %v22859_v1 = vld [vmem:[#allocation2 + $0x60] ss:$24 sps:$4 sm:$0xff]  }
 0x2db   : > { %7653 = vmatprep.mubr.bf16.mxu1 %v25230_v19 }
 0x2e1   : > { %5256 = vmatmul.mubr.bf16.gmra.mrb[104].mxu0 %v25447_v40  ;;  %v22864_v40 = vld [vmem:[#allocation2 + $0x13ec] ss:$24 sps:$4 sm:$0xff]  }
 0x2e2   : > { %7654 = vmatmul.mubr.bf16.gmra.mrb[60].mxu1 %v25226_v37  ;;  %5265 = vmatprep.mubr.bf16.mxu0 %v25453_v14  ;;  %v22888_v14 = vld [vmem:[#allocation2 + $0x14ac] ss:$24 sps:$4 sm:$0xff]  }
 0x2e3   : > { %7663 = vmatprep.mubr.bf16.mxu1 %v25258_v11 }
 0x2e9   : > { %5266 = vmatmul.mubr.bf16.gmra.mrb[108].mxu0 %v25465_v5  ;;  %v22900_v5 = vld [vmem:[#allocation2 + $0x150c] ss:$24 sps:$4 sm:$0xff]  }
 0x2ea   : > { %7664 = vmatmul.mubr.bf16.gmra.mrb[64].mxu1 %v25254_v58  ;;  %5275 = vmatprep.mubr.bf16.mxu0 %v25472_v44  ;;  %v22876_v44 = vld [vmem:[#allocation2 + $0x144c] ss:$24 sps:$4 sm:$0xff]  }
 0x2eb   : > { %7673 = vmatprep.mubr.bf16.mxu1 %v25295_v26 }
 0x2f1   : > { %5276 = vmatmul.mubr.bf16.gmra.mrb[112].mxu0 %v25482_v51  ;;  %v28437_v51 = vld [vmem:[#allocation69_spill] sm:$0xff] }
 0x2f2   : > { %7674 = vmatmul.mubr.bf16.gmra.mrb[68].mxu1 %v25288_v16  ;;  %5285 = vmatprep.mubr.bf16.mxu0 %v25487_v29  ;;  %v22855_v29 = vld [vmem:[#allocation2 + $0x34] ss:$24 sps:$4 sm:$0xff]  }
 0x2f3   : > { %7683 = vmatprep.mubr.bf16.mxu1 %v25334_v31 }
 0x2f9   : > { %5286 = vmatmul.mubr.bf16.gmra.mrb[116].mxu0 %v28437_v51  ;;  %v22850_v51 = vld [vmem:[#allocation2 + $0x1388] ss:$24 sps:$4 sm:$0xff]  }
 0x2fa   : > { %7684 = vmatmul.mubr.bf16.gmra.mrb[72].mxu1 %v28438_v6  ;;  %5328 = vmatprep.mubr.bf16.mxu0 %v28439_v36 }
 0x2fb   : > { %7726 = vmatprep.mubr.bf16.mxu1 %v28439_v36 }
 0x301   : > { %18933 = vmatmul.mubr.msk.bf16.vlgmr.msra.gmra.mrb[92].mxu0 %vm4141_vm3, %v28440_v52  ;;  %v22870_v52 = vld [vmem:[#allocation2 + $0x141c] ss:$24 sps:$4 sm:$0xff]  }
 0x302   : > { %6974 = vmatpush1.bf16.msra.mxu0 %v22847_v30  ;;  %19259 = vmatmul.mubr.msk.bf16.vlgmr.msra.gmra.mrb[48].mxu1 %vm4141_vm3, %v28441_v9  ;;  %v28442_v30 = vld [vmem:[#allocation71_spill] sm:$0xff] }
 0x303   : > { %10720 = vmatpush1.bf16.msra.mxu1 %v22850_v51  ;;  %6975 = vmatprep.subr.bf16.mxu0 %v22855_v29  ;;  %v28443_v29 = vld [vmem:[#allocation58_spill] sm:$0xff]  ;;  %v22868_v51 = vld [vmem:[#allocation2 + $0x1418] ss:$24 sps:$4 sm:$0xff]  }
 0x304   : > { %10721 = vmatprep.subr.bf16.mxu1 %v22858_v34  ;;  %5338 = vmatprep.mubr.bf16.mxu0 %v28439_v36  ;;  %v22865_v34 = vld [vmem:[#allocation2 + $0x90] ss:$24 sps:$4 sm:$0xff]  }
 0x305   : > { %7736 = vmatprep.mubr.bf16.mxu1 %v28439_v36 }
 0x306   : > { %6976 = vmatpush1.bf16.msra.mxu0 %v22853_v28  ;;  %v22871_v28 = vld [vmem:[#allocation2 + $0xc0] ss:$24 sps:$4 sm:$0xff]  }
 0x307   : > { %10722 = vmatpush1.bf16.msra.mxu1 %v22856_v62  ;;  %6977 = vmatprep.subr.bf16.mxu0 %v22861_v21  ;;  %v22879_v62 = vld [vmem:[#allocation2 + $0xf4] ss:$24 sps:$4 sm:$0xff]  }
 0x308   : > { %10723 = vmatprep.subr.bf16.mxu1 %v22864_v40  ;;  %v22874_v40 = vld [vmem:[#allocation2 + $0x1448] ss:$24 sps:$4 sm:$0xff]   ;;  %v22882_v21 = vld [vmem:[#allocation2 + $0x147c] ss:$24 sps:$4 sm:$0xff]  }
 0x309   : > { %18934 = vmatmul.mubr.msk.bf16.gmra.mrb[96].mxu0 %vm4141_vm3, %v28442_v30  ;;  %v22885_v30 = vld [vmem:[#allocation2 + $0x124] ss:$24 sps:$4 sm:$0xff]  }
 0x30a   : > { %6978 = vmatpush1.bf16.msra.mxu0 %v22859_v1  ;;  %19260 = vmatmul.mubr.msk.bf16.gmra.mrb[52].mxu1 %vm4141_vm3, %v28443_v29  ;;  %v28444_v1 = vld [vmem:[#allocation72_spill] sm:$0xff] }
 0x30b   : > { %10724 = vmatpush1.bf16.msra.mxu1 %v22862_v7  ;;  %6979 = vmatprep.subr.bf16.mxu0 %v22867_v43  ;;  %v28445_v7 = vld [vmem:[#allocation63_spill] sm:$0xff] }
 0x30c   : > { %10725 = vmatprep.subr.bf16.mxu1 %v22870_v52  ;;  %5348 = vmatprep.mubr.bf16.mxu0 %v28439_v36  ;;  %v22877_v43 = vld [vmem:[#allocation2 + $0xf0] ss:$24 sps:$4 sm:$0xff]  }
 0x30d   : > { %7746 = vmatprep.mubr.bf16.mxu1 %v28439_v36  ;;  %v22880_v52 = vld [vmem:[#allocation2 + $0x1478] ss:$24 sps:$4 sm:$0xff]  }
 0x30e   : > { %6980 = vmatpush1.bf16.msra.mxu0 %v22865_v34  ;;  %v22883_v34 = vld [vmem:[#allocation2 + $0x120] ss:$24 sps:$4 sm:$0xff]  }
 0x30f   : > { %10726 = vmatpush1.bf16.msra.mxu1 %v22868_v51  ;;  %6981 = vmatprep.subr.bf16.mxu0 %v22873_v63  ;;  %v22886_v63 = vld [vmem:[#allocation2 + $0x14a8] ss:$24 sps:$4 sm:$0xff]   ;;  %v22894_v51 = vld [vmem:[#allocation2 + $0x14dc] ss:$24 sps:$4 sm:$0xff]  }
 0x310   : > { %10727 = vmatprep.subr.bf16.mxu1 %v22876_v44  ;;  %v22891_v44 = vld [vmem:[#allocation2 + $0x154] ss:$24 sps:$4 sm:$0xff]  }
 0x311   : > { %18935 = vmatmul.mubr.msk.bf16.gmra.mrb[100].mxu0 %vm4141_vm3, %v28444_v1  ;;  %v22897_v1 = vld [vmem:[#allocation2 + $0x184] ss:$24 sps:$4 sm:$0xff]  }
 0x312   : > { %6982 = vmatpush1.bf16.msra.mxu0 %v22871_v28  ;;  %19261 = vmatmul.mubr.msk.bf16.gmra.mrb[56].mxu1 %vm4141_vm3, %v28445_v7  ;;  %v28446_v28 = vld [vmem:[#allocation73_spill] sm:$0xff]  ;;  %v22940_v7 = vld [vmem:[#allocation2 + $0x1658] ss:$24 sps:$4 sm:$0xff]  }
 0x313   : > { %10728 = vmatpush1.bf16.msra.mxu1 %v22874_v40  ;;  %6983 = vmatprep.subr.bf16.mxu0 %v22879_v62  ;;  %v28447_v40 = vld [vmem:[#allocation62_spill] sm:$0xff] }
 0x314   : > { %10729 = vmatprep.subr.bf16.mxu1 %v22882_v21  ;;  %5358 = vmatprep.mubr.bf16.mxu0 %v28439_v36  ;;  %v22889_v62 = vld [vmem:[#allocation2 + $0x150] ss:$24 sps:$4 sm:$0xff]  }
 0x315   : > { %7756 = vmatprep.mubr.bf16.mxu1 %v28439_v36  ;;  %v22892_v21 = vld [vmem:[#allocation2 + $0x14d8] ss:$24 sps:$4 sm:$0xff]  }
 0x316   : > { %6984 = vmatpush1.bf16.msra.mxu0 %v22877_v43  ;;  %v22895_v43 = vld [vmem:[#allocation2 + $0x180] ss:$24 sps:$4 sm:$0xff]  }
 0x317   : > { %10730 = vmatpush1.bf16.msra.mxu1 %v22880_v52  ;;  %6985 = vmatprep.subr.bf16.mxu0 %v22885_v30  ;;  %v22903_v52 = vld [vmem:[#allocation2 + $0x1b4] ss:$24 sps:$4 sm:$0xff]  }
 0x318   : > { %10731 = vmatprep.subr.bf16.mxu1 %v22888_v14  ;;  %v22898_v14 = vld [vmem:[#allocation2 + $0x1508] ss:$24 sps:$4 sm:$0xff]   ;;  %v22906_v30 = vld [vmem:[#allocation2 + $0x153c] ss:$24 sps:$4 sm:$0xff]  }
 0x319   : > { %18936 = vmatmul.mubr.msk.bf16.gmra.mrb[104].mxu0 %vm4141_vm3, %v28446_v28  ;;  %v22909_v28 = vld [vmem:[#allocation2 + $0x1e4] ss:$24 sps:$4 sm:$0xff]  }
 0x31a   : > { %6986 = vmatpush1.bf16.msra.mxu0 %v22883_v34  ;;  %19262 = vmatmul.mubr.msk.bf16.gmra.mrb[60].mxu1 %vm4141_vm3, %v28447_v40  ;;  %v28448_v34 = vld [vmem:[#allocation55_spill] sm:$0xff]  ;;  %v22912_v40 = vld [vmem:[#allocation2 + $0x156c] ss:$24 sps:$4 sm:$0xff]  }
 0x31b   : > { %10732 = vmatpush1.bf16.msra.mxu1 %v22886_v63  ;;  %6987 = vmatprep.subr.bf16.mxu0 %v22891_v44  ;;  %v28449_v63 = vld [vmem:[#allocation65_spill] sm:$0xff]  ;;  %v22901_v44 = vld [vmem:[#allocation2 + $0x1b0] ss:$24 sps:$4 sm:$0xff]  }
 0x31c   : > { %10733 = vmatprep.subr.bf16.mxu1 %v22894_v51  ;;  %5368 = vmatprep.mubr.bf16.mxu0 %v28439_v36  ;;  %v22904_v51 = vld [vmem:[#allocation2 + $0x1538] ss:$24 sps:$4 sm:$0xff]  }
 0x31d   : > { %7766 = vmatprep.mubr.bf16.mxu1 %v28439_v36 }
 0x31e   : > { %6988 = vmatpush1.bf16.msra.mxu0 %v22889_v62  ;;  %v22907_v62 = vld [vmem:[#allocation2 + $0x1e0] ss:$24 sps:$4 sm:$0xff]  }
 0x31f   : > { %10734 = vmatpush1.bf16.msra.mxu1 %v22892_v21  ;;  %6989 = vmatprep.subr.bf16.mxu0 %v22897_v1  ;;  %v22915_v21 = vld [vmem:[#allocation2 + $0x214] ss:$24 sps:$4 sm:$0xff]  }
 0x320   : > { %10735 = vmatprep.subr.bf16.mxu1 %v22900_v5  ;;  %v22910_v5 = vld [vmem:[#allocation2 + $0x1568] ss:$24 sps:$4 sm:$0xff]   ;;  %v22918_v1 = vld [vmem:[#allocation2 + $0x159c] ss:$24 sps:$4 sm:$0xff]  }
 0x321   : > { %18937 = vmatmul.mubr.msk.bf16.gmra.mrb[108].mxu0 %vm4141_vm3, %v28448_v34  ;;  %v22921_v34 = vld [vmem:[#allocation2 + $0x244] ss:$24 sps:$4 sm:$0xff]  }
 0x322   : > { %6990 = vmatpush1.bf16.msra.mxu0 %v22895_v43  ;;  %19263 = vmatmul.mubr.msk.bf16.gmra.mrb[64].mxu1 %vm4141_vm3, %v28449_v63  ;;  %v28450_v43 = vld [vmem:[#allocation75_spill] sm:$0xff]  ;;  %v22924_v63 = vld [vmem:[#allocation2 + $0x15cc] ss:$24 sps:$4 sm:$0xff]  }
 0x323   : > { %10736 = vmatpush1.bf16.msra.mxu1 %v22898_v14  ;;  %6991 = vmatprep.subr.bf16.mxu0 %v22903_v52  ;;  %v28451_v14 = vld [vmem:[#allocation64_spill] sm:$0xff]  ;;  %v22913_v52 = vld [vmem:[#allocation2 + $0x210] ss:$24 sps:$4 sm:$0xff]  }
 0x324   : > { %10737 = vmatprep.subr.bf16.mxu1 %v22906_v30  ;;  %5378 = vmatprep.mubr.bf16.mxu0 %v28439_v36  ;;  %v22916_v30 = vld [vmem:[#allocation2 + $0x1598] ss:$24 sps:$4 sm:$0xff]  }
 0x325   : > { %7776 = vmatprep.mubr.bf16.mxu1 %v28439_v36 }
 0x326   : > { %6992 = vmatpush1.bf16.msra.mxu0 %v22901_v44  ;;  %v22919_v44 = vld [vmem:[#allocation2 + $0x240] ss:$24 sps:$4 sm:$0xff]  }
 0x327   : > { %10738 = vmatpush1.bf16.msra.mxu1 %v22904_v51  ;;  %6993 = vmatprep.subr.bf16.mxu0 %v22909_v28  ;;  %v28454_v28 = vrot.slane %v28387_v17, 1  ;;  %v22939_v51 = vld [vmem:[#allocation2 + $0x2d4] ss:$24 sps:$4 sm:$0xff]  }
 0x328   : > { %10739 = vmatprep.subr.bf16.mxu1 %v22912_v40  ;;  %v22922_v40 = vld [vmem:[#allocation2 + $0x15c8] ss:$24 sps:$4 sm:$0xff]  }
 0x329   : > { %18938 = vmatmul.mubr.msk.bf16.gmra.mrb[112].mxu0 %vm4141_vm3, %v28450_v43  ;;  %v22930_v43 = vld [vmem:[#allocation2 + $0x15fc] ss:$24 sps:$4 sm:$0xff]  }
 0x32a   : > { %6994 = vmatpush1.bf16.msra.mxu0 %v22907_v62  ;;  %19264 = vmatmul.mubr.msk.bf16.gmra.mrb[68].mxu1 %vm4141_vm3, %v28451_v14  ;;  %v22927_v62 = vld [vmem:[#allocation2 + $0x274] ss:$24 sps:$4 sm:$0xff]   ;;  %v22928_v14 = vld [vmem:[#allocation2 + $0x15f8] ss:$24 sps:$4 sm:$0xff]  }
 0x32b   : > { %10740 = vmatpush1.bf16.msra.mxu1 %v22910_v5  ;;  %6995 = vmatprep.subr.bf16.mxu0 %v22915_v21  ;;  %v28452_v5 = vld [vmem:[#allocation76_spill] sm:$0xff]  ;;  %v28453_v21 = vld [vmem:[#allocation66_spill] sm:$0xff] }
 0x32c   : > { %10741 = vmatprep.subr.bf16.mxu1 %v22918_v1  ;;  %5388 = vmatprep.mubr.bf16.mxu0 %v28439_v36  ;;  %v22925_v1 = vld [vmem:[#allocation2 + $0x270] ss:$24 sps:$4 sm:$0xff]  }
 0x32d   : > { %7786 = vmatprep.mubr.bf16.mxu1 %v28439_v36 }
 0x32e   : > { %6996 = vmatpush1.bf16.msra.mxu0 %v22913_v52  ;;  %v28455_v52 = vrot.slane %v28383_v8, 1 }
 0x32f   : > { %10742 = vmatpush1.bf16.msra.mxu1 %v22916_v30  ;;  %6997 = vmatprep.subr.bf16.mxu0 %v22921_v34  ;;  %v22936_v34 = vld [vmem:[#allocation2 + $0x162c] ss:$24 sps:$4 sm:$0xff]  }
 0x330   : > { %10743 = vmatprep.subr.bf16.mxu1 %v22924_v63  ;;  %v25742_v30 = vsel %vm8578_vm4, %v28455_v52, %v28454_v28  ;;  %v22933_v63 = vld [vmem:[#allocation2 + $0x2a4] ss:$24 sps:$4 sm:$0xff]   ;;  %v22943_v52 = vld [vmem:[#allocation2 + $0x300] ss:$24 sps:$4 sm:$0xff]  }
 0x331   : > { %18939 = vmatmul.mubr.msk.bf16.gmra.mrb[116].mxu0 %vm4141_vm3, %v28452_v5  ;;  %28456 = vst [vmem:[#allocation16_spill] sm:$0xff] %v25742_v30  ;;  %v22934_v5 = vld [vmem:[#allocation2 + $0x1628] ss:$24 sps:$4 sm:$0xff]   ;;  %v22948_v28 = vld [vmem:[#allocation2 + $0x168c] ss:$24 sps:$4 sm:$0xff]  }
 0x332   : > { %6998 = vmatpush1.bf16.msra.mxu0 %v22919_v44  ;;  %19265 = vmatmul.mubr.msk.bf16.gmra.mrb[72].mxu1 %vm4141_vm3, %v28453_v21  ;;  %v22931_v44 = vld [vmem:[#allocation2 + $0x2a0] ss:$24 sps:$4 sm:$0xff]   ;;  %v22937_v21 = vld [vmem:[#allocation2 + $0x2d0] ss:$24 sps:$4 sm:$0xff]  }
 0x333   : > { %10744 = vmatpush1.bf16.msra.mxu1 %v22922_v40  ;;  %7005 = vmatprep.mubr.bf16.mxu0 %v28383_v8  ;;  %v22942_v40 = vld [vmem:[#allocation2 + $0x165c] ss:$24 sps:$4 sm:$0xff]  }
 0x334   : > { %10751 = vmatprep.mubr.bf16.mxu1 %v25742_v30  ;;  %6999 = vmatprep.subr.bf16.mxu0 %v22927_v62  ;;  %v22945_v8 = vld [vmem:[#allocation2 + $0x304] ss:$24 sps:$4 sm:$0xff]   ;;  %v22963_v30 = vld [vmem:[#allocation2 + $0x394] ss:$24 sps:$4 sm:$0xff]  }
 0x335   : > { %10745 = vmatprep.subr.bf16.mxu1 %v22930_v43  ;;  %v22960_v43 = vld [vmem:[#allocation2 + $0x16ec] ss:$24 sps:$4 sm:$0xff]   ;;  %v22966_v62 = vld [vmem:[#allocation2 + $0x171c] ss:$24 sps:$4 sm:$0xff]  }
 0x336   : > { %7000 = vmatpush1.bf16.msra.mxu0 %v22925_v1  ;;  %v22957_v1 = vld [vmem:[#allocation2 + $0x364] ss:$24 sps:$4 sm:$0xff]  }
 0x337   : > { %10746 = vmatpush1.bf16.msra.mxu1 %v22928_v14  ;;  %7001 = vmatprep.subr.bf16.mxu0 %v22933_v63  ;;  %v22946_v14 = vld [vmem:[#allocation2 + $0x1688] ss:$24 sps:$4 sm:$0xff]   ;;  %v22951_v63 = vld [vmem:[#allocation2 + $0x334] ss:$24 sps:$4 sm:$0xff]  }
 0x338   : > { %10747 = vmatprep.subr.bf16.mxu1 %v22936_v34  ;;  %v22954_v34 = vld [vmem:[#allocation2 + $0x16bc] ss:$24 sps:$4 sm:$0xff]  }
 0x33a   : > { %7002 = vmatpush1.bf16.msra.mxu0 %v22931_v44  ;;  %v28458_v44 = vrot.slane %v28385_v54, 1 }
 0x33b   : > { %10748 = vmatpush1.bf16.msra.mxu1 %v22934_v5  ;;  %7003 = vmatprep.subr.bf16.mxu0 %v22939_v51  ;;  %v28457_v51 = vrot.slane %v28389_v32, 1 }
 0x33c   : > { %10749 = vmatprep.subr.bf16.mxu1 %v22942_v40  ;;  %v22949_v40 = vld [vmem:[#allocation2 + $0x330] ss:$24 sps:$4 sm:$0xff]  }
 0x33d   : > { %v25755_v5 = vsel %vm8578_vm4, %v28458_v44, %v28457_v51  ;;  %v22955_v51 = vld [vmem:[#allocation2 + $0x360] ss:$24 sps:$4 sm:$0xff]  }
 0x33e   : > { %7004 = vmatpush1.bf16.msra.mxu0 %v22937_v21  ;;  %28459 = vst [vmem:[#allocation17_spill] sm:$0xff] %v25755_v5  ;;  %v28460_v21 = vrot.slane %v28391_v23, 1  ;;  %v22958_v44 = vld [vmem:[#allocation2 + $0x16e8] ss:$24 sps:$4 sm:$0xff]  }
 0x33f   : > { %10750 = vmatpush1.bf16.msra.mxu1 %v22940_v7  ;;  %7076 = vmatprep.subr.bf16.mxu0 %v22945_v8  ;;  %v28461_v8 = vrot.slane %v28387_v17, 1 }
 0x340   : > { %10822 = vmatprep.subr.bf16.mxu1 %v22948_v28  ;;  %v22952_v28 = vld [vmem:[#allocation2 + $0x16b8] ss:$24 sps:$4 sm:$0xff]  }
 0x341   : > { %7006 = vmatmul.mubr.bf16.vlgmr.msra.gmra.mrb[64].mxu0 %v28385_v54  ;;  %v25764_v7 = vsel %vm8578_vm4, %v28461_v8, %v28460_v21  ;;  %v28463_v21 = vrot.slane %v28393_v45, 1 }
 0x342   : > { %10752 = vmatmul.mubr.bf16.vlgmr.msra.gmra.mrb[48].mxu1 %v25755_v5  ;;  %7015 = vmatprep.mubr.bf16.mxu0 %v28387_v17  ;;  %28462 = vst [vmem:[#allocation10_spill] sm:$0xff] %v25764_v7  ;;  %v23026_v5 = vld [vmem:[#allocation2 + $0x18fc] ss:$24 sps:$4 sm:$0xff]  }
 0x343   : > { %7077 = vmatpush1.bf16.msra.mxu0 %v22943_v52  ;;  %10761 = vmatprep.mubr.bf16.mxu1 %v25764_v7  ;;  %v28464_v52 = vrot.slane %v28389_v32, 1  ;;  %v22978_v7 = vld [vmem:[#allocation2 + $0x177c] ss:$24 sps:$4 sm:$0xff]  }
 0x344   : > { %10823 = vmatpush1.bf16.msra.mxu1 %v22946_v14  ;;  %7078 = vmatprep.subr.bf16.mxu0 %v22951_v63  ;;  %v22961_v14 = vld [vmem:[#allocation2 + $0x390] ss:$24 sps:$4 sm:$0xff]   ;;  %v28466_v63 = vrot.slane %v28395_v46, 1 }
 0x345   : > { %10824 = vmatprep.subr.bf16.mxu1 %v22954_v34  ;;  %v25773_v8 = vsel %vm8578_vm4, %v28464_v52, %v28463_v21  ;;  %v28467_v34 = vrot.slane %v28391_v23, 1  ;;  %v22972_v21 = vld [vmem:[#allocation2 + $0x174c] ss:$24 sps:$4 sm:$0xff]   ;;  %v22970_v52 = vld [vmem:[#allocation2 + $0x1748] ss:$24 sps:$4 sm:$0xff]  }
 0x346   : > { %28465 = vst [vmem:[#allocation22_spill] sm:$0xff] %v25773_v8 }
 0x347   : > { %7079 = vmatpush1.bf16.msra.mxu0 %v22949_v40  ;;  %v22964_v40 = vld [vmem:[#allocation2 + $0x1718] ss:$24 sps:$4 sm:$0xff]  }
 0x348   : > { %10825 = vmatpush1.bf16.msra.mxu1 %v22952_v28  ;;  %7080 = vmatprep.subr.bf16.mxu0 %v22957_v1  ;;  %v25782_v1 = vsel %vm8578_vm4, %v28467_v34, %v28466_v63  ;;  %v22969_v28 = vld [vmem:[#allocation2 + $0x3c4] ss:$24 sps:$4 sm:$0xff]   ;;  %v28469_v63 = vrot.slane %v28397_v59, 1  ;;  %v28470_v34 = vrot.slane %v28393_v45, 1 }
 0x349   : > { %7016 = vmatmul.mubr.bf16.gmra.mrb[68].mxu0 %v28389_v32  ;;  %10826 = vmatprep.subr.bf16.mxu1 %v22960_v43  ;;  %28468 = vst [vmem:[#allocation13_spill] sm:$0xff] %v25782_v1  ;;  %v22967_v43 = vld [vmem:[#allocation2 + $0x3c0] ss:$24 sps:$4 sm:$0xff]  }
 0x34a   : > { %10762 = vmatmul.mubr.bf16.gmra.mrb[52].mxu1 %v25773_v8  ;;  %7025 = vmatprep.mubr.bf16.mxu0 %v28391_v23  ;;  %v22975_v8 = vld [vmem:[#allocation2 + $0x3f4] ss:$24 sps:$4 sm:$0xff]  }
 0x34b   : > { %7081 = vmatpush1.bf16.msra.mxu0 %v22955_v51  ;;  %10771 = vmatprep.mubr.bf16.mxu1 %v25782_v1  ;;  %v25791_v51 = vsel %vm8578_vm4, %v28470_v34, %v28469_v63  ;;  %v22984_v63 = vld [vmem:[#allocation2 + $0x17ac] ss:$24 sps:$4 sm:$0xff]   ;;  %v22982_v34 = vld [vmem:[#allocation2 + $0x17a8] ss:$24 sps:$4 sm:$0xff]   ;;  %v22990_v1 = vld [vmem:[#allocation2 + $0x17dc] ss:$24 sps:$4 sm:$0xff]  }
 0x34c   : > { %10827 = vmatpush1.bf16.msra.mxu1 %v22958_v44  ;;  %7082 = vmatprep.subr.bf16.mxu0 %v22963_v30  ;;  %28471 = vst [vmem:[#allocation23_spill] sm:$0xff] %v25791_v51  ;;  %v22973_v30 = vld [vmem:[#allocation2 + $0x3f0] ss:$24 sps:$4 sm:$0xff]   ;;  %v28473_v44 = vrot.slane %v28395_v46, 1 }
 0x34d   : > { %10828 = vmatprep.subr.bf16.mxu1 %v22966_v62  ;;  %v28472_v62 = vrot.slane %v28399_v61, 1 }
 0x34f   : > { %7083 = vmatpush1.bf16.msra.mxu0 %v22961_v14  ;;  %v25800_v14 = vsel %vm8578_vm4, %v28473_v44, %v28472_v62  ;;  %v28475_v62 = vrot.slane %v28401_v27, 1  ;;  %v28476_v44 = vrot.slane %v28397_v59, 1 }
 0x350   : > { %10829 = vmatpush1.bf16.msra.mxu1 %v22964_v40  ;;  %7084 = vmatprep.subr.bf16.mxu0 %v22969_v28  ;;  %28474 = vst [vmem:[#allocation12_spill] sm:$0xff] %v25800_v14  ;;  %v22976_v40 = vld [vmem:[#allocation2 + $0x1778] ss:$24 sps:$4 sm:$0xff]   ;;  %v22981_v28 = vld [vmem:[#allocation2 + $0x424] ss:$24 sps:$4 sm:$0xff]  }
 0x351   : > { %7026 = vmatmul.mubr.bf16.gmra.mrb[72].mxu0 %v28393_v45  ;;  %10830 = vmatprep.subr.bf16.mxu1 %v22972_v21  ;;  %v22979_v21 = vld [vmem:[#allocation2 + $0x420] ss:$24 sps:$4 sm:$0xff]  }
 0x352   : > { %10772 = vmatmul.mubr.bf16.gmra.mrb[56].mxu1 %v25791_v51  ;;  %7035 = vmatprep.mubr.bf16.mxu0 %v28395_v46  ;;  %v22987_v51 = vld [vmem:[#allocation2 + $0x454] ss:$24 sps:$4 sm:$0xff]  }
 0x353   : > { %7085 = vmatpush1.bf16.msra.mxu0 %v22967_v43  ;;  %10781 = vmatprep.mubr.bf16.mxu1 %v25800_v14  ;;  %v25809_v43 = vsel %vm8578_vm4, %v28476_v44, %v28475_v62  ;;  %v22996_v62 = vld [vmem:[#allocation2 + $0x180c] ss:$24 sps:$4 sm:$0xff]   ;;  %v22994_v44 = vld [vmem:[#allocation2 + $0x1808] ss:$24 sps:$4 sm:$0xff]   ;;  %v23002_v14 = vld [vmem:[#allocation2 + $0x183c] ss:$24 sps:$4 sm:$0xff]  }
 0x354   : > { %10831 = vmatpush1.bf16.msra.mxu1 %v22970_v52  ;;  %7086 = vmatprep.subr.bf16.mxu0 %v22975_v8  ;;  %28477 = vst [vmem:[#allocation28_spill] sm:$0xff] %v25809_v43  ;;  %v22985_v52 = vld [vmem:[#allocation2 + $0x450] ss:$24 sps:$4 sm:$0xff]   ;;  %v28479_v8 = vrot.slane %v28399_v61, 1 }
 0x355   : > { %10832 = vmatprep.subr.bf16.mxu1 %v22978_v7  ;;  %v28478_v7 = vrot.slane %v28430_v20, 1 }
 0x357   : > { %7087 = vmatpush1.bf16.msra.mxu0 %v22973_v30  ;;  %v25818_v30 = vsel %vm8578_vm4, %v28479_v8, %v28478_v7  ;;  %v28481_v7 = vrot.slane %v28431_v22, 1  ;;  %v28482_v8 = vrot.slane %v28401_v27, 1 }
 0x358   : > { %10833 = vmatpush1.bf16.msra.mxu1 %v22976_v40  ;;  %7088 = vmatprep.subr.bf16.mxu0 %v22981_v28  ;;  %28480 = vst [vmem:[#allocation19_spill] sm:$0xff] %v25818_v30  ;;  %v22988_v40 = vld [vmem:[#allocation2 + $0x17d8] ss:$24 sps:$4 sm:$0xff]   ;;  %v22993_v28 = vld [vmem:[#allocation2 + $0x484] ss:$24 sps:$4 sm:$0xff]  }
 0x359   : > { %7036 = vmatmul.mubr.bf16.gmra.mrb[76].mxu0 %v28397_v59  ;;  %10834 = vmatprep.subr.bf16.mxu1 %v22984_v63  ;;  %v22991_v63 = vld [vmem:[#allocation2 + $0x480] ss:$24 sps:$4 sm:$0xff]  }
 0x35a   : > { %10782 = vmatmul.mubr.bf16.gmra.mrb[60].mxu1 %v25809_v43  ;;  %7045 = vmatprep.mubr.bf16.mxu0 %v28399_v61  ;;  %v22999_v43 = vld [vmem:[#allocation2 + $0x4b4] ss:$24 sps:$4 sm:$0xff]  }
 0x35b   : > { %7089 = vmatpush1.bf16.msra.mxu0 %v22979_v21  ;;  %10791 = vmatprep.mubr.bf16.mxu1 %v25818_v30  ;;  %v25827_v21 = vsel %vm8578_vm4, %v28482_v8, %v28481_v7  ;;  %v23008_v7 = vld [vmem:[#allocation2 + $0x186c] ss:$24 sps:$4 sm:$0xff]   ;;  %v23006_v8 = vld [vmem:[#allocation2 + $0x1868] ss:$24 sps:$4 sm:$0xff]   ;;  %v23014_v30 = vld [vmem:[#allocation2 + $0x189c] ss:$24 sps:$4 sm:$0xff]  }
 0x35c   : > { %10835 = vmatpush1.bf16.msra.mxu1 %v22982_v34  ;;  %7090 = vmatprep.subr.bf16.mxu0 %v22987_v51  ;;  %28483 = vst [vmem:[#allocation29_spill] sm:$0xff] %v25827_v21  ;;  %v22997_v51 = vld [vmem:[#allocation2 + $0x4b0] ss:$24 sps:$4 sm:$0xff]   ;;  %v28485_v34 = vrot.slane %v28430_v20, 1 }
 0x35d   : > { %10836 = vmatprep.subr.bf16.mxu1 %v22990_v1  ;;  %v28484_v1 = vrot.slane %v28432_v39, 1 }
 0x35f   : > { %7091 = vmatpush1.bf16.msra.mxu0 %v22985_v52  ;;  %v25836_v52 = vsel %vm8578_vm4, %v28485_v34, %v28484_v1  ;;  %v28487_v1 = vrot.slane %v28433_v56, 1  ;;  %v28488_v34 = vrot.slane %v28431_v22, 1 }
 0x360   : > { %10837 = vmatpush1.bf16.msra.mxu1 %v22988_v40  ;;  %7092 = vmatprep.subr.bf16.mxu0 %v22993_v28  ;;  %28486 = vst [vmem:[#allocation18_spill] sm:$0xff] %v25836_v52  ;;  %v23000_v40 = vld [vmem:[#allocation2 + $0x1838] ss:$24 sps:$4 sm:$0xff]   ;;  %v23005_v28 = vld [vmem:[#allocation2 + $0x4e4] ss:$24 sps:$4 sm:$0xff]  }
 0x361   : > { %7046 = vmatmul.mubr.bf16.gmra.mrb[80].mxu0 %v28401_v27  ;;  %10838 = vmatprep.subr.bf16.mxu1 %v22996_v62  ;;  %v23003_v62 = vld [vmem:[#allocation2 + $0x4e0] ss:$24 sps:$4 sm:$0xff]  }
 0x362   : > { %10792 = vmatmul.mubr.bf16.gmra.mrb[64].mxu1 %v25827_v21  ;;  %7055 = vmatprep.mubr.bf16.mxu0 %v28430_v20  ;;  %v23011_v21 = vld [vmem:[#allocation2 + $0x514] ss:$24 sps:$4 sm:$0xff]  }
 0x363   : > { %7093 = vmatpush1.bf16.msra.mxu0 %v22991_v63  ;;  %10801 = vmatprep.mubr.bf16.mxu1 %v25836_v52  ;;  %v25845_v63 = vsel %vm8578_vm4, %v28488_v34, %v28487_v1  ;;  %v23020_v1 = vld [vmem:[#allocation2 + $0x18cc] ss:$24 sps:$4 sm:$0xff]  }
 0x364   : > { %10839 = vmatpush1.bf16.msra.mxu1 %v22994_v44  ;;  %7094 = vmatprep.subr.bf16.mxu0 %v22999_v43  ;;  %28489 = vst [vmem:[#allocation33_spill] sm:$0xff] %v25845_v63  ;;  %v23009_v44 = vld [vmem:[#allocation2 + $0x510] ss:$24 sps:$4 sm:$0xff]   ;;  %v28491_v43 = vrot.slane %v28432_v39, 1  ;;  %v23023_v52 = vld [vmem:[#allocation2 + $0x574] ss:$24 sps:$4 sm:$0xff]  }
 0x365   : > { %10840 = vmatprep.subr.bf16.mxu1 %v23002_v14  ;;  %v28490_v14 = vrot.slane %v28427_v10, 1  ;;  %v23018_v10 = vld [vmem:[#allocation2 + $0x18c8] ss:$24 sps:$4 sm:$0xff]   ;;  %v23047_v34 = vld [vmem:[#allocation2 + $0x634] ss:$24 sps:$4 sm:$0xff]  }
 0x367   : > { %7095 = vmatpush1.bf16.msra.mxu0 %v22997_v51  ;;  %v25854_v51 = vsel %vm8578_vm4, %v28491_v43, %v28490_v14  ;;  %v28495_v14 = vrot.slane %v28434_v18, 1 }
 0x368   : > { %10841 = vmatpush1.bf16.msra.mxu1 %v23000_v40  ;;  %7096 = vmatprep.subr.bf16.mxu0 %v23005_v28  ;;  %v23012_v40 = vld [vmem:[#allocation2 + $0x1898] ss:$24 sps:$4 sm:$0xff]   ;;  %v23017_v28 = vld [vmem:[#allocation2 + $0x544] ss:$24 sps:$4 sm:$0xff]  }
 0x369   : > { %7056 = vmatmul.mubr.bf16.gmra.mrb[84].mxu0 %v28431_v22  ;;  %10842 = vmatprep.subr.bf16.mxu1 %v23008_v7  ;;  %v23015_v7 = vld [vmem:[#allocation2 + $0x540] ss:$24 sps:$4 sm:$0xff]  }
 0x36a   : > { %10802 = vmatmul.mubr.bf16.gmra.mrb[68].mxu1 %v25845_v63  ;;  %7065 = vmatprep.mubr.bf16.mxu0 %v28432_v39  ;;  %v23042_v63 = vld [vmem:[#allocation2 + $0x1988] ss:$24 sps:$4 sm:$0xff]  }
 0x36b   : > { %7097 = vmatpush1.bf16.msra.mxu0 %v23003_v62  ;;  %10811 = vmatprep.mubr.bf16.mxu1 %v25854_v51  ;;  %v28492_v62 = vrot.slane %v28426_v25, 1  ;;  %v23024_v25 = vld [vmem:[#allocation2 + $0x18f8] ss:$24 sps:$4 sm:$0xff]  }
 0x36c   : > { %10843 = vmatpush1.bf16.msra.mxu1 %v23006_v8  ;;  %7098 = vmatprep.subr.bf16.mxu0 %v23011_v21  ;;  %v28493_v21 = vrot.slane %v28433_v56, 1  ;;  %v23021_v8 = vld [vmem:[#allocation2 + $0x570] ss:$24 sps:$4 sm:$0xff]  }
 0x36d   : > { %10844 = vmatprep.subr.bf16.mxu1 %v23014_v30 }
 0x36e   : > { %v25865_v30 = vsel %vm8578_vm4, %v28493_v21, %v28492_v62  ;;  %v23027_v62 = vld [vmem:[#allocation2 + $0x5a0] ss:$24 sps:$4 sm:$0xff]   ;;  %v23032_v21 = vld [vmem:[#allocation2 + $0x192c] ss:$24 sps:$4 sm:$0xff]  }
 0x36f   : > { %7099 = vmatpush1.bf16.msra.mxu0 %v23009_v44  ;;  %v28494_v44 = vrot.slane %v28415_v2, 1 }
 0x370   : > { %10845 = vmatpush1.bf16.msra.mxu1 %v23012_v40  ;;  %7100 = vmatprep.subr.bf16.mxu0 %v23017_v28  ;;  %v23029_v40 = vld [vmem:[#allocation2 + $0x5a4] ss:$24 sps:$4 sm:$0xff]   ;;  %v23039_v28 = vld [vmem:[#allocation2 + $0x600] ss:$24 sps:$4 sm:$0xff]  }
 0x371   : > { %7066 = vmatmul.mubr.bf16.gmra.mrb[88].mxu0 %v28433_v56  ;;  %10846 = vmatprep.subr.bf16.mxu1 %v23020_v1  ;;  %v25874_v43 = vsel %vm8578_vm4, %v28495_v14, %v28494_v44  ;;  %v23030_v44 = vld [vmem:[#allocation2 + $0x1928] ss:$24 sps:$4 sm:$0xff]   ;;  %v23035_v14 = vld [vmem:[#allocation2 + $0x5d4] ss:$24 sps:$4 sm:$0xff]   ;;  %v23041_v1 = vld [vmem:[#allocation2 + $0x604] ss:$24 sps:$4 sm:$0xff]  }
 0x372   : > { %10812 = vmatmul.mubr.bf16.gmra.mrb[72].mxu1 %v25865_v30  ;;  %7108 = vmatprep.mubr.bf16.mxu0 %v28434_v18  ;;  %28496 = vst [vmem:[#allocation25_spill] sm:$0xff] %v25874_v43 }
 0x373   : > { %7101 = vmatpush1.bf16.msra.mxu0 %v23015_v7  ;;  %10854 = vmatprep.mubr.bf16.mxu1 %v25874_v43  ;;  %v23038_v7 = vld [vmem:[#allocation2 + $0x195c] ss:$24 sps:$4 sm:$0xff]  }
 0x374   : > { %10847 = vmatpush1.bf16.msra.mxu1 %v23018_v10  ;;  %7102 = vmatprep.subr.bf16.mxu0 %v23023_v52  ;;  %v23033_v52 = vld [vmem:[#allocation2 + $0x5d0] ss:$24 sps:$4 sm:$0xff]   ;;  %v23050_v43 = vld [vmem:[#allocation2 + $0x19bc] ss:$24 sps:$4 sm:$0xff]  }
 0x375   : > { %10848 = vmatprep.subr.bf16.mxu1 %v23026_v5  ;;  %v23036_v10 = vld [vmem:[#allocation2 + $0x1958] ss:$24 sps:$4 sm:$0xff]   ;;  %v23044_v5 = vld [vmem:[#allocation2 + $0x198c] ss:$24 sps:$4 sm:$0xff]  }
 0x377   : > { %7103 = vmatpush1.bf16.msra.mxu0 %v23021_v8  ;;  %v28497_v8 = vrot.slane %v28436_v33, 1 }
 0x378   : > { %10849 = vmatpush1.bf16.msra.mxu1 %v23024_v25  ;;  %7104 = vmatprep.subr.bf16.mxu0 %v23029_v40  ;;  %v28498_v25 = vrot.slane %v28435_v35, 1 }
 0x379   : > { %10850 = vmatprep.subr.bf16.mxu1 %v23032_v21  ;;  %v28499_v21 = vrot.slane %v28419_v0, 1 }
 0x37a   : > { %v25887_v40 = vsel %vm8578_vm4, %v28498_v25, %v28497_v8  ;;  %v23059_v8 = vld [vmem:[#allocation2 + $0x694] ss:$24 sps:$4 sm:$0xff]  }
 0x37b   : > { %7105 = vmatpush1.bf16.msra.mxu0 %v23027_v62  ;;  %v23045_v62 = vld [vmem:[#allocation2 + $0x630] ss:$24 sps:$4 sm:$0xff]   ;;  %v23062_v25 = vld [vmem:[#allocation2 + $0x1a1c] ss:$24 sps:$4 sm:$0xff]  }
 0x37c   : > { %10851 = vmatpush1.bf16.msra.mxu1 %v23030_v44  ;;  %7106 = vmatprep.subr.bf16.mxu0 %v23035_v14  ;;  %v23048_v14 = vld [vmem:[#allocation2 + $0x19b8] ss:$24 sps:$4 sm:$0xff]  }
 0x37d   : > { %10852 = vmatprep.subr.bf16.mxu1 %v23038_v7  ;;  %v23053_v7 = vld [vmem:[#allocation2 + $0x664] ss:$24 sps:$4 sm:$0xff]  }
 0x37f   : > { %7107 = vmatpush1.bf16.msra.mxu0 %v23033_v52  ;;  %v23056_v52 = vld [vmem:[#allocation2 + $0x19ec] ss:$24 sps:$4 sm:$0xff]  }
 0x380   : > { %10853 = vmatpush1.bf16.msra.mxu1 %v23036_v10  ;;  %7179 = vmatprep.subr.bf16.mxu0 %v23041_v1  ;;  %v28500_v1 = vrot.slane %v28415_v2, 1  ;;  %v23051_v10 = vld [vmem:[#allocation2 + $0x660] ss:$24 sps:$4 sm:$0xff]  }
 0x381   : > { %10925 = vmatprep.subr.bf16.mxu1 %v23044_v5  ;;  %v23054_v5 = vld [vmem:[#allocation2 + $0x19e8] ss:$24 sps:$4 sm:$0xff]  }
 0x382   : > { %7109 = vmatmul.mubr.bf16.vlgmr.msra.gmra.mrb[64].mxu0 %v28435_v35  ;;  %v25896_v44 = vsel %vm8578_vm4, %v28500_v1, %v28499_v21  ;;  %v28502_v21 = vrot.slane %v28421_v53, 1 }
 0x383   : > { %10855 = vmatmul.mubr.bf16.vlgmr.msra.gmra.mrb[48].mxu1 %v25887_v40  ;;  %7118 = vmatprep.mubr.bf16.mxu0 %v28415_v2  ;;  %28501 = vst [vmem:[#allocation35_spill] sm:$0xff] %v25896_v44 }
 0x384   : > { %7180 = vmatpush1.bf16.msra.mxu0 %v23039_v28  ;;  %10864 = vmatprep.mubr.bf16.mxu1 %v25896_v44  ;;  %v28503_v28 = vrot.slane %v28436_v33, 1  ;;  %v23074_v44 = vld [vmem:[#allocation2 + $0x1a7c] ss:$24 sps:$4 sm:$0xff]  }
 0x385   : > { %10926 = vmatpush1.bf16.msra.mxu1 %v23042_v63  ;;  %7181 = vmatprep.subr.bf16.mxu0 %v23047_v34  ;;  %v23057_v63 = vld [vmem:[#allocation2 + $0x690] ss:$24 sps:$4 sm:$0xff]   ;;  %v28505_v34 = vrot.slane %v28422_v48, 1 }
 0x386   : > { %10927 = vmatprep.subr.bf16.mxu1 %v23050_v43  ;;  %v25905_v1 = vsel %vm8578_vm4, %v28503_v28, %v28502_v21  ;;  %v28506_v43 = vrot.slane %v28419_v0, 1  ;;  %v23068_v21 = vld [vmem:[#allocation2 + $0x1a4c] ss:$24 sps:$4 sm:$0xff]   ;;  %v23066_v28 = vld [vmem:[#allocation2 + $0x1a48] ss:$24 sps:$4 sm:$0xff]  }
 0x387   : > { %28504 = vst [vmem:[#allocation24_spill] sm:$0xff] %v25905_v1 }
 0x388   : > { %7182 = vmatpush1.bf16.msra.mxu0 %v23045_v62  ;;  %v25914_v62 = vsel %vm8578_vm4, %v28506_v43, %v28505_v34  ;;  %v28508_v34 = vrot.slane %v28423_v57, 1 }
 0x389   : > { %10928 = vmatpush1.bf16.msra.mxu1 %v23048_v14  ;;  %7183 = vmatprep.subr.bf16.mxu0 %v23053_v7  ;;  %28507 = vst [vmem:[#allocation38_spill] sm:$0xff] %v25914_v62  ;;  %v23060_v14 = vld [vmem:[#allocation2 + $0x1a18] ss:$24 sps:$4 sm:$0xff]   ;;  %v23065_v7 = vld [vmem:[#allocation2 + $0x6c4] ss:$24 sps:$4 sm:$0xff]  }
 0x38a   : > { %7119 = vmatmul.mubr.bf16.gmra.mrb[68].mxu0 %v28436_v33  ;;  %10929 = vmatprep.subr.bf16.mxu1 %v23056_v52  ;;  %v23063_v52 = vld [vmem:[#allocation2 + $0x6c0] ss:$24 sps:$4 sm:$0xff]  }
 0x38b   : > { %10865 = vmatmul.mubr.bf16.gmra.mrb[52].mxu1 %v25905_v1  ;;  %7128 = vmatprep.mubr.bf16.mxu0 %v28419_v0  ;;  %v23071_v1 = vld [vmem:[#allocation2 + $0x6f4] ss:$24 sps:$4 sm:$0xff]  }
 0x38c   : > { %7184 = vmatpush1.bf16.msra.mxu0 %v23051_v10  ;;  %10874 = vmatprep.mubr.bf16.mxu1 %v25914_v62  ;;  %v28509_v10 = vrot.slane %v28421_v53, 1  ;;  %v23086_v62 = vld [vmem:[#allocation2 + $0x1adc] ss:$24 sps:$4 sm:$0xff]  }
 0x38d   : > { %10930 = vmatpush1.bf16.msra.mxu1 %v23054_v5  ;;  %7185 = vmatprep.subr.bf16.mxu0 %v23059_v8  ;;  %v23069_v5 = vld [vmem:[#allocation2 + $0x6f0] ss:$24 sps:$4 sm:$0xff]   ;;  %v28511_v8 = vrot.slane %v28424_v4, 1 }
 0x38e   : > { %10931 = vmatprep.subr.bf16.mxu1 %v23062_v25  ;;  %v25923_v43 = vsel %vm8578_vm4, %v28509_v10, %v28508_v34  ;;  %v28512_v25 = vrot.slane %v28422_v48, 1  ;;  %v23080_v34 = vld [vmem:[#allocation2 + $0x1aac] ss:$24 sps:$4 sm:$0xff]   ;;  %v23078_v10 = vld [vmem:[#allocation2 + $0x1aa8] ss:$24 sps:$4 sm:$0xff]  }
 0x38f   : > { %28510 = vst [vmem:[#allocation31_spill] sm:$0xff] %v25923_v43 }
 0x390   : > { %7186 = vmatpush1.bf16.msra.mxu0 %v23057_v63  ;;  %v25932_v63 = vsel %vm8578_vm4, %v28512_v25, %v28511_v8  ;;  %v28514_v8 = vrot.slane %v28425_v49, 1 }
 0x391   : > { %10932 = vmatpush1.bf16.msra.mxu1 %v23060_v14  ;;  %7187 = vmatprep.subr.bf16.mxu0 %v23065_v7  ;;  %28513 = vst [vmem:[#allocation39_spill] sm:$0xff] %v25932_v63  ;;  %v23072_v14 = vld [vmem:[#allocation2 + $0x1a78] ss:$24 sps:$4 sm:$0xff]   ;;  %v23077_v7 = vld [vmem:[#allocation2 + $0x724] ss:$24 sps:$4 sm:$0xff]  }
 0x392   : > { %7129 = vmatmul.mubr.bf16.gmra.mrb[72].mxu0 %v28421_v53  ;;  %10933 = vmatprep.subr.bf16.mxu1 %v23068_v21  ;;  %v23075_v21 = vld [vmem:[#allocation2 + $0x720] ss:$24 sps:$4 sm:$0xff]  }
 0x393   : > { %10875 = vmatmul.mubr.bf16.gmra.mrb[56].mxu1 %v25923_v43  ;;  %7138 = vmatprep.mubr.bf16.mxu0 %v28422_v48  ;;  %v23083_v43 = vld [vmem:[#allocation2 + $0x754] ss:$24 sps:$4 sm:$0xff]  }
 0x394   : > { %7188 = vmatpush1.bf16.msra.mxu0 %v23063_v52  ;;  %10884 = vmatprep.mubr.bf16.mxu1 %v25932_v63  ;;  %v28515_v52 = vrot.slane %v28423_v57, 1  ;;  %v23098_v63 = vld [vmem:[#allocation2 + $0x1b3c] ss:$24 sps:$4 sm:$0xff]  }
 0x395   : > { %10934 = vmatpush1.bf16.msra.mxu1 %v23066_v28  ;;  %7189 = vmatprep.subr.bf16.mxu0 %v23071_v1  ;;  %v23081_v28 = vld [vmem:[#allocation2 + $0x750] ss:$24 sps:$4 sm:$0xff]   ;;  %v28518_v1 = vrot.slane %v28424_v4, 1 }
 0x396   : > { %10935 = vmatprep.subr.bf16.mxu1 %v23074_v44  ;;  %v25941_v25 = vsel %vm8578_vm4, %v28515_v52, %v28514_v8  ;;  %v28517_v44 = vrot.slane %v25103_v13, 1  ;;  %v23092_v8 = vld [vmem:[#allocation2 + $0x1b0c] ss:$24 sps:$4 sm:$0xff]   ;;  %v23090_v52 = vld [vmem:[#allocation2 + $0x1b08] ss:$24 sps:$4 sm:$0xff]  }
 0x397   : > { %28516 = vst [vmem:[#allocation30_spill] sm:$0xff] %v25941_v25 }
 0x398   : > { %7190 = vmatpush1.bf16.msra.mxu0 %v23069_v5  ;;  %v25950_v5 = vsel %vm8578_vm4, %v28518_v1, %v28517_v44  ;;  %v28520_v44 = vrot.slane %v25095_v3, 1 }
 0x399   : > { %10936 = vmatpush1.bf16.msra.mxu1 %v23072_v14  ;;  %7191 = vmatprep.subr.bf16.mxu0 %v23077_v7  ;;  %28519 = vst [vmem:[#allocation45_spill] sm:$0xff] %v25950_v5  ;;  %v23084_v14 = vld [vmem:[#allocation2 + $0x1ad8] ss:$24 sps:$4 sm:$0xff]   ;;  %v23089_v7 = vld [vmem:[#allocation2 + $0x784] ss:$24 sps:$4 sm:$0xff]  }
 0x39a   : > { %7139 = vmatmul.mubr.bf16.gmra.mrb[76].mxu0 %v28423_v57  ;;  %10937 = vmatprep.subr.bf16.mxu1 %v23080_v34  ;;  %v23087_v34 = vld [vmem:[#allocation2 + $0x780] ss:$24 sps:$4 sm:$0xff]  }
 0x39b   : > { %10885 = vmatmul.mubr.bf16.gmra.mrb[60].mxu1 %v25941_v25  ;;  %7148 = vmatprep.mubr.bf16.mxu0 %v28424_v4  ;;  %v23095_v25 = vld [vmem:[#allocation2 + $0x7b4] ss:$24 sps:$4 sm:$0xff]  }
 0x39c   : > { %7192 = vmatpush1.bf16.msra.mxu0 %v23075_v21  ;;  %10894 = vmatprep.mubr.bf16.mxu1 %v25950_v5  ;;  %v28521_v21 = vrot.slane %v28425_v49, 1  ;;  %v23110_v5 = vld [vmem:[#allocation2 + $0x1b9c] ss:$24 sps:$4 sm:$0xff]  }
 0x39d   : > { %10938 = vmatpush1.bf16.msra.mxu1 %v23078_v10  ;;  %7193 = vmatprep.subr.bf16.mxu0 %v23083_v43  ;;  %v23093_v10 = vld [vmem:[#allocation2 + $0x7b0] ss:$24 sps:$4 sm:$0xff]   ;;  %v28524_v43 = vrot.slane %v25103_v13, 1 }
 0x39e   : > { %10939 = vmatprep.subr.bf16.mxu1 %v23086_v62  ;;  %v25959_v1 = vsel %vm8578_vm4, %v28521_v21, %v28520_v44  ;;  %v28523_v62 = vrot.slane %v25137_v38, 1  ;;  %v23104_v44 = vld [vmem:[#allocation2 + $0x1b6c] ss:$24 sps:$4 sm:$0xff]   ;;  %v23102_v21 = vld [vmem:[#allocation2 + $0x1b68] ss:$24 sps:$4 sm:$0xff]  }
 0x39f   : > { %28522 = vst [vmem:[#allocation46_spill] sm:$0xff] %v25959_v1 }
 0x3a0   : > { %7194 = vmatpush1.bf16.msra.mxu0 %v23081_v28  ;;  %v25968_v28 = vsel %vm8578_vm4, %v28524_v43, %v28523_v62  ;;  %v28526_v62 = vrot.slane %v25133_v24, 1 }
 0x3a1   : > { %10940 = vmatpush1.bf16.msra.mxu1 %v23084_v14  ;;  %7195 = vmatprep.subr.bf16.mxu0 %v23089_v7  ;;  %28525 = vst [vmem:[#allocation48_spill] sm:$0xff] %v25968_v28  ;;  %v23096_v14 = vld [vmem:[#allocation2 + $0x1b38] ss:$24 sps:$4 sm:$0xff]   ;;  %v23101_v7 = vld [vmem:[#allocation2 + $0x7e4] ss:$24 sps:$4 sm:$0xff]  }
 0x3a2   : > { %7149 = vmatmul.mubr.bf16.gmra.mrb[80].mxu0 %v28425_v49  ;;  %10941 = vmatprep.subr.bf16.mxu1 %v23092_v8  ;;  %v23099_v8 = vld [vmem:[#allocation2 + $0x7e0] ss:$24 sps:$4 sm:$0xff]  }
 0x3a3   : > { %10895 = vmatmul.mubr.bf16.gmra.mrb[64].mxu1 %v25959_v1  ;;  %7158 = vmatprep.mubr.bf16.mxu0 %v25103_v13  ;;  %v23107_v1 = vld [vmem:[#allocation2 + $0x814] ss:$24 sps:$4 sm:$0xff]  }
 0x3a4   : > { %7196 = vmatpush1.bf16.msra.mxu0 %v23087_v34  ;;  %10904 = vmatprep.mubr.bf16.mxu1 %v25968_v28  ;;  %v28527_v34 = vrot.slane %v25095_v3, 1  ;;  %v23122_v28 = vld [vmem:[#allocation2 + $0x1bfc] ss:$24 sps:$4 sm:$0xff]  }
 0x3a5   : > { %10942 = vmatpush1.bf16.msra.mxu1 %v23090_v52  ;;  %7197 = vmatprep.subr.bf16.mxu0 %v23095_v25  ;;  %v23105_v52 = vld [vmem:[#allocation2 + $0x810] ss:$24 sps:$4 sm:$0xff]   ;;  %v28530_v25 = vrot.slane %v25137_v38, 1 }
 0x3a6   : > { %10943 = vmatprep.subr.bf16.mxu1 %v23098_v63  ;;  %v25977_v43 = vsel %vm8578_vm4, %v28527_v34, %v28526_v62  ;;  %v28529_v63 = vrot.slane %v28429_v12, 1  ;;  %v23111_v62 = vld [vmem:[#allocation2 + $0x840] ss:$24 sps:$4 sm:$0xff]   ;;  %v28531_v12 = vrot.slane %v28428_v60, 1  ;;  %v23125_v60 = vld [vmem:[#allocation2 + $0x8a4] ss:$24 sps:$4 sm:$0xff]  }
 0x3a7   : > { %28528 = vst [vmem:[#allocation49_spill] sm:$0xff] %v25977_v43  ;;  %v23114_v34 = vld [vmem:[#allocation2 + $0x1bc8] ss:$24 sps:$4 sm:$0xff]  }
 0x3a8   : > { %7198 = vmatpush1.bf16.msra.mxu0 %v23093_v10  ;;  %v25986_v10 = vsel %vm8578_vm4, %v28530_v25, %v28529_v63  ;;  %v23120_v25 = vld [vmem:[#allocation2 + $0x1bf8] ss:$24 sps:$4 sm:$0xff]  }
 0x3a9   : > { %10944 = vmatpush1.bf16.msra.mxu1 %v23096_v14  ;;  %7199 = vmatprep.subr.bf16.mxu0 %v23101_v7  ;;  %v23108_v14 = vld [vmem:[#allocation2 + $0x1b98] ss:$24 sps:$4 sm:$0xff]   ;;  %v23113_v7 = vld [vmem:[#allocation2 + $0x844] ss:$24 sps:$4 sm:$0xff]  }
 0x3aa   : > { %7159 = vmatmul.mubr.bf16.gmra.mrb[84].mxu0 %v25095_v3  ;;  %10945 = vmatprep.subr.bf16.mxu1 %v23104_v44  ;;  %v23116_v44 = vld [vmem:[#allocation2 + $0x1bcc] ss:$24 sps:$4 sm:$0xff]  }
 0x3ab   : > { %10905 = vmatmul.mubr.bf16.gmra.mrb[68].mxu1 %v25977_v43  ;;  %7168 = vmatprep.mubr.bf16.mxu0 %v25137_v38  ;;  %v23119_v43 = vld [vmem:[#allocation2 + $0x874] ss:$24 sps:$4 sm:$0xff]  }
 0x3ac   : > { %7200 = vmatpush1.bf16.msra.mxu0 %v23099_v8  ;;  %10914 = vmatprep.mubr.bf16.mxu1 %v25986_v10  ;;  %v28532_v8 = vrot.slane %v25133_v24, 1 }
 0x3ad   : > { %10946 = vmatpush1.bf16.msra.mxu1 %v23102_v21  ;;  %7201 = vmatprep.subr.bf16.mxu0 %v23107_v1  ;;  %v23117_v1 = vld [vmem:[#allocation2 + $0x870] ss:$24 sps:$4 sm:$0xff]   ;;  %v28535_v21 = vrot.slane %v25163_v47, 1 }
 0x3ae   : > { %10947 = vmatprep.subr.bf16.mxu1 %v23110_v5  ;;  %v25995_v63 = vsel %vm8578_vm4, %v28532_v8, %v28531_v12  ;;  %v28534_v5 = vrot.slane %v25192_v15, 1  ;;  %v23131_v12 = vld [vmem:[#allocation2 + $0x8d4] ss:$24 sps:$4 sm:$0xff]  }
 0x3af   : > { %28533 = vst [vmem:[#allocation50_spill] sm:$0xff] %v25995_v63  ;;  %v23134_v8 = vld [vmem:[#allocation2 + $0x1c5c] ss:$24 sps:$4 sm:$0xff]  }
 0x3b0   : > { %7202 = vmatpush1.bf16.msra.mxu0 %v23105_v52  ;;  %v26004_v52 = vsel %vm8578_vm4, %v28535_v21, %v28534_v5  ;;  %v23132_v5 = vld [vmem:[#allocation2 + $0x1c58] ss:$24 sps:$4 sm:$0xff]   ;;  %v23137_v21 = vld [vmem:[#allocation2 + $0x904] ss:$24 sps:$4 sm:$0xff]  }
 0x3b1   : > { %10948 = vmatpush1.bf16.msra.mxu1 %v23108_v14  ;;  %7203 = vmatprep.subr.bf16.mxu0 %v23113_v7  ;;  %28536 = vst [vmem:[#allocation51_spill] sm:$0xff] %v26004_v52  ;;  %v23128_v14 = vld [vmem:[#allocation2 + $0x1c2c] ss:$24 sps:$4 sm:$0xff]   ;;  %v23123_v7 = vld [vmem:[#allocation2 + $0x8a0] ss:$24 sps:$4 sm:$0xff]  }
 0x3b2   : > { %7169 = vmatmul.mubr.bf16.gmra.mrb[88].mxu0 %v25133_v24  ;;  %10949 = vmatprep.subr.bf16.mxu1 %v23116_v44  ;;  %v23126_v44 = vld [vmem:[#allocation2 + $0x1c28] ss:$24 sps:$4 sm:$0xff]  }
 0x3b3   : > { %10915 = vmatmul.mubr.bf16.gmra.mrb[72].mxu1 %v25995_v63  ;;  %7211 = vmatprep.mubr.bf16.mxu0 %v25163_v47  ;;  %v23129_v63 = vld [vmem:[#allocation2 + $0x8d0] ss:$24 sps:$4 sm:$0xff]  }
 0x3b4   : > { %7204 = vmatpush1.bf16.msra.mxu0 %v23111_v62  ;;  %10957 = vmatprep.mubr.bf16.mxu1 %v26004_v52  ;;  %v23146_v62 = vld [vmem:[#allocation2 + $0x1c8c] ss:$24 sps:$4 sm:$0xff]   ;;  %v23135_v52 = vld [vmem:[#allocation2 + $0x900] ss:$24 sps:$4 sm:$0xff]  }
 0x3b5   : > { %10950 = vmatpush1.bf16.msra.mxu1 %v23114_v34  ;;  %7205 = vmatprep.subr.bf16.mxu0 %v23119_v43  ;;  %v23140_v43 = vld [vmem:[#allocation2 + $0x934] ss:$24 sps:$4 sm:$0xff]   ;;  %v28537_v34 = vrot.slane %v25190_v55, 1 }
 0x3b6   : > { %10951 = vmatprep.subr.bf16.mxu1 %v23122_v28  ;;  %v23144_v28 = vld [vmem:[#allocation2 + $0x1c88] ss:$24 sps:$4 sm:$0xff]  }
 0x3b8   : > { %7206 = vmatpush1.bf16.msra.mxu0 %v23117_v1  ;;  %v28538_v1 = vrot.slane %v25159_v42, 1 }
 0x3b9   : > { %10952 = vmatpush1.bf16.msra.mxu1 %v23120_v25  ;;  %7207 = vmatprep.subr.bf16.mxu0 %v23125_v60  ;;  %v23138_v60 = vld [vmem:[#allocation2 + $0x930] ss:$24 sps:$4 sm:$0xff]  }
 0x3ba   : > { %10953 = vmatprep.subr.bf16.mxu1 %v23128_v14  ;;  %v26013_v25 = vsel %vm8578_vm4, %v28538_v1, %v28537_v34  ;;  %v23152_v14 = vld [vmem:[#allocation2 + $0x1cbc] ss:$24 sps:$4 sm:$0xff]   ;;  %v23153_v34 = vld [vmem:[#allocation2 + $0x1ce8] ss:$24 sps:$4 sm:$0xff]   ;;  %v28543_v1 = vrot.slane %v25202_v41, 1 }
 0x3bb   : > { %28539 = vst [vmem:[#allocation52_spill] sm:$0xff] %v26013_v25 }
 0x3bc   : > { %7208 = vmatpush1.bf16.msra.mxu0 %v23123_v7  ;;  %v28541_v7 = vrot.slane %v25192_v15, 1 }
 0x3bd   : > { %10954 = vmatpush1.bf16.msra.mxu1 %v23126_v44  ;;  %7209 = vmatprep.subr.bf16.mxu0 %v23131_v12  ;;  %v23143_v12 = vld [vmem:[#allocation2 + $0x964] ss:$24 sps:$4 sm:$0xff]  }
 0x3be   : > { %10955 = vmatprep.subr.bf16.mxu1 %v23134_v8  ;;  %v23150_v8 = vld [vmem:[#allocation2 + $0x1cb8] ss:$24 sps:$4 sm:$0xff]  }
 0x3c0   : > { %7210 = vmatpush1.bf16.msra.mxu0 %v23129_v63  ;;  %v28540_v63 = vrot.slane %v25211_v50, 1 }
 0x3c1   : > { %10956 = vmatpush1.bf16.msra.mxu1 %v23132_v5  ;;  %7282 = vmatprep.subr.bf16.mxu0 %v23137_v21  ;;  %v23155_v5 = vld [vmem:[#allocation2 + $0x1cec] ss:$24 sps:$4 sm:$0xff]   ;;  %v23141_v21 = vld [vmem:[#allocation2 + $0x960] ss:$24 sps:$4 sm:$0xff]  }
 0x3c2   : > { %11028 = vmatprep.subr.bf16.mxu1 %v23146_v62  ;;  %v26022_v44 = vsel %vm8578_vm4, %v28541_v7, %v28540_v63  ;;  %v23149_v62 = vld [vmem:[#allocation2 + $0x994] ss:$24 sps:$4 sm:$0xff]   ;;  %v28544_v63 = vrot.slane %v25190_v55, 1  ;;  %v23147_v7 = vld [vmem:[#allocation2 + $0x990] ss:$24 sps:$4 sm:$0xff]  }
 0x3c3   : > { %7212 = vmatmul.mubr.bf16.vlgmr.msra.gmra.mrb[64].mxu0 %v25159_v42  ;;  %28542 = vst [vmem:[#allocation21_spill] sm:$0xff] %v26022_v44 }
 0x3c4   : > { %10958 = vmatmul.mubr.bf16.vlgmr.msra.gmra.mrb[48].mxu1 %v26013_v25  ;;  %7221 = vmatprep.mubr.bf16.mxu0 %v25192_v15  ;;  %v23200_v25 = vld [vmem:[#allocation2 + $0x284] ss:$24 sps:$4 sm:$0xff]  }
 0x3c5   : > { %7283 = vmatpush1.bf16.msra.mxu0 %v23135_v52  ;;  %10967 = vmatprep.mubr.bf16.mxu1 %v26022_v44  ;;  %v26031_v52 = vsel %vm8578_vm4, %v28544_v63, %v28543_v1  ;;  %v23194_v44 = vld [vmem:[#allocation2 + $0x224] ss:$24 sps:$4 sm:$0xff]  }
 0x3c6   : > { %7284 = vmatprep.subr.bf16.mxu0 %v23140_v43  ;;  %11029 = vmatpush1.bf16.msra.mxu1 %v23144_v28  ;;  %28545 = vst [vmem:[#allocation54_spill] sm:$0xff] %v26031_v52  ;;  %v23158_v43 = vld [vmem:[#allocation2 + $0x1d1c] ss:$24 sps:$4 sm:$0xff]   ;;  %v28546_v28 = vrot.slane %v25230_v19, 1 }
 0x3c7   : > { %11030 = vmatprep.subr.bf16.mxu1 %v23152_v14 }
 0x3c9   : > { %7285 = vmatpush1.bf16.msra.mxu0 %v23138_v60  ;;  %v28547_v60 = vrot.slane %v25211_v50, 1 }
 0x3ca   : > { %7286 = vmatprep.subr.bf16.mxu0 %v23143_v12  ;;  %11031 = vmatpush1.bf16.msra.mxu1 %v23150_v8  ;;  %v23156_v12 = vld [vmem:[#allocation2 + $0x1d18] ss:$24 sps:$4 sm:$0xff]   ;;  %v23161_v8 = vld [vmem:[#allocation2 + $0x14] ss:$24 sps:$4 sm:$0xff]  }
 0x3cb   : > { %7222 = vmatmul.mubr.bf16.gmra.mrb[68].mxu0 %v25190_v55  ;;  %11032 = vmatprep.subr.bf16.mxu1 %v23155_v5  ;;  %v26040_v14 = vsel %vm8578_vm4, %v28547_v60, %v28546_v28  ;;  %v28549_v5 = vrot.slane %v25226_v37, 1 }
 0x3cc   : > { %10968 = vmatmul.mubr.bf16.gmra.mrb[52].mxu1 %v26031_v52  ;;  %7231 = vmatprep.mubr.bf16.mxu0 %v25211_v50  ;;  %28548 = vst [vmem:[#allocation53_spill] sm:$0xff] %v26040_v14  ;;  %v23188_v52 = vld [vmem:[#allocation2 + $0x1c4] ss:$24 sps:$4 sm:$0xff]  }
 0x3cd   : > { %10977 = vmatprep.mubr.bf16.mxu1 %v26040_v14  ;;  %7287 = vmatpush1.bf16.msra.mxu0 %v23141_v21  ;;  %v26049_v63 = vsel %vm8578_vm4, %v28543_v1, %v28549_v5  ;;  %v28551_v21 = vrot.slane %v25258_v11, 1  ;;  %v8666_v1 = vrot.slane %v25334_v31, 1  ;;  %v23182_v14 = vld [vmem:[#allocation2 + $0x164] ss:$24 sps:$4 sm:$0xff]  }
 0x3ce   : > { %7288 = vmatprep.subr.bf16.mxu0 %v23149_v62  ;;  %11033 = vmatpush1.bf16.msra.mxu1 %v23153_v34  ;;  %28550 = vst [vmem:[#allocation27_spill] sm:$0xff] %v26049_v63  ;;  %v28552_v62 = vmov %v28546_v28  ;;  %v28554_v28 = vmov %v28549_v5  ;;  %v8650_v5 = vrot.slane %v25288_v16, 1 }
 0x3cf   : > { %11034 = vmatprep.subr.bf16.mxu1 %v23158_v43  ;;  %v26058_v34 = vsel %vm8578_vm4, %v28552_v62, %v28551_v21  ;;  %v8652_v43 = vrot.slane %v25295_v26, 1  ;;  %v28559_v62 = vld [vmem:[#allocation67_spill] sm:$0xff] }
 0x3d0   : > { %28553 = vst [vmem:[#allocation56_spill] sm:$0xff] %v26058_v34 }
 0x3d1   : > { %7289 = vmatpush1.bf16.msra.mxu0 %v23147_v7  ;;  %v8636_v7 = vrot.slane %v25254_v58, 1 }
 0x3d2   : > { %11035 = vmatpush1.bf16.msra.mxu1 %v23156_v12  ;;  %7797 = vmatprep.subr.bf16.mxu0 %v23161_v8  ;;  %v28556_v12 = vmov %v28551_v21 }
 0x3d3   : > { %7232 = vmatmul.mubr.bf16.gmra.mrb[72].mxu0 %v25202_v41  ;;  %v26067_v60 = vsel %vm8578_vm4, %v28554_v28, %v8636_v7  ;;  %v26074_v8 = vsel %vm8578_vm4, %v28556_v12, %v8652_v43  ;;  %v26081_v21 = vsel %vm8578_vm4, %v8636_v7, %v8650_v5  ;;  %v8680_v28 = vrot.slane %v28559_v62, 1  ;;  %v28562_v7 = vld [vmem:[#allocation68_spill] sm:$0xff] }
 0x3d4   : > { %10978 = vmatmul.mubr.bf16.gmra.mrb[56].mxu1 %v26049_v63  ;;  %7241 = vmatprep.mubr.bf16.mxu0 %v25230_v19  ;;  %28555 = vst [vmem:[#allocation26_spill] sm:$0xff] %v26067_v60  ;;  %28557 = vst [vmem:[#allocation37_spill] sm:$0xff] %v26074_v8  ;;  %v26087_v12 = vsel %vm8578_vm4, %v8652_v43, %v8666_v1  ;;  %v23176_v63 = vld [vmem:[#allocation2 + $0x104] ss:$24 sps:$4 sm:$0xff]  }
 0x3d5   : > { %10987 = vmatprep.mubr.bf16.mxu1 %v26058_v34  ;;  %28558 = vst [vmem:[#allocation32_spill] sm:$0xff] %v26081_v21  ;;  %28560 = vst [vmem:[#allocation47_spill] sm:$0xff] %v26087_v12  ;;  %v8678_v34 = vrot.slane %v28562_v7, 1  ;;  %v26099_v62 = vsel %vm8578_vm4, %v8666_v1, %v8680_v28  ;;  %v8598_v7 = vrot.slane %v28443_v29, 1  ;;  %v23164_v1 = vld [vmem:[#allocation2 + $0x44] ss:$24 sps:$4 sm:$0xff]  }
 0x3d6   : > { %28563 = vst [vmem:[#allocation43_spill] sm:$0xff] %v26099_v62 }
 0x3db   : > { %7242 = vmatmul.mubr.bf16.gmra.mrb[76].mxu0 %v25226_v37 }
 0x3dc   : > { %10988 = vmatmul.mubr.bf16.gmra.mrb[60].mxu1 %v26067_v60  ;;  %7251 = vmatprep.mubr.bf16.mxu0 %v25258_v11  ;;  %v8664_v60 = vrot.slane %v28438_v6, 1 }
 0x3dd   : > { %10997 = vmatprep.mubr.bf16.mxu1 %v26074_v8 }
 0x3de   : > { %v26093_v8 = vsel %vm8578_vm4, %v8650_v5, %v8664_v60  ;;  %v26104_v43 = vsel %vm8578_vm4, %v8664_v60, %v8678_v34  ;;  %v8597_v5 = vrot.slane %v28441_v9, 1  ;;  %v28566_v34 = vld [vmem:[#allocation63_spill] sm:$0xff] }
 0x3df   : > { %28561 = vst [vmem:[#allocation42_spill] sm:$0xff] %v26093_v8  ;;  %28564 = vst [vmem:[#allocation44_spill] sm:$0xff] %v26104_v43  ;;  %v8612_v60 = vrot.slane %v28566_v34, 1 }
 0x3e0   : > { %v26114_v28 = vsel %vm8578_vm4, %v8597_v5, %v8598_v7 }
 0x3e1   : > { %28565 = vst [vmem:[#allocation61_spill] sm:$0xff] %v26114_v28  ;;  %v26124_v5 = vsel %vm8578_vm4, %v8598_v7, %v8612_v60  ;;  %v23179_v7 = vld [vmem:[#allocation2 + $0x134] ss:$24 sps:$4 sm:$0xff]  }
 0x3e2   : > { %28567 = vst [vmem:[#allocation57_spill] sm:$0xff] %v26124_v5 }
 0x3e3   : > { %7252 = vmatmul.mubr.bf16.gmra.mrb[80].mxu0 %v25254_v58 }
 0x3e4   : > { %10998 = vmatmul.mubr.bf16.gmra.mrb[64].mxu1 %v26081_v21  ;;  %7261 = vmatprep.mubr.bf16.mxu0 %v25295_v26  ;;  %v23170_v21 = vld [vmem:[#allocation2 + $0xa4] ss:$24 sps:$4 sm:$0xff]  }
 0x3e5   : > { %11007 = vmatprep.mubr.bf16.mxu1 %v26087_v12  ;;  %v23165_v12 = vld [vmem:[#allocation2 + $0x70] ss:$24 sps:$4 sm:$0xff]  }
 0x3eb   : > { %7262 = vmatmul.mubr.bf16.gmra.mrb[84].mxu0 %v25288_v16 }
 0x3ec   : > { %11008 = vmatmul.mubr.bf16.gmra.mrb[68].mxu1 %v26093_v8  ;;  %7271 = vmatprep.mubr.bf16.mxu0 %v25334_v31  ;;  %v23159_v8 = vld [vmem:[#allocation2 + $0x10] ss:$24 sps:$4 sm:$0xff]  }
 0x3ed   : > { %11017 = vmatprep.mubr.bf16.mxu1 %v26099_v62  ;;  %v23167_v62 = vld [vmem:[#allocation2 + $0x74] ss:$24 sps:$4 sm:$0xff]  }
 0x3f3   : > { %7272 = vmatmul.mubr.bf16.gmra.mrb[88].mxu0 %v28438_v6 }
 0x3f4   : > { %11018 = vmatmul.mubr.bf16.gmra.mrb[72].mxu1 %v26104_v43  ;;  %7314 = vmatprep.mubr.bf16.mxu0 %v28439_v36  ;;  %v23162_v43 = vld [vmem:[#allocation2 + $0x40] ss:$24 sps:$4 sm:$0xff]  }
 0x3f5   : > { %11060 = vmatprep.mubr.bf16.mxu1 %v28439_v36 }
 0x3fb   : > { %19252 = vmatmul.mubr.msk.bf16.vlgmr.msra.gmra.mrb[64].mxu0 %vm4141_vm3, %v28441_v9 }
 0x3fc   : > { %7798 = vmatpush1.bf16.msra.mxu0 %v23159_v8  ;;  %19592 = vmatmul.mubr.msk.bf16.vlgmr.msra.gmra.mrb[48].mxu1 %vm4141_vm3, %v26114_v28  ;;  %v23168_v8 = vld [vmem:[#allocation2 + $0xa0] ss:$24 sps:$4 sm:$0xff]   ;;  %v23171_v28 = vld [vmem:[#allocation2 + $0xd0] ss:$24 sps:$4 sm:$0xff]  }
 0x3fd   : > { %7799 = vmatprep.subr.bf16.mxu0 %v23164_v1  ;;  %7324 = vmatprep.mubr.bf16.mxu0 %v28439_v36  ;;  %v23173_v1 = vld [vmem:[#allocation2 + $0xd4] ss:$24 sps:$4 sm:$0xff]  }
 0x3fe   : > { %11070 = vmatprep.mubr.bf16.mxu1 %v28439_v36 }
 0x400   : > { %7800 = vmatpush1.bf16.msra.mxu0 %v23162_v43  ;;  %v28568_v43 = vld [vmem:[#allocation62_spill] sm:$0xff] }
 0x401   : > { %7801 = vmatprep.subr.bf16.mxu0 %v23167_v62  ;;  %v8626_v62 = vrot.slane %v28568_v43, 1 }
 0x403   : > { %19253 = vmatmul.mubr.msk.bf16.gmra.mrb[68].mxu0 %vm4141_vm3, %v28443_v29 }
 0x404   : > { %7802 = vmatpush1.bf16.msra.mxu0 %v23165_v12  ;;  %19593 = vmatmul.mubr.msk.bf16.gmra.mrb[52].mxu1 %vm4141_vm3, %v26124_v5  ;;  %v26134_v12 = vsel %vm8578_vm4, %v8612_v60, %v8626_v62  ;;  %v23177_v5 = vld [vmem:[#allocation2 + $0x130] ss:$24 sps:$4 sm:$0xff]   ;;  %v23185_v60 = vld [vmem:[#allocation2 + $0x194] ss:$24 sps:$4 sm:$0xff]  }
 0x405   : > { %7803 = vmatprep.subr.bf16.mxu0 %v23170_v21  ;;  %7334 = vmatprep.mubr.bf16.mxu0 %v28439_v36  ;;  %28569 = vst [vmem:[#allocation36_spill] sm:$0xff] %v26134_v12  ;;  %v23174_v21 = vld [vmem:[#allocation2 + $0x100] ss:$24 sps:$4 sm:$0xff]  }
 0x406   : > { %11080 = vmatprep.mubr.bf16.mxu1 %v28439_v36 }
 0x408   : > { %7804 = vmatpush1.bf16.msra.mxu0 %v23168_v8  ;;  %v28570_v8 = vld [vmem:[#allocation65_spill] sm:$0xff] }
 0x409   : > { %7805 = vmatprep.subr.bf16.mxu0 %v23173_v1  ;;  %v8640_v1 = vrot.slane %v28570_v8, 1 }
 0x40b   : > { %19254 = vmatmul.mubr.msk.bf16.gmra.mrb[72].mxu0 %vm4141_vm3, %v28566_v34 }
 0x40c   : > { %7806 = vmatpush1.bf16.msra.mxu0 %v23171_v28  ;;  %19594 = vmatmul.mubr.msk.bf16.gmra.mrb[56].mxu1 %vm4141_vm3, %v26134_v12  ;;  %v26144_v28 = vsel %vm8578_vm4, %v8626_v62, %v8640_v1  ;;  %v23183_v12 = vld [vmem:[#allocation2 + $0x190] ss:$24 sps:$4 sm:$0xff]   ;;  %v23191_v62 = vld [vmem:[#allocation2 + $0x1f4] ss:$24 sps:$4 sm:$0xff]  }
 0x40d   : > { %7807 = vmatprep.subr.bf16.mxu0 %v23176_v63  ;;  %7344 = vmatprep.mubr.bf16.mxu0 %v28439_v36  ;;  %28571 = vst [vmem:[#allocation34_spill] sm:$0xff] %v26144_v28  ;;  %v23180_v63 = vld [vmem:[#allocation2 + $0x160] ss:$24 sps:$4 sm:$0xff]  }
 0x40e   : > { %11090 = vmatprep.mubr.bf16.mxu1 %v28439_v36 }
 0x410   : > { %7808 = vmatpush1.bf16.msra.mxu0 %v23174_v21  ;;  %v28572_v21 = vld [vmem:[#allocation64_spill] sm:$0xff] }
 0x411   : > { %7809 = vmatprep.subr.bf16.mxu0 %v23179_v7  ;;  %v8654_v7 = vrot.slane %v28572_v21, 1 }
 0x413   : > { %19255 = vmatmul.mubr.msk.bf16.gmra.mrb[76].mxu0 %vm4141_vm3, %v28568_v43 }
 0x414   : > { %7810 = vmatpush1.bf16.msra.mxu0 %v23177_v5  ;;  %19595 = vmatmul.mubr.msk.bf16.gmra.mrb[60].mxu1 %vm4141_vm3, %v26144_v28  ;;  %v26154_v5 = vsel %vm8578_vm4, %v8640_v1, %v8654_v7  ;;  %v23189_v28 = vld [vmem:[#allocation2 + $0x1f0] ss:$24 sps:$4 sm:$0xff]   ;;  %v23197_v1 = vld [vmem:[#allocation2 + $0x254] ss:$24 sps:$4 sm:$0xff]  }
 0x415   : > { %7811 = vmatprep.subr.bf16.mxu0 %v23182_v14  ;;  %7354 = vmatprep.mubr.bf16.mxu0 %v28439_v36  ;;  %28573 = vst [vmem:[#allocation41_spill] sm:$0xff] %v26154_v5  ;;  %v23186_v14 = vld [vmem:[#allocation2 + $0x1c0] ss:$24 sps:$4 sm:$0xff]  }
 0x416   : > { %11100 = vmatprep.mubr.bf16.mxu1 %v28439_v36 }
 0x418   : > { %7812 = vmatpush1.bf16.msra.mxu0 %v23180_v63  ;;  %v28574_v63 = vld [vmem:[#allocation66_spill] sm:$0xff] }
 0x419   : > { %7813 = vmatprep.subr.bf16.mxu0 %v23185_v60  ;;  %v8668_v60 = vrot.slane %v28574_v63, 1 }
 0x41b   : > { %19256 = vmatmul.mubr.msk.bf16.gmra.mrb[80].mxu0 %vm4141_vm3, %v28570_v8 }
 0x41c   : > { %7814 = vmatpush1.bf16.msra.mxu0 %v23183_v12  ;;  %19596 = vmatmul.mubr.msk.bf16.gmra.mrb[64].mxu1 %vm4141_vm3, %v26154_v5  ;;  %v26164_v12 = vsel %vm8578_vm4, %v8654_v7, %v8668_v60  ;;  %v23195_v5 = vld [vmem:[#allocation2 + $0x250] ss:$24 sps:$4 sm:$0xff]  }
 0x41d   : > { %7815 = vmatprep.subr.bf16.mxu0 %v23188_v52  ;;  %7364 = vmatprep.mubr.bf16.mxu0 %v28439_v36  ;;  %28575 = vst [vmem:[#allocation40_spill] sm:$0xff] %v26164_v12  ;;  %v23192_v52 = vld [vmem:[#allocation2 + $0x220] ss:$24 sps:$4 sm:$0xff]   ;;  %v28577_v7 = vld [vmem:[#allocation11_spill] sm:$0xff] }
 0x41e   : > { %11110 = vmatprep.mubr.bf16.mxu1 %v28439_v36 }
 0x420   : > { %7816 = vmatpush1.bf16.msra.mxu0 %v23186_v14  ;;  %v28576_v14 = vld [vmem:[#allocation74_spill] sm:$0xff] }
 0x421   : > { %7817 = vmatprep.subr.bf16.mxu0 %v23191_v62  ;;  %v8682_v62 = vrot.slane %v28576_v14, 1  ;;  %v23204_v14 = vld [vmem:[#allocation2 + $0x2e0] ss:$24 sps:$4 sm:$0xff]  }
 0x423   : > { %19257 = vmatmul.mubr.msk.bf16.gmra.mrb[84].mxu0 %vm4141_vm3, %v28572_v21 }
 0x424   : > { %7818 = vmatpush1.bf16.msra.mxu0 %v23189_v28  ;;  %19597 = vmatmul.mubr.msk.bf16.gmra.mrb[68].mxu1 %vm4141_vm3, %v26164_v12  ;;  %v26174_v28 = vsel %vm8578_vm4, %v8668_v60, %v8682_v62  ;;  %v23203_v12 = vld [vmem:[#allocation2 + $0x2b4] ss:$24 sps:$4 sm:$0xff]   ;;  %v23212_v62 = vld [vmem:[#allocation2 + $0x344] ss:$24 sps:$4 sm:$0xff]  }
 0x425   : > { %7819 = vmatprep.subr.bf16.mxu0 %v23194_v44  ;;  %7374 = vmatprep.mubr.bf16.mxu0 %v28439_v36  ;;  %v23198_v44 = vld [vmem:[#allocation2 + $0x280] ss:$24 sps:$4 sm:$0xff]   ;;  %v23209_v60 = vld [vmem:[#allocation2 + $0x314] ss:$24 sps:$4 sm:$0xff]  }
 0x426   : > { %11120 = vmatprep.mubr.bf16.mxu1 %v28439_v36 }
 0x428   : > { %7820 = vmatpush1.bf16.msra.mxu0 %v23192_v52  ;;  %v23201_v52 = vld [vmem:[#allocation2 + $0x2b0] ss:$24 sps:$4 sm:$0xff]  }
 0x429   : > { %7821 = vmatprep.subr.bf16.mxu0 %v23197_v1  ;;  %v23206_v1 = vld [vmem:[#allocation2 + $0x2e4] ss:$24 sps:$4 sm:$0xff]  }
 0x42b   : > { %19258 = vmatmul.mubr.msk.bf16.gmra.mrb[88].mxu0 %vm4141_vm3, %v28574_v63 }
 0x42c   : > { %7822 = vmatpush1.bf16.msra.mxu0 %v23195_v5  ;;  %19598 = vmatmul.mubr.msk.bf16.gmra.mrb[72].mxu1 %vm4141_vm3, %v26174_v28  ;;  %v23207_v5 = vld [vmem:[#allocation2 + $0x310] ss:$24 sps:$4 sm:$0xff]  }
 0x42d   : > { %7829 = vmatprep.mubr.bf16.mxu0 %v28577_v7  ;;  %7823 = vmatprep.subr.bf16.mxu0 %v23200_v25  ;;  %v23210_v25 = vld [vmem:[#allocation2 + $0x340] ss:$24 sps:$4 sm:$0xff]   ;;  %v23215_v7 = vld [vmem:[#allocation2 + $0x374] ss:$24 sps:$4 sm:$0xff]  }
 0x42e   : > { %11932 = vmatprep.mubr.bf16.mxu1 %v28439_v36 }
 0x430   : > { %7824 = vmatpush1.bf16.msra.mxu0 %v23198_v44  ;;  %v23213_v44 = vld [vmem:[#allocation2 + $0x370] ss:$24 sps:$4 sm:$0xff]  }
 0x431   : > { %7825 = vmatprep.subr.bf16.mxu0 %v23203_v12  ;;  %v23218_v12 = vld [vmem:[#allocation2 + $0x3a4] ss:$24 sps:$4 sm:$0xff]  }
 0x434   : > { %7826 = vmatpush1.bf16.msra.mxu0 %v23201_v52  ;;  %v23216_v52 = vld [vmem:[#allocation2 + $0x3a0] ss:$24 sps:$4 sm:$0xff]  }
 0x435   : > { %7827 = vmatprep.subr.bf16.mxu0 %v23206_v1  ;;  %v23221_v1 = vld [vmem:[#allocation2 + $0x3d4] ss:$24 sps:$4 sm:$0xff]  }
 0x438   : > { %7828 = vmatpush1.bf16.msra.mxu0 %v23204_v14  ;;  %v23222_v14 = vld [vmem:[#allocation2 + $0x400] ss:$24 sps:$4 sm:$0xff]  }
 0x439   : > { %7900 = vmatprep.subr.bf16.mxu0 %v23209_v60  ;;  %v23227_v60 = vld [vmem:[#allocation2 + $0x434] ss:$24 sps:$4 sm:$0xff]  }
 0x43b   : > { %7830 = vmatmul.mubr.bf16.vlgmr.msra.gmra.mrb[92].mxu0 %v28385_v54  ;;  %v23219_v54 = vld [vmem:[#allocation2 + $0x3d0] ss:$24 sps:$4 sm:$0xff]  }
 0x43c   : > { %7839 = vmatprep.mubr.bf16.mxu0 %v28387_v17  ;;  %7901 = vmatpush1.bf16.msra.mxu0 %v23207_v5  ;;  %v23224_v17 = vld [vmem:[#allocation2 + $0x404] ss:$24 sps:$4 sm:$0xff]   ;;  %v23228_v5 = vld [vmem:[#allocation2 + $0x460] ss:$24 sps:$4 sm:$0xff]  }
 0x43d   : > { %7902 = vmatprep.subr.bf16.mxu0 %v23212_v62  ;;  %v23233_v62 = vld [vmem:[#allocation2 + $0x494] ss:$24 sps:$4 sm:$0xff]  }
 0x440   : > { %7903 = vmatpush1.bf16.msra.mxu0 %v23210_v25  ;;  %v23234_v25 = vld [vmem:[#allocation2 + $0x4c0] ss:$24 sps:$4 sm:$0xff]  }
 0x441   : > { %7904 = vmatprep.subr.bf16.mxu0 %v23215_v7  ;;  %v23239_v7 = vld [vmem:[#allocation2 + $0x4f4] ss:$24 sps:$4 sm:$0xff]  }
 0x443   : > { %7840 = vmatmul.mubr.bf16.gmra.mrb[96].mxu0 %v28389_v32  ;;  %v23225_v32 = vld [vmem:[#allocation2 + $0x430] ss:$24 sps:$4 sm:$0xff]  }
 0x444   : > { %7849 = vmatprep.mubr.bf16.mxu0 %v28391_v23  ;;  %7905 = vmatpush1.bf16.msra.mxu0 %v23213_v44  ;;  %v23230_v23 = vld [vmem:[#allocation2 + $0x464] ss:$24 sps:$4 sm:$0xff]   ;;  %v23240_v44 = vld [vmem:[#allocation2 + $0x520] ss:$24 sps:$4 sm:$0xff]  }
 0x445   : > { %7906 = vmatprep.subr.bf16.mxu0 %v23218_v12  ;;  %v23245_v12 = vld [vmem:[#allocation2 + $0x554] ss:$24 sps:$4 sm:$0xff]  }
 0x448   : > { %7907 = vmatpush1.bf16.msra.mxu0 %v23216_v52  ;;  %v23246_v52 = vld [vmem:[#allocation2 + $0x580] ss:$24 sps:$4 sm:$0xff]  }
 0x449   : > { %7908 = vmatprep.subr.bf16.mxu0 %v23221_v1  ;;  %v23251_v1 = vld [vmem:[#allocation2 + $0x5b4] ss:$24 sps:$4 sm:$0xff]  }
 0x44b   : > { %7850 = vmatmul.mubr.bf16.gmra.mrb[100].mxu0 %v28393_v45  ;;  %v23231_v45 = vld [vmem:[#allocation2 + $0x490] ss:$24 sps:$4 sm:$0xff]  }
 0x44c   : > { %7859 = vmatprep.mubr.bf16.mxu0 %v28395_v46  ;;  %7909 = vmatpush1.bf16.msra.mxu0 %v23219_v54  ;;  %v23236_v46 = vld [vmem:[#allocation2 + $0x4c4] ss:$24 sps:$4 sm:$0xff]   ;;  %v23252_v54 = vld [vmem:[#allocation2 + $0x5e0] ss:$24 sps:$4 sm:$0xff]  }
 0x44d   : > { %7910 = vmatprep.subr.bf16.mxu0 %v23224_v17  ;;  %v23257_v17 = vld [vmem:[#allocation2 + $0x614] ss:$24 sps:$4 sm:$0xff]  }
 0x450   : > { %7911 = vmatpush1.bf16.msra.mxu0 %v23222_v14  ;;  %v23255_v14 = vld [vmem:[#allocation2 + $0x610] ss:$24 sps:$4 sm:$0xff]  }
 0x451   : > { %7912 = vmatprep.subr.bf16.mxu0 %v23227_v60  ;;  %v23260_v60 = vld [vmem:[#allocation2 + $0x644] ss:$24 sps:$4 sm:$0xff]  }
 0x453   : > { %7860 = vmatmul.mubr.bf16.gmra.mrb[104].mxu0 %v28397_v59  ;;  %v23237_v59 = vld [vmem:[#allocation2 + $0x4f0] ss:$24 sps:$4 sm:$0xff]  }
 0x454   : > { %7869 = vmatprep.mubr.bf16.mxu0 %v28399_v61  ;;  %7913 = vmatpush1.bf16.msra.mxu0 %v23225_v32  ;;  %v23242_v61 = vld [vmem:[#allocation2 + $0x524] ss:$24 sps:$4 sm:$0xff]   ;;  %v23261_v32 = vld [vmem:[#allocation2 + $0x670] ss:$24 sps:$4 sm:$0xff]  }
 0x455   : > { %7914 = vmatprep.subr.bf16.mxu0 %v23230_v23  ;;  %v23266_v23 = vld [vmem:[#allocation2 + $0x6a4] ss:$24 sps:$4 sm:$0xff]  }
 0x458   : > { %7915 = vmatpush1.bf16.msra.mxu0 %v23228_v5  ;;  %v23264_v5 = vld [vmem:[#allocation2 + $0x6a0] ss:$24 sps:$4 sm:$0xff]  }
 0x459   : > { %7916 = vmatprep.subr.bf16.mxu0 %v23233_v62  ;;  %v23269_v62 = vld [vmem:[#allocation2 + $0x6d4] ss:$24 sps:$4 sm:$0xff]  }
 0x45b   : > { %7870 = vmatmul.mubr.bf16.gmra.mrb[108].mxu0 %v28401_v27  ;;  %v23243_v27 = vld [vmem:[#allocation2 + $0x550] ss:$24 sps:$4 sm:$0xff]  }
 0x45c   : > { %7879 = vmatprep.mubr.bf16.mxu0 %v28430_v20  ;;  %7917 = vmatpush1.bf16.msra.mxu0 %v23231_v45  ;;  %v23248_v20 = vld [vmem:[#allocation2 + $0x584] ss:$24 sps:$4 sm:$0xff]   ;;  %v23270_v45 = vld [vmem:[#allocation2 + $0x700] ss:$24 sps:$4 sm:$0xff]  }
 0x45d   : > { %7918 = vmatprep.subr.bf16.mxu0 %v23236_v46  ;;  %v23275_v46 = vld [vmem:[#allocation2 + $0x734] ss:$24 sps:$4 sm:$0xff]  }
 0x460   : > { %7919 = vmatpush1.bf16.msra.mxu0 %v23234_v25  ;;  %v23276_v25 = vld [vmem:[#allocation2 + $0x760] ss:$24 sps:$4 sm:$0xff]  }
 0x461   : > { %7920 = vmatprep.subr.bf16.mxu0 %v23239_v7  ;;  %v23281_v7 = vld [vmem:[#allocation2 + $0x794] ss:$24 sps:$4 sm:$0xff]  }
 0x463   : > { %7880 = vmatmul.mubr.bf16.gmra.mrb[112].mxu0 %v28431_v22  ;;  %v23249_v22 = vld [vmem:[#allocation2 + $0x5b0] ss:$24 sps:$4 sm:$0xff]  }
 0x464   : > { %7889 = vmatprep.mubr.bf16.mxu0 %v28432_v39  ;;  %7921 = vmatpush1.bf16.msra.mxu0 %v23237_v59  ;;  %v23254_v39 = vld [vmem:[#allocation2 + $0x5e4] ss:$24 sps:$4 sm:$0xff]   ;;  %v23282_v59 = vld [vmem:[#allocation2 + $0x7c0] ss:$24 sps:$4 sm:$0xff]  }
 0x465   : > { %7922 = vmatprep.subr.bf16.mxu0 %v23242_v61  ;;  %v23287_v61 = vld [vmem:[#allocation2 + $0x7f4] ss:$24 sps:$4 sm:$0xff]  }
 0x468   : > { %7923 = vmatpush1.bf16.msra.mxu0 %v23240_v44  ;;  %v23288_v44 = vld [vmem:[#allocation2 + $0x820] ss:$24 sps:$4 sm:$0xff]  }
 0x469   : > { %7924 = vmatprep.subr.bf16.mxu0 %v23245_v12  ;;  %v23293_v12 = vld [vmem:[#allocation2 + $0x854] ss:$24 sps:$4 sm:$0xff]  }
 0x46b   : > { %7890 = vmatmul.mubr.bf16.gmra.mrb[116].mxu0 %v28433_v56  ;;  %v23258_v56 = vld [vmem:[#allocation2 + $0x640] ss:$24 sps:$4 sm:$0xff]  }
 0x46c   : > { %7925 = vmatpush1.bf16.msra.mxu0 %v23243_v27  ;;  %7932 = vmatprep.mubr.bf16.mxu0 %v28434_v18  ;;  %v23263_v18 = vld [vmem:[#allocation2 + $0x674] ss:$24 sps:$4 sm:$0xff]   ;;  %v23294_v27 = vld [vmem:[#allocation2 + $0x880] ss:$24 sps:$4 sm:$0xff]  }
 0x46d   : > { %7926 = vmatprep.subr.bf16.mxu0 %v23248_v20  ;;  %v23299_v20 = vld [vmem:[#allocation2 + $0x8b4] ss:$24 sps:$4 sm:$0xff]  }
 0x470   : > { %7927 = vmatpush1.bf16.msra.mxu0 %v23246_v52  ;;  %v23300_v52 = vld [vmem:[#allocation2 + $0x8e0] ss:$24 sps:$4 sm:$0xff]  }
 0x471   : > { %7928 = vmatprep.subr.bf16.mxu0 %v23251_v1  ;;  %v23305_v1 = vld [vmem:[#allocation2 + $0x914] ss:$24 sps:$4 sm:$0xff]  }
 0x474   : > { %7929 = vmatpush1.bf16.msra.mxu0 %v23249_v22  ;;  %v23303_v22 = vld [vmem:[#allocation2 + $0x910] ss:$24 sps:$4 sm:$0xff]  }
 0x475   : > { %7930 = vmatprep.subr.bf16.mxu0 %v23254_v39  ;;  %v23308_v39 = vld [vmem:[#allocation2 + $0x944] ss:$24 sps:$4 sm:$0xff]  }
 0x478   : > { %7931 = vmatpush1.bf16.msra.mxu0 %v23252_v54  ;;  %v23309_v54 = vld [vmem:[#allocation2 + $0x970] ss:$24 sps:$4 sm:$0xff]  }
 0x479   : > { %8003 = vmatprep.subr.bf16.mxu0 %v23257_v17  ;;  %v23314_v17 = vld [vmem:[#allocation2 + $0x9a4] ss:$24 sps:$4 sm:$0xff]  }
 0x47b   : > { %7933 = vmatmul.mubr.bf16.vlgmr.msra.gmra.mrb[92].mxu0 %v28435_v35  ;;  %v23267_v35 = vld [vmem:[#allocation2 + $0x6d0] ss:$24 sps:$4 sm:$0xff]  }
 0x47c   : > { %7942 = vmatprep.mubr.bf16.mxu0 %v28415_v2  ;;  %8004 = vmatpush1.bf16.msra.mxu0 %v23255_v14  ;;  %v23272_v2 = vld [vmem:[#allocation2 + $0x704] ss:$24 sps:$4 sm:$0xff]   ;;  %v23312_v14 = vld [vmem:[#allocation2 + $0x9a0] ss:$24 sps:$4 sm:$0xff]  }
 0x47d   : > { %8005 = vmatprep.subr.bf16.mxu0 %v23260_v60  ;;  %v23317_v60 = vld [vmem:[#allocation2 + $0x1384] ss:$24 sps:$4 sm:$0xff]  }
 0x480   : > { %8006 = vmatpush1.bf16.msra.mxu0 %v23258_v56 }
 0x481   : > { %8007 = vmatprep.subr.bf16.mxu0 %v23263_v18 }
 0x483   : > { %7943 = vmatmul.mubr.bf16.gmra.mrb[96].mxu0 %v28436_v33  ;;  %v23273_v33 = vld [vmem:[#allocation2 + $0x730] ss:$24 sps:$4 sm:$0xff]  }
 0x484   : > { %7952 = vmatprep.mubr.bf16.mxu0 %v28419_v0  ;;  %8008 = vmatpush1.bf16.msra.mxu0 %v23261_v32  ;;  %v23278_v0 = vld [vmem:[#allocation2 + $0x764] ss:$24 sps:$4 sm:$0xff]  }
 0x485   : > { %8009 = vmatprep.subr.bf16.mxu0 %v23266_v23 }
 0x488   : > { %8010 = vmatpush1.bf16.msra.mxu0 %v23264_v5 }
 0x489   : > { %8011 = vmatprep.subr.bf16.mxu0 %v23269_v62 }
 0x48b   : > { %7953 = vmatmul.mubr.bf16.gmra.mrb[100].mxu0 %v28421_v53  ;;  %v23279_v53 = vld [vmem:[#allocation2 + $0x790] ss:$24 sps:$4 sm:$0xff]  }
 0x48c   : > { %7962 = vmatprep.mubr.bf16.mxu0 %v28422_v48  ;;  %8012 = vmatpush1.bf16.msra.mxu0 %v23267_v35  ;;  %v23284_v48 = vld [vmem:[#allocation2 + $0x7c4] ss:$24 sps:$4 sm:$0xff]  }
 0x48d   : > { %8013 = vmatprep.subr.bf16.mxu0 %v23272_v2 }
 0x490   : > { %8014 = vmatpush1.bf16.msra.mxu0 %v23270_v45 }
 0x491   : > { %8015 = vmatprep.subr.bf16.mxu0 %v23275_v46 }
 0x493   : > { %7963 = vmatmul.mubr.bf16.gmra.mrb[104].mxu0 %v28423_v57  ;;  %v23285_v57 = vld [vmem:[#allocation2 + $0x7f0] ss:$24 sps:$4 sm:$0xff]  }
 0x494   : > { %7972 = vmatprep.mubr.bf16.mxu0 %v28424_v4  ;;  %8016 = vmatpush1.bf16.msra.mxu0 %v23273_v33  ;;  %v23290_v4 = vld [vmem:[#allocation2 + $0x824] ss:$24 sps:$4 sm:$0xff]  }
 0x495   : > { %8017 = vmatprep.subr.bf16.mxu0 %v23278_v0 }
 0x498   : > { %8018 = vmatpush1.bf16.msra.mxu0 %v23276_v25 }
 0x499   : > { %8019 = vmatprep.subr.bf16.mxu0 %v23281_v7 }
 0x49b   : > { %7973 = vmatmul.mubr.bf16.gmra.mrb[108].mxu0 %v28425_v49  ;;  %v23291_v49 = vld [vmem:[#allocation2 + $0x850] ss:$24 sps:$4 sm:$0xff]  }
 0x49c   : > { %7982 = vmatprep.mubr.bf16.mxu0 %v25103_v13  ;;  %8020 = vmatpush1.bf16.msra.mxu0 %v23279_v53  ;;  %v23296_v13 = vld [vmem:[#allocation2 + $0x884] ss:$24 sps:$4 sm:$0xff]  }
 0x49d   : > { %8021 = vmatprep.subr.bf16.mxu0 %v23284_v48 }
 0x4a0   : > { %8022 = vmatpush1.bf16.msra.mxu0 %v23282_v59 }
 0x4a1   : > { %8023 = vmatprep.subr.bf16.mxu0 %v23287_v61 }
 0x4a3   : > { %7983 = vmatmul.mubr.bf16.gmra.mrb[112].mxu0 %v25095_v3  ;;  %v23297_v3 = vld [vmem:[#allocation2 + $0x8b0] ss:$24 sps:$4 sm:$0xff]  }
 0x4a4   : > { %7992 = vmatprep.mubr.bf16.mxu0 %v25137_v38  ;;  %8024 = vmatpush1.bf16.msra.mxu0 %v23285_v57  ;;  %v23302_v38 = vld [vmem:[#allocation2 + $0x8e4] ss:$24 sps:$4 sm:$0xff]  }
 0x4a5   : > { %8025 = vmatprep.subr.bf16.mxu0 %v23290_v4 }
 0x4a8   : > { %8026 = vmatpush1.bf16.msra.mxu0 %v23288_v44 }
 0x4a9   : > { %8027 = vmatprep.subr.bf16.mxu0 %v23293_v12 }
 0x4ab   : > { %7993 = vmatmul.mubr.bf16.gmra.mrb[116].mxu0 %v25133_v24  ;;  %v23311_v24 = vld [vmem:[#allocation2 + $0x974] ss:$24 sps:$4 sm:$0xff]  }
 0x4ac   : > { %8028 = vmatpush1.bf16.msra.mxu0 %v23291_v49  ;;  %8035 = vmatprep.mubr.bf16.mxu0 %v25163_v47  ;;  %v23306_v47 = vld [vmem:[#allocation2 + $0x940] ss:$24 sps:$4 sm:$0xff]  }
 0x4ad   : > { %8029 = vmatprep.subr.bf16.mxu0 %v23296_v13 }
 0x4b0   : > { %8030 = vmatpush1.bf16.msra.mxu0 %v23294_v27 }
 0x4b1   : > { %8031 = vmatprep.subr.bf16.mxu0 %v23299_v20 }
 0x4b4   : > { %8032 = vmatpush1.bf16.msra.mxu0 %v23297_v3 }
 0x4b5   : > { %8033 = vmatprep.subr.bf16.mxu0 %v23302_v38 }
 0x4b8   : > { %8034 = vmatpush1.bf16.msra.mxu0 %v23300_v52 }
 0x4b9   : > { %8106 = vmatprep.subr.bf16.mxu0 %v23305_v1 }
 0x4bb   : > { %8036 = vmatmul.mubr.bf16.vlgmr.msra.gmra.mrb[92].mxu0 %v25159_v42  ;;  %v11627_v42 = vld [vmem:[%s28073_s4] sm:$0x3f] }
 0x4bc   : > { %8045 = vmatprep.mubr.bf16.mxu0 %v25192_v15  ;;  %8107 = vmatpush1.bf16.msra.mxu0 %v23303_v22  ;;  %v28578_v15 = vld [vmem:[#allocation9_spill] sm:$0xff] }
 0x4bd   : > { %8108 = vmatprep.subr.bf16.mxu0 %v23308_v39  ;;  %v28579_v56 = vsub.s32 2, %v28578_v15 }
 0x4bf   : > { %v26219_v18 = vrot.slane %v11627_v42, %v28579_v56 }
 0x4c0   : > { %8109 = vmatpush1.bf16.msra.mxu0 %v23306_v47 }
 0x4c1   : > { %8110 = vmatprep.subr.bf16.mxu0 %v23311_v24 }
 0x4c3   : > { %8046 = vmatmul.mubr.bf16.gmra.mrb[96].mxu0 %v25190_v55  ;;  %v28580_v55 = vsub.s32 3, %v28578_v15 }
 0x4c4   : > { %8055 = vmatprep.mubr.bf16.mxu0 %v25211_v50  ;;  %8111 = vmatpush1.bf16.msra.mxu0 %v23309_v54 }
 0x4c5   : > { %8112 = vmatprep.subr.bf16.mxu0 %v23314_v17  ;;  %v26223_v50 = vrot.slane %v11627_v42, %v28580_v55 }
 0x4c8   : > { %8113 = vmatpush1.bf16.msra.mxu0 %v23312_v14 }
 0x4c9   : > { %10307 = vmatprep.subr.bf16.mxu0 %v23317_v60 }
 0x4cb   : > { %8056 = vmatmul.mubr.bf16.gmra.mrb[100].mxu0 %v25202_v41 }
 0x4cc   : > { %8065 = vmatprep.mubr.bf16.mxu0 %v25230_v19 }
 0x4cf   : > { %v11062_v32 = vpop.f32.mrb[48].mxu1 }
 0x4d0   : > { %v11661_v23 = vadd.f32 %v26219_v18, %v11062_v32  ;;  %v11064_v5 = vpop.f32.mrb[49].mxu1 }
 0x4d1   : > { %v11662_v62 = vadd.f32 %v26223_v50, %v11064_v5  ;;  %v11066_v35 = vpop.f32.mrb[50].mxu1 }
 0x4d2   : > { %v11667_v2 = vadd.f32 %v26219_v18, %v11066_v35  ;;  %v11068_v41 = vpop.f32.mrb[51].mxu1  ;;  %v11745_v45 = vmax.f32 %v11661_v23, 0.0 }
 0x4d3   : > { %v11668_v19 = vadd.f32 %v26223_v50, %v11068_v41  ;;  %8066 = vmatmul.mubr.bf16.gmra.mrb[104].mxu0 %v25226_v37  ;;  %v11746_v33 = vmax.f32 %v11662_v62, 0.0 }
 0x4d4   : > { %v11751_v46 = vmax.f32 %v11667_v2, 0.0  ;;  %8075 = vmatprep.mubr.bf16.mxu0 %v25258_v11 }
 0x4d5   : > { %v11752_v0 = vmax.f32 %v11668_v19, 0.0 }
 0x4d6   : > { %v26231_v25 = vpack.c.bf16 %v11751_v46, %v11745_v45 }
 0x4d7   : > { %v26233_v7 = vpack.c.bf16 %v11752_v0, %v11746_v33  ;;  %v11072_v53 = vpop.f32.mrb[52].mxu1 }
 0x4d8   : > { %v11673_v48 = vadd.f32 %v26219_v18, %v11072_v53  ;;  %v11074_v59 = vpop.f32.mrb[53].mxu1  ;;  %v23315_v53 = vld [vmem:[#allocation2 + $0x1380] ss:$24 sps:$4 sm:$0xff]  }
 0x4d9   : > { %v11674_v61 = vadd.f32 %v26223_v50, %v11074_v59  ;;  %v11076_v57 = vpop.f32.mrb[54].mxu1 }
 0x4da   : > { %v11679_v4 = vadd.f32 %v26219_v18, %v11076_v57  ;;  %v11078_v37 = vpop.f32.mrb[55].mxu1  ;;  %v11757_v11 = vmax.f32 %v11673_v48, 0.0 }
 0x4db   : > { %v11680_v44 = vadd.f32 %v26223_v50, %v11078_v37  ;;  %8076 = vmatmul.mubr.bf16.gmra.mrb[108].mxu0 %v25254_v58  ;;  %v11758_v49 = vmax.f32 %v11674_v61, 0.0  ;;  %v23320_v61 = vld [vmem:[#allocation2 + $0x13b4] ss:$24 sps:$4 sm:$0xff]  }
 0x4dc   : > { %v11763_v12 = vmax.f32 %v11679_v4, 0.0  ;;  %8085 = vmatprep.mubr.bf16.mxu0 %v25295_v26 }
 0x4dd   : > { %v11764_v13 = vmax.f32 %v11680_v44, 0.0 }
 0x4de   : > { %v26241_v27 = vpack.c.bf16 %v11763_v12, %v11757_v11  ;;  %v23318_v11 = vld [vmem:[#allocation2 + $0x13b0] ss:$24 sps:$4 sm:$0xff]  }
 0x4df   : > { %v26243_v20 = vpack.c.bf16 %v11764_v13, %v11758_v49  ;;  %v11082_v3 = vpop.f32.mrb[56].mxu1  ;;  %v23323_v13 = vld [vmem:[#allocation2 + $0x13e4] ss:$24 sps:$4 sm:$0xff]  }
 0x4e0   : > { %v11685_v38 = vadd.f32 %v26219_v18, %v11082_v3  ;;  %v11084_v52 = vpop.f32.mrb[57].mxu1 }
 0x4e1   : > { %v11686_v1 = vadd.f32 %v26223_v50, %v11084_v52  ;;  %v11086_v22 = vpop.f32.mrb[58].mxu1 }
 0x4e2   : > { %v11691_v39 = vadd.f32 %v26219_v18, %v11086_v22  ;;  %v11088_v58 = vpop.f32.mrb[59].mxu1  ;;  %v11769_v26 = vmax.f32 %v11685_v38, 0.0 }
 0x4e3   : > { %v11692_v47 = vadd.f32 %v26223_v50, %v11088_v58  ;;  %8086 = vmatmul.mubr.bf16.gmra.mrb[112].mxu0 %v25288_v16  ;;  %v11770_v54 = vmax.f32 %v11686_v1, 0.0 }
 0x4e4   : > { %v11775_v24 = vmax.f32 %v11691_v39, 0.0  ;;  %8095 = vmatprep.mubr.bf16.mxu0 %v25334_v31 }
 0x4e5   : > { %v11776_v17 = vmax.f32 %v11692_v47, 0.0  ;;  %v23326_v47 = vld [vmem:[#allocation2 + $0x1414] ss:$24 sps:$4 sm:$0xff]  }
 0x4e6   : > { %v26251_v14 = vpack.c.bf16 %v11775_v24, %v11769_v26 }
 0x4e7   : > { %v26253_v60 = vpack.c.bf16 %v11776_v17, %v11770_v54  ;;  %v11092_v42 = vpop.f32.mrb[60].mxu1 }
 0x4e8   : > { %28581 = vst [vmem:[#allocation15_spill] sm:$0xff] %v26251_v14  ;;  %v11697_v56 = vadd.f32 %v26219_v18, %v11092_v42  ;;  %v11094_v55 = vpop.f32.mrb[61].mxu1  ;;  %v28633_v14 = vld [vmem:[#allocation41_spill] sm:$0xff] }
 0x4e9   : > { %28582 = vst [vmem:[#allocation14_spill] sm:$0xff] %v26253_v60  ;;  %v11698_v32 = vadd.f32 %v26223_v50, %v11094_v55  ;;  %v11096_v23 = vpop.f32.mrb[62].mxu1  ;;  %v28634_v60 = vld [vmem:[#allocation40_spill] sm:$0xff] }
 0x4ea   : > { %v11703_v5 = vadd.f32 %v26219_v18, %v11096_v23  ;;  %v11098_v16 = vpop.f32.mrb[63].mxu1  ;;  %v11781_v31 = vmax.f32 %v11697_v56, 0.0  ;;  %v23324_v56 = vld [vmem:[#allocation2 + $0x1410] ss:$24 sps:$4 sm:$0xff]   ;;  %v23329_v23 = vld [vmem:[#allocation2 + $0x1444] ss:$24 sps:$4 sm:$0xff]  }
 0x4eb   : > { %v11704_v62 = vadd.f32 %v26223_v50, %v11098_v16  ;;  %8096 = vmatmul.mubr.bf16.gmra.mrb[116].mxu0 %v28438_v6  ;;  %v11782_v2 = vmax.f32 %v11698_v32, 0.0 }
 0x4ec   : > { %v11787_v35 = vmax.f32 %v11703_v5, 0.0  ;;  %8138 = vmatprep.mubr.bf16.mxu0 %v28439_v36 }
 0x4ed   : > { %v11788_v41 = vmax.f32 %v11704_v62, 0.0 }
 0x4ee   : > { %v26261_v19 = vpack.c.bf16 %v11787_v35, %v11781_v31 }
 0x4ef   : > { %v26263_v45 = vpack.c.bf16 %v11788_v41, %v11782_v2  ;;  %v11102_v46 = vpop.f32.mrb[64].mxu1 }
 0x4f0   : > { %28583 = vst [vmem:[#allocation20_spill] sm:$0xff] %v26261_v19  ;;  %v11709_v33 = vadd.f32 %v26219_v18, %v11102_v46  ;;  %v11104_v0 = vpop.f32.mrb[65].mxu1  ;;  %v23332_v46 = vld [vmem:[#allocation2 + $0x1474] ss:$24 sps:$4 sm:$0xff]   ;;  %v28631_v19 = vld [vmem:[#allocation36_spill] sm:$0xff] }
 0x4f1   : > { %28584 = vst [vmem:[#allocation69_spill] sm:$0xff] %v26263_v45  ;;  %v11710_v48 = vadd.f32 %v26223_v50, %v11104_v0  ;;  %v11106_v59 = vpop.f32.mrb[66].mxu1  ;;  %v28632_v45 = vld [vmem:[#allocation34_spill] sm:$0xff] }
 0x4f2   : > { %v11715_v6 = vadd.f32 %v26219_v18, %v11106_v59  ;;  %v11108_v57 = vpop.f32.mrb[67].mxu1  ;;  %v11793_v37 = vmax.f32 %v11709_v33, 0.0 }
 0x4f3   : > { %v11716_v4 = vadd.f32 %v26223_v50, %v11108_v57  ;;  %19266 = vmatmul.mubr.msk.bf16.vlgmr.msra.gmra.mrb[92].mxu0 %vm4141_vm3, %v28441_v9  ;;  %v11794_v12 = vmax.f32 %v11710_v48, 0.0  ;;  %v23321_v9 = vld [vmem:[#allocation2 + $0x13e0] ss:$24 sps:$4 sm:$0xff]  }
 0x4f4   : > { %v11799_v44 = vmax.f32 %v11715_v6, 0.0  ;;  %10308 = vmatpush1.bf16.msra.mxu0 %v23315_v53  ;;  %8148 = vmatprep.mubr.bf16.mxu0 %v28439_v36 }
 0x4f5   : > { %v11800_v49 = vmax.f32 %v11716_v4, 0.0  ;;  %10309 = vmatprep.subr.bf16.mxu0 %v23320_v61  ;;  %v23330_v61 = vld [vmem:[#allocation2 + $0x1470] ss:$24 sps:$4 sm:$0xff]   ;;  %v23335_v4 = vld [vmem:[#allocation2 + $0x14a4] ss:$24 sps:$4 sm:$0xff]  }
 0x4f6   : > { %v26272_v3 = vpack.c.bf16 %v11799_v44, %v11793_v37 }
 0x4f7   : > { %v26274_v38 = vpack.c.bf16 %v11800_v49, %v11794_v12  ;;  %v11112_v52 = vpop.f32.mrb[68].mxu1  ;;  %v23339_v12 = vld [vmem:[#allocation2 + $0x1500] ss:$24 sps:$4 sm:$0xff]   ;;  %v23344_v49 = vld [vmem:[#allocation2 + $0x1534] ss:$24 sps:$4 sm:$0xff]  }
 0x4f8   : > { %28585 = vst [vmem:[#allocation60_spill] sm:$0xff] %v26272_v3  ;;  %10310 = vmatpush1.bf16.msra.mxu0 %v23318_v11  ;;  %v11721_v1 = vadd.f32 %v26219_v18, %v11112_v52  ;;  %v11114_v22 = vpop.f32.mrb[69].mxu1  ;;  %v23341_v11 = vld [vmem:[#allocation2 + $0x1504] ss:$24 sps:$4 sm:$0xff]   ;;  %v23485_v3 = vld [vmem:[#allocation2 + $0x1454] ss:$24 sps:$4 sm:$0xff]  }
 0x4f9   : > { %28586 = vst [vmem:[#allocation70_spill] sm:$0xff] %v26274_v38  ;;  %v11722_v39 = vadd.f32 %v26223_v50, %v11114_v22  ;;  %v11116_v58 = vpop.f32.mrb[70].mxu1  ;;  %10311 = vmatprep.subr.bf16.mxu0 %v23323_v13  ;;  %v23342_v13 = vld [vmem:[#allocation2 + $0x1530] ss:$24 sps:$4 sm:$0xff]   ;;  %v23347_v52 = vld [vmem:[#allocation2 + $0x1564] ss:$24 sps:$4 sm:$0xff]  }
 0x4fa   : > { %v11727_v26 = vadd.f32 %v26219_v18, %v11116_v58  ;;  %v11118_v24 = vpop.f32.mrb[71].mxu1  ;;  %v11805_v17 = vmax.f32 %v11721_v1, 0.0  ;;  %v23350_v1 = vld [vmem:[#allocation2 + $0x1594] ss:$24 sps:$4 sm:$0xff]   ;;  %v23348_v22 = vld [vmem:[#allocation2 + $0x1590] ss:$24 sps:$4 sm:$0xff]  }
 0x4fb   : > { %v11728_v54 = vadd.f32 %v26223_v50, %v11118_v24  ;;  %19267 = vmatmul.mubr.msk.bf16.gmra.mrb[96].mxu0 %vm4141_vm3, %v28443_v29  ;;  %v11806_v55 = vmax.f32 %v11722_v39, 0.0  ;;  %v23327_v29 = vld [vmem:[#allocation2 + $0x1440] ss:$24 sps:$4 sm:$0xff]   ;;  %v23356_v39 = vld [vmem:[#allocation2 + $0x15f4] ss:$24 sps:$4 sm:$0xff]  }
 0x4fc   : > { %v11811_v42 = vmax.f32 %v11727_v26, 0.0  ;;  %10312 = vmatpush1.bf16.msra.mxu0 %v23321_v9  ;;  %8158 = vmatprep.mubr.bf16.mxu0 %v28439_v36  ;;  %v23353_v9 = vld [vmem:[#allocation2 + $0x15c4] ss:$24 sps:$4 sm:$0xff]   ;;  %v23362_v24 = vld [vmem:[#allocation2 + $0x1654] ss:$24 sps:$4 sm:$0xff]  }
 0x4fd   : > { %v11812_v32 = vmax.f32 %v11728_v54, 0.0  ;;  %10313 = vmatprep.subr.bf16.mxu0 %v23326_v47  ;;  %v28591_v58 = vld [vmem:[#allocation16_spill] sm:$0xff]  ;;  %v23354_v47 = vld [vmem:[#allocation2 + $0x15f0] ss:$24 sps:$4 sm:$0xff]  }
 0x4fe   : > { %v26283_v5 = vpack.c.bf16 %v11811_v42, %v11805_v17  ;;  %v23359_v26 = vld [vmem:[#allocation2 + $0x1624] ss:$24 sps:$4 sm:$0xff]   ;;  %v23360_v54 = vld [vmem:[#allocation2 + $0x1650] ss:$24 sps:$4 sm:$0xff]   ;;  %v23363_v42 = vld [vmem:[#allocation2 + $0x1680] ss:$24 sps:$4 sm:$0xff]  }
 0x4ff   : > { %v26285_v16 = vpack.c.bf16 %v11812_v32, %v11806_v55  ;;  %v11122_v62 = vpop.f32.mrb[72].mxu1  ;;  %v23365_v17 = vld [vmem:[#allocation2 + $0x1684] ss:$24 sps:$4 sm:$0xff]   ;;  %v23366_v32 = vld [vmem:[#allocation2 + $0x16b0] ss:$24 sps:$4 sm:$0xff]  }
 0x500   : > { %28587 = vst [vmem:[#allocation59_spill] sm:$0xff] %v26283_v5  ;;  %10314 = vmatpush1.bf16.msra.mxu0 %v23324_v56  ;;  %v11733_v31 = vadd.f32 %v26219_v18, %v11122_v62  ;;  %v11124_v35 = vpop.f32.mrb[73].mxu1  ;;  %v23368_v56 = vld [vmem:[#allocation2 + $0x16b4] ss:$24 sps:$4 sm:$0xff]   ;;  %v28592_v55 = vld [vmem:[#allocation17_spill] sm:$0xff] }
 0x501   : > { %28588 = vst [vmem:[#allocation71_spill] sm:$0xff] %v26285_v16  ;;  %v11734_v2 = vadd.f32 %v26223_v50, %v11124_v35  ;;  %v11126_v41 = vpop.f32.mrb[74].mxu1  ;;  %10315 = vmatprep.subr.bf16.mxu0 %v23329_v23  ;;  %v23371_v23 = vld [vmem:[#allocation2 + $0x16e4] ss:$24 sps:$4 sm:$0xff]   ;;  %v23369_v62 = vld [vmem:[#allocation2 + $0x16e0] ss:$24 sps:$4 sm:$0xff]  }
 0x502   : > { %v11739_v33 = vadd.f32 %v26219_v18, %v11126_v41  ;;  %v11128_v0 = vpop.f32.mrb[75].mxu1  ;;  %v11817_v48 = vmax.f32 %v11733_v31, 0.0  ;;  %v23333_v18 = vld [vmem:[#allocation2 + $0x14a0] ss:$24 sps:$4 sm:$0xff]   ;;  %v23374_v31 = vld [vmem:[#allocation2 + $0x1714] ss:$24 sps:$4 sm:$0xff]  }
 0x503   : > { %v11740_v53 = vadd.f32 %v26223_v50, %v11128_v0  ;;  %19268 = vmatmul.mubr.msk.bf16.gmra.mrb[100].mxu0 %vm4141_vm3, %v28566_v34  ;;  %v11818_v6 = vmax.f32 %v11734_v2, 0.0  ;;  %v23338_v50 = vld [vmem:[#allocation2 + $0x14d4] ss:$24 sps:$4 sm:$0xff]   ;;  %v23336_v34 = vld [vmem:[#allocation2 + $0x14d0] ss:$24 sps:$4 sm:$0xff]   ;;  %v28630_v5 = vld [vmem:[#allocation57_spill] sm:$0xff] }
 0x504   : > { %v11823_v59 = vmax.f32 %v11739_v33, 0.0  ;;  %10316 = vmatpush1.bf16.msra.mxu0 %v23327_v29  ;;  %8168 = vmatprep.mubr.bf16.mxu0 %v28439_v36  ;;  %v28594_v35 = vld [vmem:[#allocation22_spill] sm:$0xff]  ;;  %v28595_v29 = vld [vmem:[#allocation13_spill] sm:$0xff]  ;;  %v28596_v0 = vld [vmem:[#allocation23_spill] sm:$0xff] }
 0x505   : > { %v11824_v57 = vmax.f32 %v11740_v53, 0.0  ;;  %10317 = vmatprep.subr.bf16.mxu0 %v23332_v46  ;;  %v23372_v2 = vld [vmem:[#allocation2 + $0x1710] ss:$24 sps:$4 sm:$0xff]   ;;  %v23377_v41 = vld [vmem:[#allocation2 + $0x1744] ss:$24 sps:$4 sm:$0xff]  }
 0x506   : > { %v26294_v37 = vpack.c.bf16 %v11823_v59, %v11817_v48  ;;  %v23375_v46 = vld [vmem:[#allocation2 + $0x1740] ss:$24 sps:$4 sm:$0xff]   ;;  %v23380_v33 = vld [vmem:[#allocation2 + $0x1774] ss:$24 sps:$4 sm:$0xff]   ;;  %v23378_v48 = vld [vmem:[#allocation2 + $0x1770] ss:$24 sps:$4 sm:$0xff]  }
 0x507   : > { %v26296_v44 = vpack.c.bf16 %v11824_v57, %v11818_v6  ;;  %v28597_v53 = vld [vmem:[#allocation12_spill] sm:$0xff]  ;;  %v23386_v6 = vld [vmem:[#allocation2 + $0x17d4] ss:$24 sps:$4 sm:$0xff]  }
 0x508   : > { %28589 = vst [vmem:[#allocation58_spill] sm:$0xff] %v26294_v37  ;;  %10318 = vmatpush1.bf16.msra.mxu0 %v23330_v61  ;;  %v23383_v59 = vld [vmem:[#allocation2 + $0x17a4] ss:$24 sps:$4 sm:$0xff]   ;;  %v23381_v61 = vld [vmem:[#allocation2 + $0x17a0] ss:$24 sps:$4 sm:$0xff]  }
 0x509   : > { %28590 = vst [vmem:[#allocation72_spill] sm:$0xff] %v26296_v44  ;;  %10319 = vmatprep.subr.bf16.mxu0 %v23335_v4  ;;  %v28598_v57 = vld [vmem:[#allocation28_spill] sm:$0xff]  ;;  %v28599_v4 = vld [vmem:[#allocation19_spill] sm:$0xff] }
 0x50a   : > { %v23477_v37 = vld [vmem:[#allocation2 + $0x13f0] ss:$24 sps:$4 sm:$0xff]   ;;  %v23482_v44 = vld [vmem:[#allocation2 + $0x1424] ss:$24 sps:$4 sm:$0xff]   ;;  %v23480_v16 = vld [vmem:[#allocation2 + $0x1420] ss:$24 sps:$4 sm:$0xff]  }
 0x50b   : > { %19269 = vmatmul.mubr.msk.bf16.gmra.mrb[104].mxu0 %vm4141_vm3, %v28568_v43  ;;  %v23345_v43 = vld [vmem:[#allocation2 + $0x1560] ss:$24 sps:$4 sm:$0xff]   ;;  %v23488_v38 = vld [vmem:[#allocation2 + $0x1484] ss:$24 sps:$4 sm:$0xff]  }
 0x50c   : > { %10320 = vmatpush1.bf16.msra.mxu0 %v23333_v18  ;;  %8178 = vmatprep.mubr.bf16.mxu0 %v28439_v36  ;;  %v23384_v18 = vld [vmem:[#allocation2 + $0x17d0] ss:$24 sps:$4 sm:$0xff]  }
 0x50d   : > { %10321 = vmatprep.subr.bf16.mxu0 %v23338_v50  ;;  %v23389_v50 = vld [vmem:[#allocation2 + $0x1804] ss:$24 sps:$4 sm:$0xff]  }
 0x510   : > { %10322 = vmatpush1.bf16.msra.mxu0 %v23336_v34  ;;  %v23387_v34 = vld [vmem:[#allocation2 + $0x1800] ss:$24 sps:$4 sm:$0xff]  }
 0x511   : > { %10323 = vmatprep.subr.bf16.mxu0 %v23341_v11  ;;  %v23392_v11 = vld [vmem:[#allocation2 + $0x1834] ss:$24 sps:$4 sm:$0xff]  }
 0x513   : > { %19270 = vmatmul.mubr.msk.bf16.gmra.mrb[108].mxu0 %vm4141_vm3, %v28570_v8  ;;  %v23351_v8 = vld [vmem:[#allocation2 + $0x15c0] ss:$24 sps:$4 sm:$0xff]  }
 0x514   : > { %10324 = vmatpush1.bf16.msra.mxu0 %v23339_v12  ;;  %8188 = vmatprep.mubr.bf16.mxu0 %v28439_v36  ;;  %v28600_v12 = vld [vmem:[#allocation29_spill] sm:$0xff] }
 0x515   : > { %10325 = vmatprep.subr.bf16.mxu0 %v23344_v49  ;;  %v28601_v49 = vld [vmem:[#allocation18_spill] sm:$0xff] }
 0x518   : > { %10326 = vmatpush1.bf16.msra.mxu0 %v23342_v13  ;;  %v23390_v13 = vld [vmem:[#allocation2 + $0x1830] ss:$24 sps:$4 sm:$0xff]  }
 0x519   : > { %10327 = vmatprep.subr.bf16.mxu0 %v23347_v52  ;;  %v23395_v52 = vld [vmem:[#allocation2 + $0x1864] ss:$24 sps:$4 sm:$0xff]  }
 0x51b   : > { %19271 = vmatmul.mubr.msk.bf16.gmra.mrb[112].mxu0 %vm4141_vm3, %v28572_v21  ;;  %v23357_v21 = vld [vmem:[#allocation2 + $0x1620] ss:$24 sps:$4 sm:$0xff]  }
 0x51c   : > { %10328 = vmatpush1.bf16.msra.mxu0 %v23345_v43  ;;  %8198 = vmatprep.mubr.bf16.mxu0 %v28439_v36  ;;  %v23393_v43 = vld [vmem:[#allocation2 + $0x1860] ss:$24 sps:$4 sm:$0xff]  }
 0x51d   : > { %10329 = vmatprep.subr.bf16.mxu0 %v23350_v1  ;;  %v23398_v1 = vld [vmem:[#allocation2 + $0x1894] ss:$24 sps:$4 sm:$0xff]  }
 0x520   : > { %10330 = vmatpush1.bf16.msra.mxu0 %v23348_v22  ;;  %v28602_v22 = vld [vmem:[#allocation33_spill] sm:$0xff] }
 0x521   : > { %10331 = vmatprep.subr.bf16.mxu0 %v23353_v9  ;;  %v23396_v9 = vld [vmem:[#allocation2 + $0x1890] ss:$24 sps:$4 sm:$0xff]  }
 0x523   : > { %19272 = vmatmul.mubr.msk.bf16.gmra.mrb[116].mxu0 %vm4141_vm3, %v28574_v63  ;;  %v28593_v63 = vld [vmem:[#allocation10_spill] sm:$0xff] }
 0x524   : > { %10332 = vmatpush1.bf16.msra.mxu0 %v23351_v8  ;;  %10339 = vmatprep.mubr.bf16.mxu0 %v28591_v58  ;;  %v23401_v8 = vld [vmem:[#allocation2 + $0x18c4] ss:$24 sps:$4 sm:$0xff]  }
 0x525   : > { %10333 = vmatprep.subr.bf16.mxu0 %v23356_v39  ;;  %v23399_v39 = vld [vmem:[#allocation2 + $0x18c0] ss:$24 sps:$4 sm:$0xff]  }
 0x528   : > { %10334 = vmatpush1.bf16.msra.mxu0 %v23354_v47  ;;  %v23404_v47 = vld [vmem:[#allocation2 + $0x18f4] ss:$24 sps:$4 sm:$0xff]  }
 0x529   : > { %10335 = vmatprep.subr.bf16.mxu0 %v23359_v26  ;;  %v28603_v26 = vld [vmem:[#allocation25_spill] sm:$0xff] }
 0x52c   : > { %10336 = vmatpush1.bf16.msra.mxu0 %v23357_v21  ;;  %v23402_v21 = vld [vmem:[#allocation2 + $0x18f0] ss:$24 sps:$4 sm:$0xff]  }
 0x52d   : > { %10337 = vmatprep.subr.bf16.mxu0 %v23362_v24  ;;  %v23407_v24 = vld [vmem:[#allocation2 + $0x1924] ss:$24 sps:$4 sm:$0xff]  }
 0x530   : > { %10338 = vmatpush1.bf16.msra.mxu0 %v23360_v54  ;;  %v23405_v54 = vld [vmem:[#allocation2 + $0x1920] ss:$24 sps:$4 sm:$0xff]  }
 0x531   : > { %10410 = vmatprep.subr.bf16.mxu0 %v23365_v17  ;;  %v23410_v17 = vld [vmem:[#allocation2 + $0x1954] ss:$24 sps:$4 sm:$0xff]  }
 0x533   : > { %10340 = vmatmul.mubr.bf16.vlgmr.msra.gmra.mrb[64].mxu0 %v28592_v55 }
 0x534   : > { %10349 = vmatprep.mubr.bf16.mxu0 %v28593_v63  ;;  %10411 = vmatpush1.bf16.msra.mxu0 %v23363_v42  ;;  %v23408_v42 = vld [vmem:[#allocation2 + $0x1950] ss:$24 sps:$4 sm:$0xff]  }
 0x535   : > { %10412 = vmatprep.subr.bf16.mxu0 %v23368_v56  ;;  %v23413_v56 = vld [vmem:[#allocation2 + $0x1984] ss:$24 sps:$4 sm:$0xff]  }
 0x538   : > { %10413 = vmatpush1.bf16.msra.mxu0 %v23366_v32  ;;  %v23411_v32 = vld [vmem:[#allocation2 + $0x1980] ss:$24 sps:$4 sm:$0xff]  }
 0x539   : > { %10414 = vmatprep.subr.bf16.mxu0 %v23371_v23  ;;  %v23416_v23 = vld [vmem:[#allocation2 + $0x19b4] ss:$24 sps:$4 sm:$0xff]  }
 0x53b   : > { %10350 = vmatmul.mubr.bf16.gmra.mrb[68].mxu0 %v28594_v35 }
 0x53c   : > { %10359 = vmatprep.mubr.bf16.mxu0 %v28595_v29  ;;  %10415 = vmatpush1.bf16.msra.mxu0 %v23369_v62  ;;  %v28604_v62 = vld [vmem:[#allocation35_spill] sm:$0xff] }
 0x53d   : > { %10416 = vmatprep.subr.bf16.mxu0 %v23374_v31  ;;  %v23414_v31 = vld [vmem:[#allocation2 + $0x19b0] ss:$24 sps:$4 sm:$0xff]  }
 0x540   : > { %10417 = vmatpush1.bf16.msra.mxu0 %v23372_v2  ;;  %v23419_v2 = vld [vmem:[#allocation2 + $0x19e4] ss:$24 sps:$4 sm:$0xff]  }
 0x541   : > { %10418 = vmatprep.subr.bf16.mxu0 %v23377_v41  ;;  %v23417_v41 = vld [vmem:[#allocation2 + $0x19e0] ss:$24 sps:$4 sm:$0xff]  }
 0x543   : > { %10360 = vmatmul.mubr.bf16.gmra.mrb[72].mxu0 %v28596_v0 }
 0x544   : > { %10369 = vmatprep.mubr.bf16.mxu0 %v28597_v53  ;;  %10419 = vmatpush1.bf16.msra.mxu0 %v23375_v46  ;;  %v23422_v46 = vld [vmem:[#allocation2 + $0x1a14] ss:$24 sps:$4 sm:$0xff]  }
 0x545   : > { %10420 = vmatprep.subr.bf16.mxu0 %v23380_v33  ;;  %v28605_v33 = vld [vmem:[#allocation24_spill] sm:$0xff] }
 0x548   : > { %10421 = vmatpush1.bf16.msra.mxu0 %v23378_v48  ;;  %v28606_v48 = vld [vmem:[#allocation38_spill] sm:$0xff] }
 0x549   : > { %10422 = vmatprep.subr.bf16.mxu0 %v23383_v59  ;;  %v23420_v59 = vld [vmem:[#allocation2 + $0x1a10] ss:$24 sps:$4 sm:$0xff]  }
 0x54b   : > { %10370 = vmatmul.mubr.bf16.gmra.mrb[76].mxu0 %v28598_v57 }
 0x54c   : > { %10379 = vmatprep.mubr.bf16.mxu0 %v28599_v4  ;;  %10423 = vmatpush1.bf16.msra.mxu0 %v23381_v61  ;;  %v23425_v61 = vld [vmem:[#allocation2 + $0x1a44] ss:$24 sps:$4 sm:$0xff]  }
 0x54d   : > { %10424 = vmatprep.subr.bf16.mxu0 %v23386_v6  ;;  %v23423_v6 = vld [vmem:[#allocation2 + $0x1a40] ss:$24 sps:$4 sm:$0xff]  }
 0x550   : > { %10425 = vmatpush1.bf16.msra.mxu0 %v23384_v18  ;;  %v23428_v18 = vld [vmem:[#allocation2 + $0x1a74] ss:$24 sps:$4 sm:$0xff]  }
 0x551   : > { %10426 = vmatprep.subr.bf16.mxu0 %v23389_v50  ;;  %v28607_v50 = vld [vmem:[#allocation31_spill] sm:$0xff] }
 0x553   : > { %10380 = vmatmul.mubr.bf16.gmra.mrb[80].mxu0 %v28600_v12 }
 0x554   : > { %10389 = vmatprep.mubr.bf16.mxu0 %v28601_v49  ;;  %10427 = vmatpush1.bf16.msra.mxu0 %v23387_v34  ;;  %v28608_v34 = vld [vmem:[#allocation39_spill] sm:$0xff] }
 0x555   : > { %10428 = vmatprep.subr.bf16.mxu0 %v23392_v11  ;;  %v23426_v11 = vld [vmem:[#allocation2 + $0x1a70] ss:$24 sps:$4 sm:$0xff]  }
 0x558   : > { %10429 = vmatpush1.bf16.msra.mxu0 %v23390_v13  ;;  %v23431_v13 = vld [vmem:[#allocation2 + $0x1aa4] ss:$24 sps:$4 sm:$0xff]  }
 0x559   : > { %10430 = vmatprep.subr.bf16.mxu0 %v23395_v52  ;;  %v23429_v52 = vld [vmem:[#allocation2 + $0x1aa0] ss:$24 sps:$4 sm:$0xff]  }
 0x55b   : > { %10390 = vmatmul.mubr.bf16.gmra.mrb[84].mxu0 %v28602_v22 }
 0x55c   : > { %10399 = vmatprep.mubr.bf16.mxu0 %v25854_v51  ;;  %10431 = vmatpush1.bf16.msra.mxu0 %v23393_v43  ;;  %v23434_v43 = vld [vmem:[#allocation2 + $0x1ad4] ss:$24 sps:$4 sm:$0xff]  }
 0x55d   : > { %10432 = vmatprep.subr.bf16.mxu0 %v23398_v1  ;;  %v28609_v1 = vld [vmem:[#allocation30_spill] sm:$0xff] }
 0x560   : > { %10433 = vmatpush1.bf16.msra.mxu0 %v23396_v9  ;;  %v28610_v9 = vld [vmem:[#allocation45_spill] sm:$0xff] }
 0x561   : > { %10434 = vmatprep.subr.bf16.mxu0 %v23401_v8  ;;  %v23432_v8 = vld [vmem:[#allocation2 + $0x1ad0] ss:$24 sps:$4 sm:$0xff]  }
 0x563   : > { %10400 = vmatmul.mubr.bf16.gmra.mrb[88].mxu0 %v25865_v30 }
 0x564   : > { %10435 = vmatpush1.bf16.msra.mxu0 %v23399_v39  ;;  %10442 = vmatprep.mubr.bf16.mxu0 %v28603_v26  ;;  %v23437_v39 = vld [vmem:[#allocation2 + $0x1b04] ss:$24 sps:$4 sm:$0xff]  }
 0x565   : > { %10436 = vmatprep.subr.bf16.mxu0 %v23404_v47  ;;  %v23435_v47 = vld [vmem:[#allocation2 + $0x1b00] ss:$24 sps:$4 sm:$0xff]  }
 0x568   : > { %10437 = vmatpush1.bf16.msra.mxu0 %v23402_v21  ;;  %v23440_v21 = vld [vmem:[#allocation2 + $0x1b34] ss:$24 sps:$4 sm:$0xff]  }
 0x569   : > { %10438 = vmatprep.subr.bf16.mxu0 %v23407_v24  ;;  %v28611_v24 = vld [vmem:[#allocation46_spill] sm:$0xff] }
 0x56c   : > { %10439 = vmatpush1.bf16.msra.mxu0 %v23405_v54  ;;  %v28612_v54 = vld [vmem:[#allocation48_spill] sm:$0xff] }
 0x56d   : > { %10440 = vmatprep.subr.bf16.mxu0 %v23410_v17  ;;  %v23438_v17 = vld [vmem:[#allocation2 + $0x1b30] ss:$24 sps:$4 sm:$0xff]  }
 0x570   : > { %10441 = vmatpush1.bf16.msra.mxu0 %v23408_v42  ;;  %v23443_v42 = vld [vmem:[#allocation2 + $0x1b64] ss:$24 sps:$4 sm:$0xff]  }
 0x571   : > { %10513 = vmatprep.subr.bf16.mxu0 %v23413_v56  ;;  %v23441_v56 = vld [vmem:[#allocation2 + $0x1b60] ss:$24 sps:$4 sm:$0xff]  }
 0x573   : > { %10443 = vmatmul.mubr.bf16.vlgmr.msra.gmra.mrb[64].mxu0 %v25887_v40 }
 0x574   : > { %10452 = vmatprep.mubr.bf16.mxu0 %v28604_v62  ;;  %10514 = vmatpush1.bf16.msra.mxu0 %v23411_v32  ;;  %v23446_v32 = vld [vmem:[#allocation2 + $0x1b94] ss:$24 sps:$4 sm:$0xff]  }
 0x575   : > { %10515 = vmatprep.subr.bf16.mxu0 %v23416_v23  ;;  %v28613_v23 = vld [vmem:[#allocation49_spill] sm:$0xff] }
 0x578   : > { %10516 = vmatpush1.bf16.msra.mxu0 %v23414_v31  ;;  %v23444_v31 = vld [vmem:[#allocation2 + $0x1b90] ss:$24 sps:$4 sm:$0xff]  }
 0x579   : > { %10517 = vmatprep.subr.bf16.mxu0 %v23419_v2  ;;  %v23449_v2 = vld [vmem:[#allocation2 + $0x1bc4] ss:$24 sps:$4 sm:$0xff]  }
 0x57b   : > { %10453 = vmatmul.mubr.bf16.gmra.mrb[68].mxu0 %v28605_v33 }
 0x57c   : > { %10462 = vmatprep.mubr.bf16.mxu0 %v28606_v48  ;;  %10518 = vmatpush1.bf16.msra.mxu0 %v23417_v41  ;;  %v23447_v41 = vld [vmem:[#allocation2 + $0x1bc0] ss:$24 sps:$4 sm:$0xff]  }
 0x57d   : > { %10519 = vmatprep.subr.bf16.mxu0 %v23422_v46  ;;  %v23452_v46 = vld [vmem:[#allocation2 + $0x1bf4] ss:$24 sps:$4 sm:$0xff]  }
 0x580   : > { %10520 = vmatpush1.bf16.msra.mxu0 %v23420_v59  ;;  %v28614_v59 = vld [vmem:[#allocation50_spill] sm:$0xff] }
 0x581   : > { %10521 = vmatprep.subr.bf16.mxu0 %v23425_v61  ;;  %v28615_v61 = vld [vmem:[#allocation51_spill] sm:$0xff] }
 0x583   : > { %10463 = vmatmul.mubr.bf16.gmra.mrb[72].mxu0 %v28607_v50 }
 0x584   : > { %10472 = vmatprep.mubr.bf16.mxu0 %v28608_v34  ;;  %10522 = vmatpush1.bf16.msra.mxu0 %v23423_v6  ;;  %v23450_v6 = vld [vmem:[#allocation2 + $0x1bf0] ss:$24 sps:$4 sm:$0xff]  }
 0x585   : > { %10523 = vmatprep.subr.bf16.mxu0 %v23428_v18  ;;  %v23455_v18 = vld [vmem:[#allocation2 + $0x1c24] ss:$24 sps:$4 sm:$0xff]  }
 0x588   : > { %10524 = vmatpush1.bf16.msra.mxu0 %v23426_v11  ;;  %v23453_v11 = vld [vmem:[#allocation2 + $0x1c20] ss:$24 sps:$4 sm:$0xff]  }
 0x589   : > { %10525 = vmatprep.subr.bf16.mxu0 %v23431_v13  ;;  %v23458_v13 = vld [vmem:[#allocation2 + $0x1c54] ss:$24 sps:$4 sm:$0xff]  }
 0x58b   : > { %10473 = vmatmul.mubr.bf16.gmra.mrb[76].mxu0 %v28609_v1 }
 0x58c   : > { %10482 = vmatprep.mubr.bf16.mxu0 %v28610_v9  ;;  %10526 = vmatpush1.bf16.msra.mxu0 %v23429_v52  ;;  %v23456_v52 = vld [vmem:[#allocation2 + $0x1c50] ss:$24 sps:$4 sm:$0xff]  }
 0x58d   : > { %10527 = vmatprep.subr.bf16.mxu0 %v23434_v43  ;;  %v23461_v43 = vld [vmem:[#allocation2 + $0x1c84] ss:$24 sps:$4 sm:$0xff]  }
 0x590   : > { %10528 = vmatpush1.bf16.msra.mxu0 %v23432_v8  ;;  %v23459_v8 = vld [vmem:[#allocation2 + $0x1c80] ss:$24 sps:$4 sm:$0xff]  }
 0x591   : > { %10529 = vmatprep.subr.bf16.mxu0 %v23437_v39  ;;  %v23464_v39 = vld [vmem:[#allocation2 + $0x1cb4] ss:$24 sps:$4 sm:$0xff]  }
 0x593   : > { %10483 = vmatmul.mubr.bf16.gmra.mrb[80].mxu0 %v28611_v24 }
 0x594   : > { %10492 = vmatprep.mubr.bf16.mxu0 %v28612_v54  ;;  %10530 = vmatpush1.bf16.msra.mxu0 %v23435_v47  ;;  %v28616_v47 = vld [vmem:[#allocation52_spill] sm:$0xff] }
 0x595   : > { %10531 = vmatprep.subr.bf16.mxu0 %v23440_v21  ;;  %v28617_v21 = vld [vmem:[#allocation21_spill] sm:$0xff] }
 0x598   : > { %10532 = vmatpush1.bf16.msra.mxu0 %v23438_v17  ;;  %v23462_v17 = vld [vmem:[#allocation2 + $0x1cb0] ss:$24 sps:$4 sm:$0xff]  }
 0x599   : > { %10533 = vmatprep.subr.bf16.mxu0 %v23443_v42  ;;  %v23467_v42 = vld [vmem:[#allocation2 + $0x1ce4] ss:$24 sps:$4 sm:$0xff]  }
 0x59b   : > { %10493 = vmatmul.mubr.bf16.gmra.mrb[84].mxu0 %v28613_v23 }
 0x59c   : > { %10502 = vmatprep.mubr.bf16.mxu0 %v25986_v10  ;;  %10534 = vmatpush1.bf16.msra.mxu0 %v23441_v56  ;;  %v23465_v56 = vld [vmem:[#allocation2 + $0x1ce0] ss:$24 sps:$4 sm:$0xff]  }
 0x59d   : > { %10535 = vmatprep.subr.bf16.mxu0 %v23446_v32  ;;  %v23470_v32 = vld [vmem:[#allocation2 + $0x1d14] ss:$24 sps:$4 sm:$0xff]  }
 0x5a0   : > { %10536 = vmatpush1.bf16.msra.mxu0 %v23444_v31  ;;  %v28618_v31 = vld [vmem:[#allocation54_spill] sm:$0xff] }
 0x5a1   : > { %10537 = vmatprep.subr.bf16.mxu0 %v23449_v2  ;;  %v28619_v2 = vld [vmem:[#allocation53_spill] sm:$0xff] }
 0x5a3   : > { %10503 = vmatmul.mubr.bf16.gmra.mrb[88].mxu0 %v28614_v59 }
 0x5a4   : > { %10538 = vmatpush1.bf16.msra.mxu0 %v23447_v41  ;;  %10545 = vmatprep.mubr.bf16.mxu0 %v28615_v61  ;;  %v23468_v41 = vld [vmem:[#allocation2 + $0x1d10] ss:$24 sps:$4 sm:$0xff]  }
 0x5a5   : > { %10539 = vmatprep.subr.bf16.mxu0 %v23452_v46  ;;  %v23473_v46 = vld [vmem:[#allocation2 + $0x1394] ss:$24 sps:$4 sm:$0xff]  }
 0x5a8   : > { %10540 = vmatpush1.bf16.msra.mxu0 %v23450_v6  ;;  %v28620_v6 = vld [vmem:[#allocation27_spill] sm:$0xff] }
 0x5a9   : > { %10541 = vmatprep.subr.bf16.mxu0 %v23455_v18  ;;  %v28621_v18 = vld [vmem:[#allocation56_spill] sm:$0xff] }
 0x5ac   : > { %10542 = vmatpush1.bf16.msra.mxu0 %v23453_v11  ;;  %v28622_v11 = vld [vmem:[#allocation26_spill] sm:$0xff] }
 0x5ad   : > { %10543 = vmatprep.subr.bf16.mxu0 %v23458_v13  ;;  %v28623_v13 = vld [vmem:[#allocation37_spill] sm:$0xff] }
 0x5b0   : > { %10544 = vmatpush1.bf16.msra.mxu0 %v23456_v52  ;;  %v28624_v52 = vld [vmem:[#allocation32_spill] sm:$0xff] }
 0x5b1   : > { %10616 = vmatprep.subr.bf16.mxu0 %v23461_v43  ;;  %v28625_v43 = vld [vmem:[#allocation47_spill] sm:$0xff] }
 0x5b3   : > { %10546 = vmatmul.mubr.bf16.vlgmr.msra.gmra.mrb[64].mxu0 %v28616_v47 }
 0x5b4   : > { %10555 = vmatprep.mubr.bf16.mxu0 %v28617_v21  ;;  %10617 = vmatpush1.bf16.msra.mxu0 %v23459_v8  ;;  %v28626_v8 = vld [vmem:[#allocation42_spill] sm:$0xff] }
 0x5b5   : > { %10618 = vmatprep.subr.bf16.mxu0 %v23464_v39  ;;  %v28627_v39 = vld [vmem:[#allocation43_spill] sm:$0xff] }
 0x5b8   : > { %10619 = vmatpush1.bf16.msra.mxu0 %v23462_v17  ;;  %v28628_v17 = vld [vmem:[#allocation44_spill] sm:$0xff] }
 0x5b9   : > { %10620 = vmatprep.subr.bf16.mxu0 %v23467_v42  ;;  %v23471_v42 = vld [vmem:[#allocation2 + $0x1390] ss:$24 sps:$4 sm:$0xff]  }
 0x5bb   : > { %10556 = vmatmul.mubr.bf16.gmra.mrb[68].mxu0 %v28618_v31 }
 0x5bc   : > { %10565 = vmatprep.mubr.bf16.mxu0 %v28619_v2  ;;  %10621 = vmatpush1.bf16.msra.mxu0 %v23465_v56  ;;  %v23476_v56 = vld [vmem:[#allocation2 + $0x13c4] ss:$24 sps:$4 sm:$0xff]  }
 0x5bd   : > { %10622 = vmatprep.subr.bf16.mxu0 %v23470_v32  ;;  %v28629_v32 = vld [vmem:[#allocation61_spill] sm:$0xff] }
 0x5c0   : > { %10623 = vmatpush1.bf16.msra.mxu0 %v23468_v41  ;;  %v23474_v41 = vld [vmem:[#allocation2 + $0x13c0] ss:$24 sps:$4 sm:$0xff]  }
 0x5c1   : > { %11131 = vmatprep.subr.bf16.mxu0 %v23473_v46  ;;  %v23479_v46 = vld [vmem:[#allocation2 + $0x13f4] ss:$24 sps:$4 sm:$0xff]  }
 0x5c3   : > { %10566 = vmatmul.mubr.bf16.gmra.mrb[72].mxu0 %v28620_v6 }
 0x5c4   : > { %10575 = vmatprep.mubr.bf16.mxu0 %v28621_v18 }
 0x5cb   : > { %10576 = vmatmul.mubr.bf16.gmra.mrb[76].mxu0 %v28622_v11 }
 0x5cc   : > { %10585 = vmatprep.mubr.bf16.mxu0 %v28623_v13 }
 0x5d3   : > { %10586 = vmatmul.mubr.bf16.gmra.mrb[80].mxu0 %v28624_v52 }
 0x5d4   : > { %10595 = vmatprep.mubr.bf16.mxu0 %v28625_v43 }
 0x5db   : > { %10596 = vmatmul.mubr.bf16.gmra.mrb[84].mxu0 %v28626_v8 }
 0x5dc   : > { %10605 = vmatprep.mubr.bf16.mxu0 %v28627_v39 }
 0x5e3   : > { %10606 = vmatmul.mubr.bf16.gmra.mrb[88].mxu0 %v28628_v17 }
 0x5e4   : > { %10648 = vmatprep.mubr.bf16.mxu0 %v28439_v36 }
 0x5eb   : > { %19585 = vmatmul.mubr.msk.bf16.vlgmr.msra.gmra.mrb[64].mxu0 %vm4141_vm3, %v28629_v32 }
 0x5ec   : > { %11132 = vmatpush1.bf16.msra.mxu0 %v23471_v42  ;;  %10658 = vmatprep.mubr.bf16.mxu0 %v28439_v36  ;;  %v23483_v42 = vld [vmem:[#allocation2 + $0x1450] ss:$24 sps:$4 sm:$0xff]  }
 0x5ed   : > { %11133 = vmatprep.subr.bf16.mxu0 %v23476_v56  ;;  %v23486_v56 = vld [vmem:[#allocation2 + $0x1480] ss:$24 sps:$4 sm:$0xff]  }
 0x5f0   : > { %11134 = vmatpush1.bf16.msra.mxu0 %v23474_v41  ;;  %v23491_v41 = vld [vmem:[#allocation2 + $0x14b4] ss:$24 sps:$4 sm:$0xff]  }
 0x5f1   : > { %11135 = vmatprep.subr.bf16.mxu0 %v23479_v46  ;;  %v23494_v46 = vld [vmem:[#allocation2 + $0x14e4] ss:$24 sps:$4 sm:$0xff]  }
 0x5f3   : > { %19586 = vmatmul.mubr.msk.bf16.gmra.mrb[68].mxu0 %vm4141_vm3, %v28630_v5 }
 0x5f4   : > { %11136 = vmatpush1.bf16.msra.mxu0 %v23477_v37  ;;  %10668 = vmatprep.mubr.bf16.mxu0 %v28439_v36  ;;  %v23489_v37 = vld [vmem:[#allocation2 + $0x14b0] ss:$24 sps:$4 sm:$0xff]  }
 0x5f5   : > { %11137 = vmatprep.subr.bf16.mxu0 %v23482_v44  ;;  %v23495_v44 = vld [vmem:[#allocation2 + $0x1510] ss:$24 sps:$4 sm:$0xff]  }
 0x5f8   : > { %11138 = vmatpush1.bf16.msra.mxu0 %v23480_v16  ;;  %v23492_v16 = vld [vmem:[#allocation2 + $0x14e0] ss:$24 sps:$4 sm:$0xff]  }
 0x5f9   : > { %11139 = vmatprep.subr.bf16.mxu0 %v23485_v3  ;;  %v23497_v3 = vld [vmem:[#allocation2 + $0x1514] ss:$24 sps:$4 sm:$0xff]  }
 0x5fb   : > { %19587 = vmatmul.mubr.msk.bf16.gmra.mrb[72].mxu0 %vm4141_vm3, %v28631_v19 }
 0x5fc   : > { %11140 = vmatpush1.bf16.msra.mxu0 %v23483_v42  ;;  %10678 = vmatprep.mubr.bf16.mxu0 %v28439_v36  ;;  %v23500_v42 = vld [vmem:[#allocation2 + $0x1544] ss:$24 sps:$4 sm:$0xff]  }
 0x5fd   : > { %11141 = vmatprep.subr.bf16.mxu0 %v23488_v38  ;;  %v23498_v38 = vld [vmem:[#allocation2 + $0x1540] ss:$24 sps:$4 sm:$0xff]  }
 0x600   : > { %11142 = vmatpush1.bf16.msra.mxu0 %v23486_v56  ;;  %v23503_v56 = vld [vmem:[#allocation2 + $0x1574] ss:$24 sps:$4 sm:$0xff]  }
 0x601   : > { %11143 = vmatprep.subr.bf16.mxu0 %v23491_v41  ;;  %v23501_v41 = vld [vmem:[#allocation2 + $0x1570] ss:$24 sps:$4 sm:$0xff]  }
 0x603   : > { %19588 = vmatmul.mubr.msk.bf16.gmra.mrb[76].mxu0 %vm4141_vm3, %v28632_v45 }
 0x604   : > { %11144 = vmatpush1.bf16.msra.mxu0 %v23489_v37  ;;  %10688 = vmatprep.mubr.bf16.mxu0 %v28439_v36  ;;  %v23506_v37 = vld [vmem:[#allocation2 + $0x15a4] ss:$24 sps:$4 sm:$0xff]  }
 0x605   : > { %11145 = vmatprep.subr.bf16.mxu0 %v23494_v46  ;;  %v23504_v46 = vld [vmem:[#allocation2 + $0x15a0] ss:$24 sps:$4 sm:$0xff]  }
 0x608   : > { %11146 = vmatpush1.bf16.msra.mxu0 %v23492_v16  ;;  %v23509_v16 = vld [vmem:[#allocation2 + $0x15d4] ss:$24 sps:$4 sm:$0xff]  }
 0x609   : > { %11147 = vmatprep.subr.bf16.mxu0 %v23497_v3  ;;  %v23507_v3 = vld [vmem:[#allocation2 + $0x15d0] ss:$24 sps:$4 sm:$0xff]  }
 0x60b   : > { %19589 = vmatmul.mubr.msk.bf16.gmra.mrb[80].mxu0 %vm4141_vm3, %v28633_v14 }
 0x60c   : > { %11148 = vmatpush1.bf16.msra.mxu0 %v23495_v44  ;;  %10698 = vmatprep.mubr.bf16.mxu0 %v28439_v36  ;;  %v23512_v44 = vld [vmem:[#allocation2 + $0x1604] ss:$24 sps:$4 sm:$0xff]  }
 0x60d   : > { %11149 = vmatprep.subr.bf16.mxu0 %v23500_v42  ;;  %v23510_v42 = vld [vmem:[#allocation2 + $0x1600] ss:$24 sps:$4 sm:$0xff]  }
 0x610   : > { %11150 = vmatpush1.bf16.msra.mxu0 %v23498_v38  ;;  %v23515_v38 = vld [vmem:[#allocation2 + $0x1634] ss:$24 sps:$4 sm:$0xff]  }
 0x611   : > { %11151 = vmatprep.subr.bf16.mxu0 %v23503_v56  ;;  %v23513_v56 = vld [vmem:[#allocation2 + $0x1630] ss:$24 sps:$4 sm:$0xff]  }
 0x613   : > { %19590 = vmatmul.mubr.msk.bf16.gmra.mrb[84].mxu0 %vm4141_vm3, %v28634_v60  ;;  %v23524_v60 = vld [vmem:[#allocation2 + $0x16c4] ss:$24 sps:$4 sm:$0xff]  }
 0x614   : > { %11152 = vmatpush1.bf16.msra.mxu0 %v23501_v41  ;;  %10708 = vmatprep.mubr.bf16.mxu0 %v28439_v36  ;;  %v23518_v41 = vld [vmem:[#allocation2 + $0x1664] ss:$24 sps:$4 sm:$0xff]  }
 0x615   : > { %11153 = vmatprep.subr.bf16.mxu0 %v23506_v37  ;;  %v23516_v37 = vld [vmem:[#allocation2 + $0x1660] ss:$24 sps:$4 sm:$0xff]  }
 0x618   : > { %11154 = vmatpush1.bf16.msra.mxu0 %v23504_v46  ;;  %v23521_v46 = vld [vmem:[#allocation2 + $0x1694] ss:$24 sps:$4 sm:$0xff]  }
 0x619   : > { %11155 = vmatprep.subr.bf16.mxu0 %v23509_v16  ;;  %v23519_v16 = vld [vmem:[#allocation2 + $0x1690] ss:$24 sps:$4 sm:$0xff]  }
 0x61b   : > { %19591 = vmatmul.mubr.msk.bf16.gmra.mrb[88].mxu0 %vm4141_vm3, %v26174_v28 }
 0x61c   : > { %11156 = vmatpush1.bf16.msra.mxu0 %v23507_v3  ;;  %11163 = vmatprep.mubr.bf16.mxu0 %v28591_v58  ;;  %v23522_v58 = vld [vmem:[#allocation2 + $0x16c0] ss:$24 sps:$4 sm:$0xff]   ;;  %v23527_v3 = vld [vmem:[#allocation2 + $0x16f4] ss:$24 sps:$4 sm:$0xff]  }
 0x61d   : > { %11157 = vmatprep.subr.bf16.mxu0 %v23512_v44  ;;  %v23525_v44 = vld [vmem:[#allocation2 + $0x16f0] ss:$24 sps:$4 sm:$0xff]  }
 0x620   : > { %11158 = vmatpush1.bf16.msra.mxu0 %v23510_v42  ;;  %v23530_v42 = vld [vmem:[#allocation2 + $0x1724] ss:$24 sps:$4 sm:$0xff]  }
 0x621   : > { %11159 = vmatprep.subr.bf16.mxu0 %v23515_v38  ;;  %v23528_v38 = vld [vmem:[#allocation2 + $0x1720] ss:$24 sps:$4 sm:$0xff]  }
 0x624   : > { %11160 = vmatpush1.bf16.msra.mxu0 %v23513_v56  ;;  %v23533_v56 = vld [vmem:[#allocation2 + $0x1754] ss:$24 sps:$4 sm:$0xff]  }
 0x625   : > { %11161 = vmatprep.subr.bf16.mxu0 %v23518_v41  ;;  %v23539_v41 = vld [vmem:[#allocation2 + $0x17b4] ss:$24 sps:$4 sm:$0xff]  }
 0x628   : > { %11162 = vmatpush1.bf16.msra.mxu0 %v23516_v37  ;;  %v23540_v37 = vld [vmem:[#allocation2 + $0x17e0] ss:$24 sps:$4 sm:$0xff]  }
 0x629   : > { %11234 = vmatprep.subr.bf16.mxu0 %v23521_v46  ;;  %v23545_v46 = vld [vmem:[#allocation2 + $0x1814] ss:$24 sps:$4 sm:$0xff]  }
 0x62b   : > { %11164 = vmatmul.mubr.bf16.vlgmr.msra.gmra.mrb[92].mxu0 %v28592_v55  ;;  %v23531_v55 = vld [vmem:[#allocation2 + $0x1750] ss:$24 sps:$4 sm:$0xff]  }
 0x62c   : > { %11173 = vmatprep.mubr.bf16.mxu0 %v28593_v63  ;;  %11235 = vmatpush1.bf16.msra.mxu0 %v23519_v16  ;;  %v23536_v63 = vld [vmem:[#allocation2 + $0x1784] ss:$24 sps:$4 sm:$0xff]   ;;  %v23546_v16 = vld [vmem:[#allocation2 + $0x1840] ss:$24 sps:$4 sm:$0xff]  }
 0x62d   : > { %11236 = vmatprep.subr.bf16.mxu0 %v23524_v60  ;;  %v23534_v60 = vld [vmem:[#allocation2 + $0x1780] ss:$24 sps:$4 sm:$0xff]  }
 0x630   : > { %11237 = vmatpush1.bf16.msra.mxu0 %v23522_v58  ;;  %v23551_v58 = vld [vmem:[#allocation2 + $0x1874] ss:$24 sps:$4 sm:$0xff]  }
 0x631   : > { %11238 = vmatprep.subr.bf16.mxu0 %v23527_v3  ;;  %v23552_v3 = vld [vmem:[#allocation2 + $0x18a0] ss:$24 sps:$4 sm:$0xff]  }
 0x633   : > { %11174 = vmatmul.mubr.bf16.gmra.mrb[96].mxu0 %v28594_v35  ;;  %v23537_v35 = vld [vmem:[#allocation2 + $0x17b0] ss:$24 sps:$4 sm:$0xff]  }
 0x634   : > { %11183 = vmatprep.mubr.bf16.mxu0 %v28595_v29  ;;  %11239 = vmatpush1.bf16.msra.mxu0 %v23525_v44  ;;  %v23542_v29 = vld [vmem:[#allocation2 + $0x17e4] ss:$24 sps:$4 sm:$0xff]   ;;  %v23557_v44 = vld [vmem:[#allocation2 + $0x18d4] ss:$24 sps:$4 sm:$0xff]  }
 0x635   : > { %11240 = vmatprep.subr.bf16.mxu0 %v23530_v42  ;;  %v23558_v42 = vld [vmem:[#allocation2 + $0x1900] ss:$24 sps:$4 sm:$0xff]  }
 0x638   : > { %11241 = vmatpush1.bf16.msra.mxu0 %v23528_v38  ;;  %v23563_v38 = vld [vmem:[#allocation2 + $0x1934] ss:$24 sps:$4 sm:$0xff]  }
 0x639   : > { %11242 = vmatprep.subr.bf16.mxu0 %v23533_v56  ;;  %v23564_v56 = vld [vmem:[#allocation2 + $0x1960] ss:$24 sps:$4 sm:$0xff]  }
 0x63b   : > { %11184 = vmatmul.mubr.bf16.gmra.mrb[100].mxu0 %v28596_v0  ;;  %v23543_v0 = vld [vmem:[#allocation2 + $0x1810] ss:$24 sps:$4 sm:$0xff]  }
 0x63c   : > { %11193 = vmatprep.mubr.bf16.mxu0 %v28597_v53  ;;  %11243 = vmatpush1.bf16.msra.mxu0 %v23531_v55  ;;  %v23548_v53 = vld [vmem:[#allocation2 + $0x1844] ss:$24 sps:$4 sm:$0xff]   ;;  %v23569_v55 = vld [vmem:[#allocation2 + $0x1994] ss:$24 sps:$4 sm:$0xff]  }
 0x63d   : > { %11244 = vmatprep.subr.bf16.mxu0 %v23536_v63  ;;  %v23567_v63 = vld [vmem:[#allocation2 + $0x1990] ss:$24 sps:$4 sm:$0xff]  }
 0x640   : > { %11245 = vmatpush1.bf16.msra.mxu0 %v23534_v60  ;;  %v23572_v60 = vld [vmem:[#allocation2 + $0x19c4] ss:$24 sps:$4 sm:$0xff]  }
 0x641   : > { %11246 = vmatprep.subr.bf16.mxu0 %v23539_v41  ;;  %v23573_v41 = vld [vmem:[#allocation2 + $0x19f0] ss:$24 sps:$4 sm:$0xff]  }
 0x643   : > { %11194 = vmatmul.mubr.bf16.gmra.mrb[104].mxu0 %v28598_v57  ;;  %v23549_v57 = vld [vmem:[#allocation2 + $0x1870] ss:$24 sps:$4 sm:$0xff]  }
 0x644   : > { %11203 = vmatprep.mubr.bf16.mxu0 %v28599_v4  ;;  %11247 = vmatpush1.bf16.msra.mxu0 %v23537_v35  ;;  %v23554_v4 = vld [vmem:[#allocation2 + $0x18a4] ss:$24 sps:$4 sm:$0xff]  }
 0x645   : > { %11248 = vmatprep.subr.bf16.mxu0 %v23542_v29  ;;  %v23578_v35 = vld [vmem:[#allocation2 + $0x1a24] ss:$24 sps:$4 sm:$0xff]   ;;  %v23576_v29 = vld [vmem:[#allocation2 + $0x1a20] ss:$24 sps:$4 sm:$0xff]  }
 0x648   : > { %11249 = vmatpush1.bf16.msra.mxu0 %v23540_v37  ;;  %v23581_v37 = vld [vmem:[#allocation2 + $0x1a54] ss:$24 sps:$4 sm:$0xff]  }
 0x649   : > { %11250 = vmatprep.subr.bf16.mxu0 %v23545_v46  ;;  %v23582_v46 = vld [vmem:[#allocation2 + $0x1a80] ss:$24 sps:$4 sm:$0xff]  }
 0x64b   : > { %11204 = vmatmul.mubr.bf16.gmra.mrb[108].mxu0 %v28600_v12  ;;  %v23555_v12 = vld [vmem:[#allocation2 + $0x18d0] ss:$24 sps:$4 sm:$0xff]  }
 0x64c   : > { %11213 = vmatprep.mubr.bf16.mxu0 %v28601_v49  ;;  %11251 = vmatpush1.bf16.msra.mxu0 %v23543_v0  ;;  %v23560_v49 = vld [vmem:[#allocation2 + $0x1904] ss:$24 sps:$4 sm:$0xff]   ;;  %v23587_v0 = vld [vmem:[#allocation2 + $0x1ab4] ss:$24 sps:$4 sm:$0xff]  }
 0x64d   : > { %11252 = vmatprep.subr.bf16.mxu0 %v23548_v53  ;;  %v23588_v53 = vld [vmem:[#allocation2 + $0x1ae0] ss:$24 sps:$4 sm:$0xff]  }
 0x650   : > { %11253 = vmatpush1.bf16.msra.mxu0 %v23546_v16  ;;  %v23593_v16 = vld [vmem:[#allocation2 + $0x1b14] ss:$24 sps:$4 sm:$0xff]  }
 0x651   : > { %11254 = vmatprep.subr.bf16.mxu0 %v23551_v58  ;;  %v23594_v58 = vld [vmem:[#allocation2 + $0x1b40] ss:$24 sps:$4 sm:$0xff]  }
 0x653   : > { %11214 = vmatmul.mubr.bf16.gmra.mrb[112].mxu0 %v28602_v22  ;;  %v23561_v22 = vld [vmem:[#allocation2 + $0x1930] ss:$24 sps:$4 sm:$0xff]  }
 0x654   : > { %11223 = vmatprep.mubr.bf16.mxu0 %v25854_v51  ;;  %11255 = vmatpush1.bf16.msra.mxu0 %v23549_v57  ;;  %v23566_v51 = vld [vmem:[#allocation2 + $0x1964] ss:$24 sps:$4 sm:$0xff]   ;;  %v23599_v57 = vld [vmem:[#allocation2 + $0x1b74] ss:$24 sps:$4 sm:$0xff]  }
 0x655   : > { %11256 = vmatprep.subr.bf16.mxu0 %v23554_v4  ;;  %v23600_v4 = vld [vmem:[#allocation2 + $0x1ba0] ss:$24 sps:$4 sm:$0xff]  }
 0x658   : > { %11257 = vmatpush1.bf16.msra.mxu0 %v23552_v3  ;;  %v23605_v3 = vld [vmem:[#allocation2 + $0x1bd4] ss:$24 sps:$4 sm:$0xff]  }
 0x659   : > { %11258 = vmatprep.subr.bf16.mxu0 %v23557_v44  ;;  %v23606_v44 = vld [vmem:[#allocation2 + $0x1c00] ss:$24 sps:$4 sm:$0xff]  }
 0x65b   : > { %11224 = vmatmul.mubr.bf16.gmra.mrb[116].mxu0 %v25865_v30  ;;  %v23570_v30 = vld [vmem:[#allocation2 + $0x19c0] ss:$24 sps:$4 sm:$0xff]  }
 0x65c   : > { %11259 = vmatpush1.bf16.msra.mxu0 %v23555_v12  ;;  %11266 = vmatprep.mubr.bf16.mxu0 %v28603_v26  ;;  %v23575_v26 = vld [vmem:[#allocation2 + $0x19f4] ss:$24 sps:$4 sm:$0xff]  }
 0x65d   : > { %11260 = vmatprep.subr.bf16.mxu0 %v23560_v49  ;;  %v23611_v12 = vld [vmem:[#allocation2 + $0x1c34] ss:$24 sps:$4 sm:$0xff]   ;;  %v23612_v49 = vld [vmem:[#allocation2 + $0x1c60] ss:$24 sps:$4 sm:$0xff]  }
 0x660   : > { %11261 = vmatpush1.bf16.msra.mxu0 %v23558_v42  ;;  %v23617_v42 = vld [vmem:[#allocation2 + $0x1c94] ss:$24 sps:$4 sm:$0xff]  }
 0x661   : > { %11262 = vmatprep.subr.bf16.mxu0 %v23563_v38  ;;  %v23615_v38 = vld [vmem:[#allocation2 + $0x1c90] ss:$24 sps:$4 sm:$0xff]  }
 0x664   : > { %11263 = vmatpush1.bf16.msra.mxu0 %v23561_v22  ;;  %v23620_v22 = vld [vmem:[#allocation2 + $0x1cc4] ss:$24 sps:$4 sm:$0xff]  }
 0x665   : > { %11264 = vmatprep.subr.bf16.mxu0 %v23566_v51  ;;  %v23621_v51 = vld [vmem:[#allocation2 + $0x1cf0] ss:$24 sps:$4 sm:$0xff]  }
 0x668   : > { %11265 = vmatpush1.bf16.msra.mxu0 %v23564_v56  ;;  %v23626_v56 = vld [vmem:[#allocation2 + $0x1d24] ss:$24 sps:$4 sm:$0xff]  }
 0x669   : > { %11337 = vmatprep.subr.bf16.mxu0 %v23569_v55  ;;  %v23624_v55 = vld [vmem:[#allocation2 + $0x1d20] ss:$24 sps:$4 sm:$0xff]  }
 0x66b   : > { %11267 = vmatmul.mubr.bf16.vlgmr.msra.gmra.mrb[92].mxu0 %v25887_v40  ;;  %v23579_v40 = vld [vmem:[#allocation2 + $0x1a50] ss:$24 sps:$4 sm:$0xff]  }
 0x66c   : > { %11276 = vmatprep.mubr.bf16.mxu0 %v28604_v62  ;;  %11338 = vmatpush1.bf16.msra.mxu0 %v23567_v63  ;;  %v23584_v62 = vld [vmem:[#allocation2 + $0x1a84] ss:$24 sps:$4 sm:$0xff]  }
 0x66d   : > { %11339 = vmatprep.subr.bf16.mxu0 %v23572_v60 }
 0x670   : > { %11340 = vmatpush1.bf16.msra.mxu0 %v23570_v30 }
 0x671   : > { %11341 = vmatprep.subr.bf16.mxu0 %v23575_v26 }
 0x673   : > { %11277 = vmatmul.mubr.bf16.gmra.mrb[96].mxu0 %v28605_v33  ;;  %v23585_v33 = vld [vmem:[#allocation2 + $0x1ab0] ss:$24 sps:$4 sm:$0xff]  }
 0x674   : > { %11286 = vmatprep.mubr.bf16.mxu0 %v28606_v48  ;;  %11342 = vmatpush1.bf16.msra.mxu0 %v23573_v41  ;;  %v23590_v48 = vld [vmem:[#allocation2 + $0x1ae4] ss:$24 sps:$4 sm:$0xff]  }
 0x675   : > { %11343 = vmatprep.subr.bf16.mxu0 %v23578_v35 }
 0x678   : > { %11344 = vmatpush1.bf16.msra.mxu0 %v23576_v29 }
 0x679   : > { %11345 = vmatprep.subr.bf16.mxu0 %v23581_v37 }
 0x67b   : > { %11287 = vmatmul.mubr.bf16.gmra.mrb[100].mxu0 %v28607_v50  ;;  %v23591_v50 = vld [vmem:[#allocation2 + $0x1b10] ss:$24 sps:$4 sm:$0xff]  }
 0x67c   : > { %11296 = vmatprep.mubr.bf16.mxu0 %v28608_v34  ;;  %11346 = vmatpush1.bf16.msra.mxu0 %v23579_v40  ;;  %v23596_v34 = vld [vmem:[#allocation2 + $0x1b44] ss:$24 sps:$4 sm:$0xff]  }
 0x67d   : > { %11347 = vmatprep.subr.bf16.mxu0 %v23584_v62 }
 0x680   : > { %11348 = vmatpush1.bf16.msra.mxu0 %v23582_v46 }
 0x681   : > { %11349 = vmatprep.subr.bf16.mxu0 %v23587_v0 }
 0x683   : > { %11297 = vmatmul.mubr.bf16.gmra.mrb[104].mxu0 %v28609_v1  ;;  %v23597_v1 = vld [vmem:[#allocation2 + $0x1b70] ss:$24 sps:$4 sm:$0xff]  }
 0x684   : > { %11306 = vmatprep.mubr.bf16.mxu0 %v28610_v9  ;;  %11350 = vmatpush1.bf16.msra.mxu0 %v23585_v33  ;;  %v23602_v9 = vld [vmem:[#allocation2 + $0x1ba4] ss:$24 sps:$4 sm:$0xff]  }
 0x685   : > { %11351 = vmatprep.subr.bf16.mxu0 %v23590_v48 }
 0x688   : > { %11352 = vmatpush1.bf16.msra.mxu0 %v23588_v53 }
 0x689   : > { %11353 = vmatprep.subr.bf16.mxu0 %v23593_v16 }
 0x68b   : > { %11307 = vmatmul.mubr.bf16.gmra.mrb[108].mxu0 %v28611_v24  ;;  %v23603_v24 = vld [vmem:[#allocation2 + $0x1bd0] ss:$24 sps:$4 sm:$0xff]  }
 0x68c   : > { %11316 = vmatprep.mubr.bf16.mxu0 %v28612_v54  ;;  %11354 = vmatpush1.bf16.msra.mxu0 %v23591_v50  ;;  %v23608_v54 = vld [vmem:[#allocation2 + $0x1c04] ss:$24 sps:$4 sm:$0xff]  }
 0x68d   : > { %11355 = vmatprep.subr.bf16.mxu0 %v23596_v34 }
 0x690   : > { %11356 = vmatpush1.bf16.msra.mxu0 %v23594_v58 }
 0x691   : > { %11357 = vmatprep.subr.bf16.mxu0 %v23599_v57 }
 0x693   : > { %11317 = vmatmul.mubr.bf16.gmra.mrb[112].mxu0 %v28613_v23  ;;  %v23609_v23 = vld [vmem:[#allocation2 + $0x1c30] ss:$24 sps:$4 sm:$0xff]  }
 0x694   : > { %11326 = vmatprep.mubr.bf16.mxu0 %v25986_v10  ;;  %11358 = vmatpush1.bf16.msra.mxu0 %v23597_v1  ;;  %v23614_v10 = vld [vmem:[#allocation2 + $0x1c64] ss:$24 sps:$4 sm:$0xff]  }
 0x695   : > { %11359 = vmatprep.subr.bf16.mxu0 %v23602_v9 }
 0x698   : > { %11360 = vmatpush1.bf16.msra.mxu0 %v23600_v4 }
 0x699   : > { %11361 = vmatprep.subr.bf16.mxu0 %v23605_v3 }
 0x69b   : > { %11327 = vmatmul.mubr.bf16.gmra.mrb[116].mxu0 %v28614_v59  ;;  %v23618_v59 = vld [vmem:[#allocation2 + $0x1cc0] ss:$24 sps:$4 sm:$0xff]  }
 0x69c   : > { %11362 = vmatpush1.bf16.msra.mxu0 %v23603_v24  ;;  %11369 = vmatprep.mubr.bf16.mxu0 %v28615_v61  ;;  %v23623_v61 = vld [vmem:[#allocation2 + $0x1cf4] ss:$24 sps:$4 sm:$0xff]  }
 0x69d   : > { %11363 = vmatprep.subr.bf16.mxu0 %v23608_v54 }
 0x6a0   : > { %11364 = vmatpush1.bf16.msra.mxu0 %v23606_v44 }
 0x6a1   : > { %11365 = vmatprep.subr.bf16.mxu0 %v23611_v12 }
 0x6a4   : > { %11366 = vmatpush1.bf16.msra.mxu0 %v23609_v23 }
 0x6a5   : > { %11367 = vmatprep.subr.bf16.mxu0 %v23614_v10 }
 0x6a8   : > { %11368 = vmatpush1.bf16.msra.mxu0 %v23612_v49 }
 0x6a9   : > { %11440 = vmatprep.subr.bf16.mxu0 %v23617_v42 }
 0x6ab   : > { %11370 = vmatmul.mubr.bf16.vlgmr.msra.gmra.mrb[92].mxu0 %v28616_v47  ;;  %v26409_v47 = vld [vmem:[%s28073_s4] sm:$0x3f] }
 0x6ac   : > { %11379 = vmatprep.mubr.bf16.mxu0 %v28617_v21  ;;  %11441 = vmatpush1.bf16.msra.mxu0 %v23615_v38  ;;  %v28635_v21 = vsub.s32 0, %v28578_v15 }
 0x6ad   : > { %11442 = vmatprep.subr.bf16.mxu0 %v23620_v22 }
 0x6ae   : > { %v26414_v63 = vrot.slane %v26409_v47, %v28635_v21 }
 0x6b0   : > { %11443 = vmatpush1.bf16.msra.mxu0 %v23618_v59 }
 0x6b1   : > { %11444 = vmatprep.subr.bf16.mxu0 %v23623_v61 }
 0x6b3   : > { %11380 = vmatmul.mubr.bf16.gmra.mrb[96].mxu0 %v28618_v31  ;;  %v28636_v31 = vsub.s32 1, %v28578_v15 }
 0x6b4   : > { %11389 = vmatprep.mubr.bf16.mxu0 %v28619_v2  ;;  %11445 = vmatpush1.bf16.msra.mxu0 %v23621_v51 }
 0x6b5   : > { %11446 = vmatprep.subr.bf16.mxu0 %v23626_v56  ;;  %v26420_v2 = vrot.slane %v26409_v47, %v28636_v31 }
 0x6b8   : > { %11447 = vmatpush1.bf16.msra.mxu0 %v23624_v55 }
 0x6bb   : > { %11390 = vmatmul.mubr.bf16.gmra.mrb[100].mxu0 %v28620_v6 }
 0x6bc   : > { %11399 = vmatprep.mubr.bf16.mxu0 %v28621_v18 }
 0x6be   : > { %v10650_v60 = vpop.f32.mrb[64].mxu0 }
 0x6bf   : > { %v11659_v6 = vadd.f32 %v26414_v63, %v10650_v60  ;;  %v10652_v30 = vpop.f32.mrb[65].mxu0 }
 0x6c0   : > { %v11660_v26 = vadd.f32 %v26420_v2, %v10652_v30  ;;  %v10654_v41 = vpop.f32.mrb[66].mxu0 }
 0x6c1   : > { %v11665_v35 = vadd.f32 %v26414_v63, %v10654_v41  ;;  %v10656_v29 = vpop.f32.mrb[67].mxu0  ;;  %v11743_v40 = vmax.f32 %v11659_v6, 0.0 }
 0x6c2   : > { %v11666_v37 = vadd.f32 %v26420_v2, %v10656_v29  ;;  %v11744_v18 = vmax.f32 %v11660_v26, 0.0 }
 0x6c3   : > { %v11749_v62 = vmax.f32 %v11665_v35, 0.0  ;;  %11400 = vmatmul.mubr.bf16.gmra.mrb[104].mxu0 %v28622_v11 }
 0x6c4   : > { %v11750_v46 = vmax.f32 %v11666_v37, 0.0  ;;  %11409 = vmatprep.mubr.bf16.mxu0 %v28623_v13 }
 0x6c5   : > { %v26428_v0 = vpack.c.bf16 %v11749_v62, %v11743_v40 }
 0x6c6   : > { %v26430_v33 = vpack.c.bf16 %v11750_v46, %v11744_v18  ;;  %v10660_v48 = vpop.f32.mrb[68].mxu0 }
 0x6c7   : > { %v11671_v53 = vadd.f32 %v26414_v63, %v10660_v48  ;;  %v10662_v16 = vpop.f32.mrb[69].mxu0 }
 0x6c8   : > { %v11672_v50 = vadd.f32 %v26420_v2, %v10662_v16  ;;  %v10664_v34 = vpop.f32.mrb[70].mxu0  ;;  %11900 = vmatprep.subr.bf16.mxu1 %v26430_v33 }
 0x6c9   : > { %v11677_v58 = vadd.f32 %v26414_v63, %v10664_v34  ;;  %v10666_v11 = vpop.f32.mrb[71].mxu0  ;;  %11901 = vmatpush1.bf16.msra.mxu1 %v26428_v0  ;;  %v11755_v57 = vmax.f32 %v11671_v53, 0.0 }
 0x6ca   : > { %v11678_v13 = vadd.f32 %v26420_v2, %v10666_v11  ;;  %v11756_v9 = vmax.f32 %v11672_v50, 0.0 }
 0x6cb   : > { %v11761_v1 = vmax.f32 %v11677_v58, 0.0  ;;  %11410 = vmatmul.mubr.bf16.gmra.mrb[108].mxu0 %v28624_v52 }
 0x6cc   : > { %v11762_v4 = vmax.f32 %v11678_v13, 0.0  ;;  %11419 = vmatprep.mubr.bf16.mxu0 %v28625_v43 }
 0x6cd   : > { %v26440_v3 = vpack.c.bf16 %v11761_v1, %v11755_v57 }
 0x6ce   : > { %v26442_v24 = vpack.c.bf16 %v11762_v4, %v11756_v9  ;;  %v10670_v54 = vpop.f32.mrb[72].mxu0 }
 0x6cf   : > { %v11683_v44 = vadd.f32 %v26414_v63, %v10670_v54  ;;  %v10672_v12 = vpop.f32.mrb[73].mxu0 }
 0x6d0   : > { %v11684_v23 = vadd.f32 %v26420_v2, %v10672_v12  ;;  %v10674_v10 = vpop.f32.mrb[74].mxu0  ;;  %11902 = vmatprep.subr.bf16.mxu1 %v26442_v24 }
 0x6d1   : > { %v11689_v49 = vadd.f32 %v26414_v63, %v10674_v10  ;;  %v10676_v52 = vpop.f32.mrb[75].mxu0  ;;  %11903 = vmatpush1.bf16.msra.mxu1 %v26440_v3  ;;  %v11767_v42 = vmax.f32 %v11683_v44, 0.0 }
 0x6d2   : > { %v11690_v43 = vadd.f32 %v26420_v2, %v10676_v52  ;;  %v11768_v22 = vmax.f32 %v11684_v23, 0.0 }
 0x6d3   : > { %v11773_v38 = vmax.f32 %v11689_v49, 0.0  ;;  %11420 = vmatmul.mubr.bf16.gmra.mrb[112].mxu0 %v28626_v8 }
 0x6d4   : > { %v11774_v59 = vmax.f32 %v11690_v43, 0.0  ;;  %11429 = vmatprep.mubr.bf16.mxu0 %v28627_v39 }
 0x6d5   : > { %v26452_v61 = vpack.c.bf16 %v11773_v38, %v11767_v42 }
 0x6d6   : > { %v26454_v51 = vpack.c.bf16 %v11774_v59, %v11768_v22  ;;  %v10680_v56 = vpop.f32.mrb[76].mxu0 }
 0x6d7   : > { %v11695_v55 = vadd.f32 %v26414_v63, %v10680_v56  ;;  %v10682_v21 = vpop.f32.mrb[77].mxu0 }
 0x6d8   : > { %v11696_v31 = vadd.f32 %v26420_v2, %v10682_v21  ;;  %v10684_v60 = vpop.f32.mrb[78].mxu0  ;;  %11904 = vmatprep.subr.bf16.mxu1 %v26454_v51 }
 0x6d9   : > { %v11701_v6 = vadd.f32 %v26414_v63, %v10684_v60  ;;  %v10686_v8 = vpop.f32.mrb[79].mxu0  ;;  %11905 = vmatpush1.bf16.msra.mxu1 %v26452_v61  ;;  %v11779_v30 = vmax.f32 %v11695_v55, 0.0 }
 0x6da   : > { %v11702_v39 = vadd.f32 %v26420_v2, %v10686_v8  ;;  %v11780_v41 = vmax.f32 %v11696_v31, 0.0 }
 0x6db   : > { %v11785_v26 = vmax.f32 %v11701_v6, 0.0  ;;  %11430 = vmatmul.mubr.bf16.gmra.mrb[116].mxu0 %v28628_v17 }
 0x6dc   : > { %v11786_v35 = vmax.f32 %v11702_v39, 0.0  ;;  %11472 = vmatprep.mubr.bf16.mxu0 %v28439_v36 }
 0x6dd   : > { %v26464_v29 = vpack.c.bf16 %v11785_v26, %v11779_v30 }
 0x6de   : > { %v26466_v37 = vpack.c.bf16 %v11786_v35, %v11780_v41  ;;  %v10690_v40 = vpop.f32.mrb[80].mxu0  ;;  %v28639_v35 = vld [vmem:[#allocation69_spill] sm:$0xff] }
 0x6df   : > { %v11707_v62 = vadd.f32 %v26414_v63, %v10690_v40  ;;  %v10692_v18 = vpop.f32.mrb[81].mxu0  ;;  %v28640_v40 = vld [vmem:[#allocation20_spill] sm:$0xff] }
 0x6e0   : > { %v11708_v46 = vadd.f32 %v26420_v2, %v10692_v18  ;;  %v10694_v48 = vpop.f32.mrb[82].mxu0  ;;  %11906 = vmatprep.subr.bf16.mxu1 %v26466_v37  ;;  %v28642_v18 = vld [vmem:[#allocation40_spill] sm:$0xff] }
 0x6e1   : > { %v11713_v53 = vadd.f32 %v26414_v63, %v10694_v48  ;;  %v10696_v17 = vpop.f32.mrb[83].mxu0  ;;  %11907 = vmatpush1.bf16.msra.mxu1 %v26464_v29  ;;  %v11791_v50 = vmax.f32 %v11707_v62, 0.0  ;;  %v28641_v62 = vld [vmem:[#allocation70_spill] sm:$0xff]  ;;  %v28645_v48 = vld [vmem:[#allocation59_spill] sm:$0xff] }
 0x6e2   : > { %v11714_v16 = vadd.f32 %v26420_v2, %v10696_v17  ;;  %v11792_v58 = vmax.f32 %v11708_v46, 0.0  ;;  %v28644_v46 = vld [vmem:[#allocation71_spill] sm:$0xff]  ;;  %v28647_v17 = vld [vmem:[#allocation58_spill] sm:$0xff] }
 0x6e3   : > { %v11797_v34 = vmax.f32 %v11713_v53, 0.0  ;;  %19599 = vmatmul.mubr.msk.bf16.vlgmr.msra.gmra.mrb[92].mxu0 %vm4141_vm3, %v28629_v32  ;;  %v28646_v53 = vld [vmem:[#allocation72_spill] sm:$0xff] }
 0x6e4   : > { %v11798_v11 = vmax.f32 %v11714_v16, 0.0  ;;  %11482 = vmatprep.mubr.bf16.mxu0 %v28439_v36  ;;  %v26553_v16 = vld [vmem:[%s28074_s5 + $0x10] sm:$0xff]  }
 0x6e5   : > { %v26477_v13 = vpack.c.bf16 %v11797_v34, %v11791_v50  ;;  %v28649_v34 = vsub.s32 5, %v28578_v15 }
 0x6e6   : > { %v26479_v57 = vpack.c.bf16 %v11798_v11, %v11792_v58  ;;  %v10700_v1 = vpop.f32.mrb[84].mxu0 }
 0x6e7   : > { %v11719_v9 = vadd.f32 %v26414_v63, %v10700_v1  ;;  %v10702_v4 = vpop.f32.mrb[85].mxu0  ;;  %v26575_v58 = vrot.slane %v26409_v47, %v28649_v34 }
 0x6e8   : > { %v11720_v54 = vadd.f32 %v26420_v2, %v10702_v4  ;;  %v10704_v44 = vpop.f32.mrb[86].mxu0  ;;  %11908 = vmatprep.subr.bf16.mxu1 %v26479_v57 }
 0x6e9   : > { %v11725_v12 = vadd.f32 %v26414_v63, %v10704_v44  ;;  %v10706_v32 = vpop.f32.mrb[87].mxu0  ;;  %11909 = vmatpush1.bf16.msra.mxu1 %v26477_v13  ;;  %v11803_v10 = vmax.f32 %v11719_v9, 0.0 }
 0x6ea   : > { %v11726_v23 = vadd.f32 %v26420_v2, %v10706_v32  ;;  %v11804_v52 = vmax.f32 %v11720_v54, 0.0 }
 0x6eb   : > { %v11809_v49 = vmax.f32 %v11725_v12, 0.0  ;;  %19600 = vmatmul.mubr.msk.bf16.gmra.mrb[96].mxu0 %vm4141_vm3, %v28630_v5 }
 0x6ec   : > { %v11810_v43 = vmax.f32 %v11726_v23, 0.0  ;;  %11492 = vmatprep.mubr.bf16.mxu0 %v28439_v36 }
 0x6ed   : > { %v26490_v42 = vpack.c.bf16 %v11809_v49, %v11803_v10 }
 0x6ee   : > { %v26492_v38 = vpack.c.bf16 %v11810_v43, %v11804_v52  ;;  %v10710_v22 = vpop.f32.mrb[88].mxu0 }
 0x6ef   : > { %v11731_v59 = vadd.f32 %v26414_v63, %v10710_v22  ;;  %v10712_v56 = vpop.f32.mrb[89].mxu0 }
 0x6f0   : > { %v11732_v55 = vadd.f32 %v26420_v2, %v10712_v56  ;;  %v10714_v21 = vpop.f32.mrb[90].mxu0  ;;  %11910 = vmatprep.subr.bf16.mxu1 %v26492_v38 }
 0x6f1   : > { %v11737_v31 = vadd.f32 %v26414_v63, %v10714_v21  ;;  %v10716_v5 = vpop.f32.mrb[91].mxu0  ;;  %11911 = vmatpush1.bf16.msra.mxu1 %v26490_v42  ;;  %v11815_v6 = vmax.f32 %v11731_v59, 0.0  ;;  %v26511_v63 = vld [vmem:[%s28074_s5] sm:$0xff]  }
 0x6f2   : > { %v11738_v60 = vadd.f32 %v26420_v2, %v10716_v5  ;;  %v11816_v39 = vmax.f32 %v11732_v55, 0.0  ;;  %v28637_v2 = vld [vmem:[#allocation14_spill] sm:$0xff] }
 0x6f3   : > { %v11821_v8 = vmax.f32 %v11737_v31, 0.0  ;;  %19601 = vmatmul.mubr.msk.bf16.gmra.mrb[100].mxu0 %vm4141_vm3, %v28631_v19  ;;  %v26526_v19 = vld [vmem:[%s28074_s5 + $0x8] sm:$0xff]  }
 0x6f4   : > { %v11822_v30 = vmax.f32 %v11738_v60, 0.0  ;;  %11502 = vmatprep.mubr.bf16.mxu0 %v28439_v36 }
 0x6f5   : > { %v26503_v26 = vpack.c.bf16 %v11821_v8, %v11815_v6 }
 0x6f6   : > { %v26505_v41 = vpack.c.bf16 %v11822_v30, %v11816_v39 }
 0x6f8   : > { %11912 = vmatprep.subr.bf16.mxu1 %v26505_v41 }
 0x6f9   : > { %11913 = vmatpush1.bf16.msra.mxu1 %v26503_v26 }
 0x6fa   : > { %11963 = vmatprep.subr.bf16.mxu1 %v26233_v7 }
 0x6fb   : > { %19602 = vmatmul.mubr.msk.bf16.gmra.mrb[104].mxu0 %vm4141_vm3, %v28632_v45  ;;  %v28638_v45 = vld [vmem:[#allocation15_spill] sm:$0xff] }
 0x6fc   : > { %19609 = vmatmul.mubr.msk.bf16.vlgmr.msra.gmra.mrb[76].mxu1 %vm11890_vm5, %v26511_v63  ;;  %11512 = vmatprep.mubr.bf16.mxu0 %v28439_v36 }
 0x6fd   : > { %11964 = vmatpush1.bf16.msra.mxu1 %v26231_v25  ;;  %11942 = vmatprep.mubr.bf16.mxu1 %v28439_v36 }
 0x6fe   : > { %11965 = vmatprep.subr.bf16.mxu1 %v26243_v20 }
 0x701   : > { %11966 = vmatpush1.bf16.msra.mxu1 %v26241_v27 }
 0x702   : > { %11967 = vmatprep.subr.bf16.mxu1 %v28637_v2 }
 0x703   : > { %19603 = vmatmul.mubr.msk.bf16.gmra.mrb[108].mxu0 %vm4141_vm3, %v28633_v14  ;;  %v28643_v14 = vld [vmem:[#allocation60_spill] sm:$0xff] }
 0x704   : > { %11522 = vmatprep.mubr.bf16.mxu0 %v28439_v36  ;;  %19610 = vmatmul.mubr.msk.bf16.gmra.mrb[80].mxu1 %vm11890_vm5, %v26526_v19 }
 0x705   : > { %11968 = vmatpush1.bf16.msra.mxu1 %v28638_v45  ;;  %11952 = vmatprep.mubr.bf16.mxu1 %v28439_v36 }
 0x706   : > { %11969 = vmatprep.subr.bf16.mxu1 %v28639_v35 }
 0x709   : > { %11970 = vmatpush1.bf16.msra.mxu1 %v28640_v40 }
 0x70a   : > { %11971 = vmatprep.subr.bf16.mxu1 %v28641_v62 }
 0x70b   : > { %19604 = vmatmul.mubr.msk.bf16.gmra.mrb[112].mxu0 %vm4141_vm3, %v28642_v18 }
 0x70c   : > { %11532 = vmatprep.mubr.bf16.mxu0 %v28439_v36  ;;  %19611 = vmatmul.mubr.msk.bf16.gmra.mrb[84].mxu1 %vm11890_vm5, %v26553_v16 }
 0x70d   : > { %11972 = vmatpush1.bf16.msra.mxu1 %v28643_v14  ;;  %11995 = vmatprep.mubr.bf16.mxu1 %v28439_v36 }
 0x70e   : > { %11973 = vmatprep.subr.bf16.mxu1 %v28644_v46 }
 0x711   : > { %11974 = vmatpush1.bf16.msra.mxu1 %v28645_v48 }
 0x712   : > { %11975 = vmatprep.subr.bf16.mxu1 %v28646_v53 }
 0x713   : > { %19605 = vmatmul.mubr.msk.bf16.gmra.mrb[116].mxu0 %vm4141_vm3, %v26174_v28  ;;  %v28648_v28 = vsub.s32 4, %v28578_v15 }
 0x715   : > { %11976 = vmatpush1.bf16.msra.mxu1 %v28647_v17  ;;  %v26570_v50 = vrot.slane %v26409_v47, %v28648_v28 }
 0x718   : > { %19612 = vmatmul.mubr.msk.bf16.vlgmr.msra.gmra.mrb[88].mxu1 %vm11890_vm5, %v26511_v63 }
 0x719   : > { %12005 = vmatprep.mubr.bf16.mxu1 %v28439_v36 }
 0x720   : > { %19613 = vmatmul.mubr.msk.bf16.gmra.mrb[92].mxu1 %vm11890_vm5, %v26526_v19 }
 0x721   : > { %12015 = vmatprep.mubr.bf16.mxu1 %v28439_v36 }
 0x728   : > { %19614 = vmatmul.mubr.msk.bf16.gmra.mrb[96].mxu1 %vm11890_vm5, %v26553_v16 }
 0x729   : > { %12058 = vmatprep.mubr.bf16.mxu1 %v28439_v36 }
 0x7b6   : > { %v11474_v11 = vpop.f32.mrb[92].mxu0 }
 0x7b7   : > { %v11663_v1 = vadd.f32 %v26570_v50, %v11474_v11  ;;  %v11476_v9 = vpop.f32.mrb[93].mxu0 }
 0x7b8   : > { %v11664_v4 = vadd.f32 %v26575_v58, %v11476_v9  ;;  %v11478_v54 = vpop.f32.mrb[94].mxu0 }
 0x7b9   : > { %v11669_v44 = vadd.f32 %v26570_v50, %v11478_v54  ;;  %v11480_v12 = vpop.f32.mrb[95].mxu0  ;;  %v11747_v23 = vmax.f32 %v11663_v1, 0.0 }
 0x7ba   : > { %v11670_v32 = vadd.f32 %v26575_v58, %v11480_v12  ;;  %v11748_v49 = vmax.f32 %v11664_v4, 0.0 }
 0x7bb   : > { %v11753_v10 = vmax.f32 %v11669_v44, 0.0 }
 0x7bc   : > { %v11754_v52 = vmax.f32 %v11670_v32, 0.0 }
 0x7bd   : > { %v26581_v15 = vpack.c.bf16 %v11753_v10, %v11747_v23 }
 0x7be   : > { %v26583_v47 = vpack.c.bf16 %v11754_v52, %v11748_v49  ;;  %v11484_v43 = vpop.f32.mrb[96].mxu0 }
 0x7bf   : > { %v11675_v22 = vadd.f32 %v26570_v50, %v11484_v43  ;;  %v11486_v59 = vpop.f32.mrb[97].mxu0 }
 0x7c0   : > { %v11676_v56 = vadd.f32 %v26575_v58, %v11486_v59  ;;  %v11488_v55 = vpop.f32.mrb[98].mxu0  ;;  %12026 = vmatprep.subr.bf16.mxu1 %v26583_v47 }
 0x7c1   : > { %v11681_v21 = vadd.f32 %v26570_v50, %v11488_v55  ;;  %v11490_v31 = vpop.f32.mrb[99].mxu0  ;;  %12027 = vmatpush1.bf16.msra.mxu1 %v26581_v15  ;;  %v11759_v60 = vmax.f32 %v11675_v22, 0.0 }
 0x7c2   : > { %v11682_v5 = vadd.f32 %v26575_v58, %v11490_v31  ;;  %v11760_v8 = vmax.f32 %v11676_v56, 0.0 }
 0x7c3   : > { %v11765_v6 = vmax.f32 %v11681_v21, 0.0 }
 0x7c4   : > { %v11766_v39 = vmax.f32 %v11682_v5, 0.0 }
 0x7c5   : > { %v26591_v30 = vpack.c.bf16 %v11765_v6, %v11759_v60 }
 0x7c6   : > { %v26593_v18 = vpack.c.bf16 %v11766_v39, %v11760_v8  ;;  %v11494_v28 = vpop.f32.mrb[100].mxu0 }
 0x7c7   : > { %v11687_v34 = vadd.f32 %v26570_v50, %v11494_v28  ;;  %v11496_v11 = vpop.f32.mrb[101].mxu0 }
 0x7c8   : > { %v11688_v1 = vadd.f32 %v26575_v58, %v11496_v11  ;;  %v11498_v9 = vpop.f32.mrb[102].mxu0  ;;  %12028 = vmatprep.subr.bf16.mxu1 %v26593_v18 }
 0x7c9   : > { %v11693_v4 = vadd.f32 %v26570_v50, %v11498_v9  ;;  %v11500_v54 = vpop.f32.mrb[103].mxu0  ;;  %12029 = vmatpush1.bf16.msra.mxu1 %v26591_v30  ;;  %v11771_v12 = vmax.f32 %v11687_v34, 0.0 }
 0x7ca   : > { %v11694_v44 = vadd.f32 %v26575_v58, %v11500_v54  ;;  %v11772_v23 = vmax.f32 %v11688_v1, 0.0 }
 0x7cb   : > { %v11777_v32 = vmax.f32 %v11693_v4, 0.0 }
 0x7cc   : > { %v11778_v10 = vmax.f32 %v11694_v44, 0.0 }
 0x7cd   : > { %v26601_v49 = vpack.c.bf16 %v11777_v32, %v11771_v12 }
 0x7ce   : > { %v26603_v52 = vpack.c.bf16 %v11778_v10, %v11772_v23  ;;  %v11504_v43 = vpop.f32.mrb[104].mxu0 }
 0x7cf   : > { %v11699_v22 = vadd.f32 %v26570_v50, %v11504_v43  ;;  %v11506_v59 = vpop.f32.mrb[105].mxu0  ;;  %v26618_v44 = vpop.f32.mrb[76].mxu1 }
 0x7d0   : > { %v11700_v56 = vadd.f32 %v26575_v58, %v11506_v59  ;;  %v11508_v55 = vpop.f32.mrb[106].mxu0  ;;  %12030 = vmatprep.subr.bf16.mxu1 %v26603_v52  ;;  %v26622_v23 = vpop.f32.mrb[77].mxu1 }
 0x7d1   : > { %v11705_v21 = vadd.f32 %v26570_v50, %v11508_v55  ;;  %v11510_v31 = vpop.f32.mrb[107].mxu0  ;;  %12031 = vmatpush1.bf16.msra.mxu1 %v26601_v49  ;;  %v11783_v60 = vmax.f32 %v11699_v22, 0.0  ;;  %v26625_v43 = vpop.f32.mrb[78].mxu1 }
 0x7d2   : > { %v11706_v5 = vadd.f32 %v26575_v58, %v11510_v31  ;;  %v11784_v8 = vmax.f32 %v11700_v56, 0.0  ;;  %v26627_v56 = vpop.f32.mrb[79].mxu1 }
 0x7d3   : > { %v11789_v6 = vmax.f32 %v11705_v21, 0.0  ;;  %28650 = vst [vmem:[#allocation73_spill] sm:$0xff] %v26627_v56 }
 0x7d4   : > { %v11790_v39 = vmax.f32 %v11706_v5, 0.0 }
 0x7d5   : > { %v26611_v28 = vpack.c.bf16 %v11789_v6, %v11783_v60 }
 0x7d6   : > { %v26613_v34 = vpack.c.bf16 %v11790_v39, %v11784_v8  ;;  %v11514_v11 = vpop.f32.mrb[108].mxu0 }
 0x7d7   : > { %v11711_v1 = vadd.f32 %v26570_v50, %v11514_v11  ;;  %v11516_v9 = vpop.f32.mrb[109].mxu0  ;;  %v26629_v31 = vpop.f32.mrb[80].mxu1 }
 0x7d8   : > { %v11712_v4 = vadd.f32 %v26575_v58, %v11516_v9  ;;  %v11518_v54 = vpop.f32.mrb[110].mxu0  ;;  %12032 = vmatprep.subr.bf16.mxu1 %v26613_v34  ;;  %28651 = vst [vmem:[#allocation55_spill] sm:$0xff] %v26629_v31  ;;  %v26633_v60 = vpop.f32.mrb[81].mxu1 }
 0x7d9   : > { %v11717_v12 = vadd.f32 %v26570_v50, %v11518_v54  ;;  %v11520_v32 = vpop.f32.mrb[111].mxu0  ;;  %12033 = vmatpush1.bf16.msra.mxu1 %v26611_v28  ;;  %v11795_v22 = vmax.f32 %v11711_v1, 0.0  ;;  %28652 = vst [vmem:[#allocation75_spill] sm:$0xff] %v26633_v60  ;;  %v26637_v39 = vpop.f32.mrb[82].mxu1 }
 0x7da   : > { %v11718_v10 = vadd.f32 %v26575_v58, %v11520_v32  ;;  %v11796_v55 = vmax.f32 %v11712_v4, 0.0  ;;  %28653 = vst [vmem:[#allocation76_spill] sm:$0xff] %v26637_v39  ;;  %v26640_v1 = vpop.f32.mrb[83].mxu1 }
 0x7db   : > { %v11801_v59 = vmax.f32 %v11717_v12, 0.0  ;;  %28654 = vst [vmem:[#allocation67_spill] sm:$0xff] %v26640_v1 }
 0x7dc   : > { %v11802_v21 = vmax.f32 %v11718_v10, 0.0 }
 0x7dd   : > { %v26631_v5 = vpack.c.bf16 %v11801_v59, %v11795_v22 }
 0x7de   : > { %v26635_v6 = vpack.c.bf16 %v11802_v21, %v11796_v55  ;;  %v11524_v8 = vpop.f32.mrb[112].mxu0 }
 0x7df   : > { %v11723_v11 = vadd.f32 %v26570_v50, %v11524_v8  ;;  %v11526_v9 = vpop.f32.mrb[113].mxu0 }
 0x7e0   : > { %v11724_v54 = vadd.f32 %v26575_v58, %v11526_v9  ;;  %v11528_v4 = vpop.f32.mrb[114].mxu0  ;;  %12034 = vmatprep.subr.bf16.mxu1 %v26635_v6 }
 0x7e1   : > { %v11729_v12 = vadd.f32 %v26570_v50, %v11528_v4  ;;  %v11530_v32 = vpop.f32.mrb[115].mxu0  ;;  %12035 = vmatpush1.bf16.msra.mxu1 %v26631_v5  ;;  %v11807_v22 = vmax.f32 %v11723_v11, 0.0 }
 0x7e2   : > { %v11730_v10 = vadd.f32 %v26575_v58, %v11530_v32  ;;  %v11808_v55 = vmax.f32 %v11724_v54, 0.0 }
 0x7e3   : > { %v11813_v59 = vmax.f32 %v11729_v12, 0.0 }
 0x7e4   : > { %v11814_v21 = vmax.f32 %v11730_v10, 0.0 }
 0x7e5   : > { %v26647_v8 = vpack.c.bf16 %v11813_v59, %v11807_v22 }
 0x7e6   : > { %v26649_v39 = vpack.c.bf16 %v11814_v21, %v11808_v55  ;;  %v11534_v1 = vpop.f32.mrb[116].mxu0  ;;  %v23675_v55 = vld [vmem:[%s28075_s6 + $0x150] ss:$12 sps:$4 sm:$0xff]   ;;  %v23680_v21 = vld [vmem:[%s28075_s6 + $0x16c] ss:$12 sps:$4 sm:$0xff]  }
 0x7e7   : > { %v11735_v9 = vadd.f32 %v26570_v50, %v11534_v1  ;;  %v11536_v60 = vpop.f32.mrb[117].mxu0 }
 0x7e8   : > { %v11736_v31 = vadd.f32 %v26575_v58, %v11536_v60  ;;  %v11538_v4 = vpop.f32.mrb[118].mxu0  ;;  %12036 = vmatprep.subr.bf16.mxu1 %v26649_v39  ;;  %v23674_v60 = vld [vmem:[%s28075_s6 + $0x13c] ss:$12 sps:$4 sm:$0xff]  }
 0x7e9   : > { %v11741_v56 = vadd.f32 %v26570_v50, %v11538_v4  ;;  %v11540_v32 = vpop.f32.mrb[119].mxu0  ;;  %12037 = vmatpush1.bf16.msra.mxu1 %v26647_v8  ;;  %v11819_v54 = vmax.f32 %v11735_v9, 0.0  ;;  %v23651_v50 = vld [vmem:[%s28075_s6 + $0x90] ss:$12 sps:$4 sm:$0xff]  }
 0x7ea   : > { %v11742_v11 = vadd.f32 %v26575_v58, %v11540_v32  ;;  %v11820_v10 = vmax.f32 %v11736_v31, 0.0  ;;  %v23656_v58 = vld [vmem:[%s28075_s6 + $0xac] ss:$12 sps:$4 sm:$0xff]   ;;  %v23671_v31 = vld [vmem:[%s28075_s6 + $0x124] ss:$12 sps:$4 sm:$0xff]  }
 0x7eb   : > { %v11825_v12 = vmax.f32 %v11741_v56, 0.0  ;;  %v23666_v56 = vld [vmem:[%s28075_s6 + $0x108] ss:$12 sps:$4 sm:$0xff]   ;;  %v23683_v9 = vld [vmem:[%s28075_s6 + $0x184] ss:$12 sps:$4 sm:$0xff]  }
 0x7ec   : > { %v11826_v22 = vmax.f32 %v11742_v11, 0.0 }
 0x7ed   : > { %v26657_v59 = vpack.c.bf16 %v11825_v12, %v11819_v54 }
 0x7ee   : > { %v26659_v1 = vpack.c.bf16 %v11826_v22, %v11820_v10 }
 0x7f0   : > { %12038 = vmatprep.subr.bf16.mxu1 %v26659_v1 }
 0x7f1   : > { %12039 = vmatpush1.bf16.msra.mxu1 %v26657_v59 }
 0x7f2   : > { %12120 = vmatprep.subr.bf16.mxu1 %v26430_v33  ;;  %v26697_v33 = vpop.f32.mrb[84].mxu1 }
 0x7f4   : > { %19615 = vmatmul.mubr.msk.bf16.vlgmr.msra.gmra.mrb[100].mxu1 %vm11890_vm5, %v26511_v63 }
 0x7f5   : > { %12121 = vmatpush1.bf16.msra.mxu1 %v26428_v0  ;;  %12068 = vmatprep.mubr.bf16.mxu1 %v28439_v36  ;;  %v26688_v0 = vld [vmem:[%s28074_s5 + $0x18] sm:$0xff]  }
 0x7f6   : > { %12122 = vmatprep.subr.bf16.mxu1 %v26442_v24  ;;  %v26704_v24 = vpop.f32.mrb[85].mxu1 }
 0x7f9   : > { %12123 = vmatpush1.bf16.msra.mxu1 %v26440_v3  ;;  %v26702_v3 = vld [vmem:[%s28074_s5 + $0x20] sm:$0xff]  }
 0x7fa   : > { %12124 = vmatprep.subr.bf16.mxu1 %v26454_v51 }
 0x7fc   : > { %19616 = vmatmul.mubr.msk.bf16.gmra.mrb[104].mxu1 %vm11890_vm5, %v26526_v19  ;;  %v23635_v19 = vld [vmem:[%s28075_s6 + $0x4] ss:$12 sps:$4 sm:$0xff]  }
 0x7fd   : > { %12125 = vmatpush1.bf16.msra.mxu1 %v26452_v61  ;;  %12078 = vmatprep.mubr.bf16.mxu1 %v28439_v36 }
 0x7fe   : > { %12126 = vmatprep.subr.bf16.mxu1 %v26466_v37 }
 0x801   : > { %12127 = vmatpush1.bf16.msra.mxu1 %v26464_v29 }
 0x802   : > { %12128 = vmatprep.subr.bf16.mxu1 %v26479_v57 }
 0x804   : > { %19617 = vmatmul.mubr.msk.bf16.gmra.mrb[108].mxu1 %vm11890_vm5, %v26553_v16  ;;  %v23653_v16 = vld [vmem:[%s28075_s6 + $0x94] ss:$12 sps:$4 sm:$0xff]  }
 0x805   : > { %12129 = vmatpush1.bf16.msra.mxu1 %v26477_v13  ;;  %12152 = vmatprep.mubr.bf16.mxu1 %v28439_v36 }
 0x806   : > { %12130 = vmatprep.subr.bf16.mxu1 %v26492_v38 }
 0x809   : > { %12131 = vmatpush1.bf16.msra.mxu1 %v26490_v42 }
 0x80a   : > { %12132 = vmatprep.subr.bf16.mxu1 %v26505_v41 }
 0x80d   : > { %12133 = vmatpush1.bf16.msra.mxu1 %v26503_v26 }
 0x80e   : > { %12183 = vmatprep.subr.bf16.mxu1 %v26233_v7  ;;  %v26707_v7 = vpop.f32.mrb[86].mxu1 }
 0x810   : > { %19627 = vmatmul.mubr.msk.bf16.vlgmr.msra.gmra.mrb[112].mxu1 %vm11890_vm5, %v26688_v0 }
 0x811   : > { %12184 = vmatpush1.bf16.msra.mxu1 %v26231_v25  ;;  %12162 = vmatprep.mubr.bf16.mxu1 %v28439_v36  ;;  %v26710_v25 = vpop.f32.mrb[87].mxu1 }
 0x812   : > { %12185 = vmatprep.subr.bf16.mxu1 %v26243_v20  ;;  %v26717_v20 = vpop.f32.mrb[88].mxu1 }
 0x813   : > { %v26724_v61 = vpop.f32.mrb[89].mxu1 }
 0x814   : > { %v26727_v51 = vpop.f32.mrb[90].mxu1 }
 0x815   : > { %12186 = vmatpush1.bf16.msra.mxu1 %v26241_v27  ;;  %v26722_v27 = vld [vmem:[%s28074_s5 + $0x28] sm:$0xff]   ;;  %v26730_v29 = vpop.f32.mrb[91].mxu1 }
 0x816   : > { %12187 = vmatprep.subr.bf16.mxu1 %v28637_v2  ;;  %v26737_v37 = vpop.f32.mrb[92].mxu1  ;;  %v23633_v2 = vld [vmem:[%s28075_s6] ss:$12 sps:$4 sm:$0xff]  }
 0x817   : > { %v26739_v13 = vpop.f32.mrb[93].mxu1 }
 0x818   : > { %19628 = vmatmul.mubr.msk.bf16.gmra.mrb[116].mxu1 %vm11890_vm5, %v26702_v3  ;;  %v26742_v57 = vpop.f32.mrb[94].mxu1 }
 0x819   : > { %12188 = vmatpush1.bf16.msra.mxu1 %v28638_v45  ;;  %12172 = vmatprep.mubr.bf16.mxu1 %v28439_v36  ;;  %v26745_v42 = vpop.f32.mrb[95].mxu1  ;;  %v23638_v45 = vld [vmem:[%s28075_s6 + $0x1c] ss:$12 sps:$4 sm:$0xff]  }
 0x81a   : > { %12189 = vmatprep.subr.bf16.mxu1 %v28639_v35  ;;  %v26749_v38 = vpop.f32.mrb[96].mxu1  ;;  %v23636_v35 = vld [vmem:[%s28075_s6 + $0x18] ss:$12 sps:$4 sm:$0xff]  }
 0x81b   : > { %v26753_v26 = vpop.f32.mrb[97].mxu1 }
 0x81c   : > { %v26757_v41 = vpop.f32.mrb[98].mxu1 }
 0x81d   : > { %12190 = vmatpush1.bf16.msra.mxu1 %v28640_v40  ;;  %v26760_v63 = vpop.f32.mrb[99].mxu1  ;;  %v23641_v40 = vld [vmem:[%s28075_s6 + $0x34] ss:$12 sps:$4 sm:$0xff]  }
 0x81e   : > { %12191 = vmatprep.subr.bf16.mxu1 %v28641_v62  ;;  %v23639_v62 = vld [vmem:[%s28075_s6 + $0x30] ss:$12 sps:$4 sm:$0xff]  }
 0x820   : > { %19629 = vmatmul.mubr.msk.bf16.gmra.mrb[120].mxu1 %vm11890_vm5, %v26722_v27 }
 0x821   : > { %12192 = vmatpush1.bf16.msra.mxu1 %v28643_v14  ;;  %12215 = vmatprep.mubr.bf16.mxu1 %v28439_v36  ;;  %v23644_v14 = vld [vmem:[%s28075_s6 + $0x4c] ss:$12 sps:$4 sm:$0xff]  }
 0x822   : > { %12193 = vmatprep.subr.bf16.mxu1 %v28644_v46  ;;  %v23642_v46 = vld [vmem:[%s28075_s6 + $0x48] ss:$12 sps:$4 sm:$0xff]  }
 0x825   : > { %12194 = vmatpush1.bf16.msra.mxu1 %v28645_v48  ;;  %v23647_v48 = vld [vmem:[%s28075_s6 + $0x64] ss:$12 sps:$4 sm:$0xff]  }
 0x826   : > { %12195 = vmatprep.subr.bf16.mxu1 %v28646_v53  ;;  %v23645_v53 = vld [vmem:[%s28075_s6 + $0x60] ss:$12 sps:$4 sm:$0xff]  }
 0x829   : > { %12196 = vmatpush1.bf16.msra.mxu1 %v28647_v17  ;;  %v23648_v17 = vld [vmem:[%s28075_s6 + $0x78] ss:$12 sps:$4 sm:$0xff]  }
 0x82a   : > { %12246 = vmatprep.subr.bf16.mxu1 %v26583_v47  ;;  %v23659_v47 = vld [vmem:[%s28075_s6 + $0xc4] ss:$12 sps:$4 sm:$0xff]  }
 0x82c   : > { %19630 = vmatmul.mubr.msk.bf16.vlgmr.msra.gmra.mrb[124].mxu1 %vm11890_vm5, %v26688_v0 }
 0x82d   : > { %12247 = vmatpush1.bf16.msra.mxu1 %v26581_v15  ;;  %12225 = vmatprep.mubr.bf16.mxu1 %v28439_v36  ;;  %v23654_v15 = vld [vmem:[%s28075_s6 + $0xa8] ss:$12 sps:$4 sm:$0xff]  }
 0x82e   : > { %12248 = vmatprep.subr.bf16.mxu1 %v26593_v18  ;;  %v23662_v18 = vld [vmem:[%s28075_s6 + $0xdc] ss:$12 sps:$4 sm:$0xff]  }
 0x831   : > { %12249 = vmatpush1.bf16.msra.mxu1 %v26591_v30  ;;  %v23657_v30 = vld [vmem:[%s28075_s6 + $0xc0] ss:$12 sps:$4 sm:$0xff]  }
 0x832   : > { %12250 = vmatprep.subr.bf16.mxu1 %v26603_v52  ;;  %v23665_v52 = vld [vmem:[%s28075_s6 + $0xf4] ss:$12 sps:$4 sm:$0xff]  }
 0x834   : > { %19631 = vmatmul.mubr.msk.bf16.gmra.mrb[128].mxu1 %vm11890_vm5, %v26702_v3 }
 0x835   : > { %12251 = vmatpush1.bf16.msra.mxu1 %v26601_v49  ;;  %12235 = vmatprep.mubr.bf16.mxu1 %v28439_v36  ;;  %v23660_v49 = vld [vmem:[%s28075_s6 + $0xd8] ss:$12 sps:$4 sm:$0xff]  }
 0x836   : > { %12252 = vmatprep.subr.bf16.mxu1 %v26613_v34  ;;  %v23668_v34 = vld [vmem:[%s28075_s6 + $0x10c] ss:$12 sps:$4 sm:$0xff]  }
 0x839   : > { %12253 = vmatpush1.bf16.msra.mxu1 %v26611_v28  ;;  %v23663_v28 = vld [vmem:[%s28075_s6 + $0xf0] ss:$12 sps:$4 sm:$0xff]  }
 0x83a   : > { %12254 = vmatprep.subr.bf16.mxu1 %v26635_v6  ;;  %v23672_v6 = vld [vmem:[%s28075_s6 + $0x138] ss:$12 sps:$4 sm:$0xff]  }
 0x83c   : > { %19632 = vmatmul.mubr.msk.bf16.gmra.mrb[132].mxu1 %vm11890_vm5, %v26722_v27 }
 0x83d   : > { %12255 = vmatpush1.bf16.msra.mxu1 %v26631_v5  ;;  %12278 = vmatprep.mubr.bf16.mxu1 %v28439_v36  ;;  %v23669_v5 = vld [vmem:[%s28075_s6 + $0x120] ss:$12 sps:$4 sm:$0xff]  }
 0x83e   : > { %12256 = vmatprep.subr.bf16.mxu1 %v26649_v39  ;;  %v23677_v39 = vld [vmem:[%s28075_s6 + $0x154] ss:$12 sps:$4 sm:$0xff]  }
 0x841   : > { %12257 = vmatpush1.bf16.msra.mxu1 %v26647_v8  ;;  %v23678_v8 = vld [vmem:[%s28075_s6 + $0x168] ss:$12 sps:$4 sm:$0xff]  }
 0x842   : > { %12258 = vmatprep.subr.bf16.mxu1 %v26659_v1 }
 0x845   : > { %12259 = vmatpush1.bf16.msra.mxu1 %v26657_v59 }
 0x846   : > { %13323 = vmatprep.subr.bf16.mxu1 %v23635_v19 }
 0x848   : > { %19633 = vmatmul.mubr.msk.bf16.vlgmr.msra.gmra.mrb[136].mxu1 %vm11890_vm5, %v26688_v0 }
 0x849   : > { %12288 = vmatprep.mubr.bf16.mxu1 %v28439_v36  ;;  %13324 = vmatpush1.bf16.msra.mxu1 %v23633_v2 }
 0x84a   : > { %13325 = vmatprep.subr.bf16.mxu1 %v23638_v45 }
 0x84d   : > { %13326 = vmatpush1.bf16.msra.mxu1 %v23636_v35 }
 0x84e   : > { %13327 = vmatprep.subr.bf16.mxu1 %v23641_v40 }
 0x850   : > { %19634 = vmatmul.mubr.msk.bf16.gmra.mrb[140].mxu1 %vm11890_vm5, %v26702_v3 }
 0x851   : > { %12298 = vmatprep.mubr.bf16.mxu1 %v28439_v36  ;;  %13328 = vmatpush1.bf16.msra.mxu1 %v23639_v62  ;;  %v23650_v36 = vld [vmem:[%s28075_s6 + $0x7c] ss:$12 sps:$4 sm:$0xff]  }
 0x852   : > { %13329 = vmatprep.subr.bf16.mxu1 %v23644_v14 }
 0x855   : > { %13330 = vmatpush1.bf16.msra.mxu1 %v23642_v46  ;;  %v28655_v46 = vld [vmem:[#allocation73_spill] sm:$0xff] }
 0x856   : > { %13331 = vmatprep.subr.bf16.mxu1 %v23647_v48 }
 0x858   : > { %19635 = vmatmul.mubr.msk.bf16.gmra.mrb[144].mxu1 %vm11890_vm5, %v26722_v27 }
 0x859   : > { %13332 = vmatpush1.bf16.msra.mxu1 %v23645_v53 }
 0x85a   : > { %13333 = vmatprep.subr.bf16.mxu1 %v23650_v36 }
 0x85d   : > { %13334 = vmatpush1.bf16.msra.mxu1 %v23648_v17  ;;  %v23681_v17 = vld [vmem:[%s28075_s6 + $0x180] ss:$12 sps:$4 sm:$0xff]  }
 0x85e   : > { %13335 = vmatprep.subr.bf16.mxu1 %v23653_v16 }
 0x861   : > { %13336 = vmatpush1.bf16.msra.mxu1 %v23651_v50 }
 0x862   : > { %13337 = vmatprep.subr.bf16.mxu1 %v23656_v58  ;;  %v28657_v58 = vld [vmem:[#allocation75_spill] sm:$0xff] }
 0x865   : > { %13338 = vmatpush1.bf16.msra.mxu1 %v23654_v15 }
 0x866   : > { %13339 = vmatprep.subr.bf16.mxu1 %v23659_v47 }
 0x869   : > { %13340 = vmatpush1.bf16.msra.mxu1 %v23657_v30  ;;  %v23684_v30 = vld [vmem:[%s28075_s6 + $0x198] ss:$12 sps:$4 sm:$0xff]  }
 0x86a   : > { %13341 = vmatprep.subr.bf16.mxu1 %v23662_v18  ;;  %v28658_v18 = vld [vmem:[#allocation76_spill] sm:$0xff] }
 0x86d   : > { %13342 = vmatpush1.bf16.msra.mxu1 %v23660_v49 }
 0x86e   : > { %13343 = vmatprep.subr.bf16.mxu1 %v23665_v52 }
 0x871   : > { %13344 = vmatpush1.bf16.msra.mxu1 %v23663_v28  ;;  %v23689_v28 = vld [vmem:[%s28075_s6 + $0x1b4] ss:$12 sps:$4 sm:$0xff]  }
 0x872   : > { %13345 = vmatprep.subr.bf16.mxu1 %v23668_v34  ;;  %v28659_v34 = vld [vmem:[#allocation67_spill] sm:$0xff] }
 0x875   : > { %13346 = vmatpush1.bf16.msra.mxu1 %v23666_v56 }
 0x876   : > { %13347 = vmatprep.subr.bf16.mxu1 %v23671_v31 }
 0x879   : > { %13348 = vmatpush1.bf16.msra.mxu1 %v23669_v5 }
 0x87a   : > { %13349 = vmatprep.subr.bf16.mxu1 %v23674_v60  ;;  %v23687_v60 = vld [vmem:[%s28075_s6 + $0x1b0] ss:$12 sps:$4 sm:$0xff]  }
 0x87d   : > { %13350 = vmatpush1.bf16.msra.mxu1 %v23672_v6  ;;  %v23692_v6 = vld [vmem:[%s28075_s6 + $0x1cc] ss:$12 sps:$4 sm:$0xff]  }
 0x87e   : > { %13351 = vmatprep.subr.bf16.mxu1 %v23677_v39 }
 0x881   : > { %13352 = vmatpush1.bf16.msra.mxu1 %v23675_v55 }
 0x882   : > { %13353 = vmatprep.subr.bf16.mxu1 %v23680_v21 }
 0x885   : > { %13354 = vmatpush1.bf16.msra.mxu1 %v23678_v8 }
 0x886   : > { %13386 = vmatprep.subr.bf16.mxu1 %v23683_v9 }
 0x8c7   : > { %v26886_v4 = vpop.f32.mrb[100].mxu1 }
 0x8c8   : > { %v26888_v32 = vpop.f32.mrb[101].mxu1 }
 0x8c9   : > { %v26890_v11 = vpop.f32.mrb[102].mxu1 }
 0x8ca   : > { %v26892_v54 = vpop.f32.mrb[103].mxu1 }
 0x8cf   : > { %v26894_v12 = vpop.f32.mrb[104].mxu1 }
 0x8d0   : > { %v26896_v10 = vpop.f32.mrb[105].mxu1 }
 0x8d1   : > { %v26898_v22 = vpop.f32.mrb[106].mxu1 }
 0x8d2   : > { %v26900_v59 = vpop.f32.mrb[107].mxu1 }
 0x8d7   : > { %v26902_v1 = vpop.f32.mrb[108].mxu1 }
 0x8d8   : > { %v26904_v0 = vpop.f32.mrb[109].mxu1 }
 0x8d9   : > { %v26906_v3 = vpop.f32.mrb[110].mxu1 }
 0x8da   : > { %v26908_v27 = vpop.f32.mrb[111].mxu1 }
 0x8e3   : > { %v12154_v19 = vpop.f32.mrb[112].mxu1 }
 0x8e4   : > { %v12309_v2 = vmax.f32 %v26618_v44, %v12154_v19  ;;  %v12156_v45 = vpop.f32.mrb[113].mxu1  ;;  %v23686_v44 = vld [vmem:[%s28075_s6 + $0x19c] ss:$12 sps:$4 sm:$0xff]  }
 0x8e5   : > { %v12310_v35 = vmax.f32 %v26622_v23, %v12156_v45  ;;  %v12158_v40 = vpop.f32.mrb[114].mxu1  ;;  %v28656_v23 = vld [vmem:[#allocation55_spill] sm:$0xff] }
 0x8e6   : > { %v12315_v62 = vmax.f32 %v26625_v43, %v12158_v40  ;;  %v12160_v14 = vpop.f32.mrb[115].mxu1  ;;  %v23690_v19 = vld [vmem:[%s28075_s6 + $0x1c8] ss:$12 sps:$4 sm:$0xff]  }
 0x8e7   : > { %v12316_v48 = vmax.f32 %v28655_v46, %v12160_v14  ;;  %v23701_v14 = vld [vmem:[%s28075_s6 + $0x214] ss:$12 sps:$4 sm:$0xff]  }
 0x8e8   : > { %v26914_v53 = vpack.c.bf16 %v12315_v62, %v12309_v2 }
 0x8e9   : > { %v26916_v36 = vpack.c.bf16 %v12316_v48, %v12310_v35  ;;  %v23695_v35 = vld [vmem:[%s28075_s6 + $0x1e4] ss:$12 sps:$4 sm:$0xff]  }
 0x8eb   : > { %v12164_v16 = vpop.f32.mrb[116].mxu1  ;;  %13355 = vmatprep.mubr.bf16.mxu1 %v26916_v36 }
 0x8ec   : > { %v12321_v43 = vmax.f32 %v28656_v23, %v12164_v16  ;;  %v12166_v50 = vpop.f32.mrb[117].mxu1  ;;  %13356 = vmatmul.mubr.bf16.vlgmr.msra.gmra.mrb[148].mxu1 %v26914_v53  ;;  %v23699_v23 = vld [vmem:[%s28075_s6 + $0x210] ss:$12 sps:$4 sm:$0xff]  }
 0x8ed   : > { %v12322_v15 = vmax.f32 %v28657_v58, %v12166_v50  ;;  %13387 = vmatpush1.bf16.msra.mxu1 %v23681_v17  ;;  %v12168_v47 = vpop.f32.mrb[118].mxu1  ;;  %v23704_v58 = vld [vmem:[%s28075_s6 + $0x22c] ss:$12 sps:$4 sm:$0xff]  }
 0x8ee   : > { %v12327_v49 = vmax.f32 %v28658_v18, %v12168_v47  ;;  %v12170_v52 = vpop.f32.mrb[119].mxu1  ;;  %13388 = vmatprep.subr.bf16.mxu1 %v23686_v44 }
 0x8ef   : > { %v12328_v56 = vmax.f32 %v28659_v34, %v12170_v52 }
 0x8f0   : > { %v26936_v31 = vpack.c.bf16 %v12327_v49, %v12321_v43 }
 0x8f1   : > { %v26938_v5 = vpack.c.bf16 %v12328_v56, %v12322_v15  ;;  %13389 = vmatpush1.bf16.msra.mxu1 %v23684_v30 }
 0x8f2   : > { %13390 = vmatprep.subr.bf16.mxu1 %v23689_v28  ;;  %v23705_v28 = vld [vmem:[%s28075_s6 + $0x240] ss:$12 sps:$4 sm:$0xff]  }
 0x8f3   : > { %v12174_v39 = vpop.f32.mrb[120].mxu1  ;;  %13365 = vmatprep.mubr.bf16.mxu1 %v26938_v5 }
 0x8f4   : > { %v12333_v55 = vmax.f32 %v26697_v33, %v12174_v39  ;;  %v12176_v21 = vpop.f32.mrb[121].mxu1  ;;  %13366 = vmatmul.mubr.bf16.gmra.mrb[152].mxu1 %v26936_v31 }
 0x8f5   : > { %v12334_v8 = vmax.f32 %v26704_v24, %v12176_v21  ;;  %13391 = vmatpush1.bf16.msra.mxu1 %v23687_v60  ;;  %v12178_v9 = vpop.f32.mrb[122].mxu1  ;;  %v23693_v24 = vld [vmem:[%s28075_s6 + $0x1e0] ss:$12 sps:$4 sm:$0xff]   ;;  %v23710_v60 = vld [vmem:[%s28075_s6 + $0x25c] ss:$12 sps:$4 sm:$0xff]  }
 0x8f6   : > { %v12339_v2 = vmax.f32 %v26707_v7, %v12178_v9  ;;  %v12180_v45 = vpop.f32.mrb[123].mxu1  ;;  %13392 = vmatprep.subr.bf16.mxu1 %v23692_v6  ;;  %v23698_v7 = vld [vmem:[%s28075_s6 + $0x1fc] ss:$12 sps:$4 sm:$0xff]  }
 0x8f7   : > { %v12340_v33 = vmax.f32 %v26710_v25, %v12180_v45  ;;  %v23696_v25 = vld [vmem:[%s28075_s6 + $0x1f8] ss:$12 sps:$4 sm:$0xff]  }
 0x8f8   : > { %v26958_v40 = vpack.c.bf16 %v12339_v2, %v12333_v55 }
 0x8f9   : > { %v26960_v62 = vpack.c.bf16 %v12340_v33, %v12334_v8  ;;  %13393 = vmatpush1.bf16.msra.mxu1 %v23690_v19  ;;  %v23711_v19 = vld [vmem:[%s28075_s6 + $0x270] ss:$12 sps:$4 sm:$0xff]  }
 0x8fa   : > { %13394 = vmatprep.subr.bf16.mxu1 %v23695_v35  ;;  %v23716_v35 = vld [vmem:[%s28075_s6 + $0x28c] ss:$12 sps:$4 sm:$0xff]  }
 0x8fb   : > { %13375 = vmatprep.mubr.bf16.mxu1 %v26960_v62 }
 0x8fc   : > { %13376 = vmatmul.mubr.bf16.gmra.mrb[156].mxu1 %v26958_v40 }
 0x8fd   : > { %13395 = vmatpush1.bf16.msra.mxu1 %v23693_v24 }
 0x8fe   : > { %13396 = vmatprep.subr.bf16.mxu1 %v23698_v7  ;;  %v23717_v7 = vld [vmem:[%s28075_s6 + $0x2a0] ss:$12 sps:$4 sm:$0xff]  }
 0x8ff   : > { %v12217_v46 = vpop.f32.mrb[124].mxu1 }
 0x900   : > { %v12311_v48 = vmax.f32 %v26717_v20, %v12217_v46  ;;  %v12219_v17 = vpop.f32.mrb[125].mxu1 }
 0x901   : > { %v12312_v44 = vmax.f32 %v26724_v61, %v12219_v17  ;;  %13397 = vmatpush1.bf16.msra.mxu1 %v23696_v25  ;;  %v12221_v16 = vpop.f32.mrb[126].mxu1  ;;  %v23702_v61 = vld [vmem:[%s28075_s6 + $0x228] ss:$12 sps:$4 sm:$0xff]  }
 0x902   : > { %v12317_v43 = vmax.f32 %v26727_v51, %v12221_v16  ;;  %v12223_v50 = vpop.f32.mrb[127].mxu1  ;;  %13398 = vmatprep.subr.bf16.mxu1 %v23701_v14  ;;  %v23707_v51 = vld [vmem:[%s28075_s6 + $0x244] ss:$12 sps:$4 sm:$0xff]  }
 0x903   : > { %v12318_v15 = vmax.f32 %v26730_v29, %v12223_v50 }
 0x904   : > { %v26986_v20 = vpack.c.bf16 %v12317_v43, %v12311_v48  ;;  %v23725_v43 = vld [vmem:[%s28075_s6 + $0x2d4] ss:$12 sps:$4 sm:$0xff]  }
 0x905   : > { %v26988_v47 = vpack.c.bf16 %v12318_v15, %v12312_v44  ;;  %13399 = vmatpush1.bf16.msra.mxu1 %v23699_v23  ;;  %v23720_v44 = vld [vmem:[%s28075_s6 + $0x2b8] ss:$12 sps:$4 sm:$0xff]  }
 0x906   : > { %13400 = vmatprep.subr.bf16.mxu1 %v23704_v58 }
 0x907   : > { %v12227_v30 = vpop.f32.mrb[128].mxu1  ;;  %13418 = vmatprep.mubr.bf16.mxu1 %v26988_v47 }
 0x908   : > { %v12323_v18 = vmax.f32 %v26737_v37, %v12227_v30  ;;  %v12229_v29 = vpop.f32.mrb[129].mxu1 }
 0x909   : > { %v12324_v49 = vmax.f32 %v26739_v13, %v12229_v29  ;;  %13401 = vmatpush1.bf16.msra.mxu1 %v23702_v61  ;;  %v12231_v52 = vpop.f32.mrb[130].mxu1  ;;  %v23708_v13 = vld [vmem:[%s28075_s6 + $0x258] ss:$12 sps:$4 sm:$0xff]  }
 0x90a   : > { %v12329_v34 = vmax.f32 %v26742_v57, %v12231_v52  ;;  %v12233_v56 = vpop.f32.mrb[131].mxu1  ;;  %13402 = vmatprep.subr.bf16.mxu1 %v23707_v51  ;;  %v23713_v57 = vld [vmem:[%s28075_s6 + $0x274] ss:$12 sps:$4 sm:$0xff]   ;;  %v23731_v52 = vld [vmem:[%s28075_s6 + $0x304] ss:$12 sps:$4 sm:$0xff]  }
 0x90b   : > { %v12330_v6 = vmax.f32 %v26745_v42, %v12233_v56 }
 0x90c   : > { %v27007_v37 = vpack.c.bf16 %v12329_v34, %v12323_v18  ;;  %v23726_v18 = vld [vmem:[%s28075_s6 + $0x2e8] ss:$12 sps:$4 sm:$0xff]  }
 0x90d   : > { %v27009_v39 = vpack.c.bf16 %v12330_v6, %v12324_v49  ;;  %13403 = vmatpush1.bf16.msra.mxu1 %v23705_v28 }
 0x90e   : > { %13404 = vmatprep.subr.bf16.mxu1 %v23710_v60 }
 0x90f   : > { %v12237_v55 = vpop.f32.mrb[132].mxu1 }
 0x910   : > { %v12335_v21 = vmax.f32 %v26749_v38, %v12237_v55  ;;  %v12239_v8 = vpop.f32.mrb[133].mxu1 }
 0x911   : > { %v12336_v42 = vmax.f32 %v26753_v26, %v12239_v8  ;;  %13405 = vmatpush1.bf16.msra.mxu1 %v23708_v13  ;;  %v12241_v9 = vpop.f32.mrb[134].mxu1  ;;  %v23714_v26 = vld [vmem:[%s28075_s6 + $0x288] ss:$12 sps:$4 sm:$0xff]  }
 0x912   : > { %v12341_v2 = vmax.f32 %v26757_v41, %v12241_v9  ;;  %v12243_v45 = vpop.f32.mrb[135].mxu1  ;;  %13406 = vmatprep.subr.bf16.mxu1 %v23713_v57  ;;  %v23719_v41 = vld [vmem:[%s28075_s6 + $0x2a4] ss:$12 sps:$4 sm:$0xff]  }
 0x913   : > { %v12342_v33 = vmax.f32 %v26760_v63, %v12243_v45  ;;  %v23722_v63 = vld [vmem:[%s28075_s6 + $0x2bc] ss:$12 sps:$4 sm:$0xff]   ;;  %v23732_v57 = vld [vmem:[%s28075_s6 + $0x318] ss:$12 sps:$4 sm:$0xff]  }
 0x914   : > { %v27027_v38 = vpack.c.bf16 %v12341_v2, %v12335_v21  ;;  %v23735_v9 = vld [vmem:[%s28075_s6 + $0x330] ss:$12 sps:$4 sm:$0xff]   ;;  %v23741_v2 = vld [vmem:[%s28075_s6 + $0x360] ss:$12 sps:$4 sm:$0xff]  }
 0x915   : > { %v27029_v24 = vpack.c.bf16 %v12342_v33, %v12336_v42  ;;  %13407 = vmatpush1.bf16.msra.mxu1 %v23711_v19  ;;  %v23743_v19 = vld [vmem:[%s28075_s6 + $0x364] ss:$12 sps:$4 sm:$0xff]   ;;  %v23746_v45 = vld [vmem:[%s28075_s6 + $0x37c] ss:$12 sps:$4 sm:$0xff]   ;;  %v23749_v33 = vld [vmem:[%s28075_s6 + $0x394] ss:$12 sps:$4 sm:$0xff]  }
 0x916   : > { %13408 = vmatprep.subr.bf16.mxu1 %v23716_v35  ;;  %v23744_v35 = vld [vmem:[%s28075_s6 + $0x378] ss:$12 sps:$4 sm:$0xff]  }
 0x919   : > { %13409 = vmatpush1.bf16.msra.mxu1 %v23714_v26  ;;  %v23747_v26 = vld [vmem:[%s28075_s6 + $0x390] ss:$12 sps:$4 sm:$0xff]  }
 0x91a   : > { %13410 = vmatprep.subr.bf16.mxu1 %v23719_v41  ;;  %v23752_v41 = vld [vmem:[%s28075_s6 + $0x3ac] ss:$12 sps:$4 sm:$0xff]  }
 0x91b   : > { %v12280_v25 = vpop.f32.mrb[136].mxu1 }
 0x91c   : > { %v12313_v14 = vmax.f32 %v26886_v4, %v12280_v25  ;;  %v12282_v46 = vpop.f32.mrb[137].mxu1  ;;  %v23753_v25 = vld [vmem:[%s28075_s6 + $0x3c0] ss:$12 sps:$4 sm:$0xff]  }
 0x91d   : > { %v12314_v48 = vmax.f32 %v26888_v32, %v12282_v46  ;;  %13411 = vmatpush1.bf16.msra.mxu1 %v23717_v7  ;;  %v12284_v17 = vpop.f32.mrb[138].mxu1  ;;  %v23723_v32 = vld [vmem:[%s28075_s6 + $0x2d0] ss:$12 sps:$4 sm:$0xff]   ;;  %v23750_v7 = vld [vmem:[%s28075_s6 + $0x3a8] ss:$12 sps:$4 sm:$0xff]  }
 0x91e   : > { %v12319_v16 = vmax.f32 %v26890_v11, %v12284_v17  ;;  %v12286_v23 = vpop.f32.mrb[139].mxu1  ;;  %13412 = vmatprep.subr.bf16.mxu1 %v23722_v63  ;;  %v23728_v11 = vld [vmem:[%s28075_s6 + $0x2ec] ss:$12 sps:$4 sm:$0xff]   ;;  %v23755_v63 = vld [vmem:[%s28075_s6 + $0x3c4] ss:$12 sps:$4 sm:$0xff]  }
 0x91f   : > { %v12320_v50 = vmax.f32 %v26892_v54, %v12286_v23  ;;  %v23756_v46 = vld [vmem:[%s28075_s6 + $0x3d8] ss:$12 sps:$4 sm:$0xff]   ;;  %v23759_v17 = vld [vmem:[%s28075_s6 + $0x3f0] ss:$12 sps:$4 sm:$0xff]  }
 0x920   : > { %v27053_v4 = vpack.c.bf16 %v12319_v16, %v12313_v14  ;;  %v23758_v14 = vld [vmem:[%s28075_s6 + $0x3dc] ss:$12 sps:$4 sm:$0xff]   ;;  %v23767_v23 = vld [vmem:[%s28075_s6 + $0x424] ss:$12 sps:$4 sm:$0xff]  }
 0x921   : > { %v27055_v58 = vpack.c.bf16 %v12320_v50, %v12314_v48  ;;  %13413 = vmatpush1.bf16.msra.mxu1 %v23720_v44  ;;  %v23761_v48 = vld [vmem:[%s28075_s6 + $0x3f4] ss:$12 sps:$4 sm:$0xff]   ;;  %v23764_v44 = vld [vmem:[%s28075_s6 + $0x40c] ss:$12 sps:$4 sm:$0xff]   ;;  %v23770_v50 = vld [vmem:[%s28075_s6 + $0x43c] ss:$12 sps:$4 sm:$0xff]  }
 0x922   : > { %13414 = vmatprep.subr.bf16.mxu1 %v23725_v43  ;;  %v23762_v16 = vld [vmem:[%s28075_s6 + $0x408] ss:$12 sps:$4 sm:$0xff]   ;;  %v23765_v43 = vld [vmem:[%s28075_s6 + $0x420] ss:$12 sps:$4 sm:$0xff]  }
 0x923   : > { %v12290_v15 = vpop.f32.mrb[140].mxu1 }
 0x924   : > { %v12325_v61 = vmax.f32 %v26894_v12, %v12290_v15  ;;  %v12292_v51 = vpop.f32.mrb[141].mxu1  ;;  %v23771_v15 = vld [vmem:[%s28075_s6 + $0x450] ss:$12 sps:$4 sm:$0xff]  }
 0x925   : > { %v12326_v54 = vmax.f32 %v26896_v10, %v12292_v51  ;;  %13415 = vmatpush1.bf16.msra.mxu1 %v23723_v32  ;;  %v12294_v30 = vpop.f32.mrb[142].mxu1  ;;  %v23729_v10 = vld [vmem:[%s28075_s6 + $0x300] ss:$12 sps:$4 sm:$0xff]   ;;  %v23768_v32 = vld [vmem:[%s28075_s6 + $0x438] ss:$12 sps:$4 sm:$0xff]  }
 0x926   : > { %v12331_v29 = vmax.f32 %v26898_v22, %v12294_v30  ;;  %v12296_v49 = vpop.f32.mrb[143].mxu1  ;;  %13416 = vmatprep.subr.bf16.mxu1 %v23728_v11  ;;  %v23734_v22 = vld [vmem:[%s28075_s6 + $0x31c] ss:$12 sps:$4 sm:$0xff]   ;;  %v23773_v11 = vld [vmem:[%s28075_s6 + $0x454] ss:$12 sps:$4 sm:$0xff]  }
 0x927   : > { %v12332_v28 = vmax.f32 %v26900_v59, %v12296_v49  ;;  %v23774_v51 = vld [vmem:[%s28075_s6 + $0x468] ss:$12 sps:$4 sm:$0xff]   ;;  %v23781_v49 = vld [vmem:[%s28075_s6 + $0xf8] ss:$12 sps:$4 sm:$0xff]  }
 0x928   : > { %v27073_v12 = vpack.c.bf16 %v12331_v29, %v12325_v61  ;;  %v23776_v61 = vld [vmem:[%s28075_s6 + $0x46c] ss:$12 sps:$4 sm:$0xff]   ;;  %v23778_v30 = vld [vmem:[%s28075_s6 + $0x8] ss:$12 sps:$4 sm:$0xff]  }
 0x929   : > { %v27075_v34 = vpack.c.bf16 %v12332_v28, %v12326_v54  ;;  %13417 = vmatpush1.bf16.msra.mxu1 %v23726_v18  ;;  %v23777_v54 = vld [vmem:[%s28075_s6 + $0xc8] ss:$12 sps:$4 sm:$0xff]   ;;  %v23779_v18 = vld [vmem:[%s28075_s6 + $0xe0] ss:$12 sps:$4 sm:$0xff]   ;;  %v23783_v28 = vld [vmem:[%s28075_s6 + $0x110] ss:$12 sps:$4 sm:$0xff]  }
 0x92a   : > { %13449 = vmatprep.subr.bf16.mxu1 %v23731_v52  ;;  %v23780_v29 = vld [vmem:[%s28075_s6 + $0x20] ss:$12 sps:$4 sm:$0xff]   ;;  %v23782_v52 = vld [vmem:[%s28075_s6 + $0x38] ss:$12 sps:$4 sm:$0xff]  }
 0x92b   : > { %v12300_v56 = vpop.f32.mrb[144].mxu1 }
 0x92c   : > { %v12337_v60 = vmax.f32 %v26902_v1, %v12300_v56  ;;  %13419 = vmatmul.mubr.bf16.vlgmr.msra.gmra.mrb[148].mxu1 %v26986_v20  ;;  %v12302_v59 = vpop.f32.mrb[145].mxu1  ;;  %v23737_v1 = vld [vmem:[%s28075_s6 + $0x334] ss:$12 sps:$4 sm:$0xff]  }
 0x92d   : > { %v12338_v6 = vmax.f32 %v26904_v0, %v12302_v59  ;;  %13428 = vmatprep.mubr.bf16.mxu1 %v27009_v39  ;;  %13450 = vmatpush1.bf16.msra.mxu1 %v23729_v10  ;;  %v12304_v13 = vpop.f32.mrb[146].mxu1  ;;  %v23784_v10 = vld [vmem:[%s28075_s6 + $0x50] ss:$12 sps:$4 sm:$0xff]   ;;  %v23786_v56 = vld [vmem:[%s28075_s6 + $0x68] ss:$12 sps:$4 sm:$0xff]  }
 0x92e   : > { %v12343_v55 = vmax.f32 %v26906_v3, %v12304_v13  ;;  %v12306_v21 = vpop.f32.mrb[147].mxu1  ;;  %13451 = vmatprep.subr.bf16.mxu1 %v23734_v22  ;;  %v23740_v3 = vld [vmem:[%s28075_s6 + $0x34c] ss:$12 sps:$4 sm:$0xff]   ;;  %v23785_v22 = vld [vmem:[%s28075_s6 + $0x128] ss:$12 sps:$4 sm:$0xff]  }
 0x92f   : > { %v12344_v8 = vmax.f32 %v26908_v27, %v12306_v21  ;;  %v23738_v27 = vld [vmem:[%s28075_s6 + $0x348] ss:$12 sps:$4 sm:$0xff]   ;;  %v23788_v59 = vld [vmem:[%s28075_s6 + $0x80] ss:$12 sps:$4 sm:$0xff]   ;;  %v23790_v13 = vld [vmem:[%s28075_s6 + $0x98] ss:$12 sps:$4 sm:$0xff]  }
 0x930   : > { %v27095_v42 = vpack.c.bf16 %v12343_v55, %v12337_v60  ;;  %v23787_v60 = vld [vmem:[%s28075_s6 + $0x140] ss:$12 sps:$4 sm:$0xff]   ;;  %v23792_v55 = vld [vmem:[%s28075_s6 + $0xb0] ss:$12 sps:$4 sm:$0xff]   ;;  %v23793_v21 = vld [vmem:[%s28075_s6 + $0x248] ss:$12 sps:$4 sm:$0xff]  }
 0x931   : > { %v27097_v0 = vpack.c.bf16 %v12344_v8, %v12338_v6  ;;  %13452 = vmatpush1.bf16.msra.mxu1 %v23732_v57  ;;  %v23789_v6 = vld [vmem:[%s28075_s6 + $0x158] ss:$12 sps:$4 sm:$0xff]   ;;  %v23791_v57 = vld [vmem:[%s28075_s6 + $0x170] ss:$12 sps:$4 sm:$0xff]   ;;  %v23795_v8 = vld [vmem:[%s28075_s6 + $0x260] ss:$12 sps:$4 sm:$0xff]  }
 0x932   : > { %13453 = vmatprep.subr.bf16.mxu1 %v23737_v1  ;;  %v23794_v1 = vld [vmem:[%s28075_s6 + $0x188] ss:$12 sps:$4 sm:$0xff]  }
 0x934   : > { %13429 = vmatmul.mubr.bf16.gmra.mrb[152].mxu1 %v27007_v37 }
 0x935   : > { %13438 = vmatprep.mubr.bf16.mxu1 %v27029_v24  ;;  %13454 = vmatpush1.bf16.msra.mxu1 %v23735_v9  ;;  %v23796_v9 = vld [vmem:[%s28075_s6 + $0x1a0] ss:$12 sps:$4 sm:$0xff]  }
 0x936   : > { %13455 = vmatprep.subr.bf16.mxu1 %v23740_v3  ;;  %v23797_v3 = vld [vmem:[%s28075_s6 + $0x278] ss:$12 sps:$4 sm:$0xff]  }
 0x939   : > { %13456 = vmatpush1.bf16.msra.mxu1 %v23738_v27  ;;  %v23798_v27 = vld [vmem:[%s28075_s6 + $0x1b8] ss:$12 sps:$4 sm:$0xff]  }
 0x93a   : > { %13457 = vmatprep.subr.bf16.mxu1 %v23743_v19  ;;  %v23799_v19 = vld [vmem:[%s28075_s6 + $0x290] ss:$12 sps:$4 sm:$0xff]  }
 0x93c   : > { %13439 = vmatmul.mubr.bf16.gmra.mrb[156].mxu1 %v27027_v38 }
 0x93d   : > { %13458 = vmatpush1.bf16.msra.mxu1 %v23741_v2  ;;  %13481 = vmatprep.mubr.bf16.mxu1 %v27055_v58  ;;  %v23800_v2 = vld [vmem:[%s28075_s6 + $0x1d0] ss:$12 sps:$4 sm:$0xff]  }
 0x93e   : > { %13459 = vmatprep.subr.bf16.mxu1 %v23746_v45  ;;  %v23801_v45 = vld [vmem:[%s28075_s6 + $0x2a8] ss:$12 sps:$4 sm:$0xff]  }
 0x941   : > { %13460 = vmatpush1.bf16.msra.mxu1 %v23744_v35  ;;  %v23802_v35 = vld [vmem:[%s28075_s6 + $0x1e8] ss:$12 sps:$4 sm:$0xff]  }
 0x942   : > { %13461 = vmatprep.subr.bf16.mxu1 %v23749_v33  ;;  %v23803_v33 = vld [vmem:[%s28075_s6 + $0x2c0] ss:$12 sps:$4 sm:$0xff]  }
 0x945   : > { %13462 = vmatpush1.bf16.msra.mxu1 %v23747_v26  ;;  %v23804_v26 = vld [vmem:[%s28075_s6 + $0x200] ss:$12 sps:$4 sm:$0xff]  }
 0x946   : > { %13463 = vmatprep.subr.bf16.mxu1 %v23752_v41  ;;  %v23805_v41 = vld [vmem:[%s28075_s6 + $0x2d8] ss:$12 sps:$4 sm:$0xff]  }
 0x949   : > { %13464 = vmatpush1.bf16.msra.mxu1 %v23750_v7  ;;  %v23806_v7 = vld [vmem:[%s28075_s6 + $0x218] ss:$12 sps:$4 sm:$0xff]  }
 0x94a   : > { %13465 = vmatprep.subr.bf16.mxu1 %v23755_v63  ;;  %v23807_v63 = vld [vmem:[%s28075_s6 + $0x2f0] ss:$12 sps:$4 sm:$0xff]  }
 0x94d   : > { %13466 = vmatpush1.bf16.msra.mxu1 %v23753_v25  ;;  %v23808_v25 = vld [vmem:[%s28075_s6 + $0x230] ss:$12 sps:$4 sm:$0xff]  }
 0x94e   : > { %13467 = vmatprep.subr.bf16.mxu1 %v23758_v14  ;;  %v23809_v14 = vld [vmem:[%s28075_s6 + $0x3c8] ss:$12 sps:$4 sm:$0xff]  }
 0x951   : > { %13468 = vmatpush1.bf16.msra.mxu1 %v23756_v46  ;;  %v23810_v46 = vld [vmem:[%s28075_s6 + $0x308] ss:$12 sps:$4 sm:$0xff]  }
 0x952   : > { %13469 = vmatprep.subr.bf16.mxu1 %v23761_v48  ;;  %v23811_v48 = vld [vmem:[%s28075_s6 + $0x3e0] ss:$12 sps:$4 sm:$0xff]  }
 0x955   : > { %13470 = vmatpush1.bf16.msra.mxu1 %v23759_v17  ;;  %v23812_v17 = vld [vmem:[%s28075_s6 + $0x320] ss:$12 sps:$4 sm:$0xff]  }
 0x956   : > { %13471 = vmatprep.subr.bf16.mxu1 %v23764_v44  ;;  %v23813_v44 = vld [vmem:[%s28075_s6 + $0x3f8] ss:$12 sps:$4 sm:$0xff]  }
 0x959   : > { %13472 = vmatpush1.bf16.msra.mxu1 %v23762_v16  ;;  %v23814_v16 = vld [vmem:[%s28075_s6 + $0x338] ss:$12 sps:$4 sm:$0xff]  }
 0x95a   : > { %13473 = vmatprep.subr.bf16.mxu1 %v23767_v23  ;;  %v23815_v23 = vld [vmem:[%s28075_s6 + $0x410] ss:$12 sps:$4 sm:$0xff]  }
 0x95d   : > { %13474 = vmatpush1.bf16.msra.mxu1 %v23765_v43  ;;  %v23816_v43 = vld [vmem:[%s28075_s6 + $0x350] ss:$12 sps:$4 sm:$0xff]  }
 0x95e   : > { %13475 = vmatprep.subr.bf16.mxu1 %v23770_v50  ;;  %v23817_v50 = vld [vmem:[%s28075_s6 + $0x428] ss:$12 sps:$4 sm:$0xff]  }
 0x961   : > { %13476 = vmatpush1.bf16.msra.mxu1 %v23768_v32  ;;  %v23818_v32 = vld [vmem:[%s28075_s6 + $0x368] ss:$12 sps:$4 sm:$0xff]  }
 0x962   : > { %13477 = vmatprep.subr.bf16.mxu1 %v23773_v11  ;;  %v23819_v11 = vld [vmem:[%s28075_s6 + $0x440] ss:$12 sps:$4 sm:$0xff]  }
 0x965   : > { %13478 = vmatpush1.bf16.msra.mxu1 %v23771_v15  ;;  %v23820_v15 = vld [vmem:[%s28075_s6 + $0x380] ss:$12 sps:$4 sm:$0xff]  }
 0x966   : > { %13479 = vmatprep.subr.bf16.mxu1 %v23776_v61  ;;  %v23821_v61 = vld [vmem:[%s28075_s6 + $0x458] ss:$12 sps:$4 sm:$0xff]  }
 0x969   : > { %13480 = vmatpush1.bf16.msra.mxu1 %v23774_v51  ;;  %v23822_v51 = vld [vmem:[%s28075_s6 + $0x398] ss:$12 sps:$4 sm:$0xff]  }
 0x96a   : > { %20445 = vmatprep.subr.bf16.mxu1 %v23777_v54  ;;  %v23823_v54 = vld [vmem:[%s28075_s6 + $0x470] ss:$12 sps:$4 sm:$0xff]  }
 0x96c   : > { %13482 = vmatmul.mubr.bf16.vlgmr.msra.gmra.mrb[148].mxu1 %v27053_v4 }
 0x96d   : > { %13491 = vmatprep.mubr.bf16.mxu1 %v27075_v34  ;;  %20446 = vmatpush3.bf16.msra.mxu1 %v23778_v30  ;;  %v23824_v30 = vld [vmem:[%s28075_s6 + $0x3b0] ss:$12 sps:$4 sm:$0xff]  }
 0x96e   : > { %20447 = vmatprep.subr.bf16.mxu1 %v23779_v18  ;;  %v23827_v18 = vld [vmem:[%s28075_s6 + $0x484] ss:$12 sps:$4 sm:$0xff]  }
 0x971   : > { %20448 = vmatpush3.bf16.msra.mxu1 %v23780_v29  ;;  %v23825_v29 = vld [vmem:[%s28075_s6 + $0x480] ss:$12 sps:$4 sm:$0xff]  }
 0x972   : > { %20449 = vmatprep.subr.bf16.mxu1 %v23781_v49  ;;  %v23830_v49 = vld [vmem:[%s28075_s6 + $0x49c] ss:$12 sps:$4 sm:$0xff]  }
 0x974   : > { %13492 = vmatmul.mubr.bf16.gmra.mrb[152].mxu1 %v27073_v12 }
 0x975   : > { %13501 = vmatprep.mubr.bf16.mxu1 %v27097_v0  ;;  %20450 = vmatpush3.bf16.msra.mxu1 %v23782_v52  ;;  %v23828_v52 = vld [vmem:[%s28075_s6 + $0x498] ss:$12 sps:$4 sm:$0xff]  }
 0x976   : > { %20451 = vmatprep.subr.bf16.mxu1 %v23783_v28  ;;  %v23833_v28 = vld [vmem:[%s28075_s6 + $0x4b4] ss:$12 sps:$4 sm:$0xff]  }
 0x979   : > { %20452 = vmatpush3.bf16.msra.mxu1 %v23784_v10  ;;  %v23831_v10 = vld [vmem:[%s28075_s6 + $0x4b0] ss:$12 sps:$4 sm:$0xff]  }
 0x97a   : > { %20453 = vmatprep.subr.bf16.mxu1 %v23785_v22  ;;  %v23836_v22 = vld [vmem:[%s28075_s6 + $0x4cc] ss:$12 sps:$4 sm:$0xff]  }
 0x97c   : > { %13502 = vmatmul.mubr.bf16.gmra.mrb[156].mxu1 %v27095_v42 }
 0x97d   : > { %20454 = vmatpush3.bf16.msra.mxu1 %v23786_v56  ;;  %13544 = vmatprep.mubr.bf16.mxu1 %v26916_v36  ;;  %v23834_v56 = vld [vmem:[%s28075_s6 + $0x4c8] ss:$12 sps:$4 sm:$0xff]  }
 0x97e   : > { %20455 = vmatprep.subr.bf16.mxu1 %v23787_v60  ;;  %v23839_v60 = vld [vmem:[%s28075_s6 + $0x4e4] ss:$12 sps:$4 sm:$0xff]  }
 0x981   : > { %20456 = vmatpush3.bf16.msra.mxu1 %v23788_v59  ;;  %v23837_v59 = vld [vmem:[%s28075_s6 + $0x4e0] ss:$12 sps:$4 sm:$0xff]  }
 0x982   : > { %20457 = vmatprep.subr.bf16.mxu1 %v23789_v6  ;;  %v23842_v6 = vld [vmem:[%s28075_s6 + $0x4fc] ss:$12 sps:$4 sm:$0xff]  }
 0x985   : > { %20458 = vmatpush3.bf16.msra.mxu1 %v23790_v13  ;;  %v23840_v13 = vld [vmem:[%s28075_s6 + $0x4f8] ss:$12 sps:$4 sm:$0xff]  }
 0x986   : > { %20459 = vmatprep.subr.bf16.mxu1 %v23791_v57  ;;  %v23845_v57 = vld [vmem:[%s28075_s6 + $0x514] ss:$12 sps:$4 sm:$0xff]  }
 0x989   : > { %20460 = vmatpush3.bf16.msra.mxu1 %v23792_v55  ;;  %v23843_v55 = vld [vmem:[%s28075_s6 + $0x510] ss:$12 sps:$4 sm:$0xff]  }
 0x98a   : > { %20479 = vmatprep.subr.bf16.mxu1 %v23793_v21  ;;  %v23848_v21 = vld [vmem:[%s28075_s6 + $0x52c] ss:$12 sps:$4 sm:$0xff]  }
 0x98c   : > { %13545 = vmatmul.mubr.bf16.vlgmr.msra.gmra.mrb[160].mxu1 %v26914_v53 }
 0x98d   : > { %13552 = vmatprep.mubr.bf16.mxu1 %v26938_v5  ;;  %20480 = vmatpush3.bf16.msra.mxu1 %v23794_v1  ;;  %v23846_v1 = vld [vmem:[%s28075_s6 + $0x528] ss:$12 sps:$4 sm:$0xff]  }
 0x98e   : > { %20481 = vmatprep.subr.bf16.mxu1 %v23795_v8  ;;  %v23851_v8 = vld [vmem:[%s28075_s6 + $0x544] ss:$12 sps:$4 sm:$0xff]  }
 0x991   : > { %20482 = vmatpush3.bf16.msra.mxu1 %v23796_v9  ;;  %v23849_v9 = vld [vmem:[%s28075_s6 + $0x540] ss:$12 sps:$4 sm:$0xff]  }
 0x992   : > { %20483 = vmatprep.subr.bf16.mxu1 %v23797_v3  ;;  %v23854_v3 = vld [vmem:[%s28075_s6 + $0x55c] ss:$12 sps:$4 sm:$0xff]  }
 0x994   : > { %13553 = vmatmul.mubr.bf16.gmra.mrb[164].mxu1 %v26936_v31 }
 0x995   : > { %13560 = vmatprep.mubr.bf16.mxu1 %v26960_v62  ;;  %20484 = vmatpush3.bf16.msra.mxu1 %v23798_v27  ;;  %v23852_v27 = vld [vmem:[%s28075_s6 + $0x558] ss:$12 sps:$4 sm:$0xff]  }
 0x996   : > { %20485 = vmatprep.subr.bf16.mxu1 %v23799_v19  ;;  %v23857_v19 = vld [vmem:[%s28075_s6 + $0x574] ss:$12 sps:$4 sm:$0xff]  }
 0x999   : > { %20486 = vmatpush3.bf16.msra.mxu1 %v23800_v2  ;;  %v23855_v2 = vld [vmem:[%s28075_s6 + $0x570] ss:$12 sps:$4 sm:$0xff]  }
 0x99a   : > { %20487 = vmatprep.subr.bf16.mxu1 %v23801_v45  ;;  %v23860_v45 = vld [vmem:[%s28075_s6 + $0x58c] ss:$12 sps:$4 sm:$0xff]  }
 0x99c   : > { %13561 = vmatmul.mubr.bf16.gmra.mrb[168].mxu1 %v26958_v40 }
 0x99d   : > { %20488 = vmatpush3.bf16.msra.mxu1 %v23802_v35  ;;  %13601 = vmatprep.mubr.bf16.mxu1 %v26988_v47  ;;  %v23858_v35 = vld [vmem:[%s28075_s6 + $0x588] ss:$12 sps:$4 sm:$0xff]  }
 0x99e   : > { %20489 = vmatprep.subr.bf16.mxu1 %v23803_v33  ;;  %v23863_v33 = vld [vmem:[%s28075_s6 + $0x5a4] ss:$12 sps:$4 sm:$0xff]  }
 0x9a1   : > { %20490 = vmatpush3.bf16.msra.mxu1 %v23804_v26  ;;  %v23861_v26 = vld [vmem:[%s28075_s6 + $0x5a0] ss:$12 sps:$4 sm:$0xff]  }
 0x9a2   : > { %20491 = vmatprep.subr.bf16.mxu1 %v23805_v41  ;;  %v23866_v41 = vld [vmem:[%s28075_s6 + $0x5bc] ss:$12 sps:$4 sm:$0xff]  }
 0x9a5   : > { %20492 = vmatpush3.bf16.msra.mxu1 %v23806_v7  ;;  %v23864_v7 = vld [vmem:[%s28075_s6 + $0x5b8] ss:$12 sps:$4 sm:$0xff]  }
 0x9a6   : > { %20493 = vmatprep.subr.bf16.mxu1 %v23807_v63  ;;  %v23869_v63 = vld [vmem:[%s28075_s6 + $0x5d4] ss:$12 sps:$4 sm:$0xff]  }
 0x9a9   : > { %20494 = vmatpush3.bf16.msra.mxu1 %v23808_v25  ;;  %v23867_v25 = vld [vmem:[%s28075_s6 + $0x5d0] ss:$12 sps:$4 sm:$0xff]  }
 0x9aa   : > { %20513 = vmatprep.subr.bf16.mxu1 %v23809_v14  ;;  %v23872_v14 = vld [vmem:[%s28075_s6 + $0x5ec] ss:$12 sps:$4 sm:$0xff]  }
 0x9ac   : > { %13602 = vmatmul.mubr.bf16.vlgmr.msra.gmra.mrb[172].mxu1 %v26986_v20 }
 0x9ad   : > { %13609 = vmatprep.mubr.bf16.mxu1 %v27009_v39  ;;  %20514 = vmatpush3.bf16.msra.mxu1 %v23810_v46  ;;  %v23870_v46 = vld [vmem:[%s28075_s6 + $0x5e8] ss:$12 sps:$4 sm:$0xff]  }
 0x9ae   : > { %20515 = vmatprep.subr.bf16.mxu1 %v23811_v48  ;;  %v23875_v48 = vld [vmem:[%s28075_s6 + $0x604] ss:$12 sps:$4 sm:$0xff]  }
 0x9b1   : > { %20516 = vmatpush3.bf16.msra.mxu1 %v23812_v17  ;;  %v23873_v17 = vld [vmem:[%s28075_s6 + $0x600] ss:$12 sps:$4 sm:$0xff]  }
 0x9b2   : > { %20517 = vmatprep.subr.bf16.mxu1 %v23813_v44  ;;  %v23878_v44 = vld [vmem:[%s28075_s6 + $0x61c] ss:$12 sps:$4 sm:$0xff]  }
 0x9b4   : > { %13610 = vmatmul.mubr.bf16.gmra.mrb[176].mxu1 %v27007_v37 }
 0x9b5   : > { %13617 = vmatprep.mubr.bf16.mxu1 %v27029_v24  ;;  %20518 = vmatpush3.bf16.msra.mxu1 %v23814_v16  ;;  %v23876_v16 = vld [vmem:[%s28075_s6 + $0x618] ss:$12 sps:$4 sm:$0xff]  }
 0x9b6   : > { %20519 = vmatprep.subr.bf16.mxu1 %v23815_v23  ;;  %v23881_v23 = vld [vmem:[%s28075_s6 + $0x634] ss:$12 sps:$4 sm:$0xff]  }
 0x9b9   : > { %20520 = vmatpush3.bf16.msra.mxu1 %v23816_v43  ;;  %v23879_v43 = vld [vmem:[%s28075_s6 + $0x630] ss:$12 sps:$4 sm:$0xff]  }
 0x9ba   : > { %20521 = vmatprep.subr.bf16.mxu1 %v23817_v50  ;;  %v23884_v50 = vld [vmem:[%s28075_s6 + $0x64c] ss:$12 sps:$4 sm:$0xff]  }
 0x9bc   : > { %13618 = vmatmul.mubr.bf16.gmra.mrb[180].mxu1 %v27027_v38 }
 0x9bd   : > { %20522 = vmatpush3.bf16.msra.mxu1 %v23818_v32  ;;  %13658 = vmatprep.mubr.bf16.mxu1 %v27055_v58  ;;  %v23882_v32 = vld [vmem:[%s28075_s6 + $0x648] ss:$12 sps:$4 sm:$0xff]  }
 0x9be   : > { %20523 = vmatprep.subr.bf16.mxu1 %v23819_v11  ;;  %v23887_v11 = vld [vmem:[%s28075_s6 + $0x664] ss:$12 sps:$4 sm:$0xff]  }
 0x9c1   : > { %20524 = vmatpush3.bf16.msra.mxu1 %v23820_v15  ;;  %v23885_v15 = vld [vmem:[%s28075_s6 + $0x660] ss:$12 sps:$4 sm:$0xff]  }
 0x9c2   : > { %20525 = vmatprep.subr.bf16.mxu1 %v23821_v61  ;;  %v23890_v61 = vld [vmem:[%s28075_s6 + $0x67c] ss:$12 sps:$4 sm:$0xff]  }
 0x9c5   : > { %20526 = vmatpush3.bf16.msra.mxu1 %v23822_v51  ;;  %v23888_v51 = vld [vmem:[%s28075_s6 + $0x678] ss:$12 sps:$4 sm:$0xff]  }
 0x9c6   : > { %20527 = vmatprep.subr.bf16.mxu1 %v23823_v54  ;;  %v23893_v54 = vld [vmem:[%s28075_s6 + $0x694] ss:$12 sps:$4 sm:$0xff]  }
 0x9c9   : > { %20528 = vmatpush3.bf16.msra.mxu1 %v23824_v30  ;;  %v23891_v30 = vld [vmem:[%s28075_s6 + $0x690] ss:$12 sps:$4 sm:$0xff]  }
 0x9ca   : > { %14644 = vmatprep.subr.bf16.mxu1 %v23827_v18  ;;  %v23896_v18 = vld [vmem:[%s28075_s6 + $0x6ac] ss:$12 sps:$4 sm:$0xff]  }
 0x9cc   : > { %13659 = vmatmul.mubr.bf16.vlgmr.msra.gmra.mrb[184].mxu1 %v27053_v4 }
 0x9cd   : > { %13666 = vmatprep.mubr.bf16.mxu1 %v27075_v34  ;;  %14645 = vmatpush1.bf16.msra.mxu1 %v23825_v29  ;;  %v23894_v29 = vld [vmem:[%s28075_s6 + $0x6a8] ss:$12 sps:$4 sm:$0xff]  }
 0x9ce   : > { %14646 = vmatprep.subr.bf16.mxu1 %v23830_v49  ;;  %v23899_v49 = vld [vmem:[%s28075_s6 + $0x6c4] ss:$12 sps:$4 sm:$0xff]  }
 0x9d1   : > { %14647 = vmatpush1.bf16.msra.mxu1 %v23828_v52  ;;  %v23897_v52 = vld [vmem:[%s28075_s6 + $0x6c0] ss:$12 sps:$4 sm:$0xff]  }
 0x9d2   : > { %14648 = vmatprep.subr.bf16.mxu1 %v23833_v28  ;;  %v23902_v28 = vld [vmem:[%s28075_s6 + $0x6dc] ss:$12 sps:$4 sm:$0xff]  }
 0x9d4   : > { %13667 = vmatmul.mubr.bf16.gmra.mrb[188].mxu1 %v27073_v12 }
 0x9d5   : > { %13674 = vmatprep.mubr.bf16.mxu1 %v27097_v0  ;;  %14649 = vmatpush1.bf16.msra.mxu1 %v23831_v10  ;;  %v23900_v10 = vld [vmem:[%s28075_s6 + $0x6d8] ss:$12 sps:$4 sm:$0xff]  }
 0x9d6   : > { %14650 = vmatprep.subr.bf16.mxu1 %v23836_v22  ;;  %v23905_v22 = vld [vmem:[%s28075_s6 + $0x6f4] ss:$12 sps:$4 sm:$0xff]  }
 0x9d9   : > { %14651 = vmatpush1.bf16.msra.mxu1 %v23834_v56  ;;  %v23903_v56 = vld [vmem:[%s28075_s6 + $0x6f0] ss:$12 sps:$4 sm:$0xff]  }
 0x9da   : > { %14652 = vmatprep.subr.bf16.mxu1 %v23839_v60  ;;  %v23908_v60 = vld [vmem:[%s28075_s6 + $0x70c] ss:$12 sps:$4 sm:$0xff]  }
 0x9dc   : > { %13675 = vmatmul.mubr.bf16.gmra.mrb[192].mxu1 %v27095_v42 }
 0x9dd   : > { %14653 = vmatpush1.bf16.msra.mxu1 %v23837_v59  ;;  %14676 = vmatprep.mubr.bf16.mxu1 %v26916_v36  ;;  %v23906_v59 = vld [vmem:[%s28075_s6 + $0x708] ss:$12 sps:$4 sm:$0xff]  }
 0x9de   : > { %14654 = vmatprep.subr.bf16.mxu1 %v23842_v6  ;;  %v23911_v6 = vld [vmem:[%s28075_s6 + $0x724] ss:$12 sps:$4 sm:$0xff]  }
 0x9e1   : > { %14655 = vmatpush1.bf16.msra.mxu1 %v23840_v13  ;;  %v23909_v13 = vld [vmem:[%s28075_s6 + $0x720] ss:$12 sps:$4 sm:$0xff]  }
 0x9e2   : > { %14656 = vmatprep.subr.bf16.mxu1 %v23845_v57  ;;  %v23914_v57 = vld [vmem:[%s28075_s6 + $0x73c] ss:$12 sps:$4 sm:$0xff]  }
 0x9e5   : > { %14657 = vmatpush1.bf16.msra.mxu1 %v23843_v55  ;;  %v23912_v55 = vld [vmem:[%s28075_s6 + $0x738] ss:$12 sps:$4 sm:$0xff]  }
 0x9e6   : > { %14658 = vmatprep.subr.bf16.mxu1 %v23848_v21  ;;  %v23917_v21 = vld [vmem:[%s28075_s6 + $0x754] ss:$12 sps:$4 sm:$0xff]  }
 0x9e9   : > { %14659 = vmatpush1.bf16.msra.mxu1 %v23846_v1 }
 0x9ea   : > { %14660 = vmatprep.subr.bf16.mxu1 %v23851_v8 }
 0x9ed   : > { %14661 = vmatpush1.bf16.msra.mxu1 %v23849_v9 }
 0x9ee   : > { %14662 = vmatprep.subr.bf16.mxu1 %v23854_v3  ;;  %v23915_v3 = vld [vmem:[%s28075_s6 + $0x750] ss:$12 sps:$4 sm:$0xff]  }
 0x9f1   : > { %14663 = vmatpush1.bf16.msra.mxu1 %v23852_v27 }
 0x9f2   : > { %14664 = vmatprep.subr.bf16.mxu1 %v23857_v19  ;;  %v23920_v19 = vld [vmem:[%s28075_s6 + $0x76c] ss:$12 sps:$4 sm:$0xff]  }
 0x9f5   : > { %14665 = vmatpush1.bf16.msra.mxu1 %v23855_v2  ;;  %v23918_v2 = vld [vmem:[%s28075_s6 + $0x768] ss:$12 sps:$4 sm:$0xff]  }
 0x9f6   : > { %14666 = vmatprep.subr.bf16.mxu1 %v23860_v45  ;;  %v23923_v45 = vld [vmem:[%s28075_s6 + $0x784] ss:$12 sps:$4 sm:$0xff]  }
 0x9f9   : > { %14667 = vmatpush1.bf16.msra.mxu1 %v23858_v35 }
 0x9fa   : > { %14668 = vmatprep.subr.bf16.mxu1 %v23863_v33 }
 0x9fd   : > { %14669 = vmatpush1.bf16.msra.mxu1 %v23861_v26 }
 0x9fe   : > { %14670 = vmatprep.subr.bf16.mxu1 %v23866_v41  ;;  %v23921_v41 = vld [vmem:[%s28075_s6 + $0x780] ss:$12 sps:$4 sm:$0xff]  }
 0xa01   : > { %14671 = vmatpush1.bf16.msra.mxu1 %v23864_v7 }
 0xa02   : > { %14672 = vmatprep.subr.bf16.mxu1 %v23869_v63  ;;  %v23926_v63 = vld [vmem:[%s28075_s6 + $0x79c] ss:$12 sps:$4 sm:$0xff]  }
 0xa05   : > { %14673 = vmatpush1.bf16.msra.mxu1 %v23867_v25  ;;  %v23924_v25 = vld [vmem:[%s28075_s6 + $0x798] ss:$12 sps:$4 sm:$0xff]  }
 0xa06   : > { %14674 = vmatprep.subr.bf16.mxu1 %v23872_v14  ;;  %v23929_v14 = vld [vmem:[%s28075_s6 + $0x7b4] ss:$12 sps:$4 sm:$0xff]  }
 0xa09   : > { %14675 = vmatpush1.bf16.msra.mxu1 %v23870_v46 }
 0xa0a   : > { %14707 = vmatprep.subr.bf16.mxu1 %v23875_v48 }
 0xa0c   : > { %14677 = vmatmul.mubr.bf16.vlgmr.msra.gmra.mrb[196].mxu1 %v26914_v53 }
 0xa0d   : > { %14686 = vmatprep.mubr.bf16.mxu1 %v26938_v5  ;;  %14708 = vmatpush1.bf16.msra.mxu1 %v23873_v17 }
 0xa0e   : > { %14709 = vmatprep.subr.bf16.mxu1 %v23878_v44  ;;  %v23927_v44 = vld [vmem:[%s28075_s6 + $0x7b0] ss:$12 sps:$4 sm:$0xff]  }
 0xa11   : > { %14710 = vmatpush1.bf16.msra.mxu1 %v23876_v16 }
 0xa12   : > { %14711 = vmatprep.subr.bf16.mxu1 %v23881_v23  ;;  %v23932_v23 = vld [vmem:[%s28075_s6 + $0x7cc] ss:$12 sps:$4 sm:$0xff]  }
 0xa14   : > { %14687 = vmatmul.mubr.bf16.gmra.mrb[200].mxu1 %v26936_v31 }
 0xa15   : > { %14696 = vmatprep.mubr.bf16.mxu1 %v26960_v62  ;;  %14712 = vmatpush1.bf16.msra.mxu1 %v23879_v43  ;;  %v23930_v43 = vld [vmem:[%s28075_s6 + $0x7c8] ss:$12 sps:$4 sm:$0xff]  }
 0xa16   : > { %14713 = vmatprep.subr.bf16.mxu1 %v23884_v50  ;;  %v23935_v50 = vld [vmem:[%s28075_s6 + $0x7e4] ss:$12 sps:$4 sm:$0xff]  }
 0xa19   : > { %14714 = vmatpush1.bf16.msra.mxu1 %v23882_v32  ;;  %v23933_v32 = vld [vmem:[%s28075_s6 + $0x7e0] ss:$12 sps:$4 sm:$0xff]  }
 0xa1a   : > { %14715 = vmatprep.subr.bf16.mxu1 %v23887_v11  ;;  %v23938_v11 = vld [vmem:[%s28075_s6 + $0x7fc] ss:$12 sps:$4 sm:$0xff]  }
 0xa1c   : > { %14697 = vmatmul.mubr.bf16.gmra.mrb[204].mxu1 %v26958_v40 }
 0xa1d   : > { %14716 = vmatpush1.bf16.msra.mxu1 %v23885_v15  ;;  %14739 = vmatprep.mubr.bf16.mxu1 %v26988_v47  ;;  %v23936_v15 = vld [vmem:[%s28075_s6 + $0x7f8] ss:$12 sps:$4 sm:$0xff]  }
 0xa1e   : > { %14717 = vmatprep.subr.bf16.mxu1 %v23890_v61  ;;  %v23941_v61 = vld [vmem:[%s28075_s6 + $0x814] ss:$12 sps:$4 sm:$0xff]  }
 0xa21   : > { %14718 = vmatpush1.bf16.msra.mxu1 %v23888_v51 }
 0xa22   : > { %14719 = vmatprep.subr.bf16.mxu1 %v23893_v54 }
 0xa25   : > { %14720 = vmatpush1.bf16.msra.mxu1 %v23891_v30 }
 0xa26   : > { %14721 = vmatprep.subr.bf16.mxu1 %v23896_v18 }
 0xa29   : > { %14722 = vmatpush1.bf16.msra.mxu1 %v23894_v29  ;;  %v23939_v29 = vld [vmem:[%s28075_s6 + $0x810] ss:$12 sps:$4 sm:$0xff]  }
 0xa2a   : > { %14723 = vmatprep.subr.bf16.mxu1 %v23899_v49 }
 0xa2d   : > { %14724 = vmatpush1.bf16.msra.mxu1 %v23897_v52  ;;  %v23944_v52 = vld [vmem:[%s28075_s6 + $0x82c] ss:$12 sps:$4 sm:$0xff]  }
 0xa2e   : > { %14725 = vmatprep.subr.bf16.mxu1 %v23902_v28 }
 0xa31   : > { %14726 = vmatpush1.bf16.msra.mxu1 %v23900_v10  ;;  %v23942_v10 = vld [vmem:[%s28075_s6 + $0x828] ss:$12 sps:$4 sm:$0xff]  }
 0xa32   : > { %14727 = vmatprep.subr.bf16.mxu1 %v23905_v22  ;;  %v23947_v22 = vld [vmem:[%s28075_s6 + $0x844] ss:$12 sps:$4 sm:$0xff]  }
 0xa35   : > { %14728 = vmatpush1.bf16.msra.mxu1 %v23903_v56 }
 0xa36   : > { %14729 = vmatprep.subr.bf16.mxu1 %v23908_v60 }
 0xa39   : > { %14730 = vmatpush1.bf16.msra.mxu1 %v23906_v59 }
 0xa3a   : > { %14731 = vmatprep.subr.bf16.mxu1 %v23911_v6 }
 0xa3d   : > { %14732 = vmatpush1.bf16.msra.mxu1 %v23909_v13  ;;  %v23945_v13 = vld [vmem:[%s28075_s6 + $0x840] ss:$12 sps:$4 sm:$0xff]  }
 0xa3e   : > { %14733 = vmatprep.subr.bf16.mxu1 %v23914_v57 }
 0xa3f   : > { %v27541_v1 = vpop.f32.mrb[148].mxu1 }
 0xa40   : > { %v27543_v8 = vpop.f32.mrb[149].mxu1 }
 0xa41   : > { %v27545_v9 = vpop.f32.mrb[150].mxu1  ;;  %14734 = vmatpush1.bf16.msra.mxu1 %v23912_v55  ;;  %v23950_v55 = vld [vmem:[%s28075_s6 + $0x85c] ss:$12 sps:$4 sm:$0xff]  }
 0xa42   : > { %v27550_v27 = vpop.f32.mrb[151].mxu1  ;;  %14735 = vmatprep.subr.bf16.mxu1 %v23917_v21 }
 0xa45   : > { %14736 = vmatpush1.bf16.msra.mxu1 %v23915_v3  ;;  %v23948_v3 = vld [vmem:[%s28075_s6 + $0x858] ss:$12 sps:$4 sm:$0xff]  }
 0xa46   : > { %14737 = vmatprep.subr.bf16.mxu1 %v23920_v19  ;;  %v23953_v19 = vld [vmem:[%s28075_s6 + $0x874] ss:$12 sps:$4 sm:$0xff]  }
 0xa47   : > { %v27561_v35 = vpop.f32.mrb[152].mxu1 }
 0xa48   : > { %v27563_v33 = vpop.f32.mrb[153].mxu1 }
 0xa49   : > { %v27565_v26 = vpop.f32.mrb[154].mxu1  ;;  %14738 = vmatpush1.bf16.msra.mxu1 %v23918_v2 }
 0xa4a   : > { %v27570_v7 = vpop.f32.mrb[155].mxu1  ;;  %14770 = vmatprep.subr.bf16.mxu1 %v23923_v45 }
 0xa4c   : > { %14740 = vmatmul.mubr.bf16.vlgmr.msra.gmra.mrb[196].mxu1 %v26986_v20 }
 0xa4d   : > { %14749 = vmatprep.mubr.bf16.mxu1 %v27009_v39  ;;  %14771 = vmatpush1.bf16.msra.mxu1 %v23921_v41 }
 0xa4e   : > { %14772 = vmatprep.subr.bf16.mxu1 %v23926_v63 }
 0xa4f   : > { %v27583_v46 = vpop.f32.mrb[156].mxu1 }
 0xa50   : > { %v27585_v48 = vpop.f32.mrb[157].mxu1 }
 0xa51   : > { %v27587_v17 = vpop.f32.mrb[158].mxu1  ;;  %14773 = vmatpush1.bf16.msra.mxu1 %v23924_v25  ;;  %v23951_v25 = vld [vmem:[%s28075_s6 + $0x870] ss:$12 sps:$4 sm:$0xff]  }
 0xa52   : > { %v27592_v16 = vpop.f32.mrb[159].mxu1  ;;  %14774 = vmatprep.subr.bf16.mxu1 %v23929_v14 }
 0xa54   : > { %14750 = vmatmul.mubr.bf16.gmra.mrb[200].mxu1 %v27007_v37 }
 0xa55   : > { %14759 = vmatprep.mubr.bf16.mxu1 %v27029_v24  ;;  %14775 = vmatpush1.bf16.msra.mxu1 %v23927_v44  ;;  %v23956_v44 = vld [vmem:[%s28075_s6 + $0x88c] ss:$12 sps:$4 sm:$0xff]  }
 0xa56   : > { %14776 = vmatprep.subr.bf16.mxu1 %v23932_v23 }
 0xa59   : > { %14777 = vmatpush1.bf16.msra.mxu1 %v23930_v43  ;;  %v23954_v43 = vld [vmem:[%s28075_s6 + $0x888] ss:$12 sps:$4 sm:$0xff]  }
 0xa5a   : > { %14778 = vmatprep.subr.bf16.mxu1 %v23935_v50  ;;  %v23959_v50 = vld [vmem:[%s28075_s6 + $0x8a4] ss:$12 sps:$4 sm:$0xff]  }
 0xa5c   : > { %14760 = vmatmul.mubr.bf16.gmra.mrb[204].mxu1 %v27027_v38 }
 0xa5d   : > { %14779 = vmatpush1.bf16.msra.mxu1 %v23933_v32  ;;  %14802 = vmatprep.mubr.bf16.mxu1 %v27055_v58  ;;  %v23957_v32 = vld [vmem:[%s28075_s6 + $0x8a0] ss:$12 sps:$4 sm:$0xff]  }
 0xa5e   : > { %14780 = vmatprep.subr.bf16.mxu1 %v23938_v11  ;;  %v23962_v11 = vld [vmem:[%s28075_s6 + $0x8bc] ss:$12 sps:$4 sm:$0xff]  }
 0xa5f   : > { %v20461_v51 = vpop.f32.mrb[160].mxu1 }
 0xa60   : > { %v20462_v54 = vpop.f32.mrb[161].mxu1 }
 0xa61   : > { %v27619_v30 = vadd.f32 %v20462_v54, %v20461_v51  ;;  %v20464_v18 = vpop.f32.mrb[162].mxu1  ;;  %14781 = vmatpush1.bf16.msra.mxu1 %v23936_v15  ;;  %v24017_v15 = vld [vmem:[#allocation4 + $0x40] sm:$0xff]   ;;  %v24019_v51 = vld [vmem:[#allocation4 + $0x48] sm:$0xff]  }
 0xa62   : > { %v20465_v49 = vpop.f32.mrb[163].mxu1  ;;  %14782 = vmatprep.subr.bf16.mxu1 %v23941_v61  ;;  %v24018_v61 = vld [vmem:[#allocation4] sm:$0xff]   ;;  %20649 = vmatprep.subr.bf16.mxu0 %v24017_v15 }
 0xa63   : > { %v27627_v28 = vadd.f32 %v20465_v49, %v20464_v18  ;;  %v23960_v54 = vld [vmem:[%s28075_s6 + $0x8b8] ss:$12 sps:$4 sm:$0xff]   ;;  %v23965_v18 = vld [vmem:[%s28075_s6 + $0x8d4] ss:$12 sps:$4 sm:$0xff]   ;;  %20650 = vmatpush3.bf16.msra.mxu0 %v24018_v61  ;;  %v24020_v49 = vld [vmem:[#allocation4 + $0x8] sm:$0xff]  }
 0xa64   : > { %20651 = vmatprep.subr.bf16.mxu0 %v24019_v51  ;;  %v24026_v51 = vld [vmem:[#allocation4 + $0x20] sm:$0xff]  }
 0xa65   : > { %14783 = vmatpush1.bf16.msra.mxu1 %v23939_v29 }
 0xa66   : > { %14784 = vmatprep.subr.bf16.mxu1 %v23944_v52 }
 0xa67   : > { %v20467_v56 = vpop.f32.mrb[164].mxu1  ;;  %20652 = vmatpush3.bf16.msra.mxu0 %v24020_v49 }
 0xa68   : > { %v20468_v60 = vpop.f32.mrb[165].mxu1 }
 0xa69   : > { %v27635_v59 = vadd.f32 %v20468_v60, %v20467_v56  ;;  %v20470_v6 = vpop.f32.mrb[166].mxu1  ;;  %14785 = vmatpush1.bf16.msra.mxu1 %v23942_v10  ;;  %v24021_v10 = vld [vmem:[#allocation4 + $0x50] sm:$0xff]  }
 0xa6a   : > { %v20471_v57 = vpop.f32.mrb[167].mxu1  ;;  %14786 = vmatprep.subr.bf16.mxu1 %v23947_v22  ;;  %v23963_v60 = vld [vmem:[%s28075_s6 + $0x8d0] ss:$12 sps:$4 sm:$0xff]   ;;  %20653 = vmatprep.subr.bf16.mxu0 %v24021_v10 }
 0xa6b   : > { %v27643_v21 = vadd.f32 %v20471_v57, %v20470_v6 }
 0xa6d   : > { %14787 = vmatpush1.bf16.msra.mxu1 %v23945_v13  ;;  %v23968_v13 = vld [vmem:[%s28075_s6 + $0x8ec] ss:$12 sps:$4 sm:$0xff]  }
 0xa6e   : > { %14788 = vmatprep.subr.bf16.mxu1 %v23950_v55 }
 0xa6f   : > { %v20473_v2 = vpop.f32.mrb[168].mxu1 }
 0xa70   : > { %v20474_v45 = vpop.f32.mrb[169].mxu1 }
 0xa71   : > { %v27651_v41 = vadd.f32 %v20474_v45, %v20473_v2  ;;  %v20476_v63 = vpop.f32.mrb[170].mxu1  ;;  %14789 = vmatpush1.bf16.msra.mxu1 %v23948_v3  ;;  %v24022_v3 = vld [vmem:[#allocation4 + $0x10] sm:$0xff]  }
 0xa72   : > { %v20477_v14 = vpop.f32.mrb[171].mxu1  ;;  %14790 = vmatprep.subr.bf16.mxu1 %v23953_v19  ;;  %v24023_v19 = vld [vmem:[#allocation4 + $0x58] sm:$0xff]   ;;  %v23966_v45 = vld [vmem:[%s28075_s6 + $0x8e8] ss:$12 sps:$4 sm:$0xff]   ;;  %20654 = vmatpush3.bf16.msra.mxu0 %v24022_v3 }
 0xa73   : > { %v27659_v23 = vadd.f32 %v20477_v14, %v20476_v63  ;;  %v23969_v63 = vld [vmem:[%s28075_s6 + $0x548] ss:$12 sps:$4 sm:$0xff]   ;;  %20655 = vmatprep.subr.bf16.mxu0 %v24023_v19  ;;  %v23976_v19 = vld [vmem:[%s28075_s6 + $0x4d0] ss:$12 sps:$4 sm:$0xff]  }
 0xa75   : > { %14791 = vmatpush1.bf16.msra.mxu1 %v23951_v25  ;;  %v24024_v25 = vld [vmem:[#allocation4 + $0x18] sm:$0xff]  }
 0xa76   : > { %14792 = vmatprep.subr.bf16.mxu1 %v23956_v44  ;;  %v24025_v44 = vld [vmem:[#allocation4 + $0x60] sm:$0xff]   ;;  %20656 = vmatpush3.bf16.msra.mxu0 %v24024_v25 }
 0xa77   : > { %20657 = vmatprep.subr.bf16.mxu0 %v24025_v44 }
 0xa79   : > { %14793 = vmatpush1.bf16.msra.mxu1 %v23954_v43 }
 0xa7a   : > { %14794 = vmatprep.subr.bf16.mxu1 %v23959_v50  ;;  %20658 = vmatpush3.bf16.msra.mxu0 %v24026_v51  ;;  %v23984_v51 = vld [vmem:[%s28075_s6 + $0x530] ss:$12 sps:$4 sm:$0xff]  }
 0xa7d   : > { %14795 = vmatpush1.bf16.msra.mxu1 %v23957_v32 }
 0xa7e   : > { %14796 = vmatprep.subr.bf16.mxu1 %v23962_v11  ;;  %v23971_v11 = vld [vmem:[%s28075_s6 + $0x560] ss:$12 sps:$4 sm:$0xff]  }
 0xa7f   : > { %v20495_v29 = vpop.f32.mrb[172].mxu1 }
 0xa80   : > { %v20496_v52 = vpop.f32.mrb[173].mxu1 }
 0xa81   : > { %v20497_v22 = vadd.f32 %v20496_v52, %v20495_v29  ;;  %v20498_v56 = vpop.f32.mrb[174].mxu1  ;;  %14797 = vmatpush1.bf16.msra.mxu1 %v23960_v54  ;;  %v24027_v54 = vld [vmem:[#allocation4 + $0x68] sm:$0xff]  }
 0xa82   : > { %v20499_v6 = vpop.f32.mrb[175].mxu1  ;;  %14798 = vmatprep.subr.bf16.mxu1 %v23965_v18  ;;  %v23972_v29 = vld [vmem:[%s28075_s6 + $0x4a0] ss:$12 sps:$4 sm:$0xff]   ;;  %20659 = vmatprep.subr.bf16.mxu0 %v24027_v54  ;;  %v23985_v54 = vld [vmem:[%s28075_s6 + $0x6c8] ss:$12 sps:$4 sm:$0xff]  }
 0xa83   : > { %v27686_v57 = vadd.f32 %v20497_v22, %v27619_v30  ;;  %v20500_v55 = vadd.f32 %v20499_v6, %v20498_v56  ;;  %v24028_v52 = vld [vmem:[#allocation4 + $0x28] sm:$0xff]   ;;  %v23974_v56 = vld [vmem:[%s28075_s6 + $0x4b8] ss:$12 sps:$4 sm:$0xff]   ;;  %v23975_v6 = vld [vmem:[%s28075_s6 + $0x590] ss:$12 sps:$4 sm:$0xff]  }
 0xa84   : > { %20660 = vmatpush3.bf16.msra.mxu0 %v24028_v52 }
 0xa85   : > { %v27689_v2 = vadd.f32 %v20500_v55, %v27627_v28  ;;  %14799 = vmatpush1.bf16.msra.mxu1 %v23963_v60  ;;  %v23970_v28 = vld [vmem:[%s28075_s6 + $0x488] ss:$12 sps:$4 sm:$0xff]  }
 0xa86   : > { %14800 = vmatprep.subr.bf16.mxu1 %v23968_v13 }
 0xa87   : > { %v20501_v30 = vpop.f32.mrb[176].mxu1 }
 0xa88   : > { %v20502_v14 = vpop.f32.mrb[177].mxu1 }
 0xa89   : > { %v20503_v43 = vadd.f32 %v20502_v14, %v20501_v30  ;;  %v20504_v50 = vpop.f32.mrb[178].mxu1  ;;  %14801 = vmatpush1.bf16.msra.mxu1 %v23966_v45  ;;  %v23977_v45 = vld [vmem:[%s28075_s6 + $0x5a8] ss:$12 sps:$4 sm:$0xff]   ;;  %v23981_v30 = vld [vmem:[%s28075_s6 + $0x5d8] ss:$12 sps:$4 sm:$0xff]  }
 0xa8a   : > { %v20505_v32 = vpop.f32.mrb[179].mxu1  ;;  %20547 = vmatprep.subr.bf16.mxu1 %v23969_v63  ;;  %v23980_v63 = vld [vmem:[%s28075_s6 + $0x500] ss:$12 sps:$4 sm:$0xff]  }
 0xa8b   : > { %v27704_v15 = vadd.f32 %v20503_v43, %v27635_v59  ;;  %v20506_v61 = vadd.f32 %v20505_v32, %v20504_v50  ;;  %v23973_v59 = vld [vmem:[%s28075_s6 + $0x578] ss:$12 sps:$4 sm:$0xff]  }
 0xa8c   : > { %14803 = vmatmul.mubr.bf16.vlgmr.msra.gmra.mrb[196].mxu1 %v27053_v4  ;;  %v23982_v50 = vld [vmem:[%s28075_s6 + $0x518] ss:$12 sps:$4 sm:$0xff]  }
 0xa8d   : > { %v27708_v18 = vadd.f32 %v20506_v61, %v27643_v21  ;;  %14812 = vmatprep.mubr.bf16.mxu1 %v27075_v34  ;;  %20548 = vmatpush3.bf16.msra.mxu1 %v23970_v28 }
 0xa8e   : > { %20549 = vmatprep.subr.bf16.mxu1 %v23971_v11 }
 0xa8f   : > { %v20507_v49 = vpop.f32.mrb[180].mxu1 }
 0xa90   : > { %v20508_v10 = vpop.f32.mrb[181].mxu1 }
 0xa91   : > { %v20509_v22 = vadd.f32 %v20508_v10, %v20507_v49  ;;  %v20510_v21 = vpop.f32.mrb[182].mxu1  ;;  %20550 = vmatpush3.bf16.msra.mxu1 %v23972_v29  ;;  %v23987_v10 = vld [vmem:[%s28075_s6 + $0x6e0] ss:$12 sps:$4 sm:$0xff]  }
 0xa92   : > { %v20511_v60 = vpop.f32.mrb[183].mxu1  ;;  %20551 = vmatprep.subr.bf16.mxu1 %v23973_v59 }
 0xa93   : > { %v27724_v13 = vadd.f32 %v20509_v22, %v27651_v41  ;;  %v20512_v55 = vadd.f32 %v20511_v60, %v20510_v21  ;;  %v23978_v41 = vld [vmem:[%s28075_s6 + $0x4e8] ss:$12 sps:$4 sm:$0xff]   ;;  %v23988_v60 = vld [vmem:[%s28075_s6 + $0x620] ss:$12 sps:$4 sm:$0xff]  }
 0xa94   : > { %14813 = vmatmul.mubr.bf16.gmra.mrb[200].mxu1 %v27073_v12 }
 0xa95   : > { %v13623_v3 = vadd.f32 %v20512_v55, %v27659_v23  ;;  %14822 = vmatprep.mubr.bf16.mxu1 %v27097_v0  ;;  %20552 = vmatpush3.bf16.msra.mxu1 %v23974_v56  ;;  %v23979_v23 = vld [vmem:[%s28075_s6 + $0x5c0] ss:$12 sps:$4 sm:$0xff]  }
 0xa96   : > { %20553 = vmatprep.subr.bf16.mxu1 %v23975_v6  ;;  %v23989_v6 = vld [vmem:[%s28075_s6 + $0x6f8] ss:$12 sps:$4 sm:$0xff]  }
 0xa99   : > { %20554 = vmatpush3.bf16.msra.mxu1 %v23976_v19 }
 0xa9a   : > { %20555 = vmatprep.subr.bf16.mxu1 %v23977_v45 }
 0xa9c   : > { %14823 = vmatmul.mubr.bf16.gmra.mrb[204].mxu1 %v27095_v42 }
 0xa9d   : > { %20556 = vmatpush3.bf16.msra.mxu1 %v23978_v41  ;;  %14865 = vmatprep.mubr.bf16.mxu1 %v26916_v36  ;;  %v23983_v36 = vld [vmem:[%s28075_s6 + $0x5f0] ss:$12 sps:$4 sm:$0xff]  }
 0xa9e   : > { %20557 = vmatprep.subr.bf16.mxu1 %v23979_v23 }
 0xa9f   : > { %v20529_v25 = vpop.f32.mrb[184].mxu1 }
 0xaa0   : > { %v20530_v14 = vpop.f32.mrb[185].mxu1 }
 0xaa1   : > { %v20531_v44 = vadd.f32 %v20530_v14, %v20529_v25  ;;  %v20532_v43 = vpop.f32.mrb[186].mxu1  ;;  %20558 = vmatpush3.bf16.msra.mxu1 %v23980_v63  ;;  %v23993_v25 = vld [vmem:[%s28075_s6 + $0x728] ss:$12 sps:$4 sm:$0xff]   ;;  %v23998_v14 = vld [vmem:[%s28075_s6 + $0x698] ss:$12 sps:$4 sm:$0xff]  }
 0xaa2   : > { %v20533_v28 = vpop.f32.mrb[187].mxu1  ;;  %20559 = vmatprep.subr.bf16.mxu1 %v23981_v30  ;;  %v23992_v30 = vld [vmem:[%s28075_s6 + $0x650] ss:$12 sps:$4 sm:$0xff]  }
 0xaa3   : > { %v27756_v32 = vadd.f32 %v20531_v44, %v27686_v57  ;;  %v20534_v11 = vadd.f32 %v20533_v28, %v20532_v43  ;;  %v23986_v57 = vld [vmem:[%s28075_s6 + $0x608] ss:$12 sps:$4 sm:$0xff]   ;;  %v24004_v28 = vld [vmem:[%s28075_s6 + $0x7a0] ss:$12 sps:$4 sm:$0xff]  }
 0xaa4   : > { %v24001_v44 = vld [vmem:[%s28075_s6 + $0x848] ss:$12 sps:$4 sm:$0xff]  }
 0xaa5   : > { %v27759_v61 = vadd.f32 %v20534_v11, %v27689_v2  ;;  %20560 = vmatpush3.bf16.msra.mxu1 %v23982_v50  ;;  %v24002_v43 = vld [vmem:[%s28075_s6 + $0x788] ss:$12 sps:$4 sm:$0xff]   ;;  %v24003_v50 = vld [vmem:[%s28075_s6 + $0x860] ss:$12 sps:$4 sm:$0xff]   ;;  %v24006_v11 = vld [vmem:[%s28075_s6 + $0x7b8] ss:$12 sps:$4 sm:$0xff]  }
 0xaa6   : > { %20561 = vmatprep.subr.bf16.mxu1 %v23983_v36  ;;  %v24005_v36 = vld [vmem:[%s28075_s6 + $0x878] ss:$12 sps:$4 sm:$0xff]  }
 0xaa7   : > { %v20535_v29 = vpop.f32.mrb[188].mxu1 }
 0xaa8   : > { %v20536_v59 = vpop.f32.mrb[189].mxu1 }
 0xaa9   : > { %v20537_v49 = vadd.f32 %v20536_v59, %v20535_v29  ;;  %v20538_v52 = vpop.f32.mrb[190].mxu1  ;;  %20562 = vmatpush3.bf16.msra.mxu1 %v23984_v51  ;;  %v24009_v51 = vld [vmem:[%s28075_s6 + $0x8a8] ss:$12 sps:$4 sm:$0xff]   ;;  %v24013_v29 = vld [vmem:[%s28075_s6 + $0x8d8] ss:$12 sps:$4 sm:$0xff]  }
 0xaaa   : > { %v20539_v2 = vpop.f32.mrb[191].mxu1  ;;  %20581 = vmatprep.subr.bf16.mxu1 %v23985_v54  ;;  %v24010_v54 = vld [vmem:[%s28075_s6 + $0x7e8] ss:$12 sps:$4 sm:$0xff]   ;;  %v24014_v59 = vld [vmem:[%s28075_s6 + $0x818] ss:$12 sps:$4 sm:$0xff]  }
 0xaab   : > { %v27774_v22 = vadd.f32 %v20537_v49, %v27704_v15  ;;  %v20540_v21 = vadd.f32 %v20539_v2, %v20538_v52  ;;  %v24029_v49 = vld [vmem:[#allocation4 + $0x70] sm:$0xff]   ;;  %v24032_v2 = vld [vmem:[#allocation4 + $0x38] sm:$0xff]  }
 0xaac   : > { %14866 = vmatmul.mubr.bf16.vlgmr.msra.gmra.mrb[208].mxu1 %v26914_v53  ;;  %v23990_v53 = vld [vmem:[%s28075_s6 + $0x638] ss:$12 sps:$4 sm:$0xff]   ;;  %20661 = vmatprep.subr.bf16.mxu0 %v24029_v49  ;;  %v24016_v52 = vld [vmem:[%s28075_s6 + $0x830] ss:$12 sps:$4 sm:$0xff]  }
 0xaad   : > { %v27778_v56 = vadd.f32 %v20540_v21, %v27708_v18  ;;  %14873 = vmatprep.mubr.bf16.mxu1 %v26938_v5  ;;  %20582 = vmatpush3.bf16.msra.mxu1 %v23986_v57  ;;  %v23991_v18 = vld [vmem:[%s28075_s6 + $0x710] ss:$12 sps:$4 sm:$0xff]   ;;  %v24034_v21 = vld [vmem:[#allocation4 + $0x80] sm:$0xff]  }
 0xaae   : > { %20583 = vmatprep.subr.bf16.mxu1 %v23987_v10  ;;  %v24031_v57 = vld [vmem:[#allocation4 + $0x78] sm:$0xff]   ;;  %v24033_v10 = vld [vmem:[#allocation4 + $0xc0] sm:$0xff]  }
 0xaaf   : > { %v20541_v15 = vpop.f32.mrb[192].mxu1 }
 0xab0   : > { %v20542_v55 = vpop.f32.mrb[193].mxu1 }
 0xab1   : > { %v20543_v19 = vadd.f32 %v20542_v55, %v20541_v15  ;;  %v20544_v45 = vpop.f32.mrb[194].mxu1  ;;  %20584 = vmatpush3.bf16.msra.mxu1 %v23988_v60  ;;  %v24035_v60 = vld [vmem:[#allocation4 + $0x140] sm:$0xff]   ;;  %v24038_v15 = vld [vmem:[#allocation4 + $0x88] sm:$0xff]   ;;  %v24040_v55 = vld [vmem:[#allocation4 + $0xd0] sm:$0xff]  }
 0xab2   : > { %v20545_v5 = vpop.f32.mrb[195].mxu1  ;;  %20585 = vmatprep.subr.bf16.mxu1 %v23989_v6  ;;  %v24036_v6 = vld [vmem:[#allocation4 + $0xc8] sm:$0xff]  }
 0xab3   : > { %v27794_v41 = vadd.f32 %v20543_v19, %v27724_v13  ;;  %v20546_v23 = vadd.f32 %v20545_v5, %v20544_v45  ;;  %v23994_v13 = vld [vmem:[%s28075_s6 + $0x668] ss:$12 sps:$4 sm:$0xff]   ;;  %v24044_v19 = vld [vmem:[#allocation4 + $0xd8] sm:$0xff]  }
 0xab4   : > { %14874 = vmatmul.mubr.bf16.gmra.mrb[212].mxu1 %v26936_v31  ;;  %v23995_v31 = vld [vmem:[%s28075_s6 + $0x740] ss:$12 sps:$4 sm:$0xff]   ;;  %v24058_v5 = vld [vmem:[#allocation4 + $0xb0] sm:$0xff]  }
 0xab5   : > { %v27797_v63 = vadd.f32 %v20546_v23, %v13623_v3  ;;  %14881 = vmatprep.mubr.bf16.mxu1 %v26960_v62  ;;  %20586 = vmatpush3.bf16.msra.mxu1 %v23990_v53  ;;  %v23996_v62 = vld [vmem:[%s28075_s6 + $0x680] ss:$12 sps:$4 sm:$0xff]   ;;  %v23997_v3 = vld [vmem:[%s28075_s6 + $0x758] ss:$12 sps:$4 sm:$0xff]   ;;  %v24056_v53 = vld [vmem:[#allocation4 + $0xf0] sm:$0xff]  }
 0xab6   : > { %20587 = vmatprep.subr.bf16.mxu1 %v23991_v18  ;;  %v24054_v45 = vld [vmem:[#allocation4 + $0xa8] sm:$0xff]   ;;  %v24060_v18 = vld [vmem:[#allocation4 + $0xf8] sm:$0xff]  }
 0xab7   : > { %v24062_v23 = vld [vmem:[#allocation4 + $0xb8] sm:$0xff]  }
 0xab9   : > { %20588 = vmatpush3.bf16.msra.mxu1 %v23992_v30  ;;  %v24065_v30 = vld [vmem:[#allocation4 + $0x1c0] sm:$0xff]  }
 0xaba   : > { %20589 = vmatprep.subr.bf16.mxu1 %v23993_v25 }
 0xabc   : > { %14882 = vmatmul.mubr.bf16.gmra.mrb[216].mxu1 %v26958_v40  ;;  %v23999_v40 = vld [vmem:[%s28075_s6 + $0x770] ss:$12 sps:$4 sm:$0xff]  }
 0xabd   : > { %20590 = vmatpush3.bf16.msra.mxu1 %v23994_v13  ;;  %14922 = vmatprep.mubr.bf16.mxu1 %v26988_v47  ;;  %v24000_v47 = vld [vmem:[%s28075_s6 + $0x6b0] ss:$12 sps:$4 sm:$0xff]  }
 0xabe   : > { %20591 = vmatprep.subr.bf16.mxu1 %v23995_v31 }
 0xac1   : > { %20592 = vmatpush3.bf16.msra.mxu1 %v23996_v62 }
 0xac2   : > { %20593 = vmatprep.subr.bf16.mxu1 %v23997_v3 }
 0xac5   : > { %20594 = vmatpush3.bf16.msra.mxu1 %v23998_v14 }
 0xac6   : > { %20595 = vmatprep.subr.bf16.mxu1 %v23999_v40 }
 0xac9   : > { %20596 = vmatpush3.bf16.msra.mxu1 %v24000_v47 }
 0xaca   : > { %20615 = vmatprep.subr.bf16.mxu1 %v24001_v44 }
 0xacc   : > { %14923 = vmatmul.mubr.bf16.vlgmr.msra.gmra.mrb[220].mxu1 %v26986_v20  ;;  %v24007_v20 = vld [vmem:[%s28075_s6 + $0x890] ss:$12 sps:$4 sm:$0xff]  }
 0xacd   : > { %14930 = vmatprep.mubr.bf16.mxu1 %v27009_v39  ;;  %20616 = vmatpush3.bf16.msra.mxu1 %v24002_v43  ;;  %v24008_v39 = vld [vmem:[%s28075_s6 + $0x7d0] ss:$12 sps:$4 sm:$0xff]  }
 0xace   : > { %20617 = vmatprep.subr.bf16.mxu1 %v24003_v50  ;;  %v24037_v50 = vld [vmem:[#allocation4 + $0x100] sm:$0xff]  }
 0xad1   : > { %20618 = vmatpush3.bf16.msra.mxu1 %v24004_v28 }
 0xad2   : > { %20619 = vmatprep.subr.bf16.mxu1 %v24005_v36  ;;  %v24039_v36 = vld [vmem:[#allocation4 + $0x148] sm:$0xff]  }
 0xad4   : > { %14931 = vmatmul.mubr.bf16.gmra.mrb[224].mxu1 %v27007_v37  ;;  %v24011_v37 = vld [vmem:[%s28075_s6 + $0x8c0] ss:$12 sps:$4 sm:$0xff]  }
 0xad5   : > { %14938 = vmatprep.mubr.bf16.mxu1 %v27029_v24  ;;  %20620 = vmatpush3.bf16.msra.mxu1 %v24006_v11  ;;  %v24012_v24 = vld [vmem:[%s28075_s6 + $0x800] ss:$12 sps:$4 sm:$0xff]  }
 0xad6   : > { %20621 = vmatprep.subr.bf16.mxu1 %v24007_v20  ;;  %v24041_v20 = vld [vmem:[#allocation4 + $0x108] sm:$0xff]  }
 0xad9   : > { %20622 = vmatpush3.bf16.msra.mxu1 %v24008_v39 }
 0xada   : > { %20623 = vmatprep.subr.bf16.mxu1 %v24009_v51 }
 0xadc   : > { %14939 = vmatmul.mubr.bf16.gmra.mrb[228].mxu1 %v27027_v38  ;;  %v24015_v38 = vld [vmem:[%s28075_s6 + $0x8f0] ss:$12 sps:$4 sm:$0xff]  }
 0xadd   : > { %20624 = vmatpush3.bf16.msra.mxu1 %v24010_v54  ;;  %14979 = vmatprep.mubr.bf16.mxu1 %v27055_v58  ;;  %v24030_v58 = vld [vmem:[#allocation4 + $0x30] sm:$0xff]  }
 0xade   : > { %20625 = vmatprep.subr.bf16.mxu1 %v24011_v37  ;;  %20662 = vmatpush3.bf16.msra.mxu0 %v24030_v58  ;;  %v24043_v54 = vld [vmem:[#allocation4 + $0x150] sm:$0xff]  }
 0xadf   : > { %20663 = vmatprep.subr.bf16.mxu0 %v24031_v57 }
 0xae1   : > { %20626 = vmatpush3.bf16.msra.mxu1 %v24012_v24 }
 0xae2   : > { %20627 = vmatprep.subr.bf16.mxu1 %v24013_v29  ;;  %20664 = vmatpush3.bf16.msra.mxu0 %v24032_v2  ;;  %v24051_v2 = vld [vmem:[#allocation4 + $0x160] sm:$0xff]  }
 0xae3   : > { %20693 = vmatprep.subr.bf16.mxu0 %v24035_v60 }
 0xae5   : > { %20628 = vmatpush3.bf16.msra.mxu1 %v24014_v59  ;;  %v24047_v59 = vld [vmem:[#allocation4 + $0x158] sm:$0xff]  }
 0xae6   : > { %20629 = vmatprep.subr.bf16.mxu1 %v24015_v38 }
 0xae9   : > { %20630 = vmatpush3.bf16.msra.mxu1 %v24016_v52  ;;  %v24049_v52 = vld [vmem:[#allocation4 + $0x118] sm:$0xff]  }
 0xaea   : > { %20671 = vmatprep.subr.bf16.mxu1 %v24033_v10 }
 0xaec   : > { %14980 = vmatmul.mubr.bf16.vlgmr.msra.gmra.mrb[232].mxu1 %v27053_v4  ;;  %v24042_v4 = vld [vmem:[#allocation4 + $0x90] sm:$0xff]  }
 0xaed   : > { %14987 = vmatprep.mubr.bf16.mxu1 %v27075_v34  ;;  %20672 = vmatpush3.bf16.msra.mxu1 %v24034_v21  ;;  %v24048_v34 = vld [vmem:[#allocation4 + $0xe0] sm:$0xff]  }
 0xaee   : > { %20673 = vmatprep.subr.bf16.mxu1 %v24036_v6  ;;  %v24053_v6 = vld [vmem:[#allocation4 + $0x120] sm:$0xff]  }
 0xaf1   : > { %20674 = vmatpush3.bf16.msra.mxu1 %v24038_v15  ;;  %v24059_v15 = vld [vmem:[#allocation4 + $0x170] sm:$0xff]  }
 0xaf2   : > { %20675 = vmatprep.subr.bf16.mxu1 %v24040_v55  ;;  %v24061_v55 = vld [vmem:[#allocation4 + $0x130] sm:$0xff]  }
 0xaf4   : > { %14988 = vmatmul.mubr.bf16.gmra.mrb[236].mxu1 %v27073_v12  ;;  %v24046_v12 = vld [vmem:[#allocation4 + $0x98] sm:$0xff]  }
 0xaf5   : > { %14995 = vmatprep.mubr.bf16.mxu1 %v27097_v0  ;;  %20676 = vmatpush3.bf16.msra.mxu1 %v24042_v4  ;;  %v24052_v0 = vld [vmem:[#allocation4 + $0xe8] sm:$0xff]  }
 0xaf6   : > { %20677 = vmatprep.subr.bf16.mxu1 %v24044_v19 }
 0xaf9   : > { %20678 = vmatpush3.bf16.msra.mxu1 %v24046_v12 }
 0xafa   : > { %20679 = vmatprep.subr.bf16.mxu1 %v24048_v34  ;;  %v24064_v34 = vld [vmem:[#allocation4 + $0x138] sm:$0xff]  }
 0xafc   : > { %14996 = vmatmul.mubr.bf16.gmra.mrb[240].mxu1 %v27095_v42  ;;  %v24050_v42 = vld [vmem:[#allocation4 + $0xa0] sm:$0xff]  }
 0xafd   : > { %20680 = vmatpush3.bf16.msra.mxu1 %v24050_v42 }
 0xafe   : > { %20681 = vmatprep.subr.bf16.mxu1 %v24052_v0  ;;  %v24067_v0 = vld [vmem:[#allocation4 + $0x240] sm:$0xff]  }
 0xb01   : > { %20682 = vmatpush3.bf16.msra.mxu1 %v24054_v45 }
 0xb02   : > { %20683 = vmatprep.subr.bf16.mxu1 %v24056_v53 }
 0xb05   : > { %20684 = vmatpush3.bf16.msra.mxu1 %v24058_v5 }
 0xb06   : > { %20685 = vmatprep.subr.bf16.mxu1 %v24060_v18 }
 0xb09   : > { %20686 = vmatpush3.bf16.msra.mxu1 %v24062_v23 }
 0xb0a   : > { %20715 = vmatprep.subr.bf16.mxu1 %v24065_v30 }
 0xb5f   : > { %v14804_v25 = vpop.f32.mrb[196].mxu1 }
 0xb60   : > { %v15004_v13 = vmax.f32 %v27541_v1, %v14804_v25  ;;  %v14806_v31 = vpop.f32.mrb[197].mxu1 }
 0xb61   : > { %v15005_v62 = vmax.f32 %v27543_v8, %v14806_v31  ;;  %v14808_v3 = vpop.f32.mrb[198].mxu1 }
 0xb62   : > { %v15007_v14 = vmax.f32 %v27545_v9, %v14808_v3  ;;  %v14810_v40 = vpop.f32.mrb[199].mxu1 }
 0xb63   : > { %v15008_v47 = vmax.f32 %v27550_v27, %v14810_v40 }
 0xb64   : > { %v27892_v44 = vpack.c.bf16 %v15007_v14, %v15004_v13 }
 0xb65   : > { %v27894_v43 = vpack.c.bf16 %v15008_v47, %v15005_v62 }
 0xb66   : > { %v15034_v28 = vrot.slane %v27892_v44, 2 }
 0xb67   : > { %v14814_v11 = vpop.f32.mrb[200].mxu1  ;;  %17437 = vmatprep.mubr.bf16.mxu0 %v27894_v43 }
 0xb68   : > { %v15010_v1 = vmax.f32 %v27561_v35, %v14814_v11  ;;  %v14816_v8 = vpop.f32.mrb[201].mxu1  ;;  %17438 = vmatmul.mubr.bf16.vlgmr.msra.gmra.mrb[120].mxu0 %v27892_v44  ;;  %17477 = vmatprep.mubr.bf16.mxu1 %v15034_v28  ;;  %v24045_v35 = vld [vmem:[#allocation4 + $0x110] sm:$0xff]  }
 0xb69   : > { %v15011_v9 = vmax.f32 %v27563_v33, %v14816_v8  ;;  %v14818_v27 = vpop.f32.mrb[202].mxu1  ;;  %20694 = vmatpush3.bf16.msra.mxu0 %v24037_v50 }
 0xb6a   : > { %v15013_v39 = vmax.f32 %v27565_v26, %v14818_v27  ;;  %v14820_v51 = vpop.f32.mrb[203].mxu1  ;;  %20695 = vmatprep.subr.bf16.mxu0 %v24039_v36 }
 0xb6b   : > { %v15014_v37 = vmax.f32 %v27570_v7, %v14820_v51 }
 0xb6c   : > { %v27903_v24 = vpack.c.bf16 %v15013_v39, %v15010_v1 }
 0xb6d   : > { %v27905_v29 = vpack.c.bf16 %v15014_v37, %v15011_v9  ;;  %20696 = vmatpush3.bf16.msra.mxu0 %v24041_v20 }
 0xb6e   : > { %20697 = vmatprep.subr.bf16.mxu0 %v24043_v54 }
 0xb6f   : > { %v14824_v49 = vpop.f32.mrb[204].mxu1 }
 0xb70   : > { %v15016_v33 = vmax.f32 %v27583_v46, %v14824_v49  ;;  %v14826_v38 = vpop.f32.mrb[205].mxu1  ;;  %v24055_v46 = vld [vmem:[#allocation4 + $0x168] sm:$0xff]  }
 0xb71   : > { %v15017_v58 = vmax.f32 %v27585_v48, %v14826_v38  ;;  %v14828_v26 = vpop.f32.mrb[206].mxu1  ;;  %20698 = vmatpush3.bf16.msra.mxu0 %v24045_v35  ;;  %v24057_v48 = vld [vmem:[#allocation4 + $0x128] sm:$0xff]  }
 0xb72   : > { %v15019_v57 = vmax.f32 %v27587_v17, %v14828_v26  ;;  %v14830_v7 = vpop.f32.mrb[207].mxu1  ;;  %20699 = vmatprep.subr.bf16.mxu0 %v24047_v59  ;;  %v24063_v17 = vld [vmem:[#allocation4 + $0x178] sm:$0xff]  }
 0xb73   : > { %v15020_v10 = vmax.f32 %v27592_v16, %v14830_v7 }
 0xb74   : > { %v27911_v21 = vpack.c.bf16 %v15019_v57, %v15016_v33 }
 0xb75   : > { %v27913_v60 = vpack.c.bf16 %v15020_v10, %v15017_v58  ;;  %20700 = vmatpush3.bf16.msra.mxu0 %v24049_v52 }
 0xb76   : > { %20701 = vmatprep.subr.bf16.mxu0 %v24051_v2 }
 0xb79   : > { %20702 = vmatpush3.bf16.msra.mxu0 %v24053_v6 }
 0xb7a   : > { %20703 = vmatprep.subr.bf16.mxu0 %v24055_v46 }
 0xb7d   : > { %20704 = vmatpush3.bf16.msra.mxu0 %v24057_v48 }
 0xb7e   : > { %20705 = vmatprep.subr.bf16.mxu0 %v24059_v15 }
 0xb7f   : > { %v20563_v4 = vpop.f32.mrb[208].mxu1 }
 0xb80   : > { %v20564_v19 = vpop.f32.mrb[209].mxu1 }
 0xb81   : > { %v20565_v12 = vadd.f32 %v20564_v19, %v20563_v4  ;;  %v20566_v16 = vpop.f32.mrb[210].mxu1  ;;  %20706 = vmatpush3.bf16.msra.mxu0 %v24061_v55 }
 0xb82   : > { %v20567_v42 = vpop.f32.mrb[211].mxu1  ;;  %20707 = vmatprep.subr.bf16.mxu0 %v24063_v17 }
 0xb83   : > { %v20568_v45 = vadd.f32 %v20567_v42, %v20566_v16 }
 0xb85   : > { %20708 = vmatpush3.bf16.msra.mxu0 %v24064_v34  ;;  %v24066_v34 = vld [vmem:[#allocation4 + $0x180] sm:$0xff]  }
 0xb86   : > { %20737 = vmatprep.subr.bf16.mxu0 %v24067_v0 }
 0xb87   : > { %v20569_v53 = vpop.f32.mrb[212].mxu1 }
 0xb88   : > { %v20570_v5 = vpop.f32.mrb[213].mxu1 }
 0xb89   : > { %v20571_v18 = vadd.f32 %v20570_v5, %v20569_v53  ;;  %v20572_v23 = vpop.f32.mrb[214].mxu1  ;;  %v24068_v53 = vld [vmem:[#allocation4 + $0x1c8] sm:$0xff]  }
 0xb8a   : > { %v20573_v30 = vpop.f32.mrb[215].mxu1 }
 0xb8b   : > { %v20574_v25 = vadd.f32 %v20573_v30, %v20572_v23 }
 0xb8f   : > { %v20575_v13 = vpop.f32.mrb[216].mxu1 }
 0xb90   : > { %v20576_v31 = vpop.f32.mrb[217].mxu1 }
 0xb91   : > { %v20577_v62 = vadd.f32 %v20576_v31, %v20575_v13  ;;  %v20578_v3 = vpop.f32.mrb[218].mxu1  ;;  %v24070_v13 = vld [vmem:[#allocation4 + $0x188] sm:$0xff]  }
 0xb92   : > { %v20579_v14 = vpop.f32.mrb[219].mxu1  ;;  %v24071_v31 = vld [vmem:[#allocation4 + $0x248] sm:$0xff]  }
 0xb93   : > { %v20580_v40 = vadd.f32 %v20579_v14, %v20578_v3  ;;  %v15046_v14 = vrot.slane %v27892_v44, 6 }
 0xb9f   : > { %v20597_v47 = vpop.f32.mrb[220].mxu1 }
 0xba0   : > { %v20598_v50 = vpop.f32.mrb[221].mxu1 }
 0xba1   : > { %v20599_v28 = vadd.f32 %v20598_v50, %v20597_v47  ;;  %v20600_v36 = vpop.f32.mrb[222].mxu1 }
 0xba2   : > { %v20601_v11 = vpop.f32.mrb[223].mxu1 }
 0xba3   : > { %v14925_v1 = vadd.f32 %v20599_v28, %v20565_v12  ;;  %v20602_v8 = vadd.f32 %v20601_v11, %v20600_v36  ;;  %v24073_v28 = vld [vmem:[#allocation4 + $0x208] sm:$0xff]   ;;  %v24074_v11 = vld [vmem:[#allocation4 + $0x190] sm:$0xff]  }
 0xba5   : > { %v14928_v9 = vadd.f32 %v20602_v8, %v20568_v45 }
 0xba7   : > { %v20603_v27 = vpop.f32.mrb[224].mxu1 }
 0xba8   : > { %v20604_v20 = vpop.f32.mrb[225].mxu1 }
 0xba9   : > { %v20605_v39 = vadd.f32 %v20604_v20, %v20603_v27  ;;  %v20606_v51 = vpop.f32.mrb[226].mxu1  ;;  %v24076_v27 = vld [vmem:[#allocation4 + $0x1d8] sm:$0xff]  }
 0xbaa   : > { %v20607_v54 = vpop.f32.mrb[227].mxu1 }
 0xbab   : > { %v14933_v37 = vadd.f32 %v20605_v39, %v20571_v18  ;;  %v20608_v35 = vadd.f32 %v20607_v54, %v20606_v51  ;;  %v15041_v18 = vrot.slane %v27894_v43, 4  ;;  %v24078_v54 = vld [vmem:[#allocation4 + $0x198] sm:$0xff]  }
 0xbad   : > { %v14936_v59 = vadd.f32 %v20608_v35, %v20574_v25  ;;  %v24069_v25 = vld [vmem:[#allocation4 + $0x200] sm:$0xff]  }
 0xbaf   : > { %v20609_v49 = vpop.f32.mrb[228].mxu1 }
 0xbb0   : > { %v20610_v33 = vpop.f32.mrb[229].mxu1 }
 0xbb1   : > { %v20611_v38 = vadd.f32 %v20610_v33, %v20609_v49  ;;  %v20612_v58 = vpop.f32.mrb[230].mxu1  ;;  %v24080_v49 = vld [vmem:[#allocation4 + $0x1e0] sm:$0xff]  }
 0xbb2   : > { %v20613_v26 = vpop.f32.mrb[231].mxu1 }
 0xbb3   : > { %v14941_v52 = vadd.f32 %v20611_v38, %v20577_v62  ;;  %v20614_v57 = vadd.f32 %v20613_v26, %v20612_v58  ;;  %v24081_v38 = vld [vmem:[#allocation4 + $0x218] sm:$0xff]   ;;  %v24082_v58 = vld [vmem:[#allocation4 + $0x1a0] sm:$0xff]  }
 0xbb4   : > { %v24083_v26 = vld [vmem:[#allocation4 + $0x260] sm:$0xff]  }
 0xbb5   : > { %v14944_v7 = vadd.f32 %v20614_v57, %v20580_v40  ;;  %v24072_v40 = vld [vmem:[#allocation4 + $0x1d0] sm:$0xff]   ;;  %v24084_v57 = vld [vmem:[#allocation4 + $0x1e8] sm:$0xff]  }
 0xbbf   : > { %v20631_v2 = vpop.f32.mrb[232].mxu1 }
 0xbc0   : > { %v20632_v10 = vpop.f32.mrb[233].mxu1 }
 0xbc1   : > { %v20633_v6 = vadd.f32 %v20632_v10, %v20631_v2  ;;  %v20634_v46 = vpop.f32.mrb[234].mxu1  ;;  %v24085_v2 = vld [vmem:[#allocation4 + $0x220] sm:$0xff]   ;;  %v24088_v10 = vld [vmem:[#allocation4 + $0x1f0] sm:$0xff]  }
 0xbc2   : > { %v20635_v48 = vpop.f32.mrb[235].mxu1 }
 0xbc3   : > { %v14982_v15 = vadd.f32 %v20633_v6, %v14925_v1  ;;  %v20636_v55 = vadd.f32 %v20635_v48, %v20634_v46  ;;  %v24075_v1 = vld [vmem:[#allocation4 + $0x250] sm:$0xff]   ;;  %v24092_v48 = vld [vmem:[#allocation4 + $0x1f8] sm:$0xff]  }
 0xbc4   : > { %v24090_v6 = vld [vmem:[#allocation4 + $0x1b0] sm:$0xff]  }
 0xbc5   : > { %v15006_v17 = vmax.f32 %v27756_v32, %v14982_v15  ;;  %v14985_v4 = vadd.f32 %v20636_v55, %v14928_v9  ;;  %v24091_v46 = vld [vmem:[#allocation4 + $0x270] sm:$0xff]   ;;  %v24094_v55 = vld [vmem:[#allocation4 + $0x1b8] sm:$0xff]  }
 0xbc6   : > { %v24093_v15 = vld [vmem:[#allocation4 + $0x230] sm:$0xff]  }
 0xbc7   : > { %v15009_v19 = vmax.f32 %v27759_v61, %v14985_v4  ;;  %v20637_v12 = vpop.f32.mrb[236].mxu1  ;;  %v15035_v61 = vrot.slane %v27894_v43, 2  ;;  %v24097_v4 = vld [vmem:[#allocation4 + $0x2c0] sm:$0xff]  }
 0xbc8   : > { %v20638_v16 = vpop.f32.mrb[237].mxu1 }
 0xbc9   : > { %v27917_v42 = vpack.c.bf16 %v15009_v19, %v15006_v17  ;;  %v20639_v0 = vadd.f32 %v20638_v16, %v20637_v12  ;;  %v20640_v45 = vpop.f32.mrb[238].mxu1  ;;  %v24095_v17 = vld [vmem:[#allocation4 + $0x278] sm:$0xff]   ;;  %v24098_v12 = vld [vmem:[#allocation4 + $0x280] sm:$0xff]   ;;  %v15040_v16 = vrot.slane %v27892_v44, 4  ;;  %v24105_v44 = vld [vmem:[#allocation4 + $0x308] sm:$0xff]  }
 0xbca   : > { %v20641_v5 = vpop.f32.mrb[239].mxu1  ;;  %v24096_v19 = vld [vmem:[#allocation4 + $0x238] sm:$0xff]  }
 0xbcb   : > { %v14990_v23 = vadd.f32 %v20639_v0, %v14933_v37  ;;  %v20642_v30 = vadd.f32 %v20641_v5, %v20640_v45  ;;  %17478 = vmatmul.mubr.bf16.vlgmr.msra.gmra.mrb[244].mxu1 %v27917_v42  ;;  %v15036_v32 = vrot.slane %v27917_v42, 2  ;;  %v24079_v37 = vld [vmem:[#allocation4 + $0x258] sm:$0xff]   ;;  %v24100_v0 = vld [vmem:[#allocation4 + $0x2c8] sm:$0xff]   ;;  %v15048_v45 = vrot.slane %v27917_v42, 6 }
 0xbcc   : > { %20716 = vmatpush3.bf16.msra.mxu1 %v24066_v34  ;;  %17557 = vmatprep.mubr.bf16.mxu1 %v15041_v18  ;;  %v24099_v34 = vld [vmem:[#allocation4 + $0x340] sm:$0xff]   ;;  %v15042_v5 = vrot.slane %v27917_v42, 4  ;;  %v24102_v18 = vld [vmem:[#allocation4 + $0x288] sm:$0xff]   ;;  %v24110_v42 = vld [vmem:[#allocation4 + $0x298] sm:$0xff]  }
 0xbcd   : > { %v15012_v62 = vmax.f32 %v27774_v22, %v14990_v23  ;;  %v14993_v3 = vadd.f32 %v20642_v30, %v14936_v59  ;;  %17517 = vmatprep.mubr.bf16.mxu0 %v15036_v32  ;;  %20717 = vmatprep.subr.bf16.mxu1 %v24068_v53  ;;  %v24101_v53 = vld [vmem:[#allocation4 + $0x300] sm:$0xff]   ;;  %v24103_v23 = vld [vmem:[#allocation4 + $0x348] sm:$0xff]   ;;  %v24104_v30 = vld [vmem:[#allocation4 + $0x2d0] sm:$0xff]  }
 0xbce   : > { %17518 = vmatmul.mubr.bf16.vlgmr.msra.gmra.mrb[124].mxu0 %v15035_v61  ;;  %v24106_v32 = vld [vmem:[#allocation4 + $0x290] sm:$0xff]   ;;  %v24108_v61 = vld [vmem:[#allocation4 + $0x2d8] sm:$0xff]  }
 0xbcf   : > { %v15015_v47 = vmax.f32 %v27778_v56, %v14993_v3  ;;  %20738 = vmatpush3.bf16.msra.mxu0 %v24069_v25  ;;  %v20643_v50 = vpop.f32.mrb[240].mxu1  ;;  %17597 = vmatprep.mubr.bf16.mxu0 %v15046_v14  ;;  %v24077_v56 = vld [vmem:[#allocation4 + $0x210] sm:$0xff]   ;;  %v24113_v3 = vld [vmem:[#allocation4 + $0x318] sm:$0xff]   ;;  %v24114_v14 = vld [vmem:[#allocation4 + $0x2a0] sm:$0xff]  }
 0xbd0   : > { %20718 = vmatpush3.bf16.msra.mxu1 %v24070_v13  ;;  %v20644_v36 = vpop.f32.mrb[241].mxu1  ;;  %20739 = vmatprep.subr.bf16.mxu0 %v24071_v31  ;;  %v24107_v25 = vld [vmem:[#allocation4 + $0x350] sm:$0xff]   ;;  %v24111_v31 = vld [vmem:[#allocation4 + $0x358] sm:$0xff]  }
 0xbd1   : > { %v27926_v8 = vpack.c.bf16 %v15015_v47, %v15012_v62  ;;  %v20645_v22 = vadd.f32 %v20644_v36, %v20643_v50  ;;  %v20646_v9 = vpop.f32.mrb[242].mxu1  ;;  %20719 = vmatprep.subr.bf16.mxu1 %v24072_v40  ;;  %v24109_v13 = vld [vmem:[#allocation4 + $0x310] sm:$0xff]   ;;  %v24112_v62 = vld [vmem:[#allocation4 + $0x2e0] sm:$0xff]   ;;  %v24116_v47 = vld [vmem:[#allocation4 + $0x2e8] sm:$0xff]  }
 0xbd2   : > { %v20647_v20 = vpop.f32.mrb[243].mxu1  ;;  %v24115_v40 = vld [vmem:[#allocation4 + $0x360] sm:$0xff]   ;;  %v24119_v36 = vld [vmem:[#allocation4 + $0x368] sm:$0xff]  }
 0xbd3   : > { %v14998_v39 = vadd.f32 %v20645_v22, %v14941_v52  ;;  %v20648_v51 = vadd.f32 %v20647_v20, %v20646_v9  ;;  %20740 = vmatpush3.bf16.msra.mxu0 %v24073_v28  ;;  %v24117_v50 = vld [vmem:[#allocation4 + $0x320] sm:$0xff]   ;;  %v24118_v28 = vld [vmem:[#allocation4 + $0x2a8] sm:$0xff]   ;;  %v24122_v22 = vld [vmem:[#allocation4 + $0x2b0] sm:$0xff]  }
 0xbd4   : > { %20720 = vmatpush3.bf16.msra.mxu1 %v24074_v11  ;;  %20741 = vmatprep.subr.bf16.mxu0 %v24075_v1  ;;  %v24120_v11 = vld [vmem:[#allocation4 + $0x2f0] sm:$0xff]   ;;  %v24121_v1 = vld [vmem:[#allocation4 + $0x328] sm:$0xff]  }
 0xbd5   : > { %v15018_v35 = vmax.f32 %v27794_v41, %v14998_v39  ;;  %v15001_v59 = vadd.f32 %v20648_v51, %v14944_v7  ;;  %20721 = vmatprep.subr.bf16.mxu1 %v24076_v27  ;;  %v24086_v41 = vld [vmem:[#allocation4 + $0x1a8] sm:$0xff]   ;;  %v24123_v9 = vld [vmem:[#allocation4 + $0x370] sm:$0xff]   ;;  %v24124_v27 = vld [vmem:[#allocation4 + $0x2f8] sm:$0xff]  }
 0xbd6   : > { %v24087_v7 = vld [vmem:[#allocation4 + $0x268] sm:$0xff]   ;;  %v24125_v20 = vld [vmem:[#allocation4 + $0x330] sm:$0xff]   ;;  %v24126_v39 = vld [vmem:[#allocation4 + $0x2b8] sm:$0xff]  }
 0xbd7   : > { %v15021_v33 = vmax.f32 %v27797_v63, %v15001_v59  ;;  %20742 = vmatpush3.bf16.msra.mxu0 %v24077_v56  ;;  %v24089_v63 = vld [vmem:[#allocation4 + $0x228] sm:$0xff]   ;;  %v24127_v51 = vld [vmem:[#allocation4 + $0x378] sm:$0xff]   ;;  %v24129_v56 = vld [vmem:[#allocation4 + $0x3c0] sm:$0xff]  }
 0xbd8   : > { %20722 = vmatpush3.bf16.msra.mxu1 %v24078_v54  ;;  %20743 = vmatprep.subr.bf16.mxu0 %v24079_v37  ;;  %v24128_v54 = vld [vmem:[#allocation4 + $0x338] sm:$0xff]   ;;  %v24130_v37 = vld [vmem:[#allocation4 + $0x380] sm:$0xff]  }
 0xbd9   : > { %v27930_v52 = vpack.c.bf16 %v15021_v33, %v15018_v35  ;;  %20723 = vmatprep.subr.bf16.mxu1 %v24080_v49  ;;  %v15047_v35 = vrot.slane %v27894_v43, 6  ;;  %v24131_v59 = vld [vmem:[#allocation4 + $0x440] sm:$0xff]   ;;  %v24132_v49 = vld [vmem:[#allocation4 + $0x3c8] sm:$0xff]   ;;  %v15055_v33 = vrot.slane %v27903_v24, 2 }
 0xbda   : > { %v24137_v43 = vld [vmem:[#allocation4 + $0x408] sm:$0xff]  }
 0xbdb   : > { %20744 = vmatpush3.bf16.msra.mxu0 %v24081_v38  ;;  %v24133_v38 = vld [vmem:[#allocation4 + $0x400] sm:$0xff]  }
 0xbdc   : > { %20724 = vmatpush3.bf16.msra.mxu1 %v24082_v58  ;;  %20745 = vmatprep.subr.bf16.mxu0 %v24083_v26  ;;  %v24134_v58 = vld [vmem:[#allocation4 + $0x388] sm:$0xff]  }
 0xbdd   : > { %20725 = vmatprep.subr.bf16.mxu1 %v24084_v57  ;;  %v24135_v26 = vld [vmem:[#allocation4 + $0x448] sm:$0xff]   ;;  %v15057_v57 = vrot.slane %v27926_v8, 2 }
 0xbdf   : > { %20746 = vmatpush3.bf16.msra.mxu0 %v24085_v2  ;;  %v24136_v2 = vld [vmem:[#allocation4 + $0x3d0] sm:$0xff]  }
 0xbe0   : > { %20726 = vmatpush3.bf16.msra.mxu1 %v24086_v41  ;;  %20747 = vmatprep.subr.bf16.mxu0 %v24087_v7  ;;  %v24138_v41 = vld [vmem:[#allocation4 + $0x390] sm:$0xff]  }
 0xbe1   : > { %20727 = vmatprep.subr.bf16.mxu1 %v24088_v10  ;;  %v24139_v7 = vld [vmem:[#allocation4 + $0x450] sm:$0xff]   ;;  %v24140_v10 = vld [vmem:[#allocation4 + $0x3d8] sm:$0xff]  }
 0xbe3   : > { %20748 = vmatpush3.bf16.msra.mxu0 %v24089_v63  ;;  %v24141_v63 = vld [vmem:[#allocation4 + $0x410] sm:$0xff]  }
 0xbe4   : > { %20728 = vmatpush3.bf16.msra.mxu1 %v24090_v6  ;;  %20749 = vmatprep.subr.bf16.mxu0 %v24091_v46  ;;  %v24142_v6 = vld [vmem:[#allocation4 + $0x398] sm:$0xff]  }
 0xbe5   : > { %20729 = vmatprep.subr.bf16.mxu1 %v24092_v48  ;;  %v24143_v46 = vld [vmem:[#allocation4 + $0x458] sm:$0xff]   ;;  %v24144_v48 = vld [vmem:[#allocation4 + $0x3e0] sm:$0xff]  }
 0xbe7   : > { %20750 = vmatpush3.bf16.msra.mxu0 %v24093_v15  ;;  %v24145_v15 = vld [vmem:[#allocation4 + $0x418] sm:$0xff]  }
 0xbe8   : > { %20730 = vmatpush3.bf16.msra.mxu1 %v24094_v55  ;;  %20751 = vmatprep.subr.bf16.mxu0 %v24095_v17  ;;  %v24146_v55 = vld [vmem:[#allocation4 + $0x3a0] sm:$0xff]  }
 0xbe9   : > { %20759 = vmatprep.subr.bf16.mxu1 %v24097_v4  ;;  %v24147_v17 = vld [vmem:[#allocation4 + $0x460] sm:$0xff]   ;;  %v24148_v4 = vld [vmem:[#allocation4 + $0x3e8] sm:$0xff]  }
 0xbeb   : > { %17558 = vmatmul.mubr.bf16.vlgmr.msra.gmra.mrb[248].mxu1 %v15040_v16  ;;  %20752 = vmatpush3.bf16.msra.mxu0 %v24096_v19  ;;  %v24149_v19 = vld [vmem:[#allocation4 + $0x420] sm:$0xff]   ;;  %v24151_v16 = vld [vmem:[#allocation4 + $0x468] sm:$0xff]  }
 0xbec   : > { %20760 = vmatpush3.bf16.msra.mxu1 %v24098_v12  ;;  %17637 = vmatprep.mubr.bf16.mxu1 %v15048_v45  ;;  %v24150_v12 = vld [vmem:[#allocation4 + $0x3a8] sm:$0xff]   ;;  %v24154_v45 = vld [vmem:[#allocation4 + $0x3b0] sm:$0xff]  }
 0xbed   : > { %20781 = vmatprep.subr.bf16.mxu0 %v24099_v34  ;;  %20761 = vmatprep.subr.bf16.mxu1 %v24100_v0  ;;  %v24152_v34 = vld [vmem:[#allocation4 + $0x3f0] sm:$0xff]   ;;  %v24153_v0 = vld [vmem:[#allocation4 + $0x428] sm:$0xff]  }
 0xbee   : > { %17598 = vmatmul.mubr.bf16.vlgmr.msra.gmra.mrb[128].mxu0 %v15042_v5  ;;  %v24156_v5 = vld [vmem:[#allocation4 + $0x3f8] sm:$0xff]  }
 0xbef   : > { %20782 = vmatpush3.bf16.msra.mxu0 %v24101_v53  ;;  %17677 = vmatprep.mubr.bf16.mxu0 %v27905_v29  ;;  %v24155_v53 = vld [vmem:[#allocation4 + $0x470] sm:$0xff]  }
 0xbf0   : > { %20762 = vmatpush3.bf16.msra.mxu1 %v24102_v18  ;;  %20783 = vmatprep.subr.bf16.mxu0 %v24103_v23  ;;  %v24157_v18 = vld [vmem:[#allocation4 + $0x430] sm:$0xff]   ;;  %v24158_v23 = vld [vmem:[#allocation4 + $0x3b8] sm:$0xff]  }
 0xbf1   : > { %20763 = vmatprep.subr.bf16.mxu1 %v24104_v30  ;;  %v24159_v30 = vld [vmem:[#allocation4 + $0x478] sm:$0xff]  }
 0xbf3   : > { %20784 = vmatpush3.bf16.msra.mxu0 %v24105_v44  ;;  %v24161_v44 = vld [vmem:[#allocation4 + $0x4c0] sm:$0xff]  }
 0xbf4   : > { %20764 = vmatpush3.bf16.msra.mxu1 %v24106_v32  ;;  %20785 = vmatprep.subr.bf16.mxu0 %v24107_v25  ;;  %v24160_v32 = vld [vmem:[#allocation4 + $0x438] sm:$0xff]   ;;  %v24162_v25 = vld [vmem:[#allocation4 + $0x480] sm:$0xff]  }
 0xbf5   : > { %20765 = vmatprep.subr.bf16.mxu1 %v24108_v61  ;;  %v24163_v61 = vld [vmem:[#allocation4 + $0x540] sm:$0xff]  }
 0xbf7   : > { %20786 = vmatpush3.bf16.msra.mxu0 %v24109_v13  ;;  %v24164_v13 = vld [vmem:[#allocation4 + $0x4c8] sm:$0xff]  }
 0xbf8   : > { %20766 = vmatpush3.bf16.msra.mxu1 %v24110_v42  ;;  %20787 = vmatprep.subr.bf16.mxu0 %v24111_v31  ;;  %v15062_v42 = vrot.slane %v27905_v29, 4  ;;  %v24165_v31 = vld [vmem:[#allocation4 + $0x500] sm:$0xff]  }
 0xbf9   : > { %20767 = vmatprep.subr.bf16.mxu1 %v24112_v62  ;;  %v15056_v62 = vrot.slane %v27905_v29, 2 }
 0xbfb   : > { %20788 = vmatpush3.bf16.msra.mxu0 %v24113_v3  ;;  %v24166_v3 = vld [vmem:[#allocation4 + $0x488] sm:$0xff]  }
 0xbfc   : > { %20768 = vmatpush3.bf16.msra.mxu1 %v24114_v14  ;;  %20789 = vmatprep.subr.bf16.mxu0 %v24115_v40  ;;  %v24167_v14 = vld [vmem:[#allocation4 + $0x548] sm:$0xff]   ;;  %v15067_v40 = vrot.slane %v27903_v24, 6 }
 0xbfd   : > { %20769 = vmatprep.subr.bf16.mxu1 %v24116_v47  ;;  %v24168_v47 = vld [vmem:[#allocation4 + $0x4d0] sm:$0xff]  }
 0xbff   : > { %20790 = vmatpush3.bf16.msra.mxu0 %v24117_v50  ;;  %v24169_v50 = vld [vmem:[#allocation4 + $0x508] sm:$0xff]  }
 0xc00   : > { %20770 = vmatpush3.bf16.msra.mxu1 %v24118_v28  ;;  %20791 = vmatprep.subr.bf16.mxu0 %v24119_v36  ;;  %v24170_v28 = vld [vmem:[#allocation4 + $0x490] sm:$0xff]  }
 0xc01   : > { %20771 = vmatprep.subr.bf16.mxu1 %v24120_v11  ;;  %v24171_v36 = vld [vmem:[#allocation4 + $0x550] sm:$0xff]   ;;  %v24172_v11 = vld [vmem:[#allocation4 + $0x4d8] sm:$0xff]  }
 0xc03   : > { %20792 = vmatpush3.bf16.msra.mxu0 %v24121_v1  ;;  %v24173_v1 = vld [vmem:[#allocation4 + $0x510] sm:$0xff]  }
 0xc04   : > { %20772 = vmatpush3.bf16.msra.mxu1 %v24122_v22  ;;  %20793 = vmatprep.subr.bf16.mxu0 %v24123_v9  ;;  %v24174_v22 = vld [vmem:[#allocation4 + $0x498] sm:$0xff]  }
 0xc05   : > { %20773 = vmatprep.subr.bf16.mxu1 %v24124_v27  ;;  %v24175_v9 = vld [vmem:[#allocation4 + $0x558] sm:$0xff]   ;;  %v24176_v27 = vld [vmem:[#allocation4 + $0x4e0] sm:$0xff]  }
 0xc07   : > { %20794 = vmatpush3.bf16.msra.mxu0 %v24125_v20  ;;  %v24177_v20 = vld [vmem:[#allocation4 + $0x518] sm:$0xff]  }
 0xc08   : > { %20774 = vmatpush3.bf16.msra.mxu1 %v24126_v39  ;;  %20795 = vmatprep.subr.bf16.mxu0 %v24127_v51  ;;  %v24178_v39 = vld [vmem:[#allocation4 + $0x4a0] sm:$0xff]  }
 0xc09   : > { %20803 = vmatprep.subr.bf16.mxu1 %v24129_v56  ;;  %v24179_v51 = vld [vmem:[#allocation4 + $0x560] sm:$0xff]   ;;  %v24180_v56 = vld [vmem:[#allocation4 + $0x4e8] sm:$0xff]  }
 0xc0b   : > { %17638 = vmatmul.mubr.bf16.vlgmr.msra.gmra.mrb[252].mxu1 %v15047_v35  ;;  %20796 = vmatpush3.bf16.msra.mxu0 %v24128_v54 }
 0xc0c   : > { %20804 = vmatpush3.bf16.msra.mxu1 %v24130_v37  ;;  %17717 = vmatprep.mubr.bf16.mxu1 %v15055_v33  ;;  %v24181_v37 = vld [vmem:[#allocation4 + $0x520] sm:$0xff]  }
 0xc0d   : > { %20825 = vmatprep.subr.bf16.mxu0 %v24131_v59  ;;  %20805 = vmatprep.subr.bf16.mxu1 %v24132_v49  ;;  %v24182_v59 = vld [vmem:[#allocation4 + $0x4a8] sm:$0xff]  }
 0xc0e   : > { %17678 = vmatmul.mubr.bf16.vlgmr.msra.gmra.mrb[132].mxu0 %v27903_v24  ;;  %v24183_v49 = vld [vmem:[#allocation4 + $0x568] sm:$0xff]  }
 0xc0f   : > { %20826 = vmatpush3.bf16.msra.mxu0 %v24133_v38  ;;  %17757 = vmatprep.mubr.bf16.mxu0 %v15057_v57  ;;  %v24185_v57 = vld [vmem:[#allocation4 + $0x528] sm:$0xff]  }
 0xc10   : > { %20806 = vmatpush3.bf16.msra.mxu1 %v24134_v58  ;;  %20827 = vmatprep.subr.bf16.mxu0 %v24135_v26  ;;  %v24184_v58 = vld [vmem:[#allocation4 + $0x4f0] sm:$0xff]  }
 0xc11   : > { %20807 = vmatprep.subr.bf16.mxu1 %v24136_v2  ;;  %v24186_v2 = vld [vmem:[#allocation4 + $0x4b0] sm:$0xff]  }
 0xc13   : > { %20828 = vmatpush3.bf16.msra.mxu0 %v24137_v43  ;;  %v24187_v43 = vld [vmem:[#allocation4 + $0x570] sm:$0xff]  }
 0xc14   : > { %20808 = vmatpush3.bf16.msra.mxu1 %v24138_v41  ;;  %20829 = vmatprep.subr.bf16.mxu0 %v24139_v7  ;;  %v24188_v41 = vld [vmem:[#allocation4 + $0x4f8] sm:$0xff]   ;;  %v24189_v7 = vld [vmem:[#allocation4 + $0x530] sm:$0xff]  }
 0xc15   : > { %20809 = vmatprep.subr.bf16.mxu1 %v24140_v10  ;;  %v24190_v10 = vld [vmem:[#allocation4 + $0x4b8] sm:$0xff]  }
 0xc17   : > { %20830 = vmatpush3.bf16.msra.mxu0 %v24141_v63  ;;  %v24191_v63 = vld [vmem:[#allocation4 + $0x578] sm:$0xff]  }
 0xc18   : > { %20810 = vmatpush3.bf16.msra.mxu1 %v24142_v6  ;;  %20831 = vmatprep.subr.bf16.mxu0 %v24143_v46  ;;  %v24193_v6 = vld [vmem:[#allocation4 + $0x5c0] sm:$0xff]   ;;  %v24192_v46 = vld [vmem:[#allocation4 + $0x538] sm:$0xff]  }
 0xc19   : > { %20811 = vmatprep.subr.bf16.mxu1 %v24144_v48  ;;  %v24194_v48 = vld [vmem:[#allocation4 + $0x580] sm:$0xff]  }
 0xc1b   : > { %20832 = vmatpush3.bf16.msra.mxu0 %v24145_v15  ;;  %v15061_v15 = vrot.slane %v27903_v24, 4  ;;  %v24201_v24 = vld [vmem:[#allocation4 + $0x608] sm:$0xff]  }
 0xc1c   : > { %20812 = vmatpush3.bf16.msra.mxu1 %v24146_v55  ;;  %20833 = vmatprep.subr.bf16.mxu0 %v24147_v17  ;;  %v24195_v55 = vld [vmem:[#allocation4 + $0x640] sm:$0xff]   ;;  %v24196_v17 = vld [vmem:[#allocation4 + $0x5c8] sm:$0xff]  }
 0xc1d   : > { %20813 = vmatprep.subr.bf16.mxu1 %v24148_v4  ;;  %v15069_v4 = vrot.slane %v27926_v8, 6 }
 0xc1f   : > { %20834 = vmatpush3.bf16.msra.mxu0 %v24149_v19  ;;  %v24197_v19 = vld [vmem:[#allocation4 + $0x600] sm:$0xff]  }
 0xc20   : > { %20814 = vmatpush3.bf16.msra.mxu1 %v24150_v12  ;;  %20835 = vmatprep.subr.bf16.mxu0 %v24151_v16  ;;  %v15063_v12 = vrot.slane %v27926_v8, 4  ;;  %v24198_v16 = vld [vmem:[#allocation4 + $0x588] sm:$0xff]  }
 0xc21   : > { %20815 = vmatprep.subr.bf16.mxu1 %v24152_v34  ;;  %v24199_v34 = vld [vmem:[#allocation4 + $0x648] sm:$0xff]  }
 0xc23   : > { %20836 = vmatpush3.bf16.msra.mxu0 %v24153_v0  ;;  %v24200_v0 = vld [vmem:[#allocation4 + $0x5d0] sm:$0xff]  }
 0xc24   : > { %20816 = vmatpush3.bf16.msra.mxu1 %v24154_v45  ;;  %20837 = vmatprep.subr.bf16.mxu0 %v24155_v53  ;;  %v24202_v45 = vld [vmem:[#allocation4 + $0x590] sm:$0xff]  }
 0xc25   : > { %20817 = vmatprep.subr.bf16.mxu1 %v24156_v5  ;;  %v24203_v53 = vld [vmem:[#allocation4 + $0x650] sm:$0xff]   ;;  %v24204_v5 = vld [vmem:[#allocation4 + $0x5d8] sm:$0xff]  }
 0xc27   : > { %20838 = vmatpush3.bf16.msra.mxu0 %v24157_v18  ;;  %v24205_v18 = vld [vmem:[#allocation4 + $0x610] sm:$0xff]  }
 0xc28   : > { %20818 = vmatpush3.bf16.msra.mxu1 %v24158_v23  ;;  %20839 = vmatprep.subr.bf16.mxu0 %v24159_v30  ;;  %v24207_v23 = vld [vmem:[#allocation4 + $0x658] sm:$0xff]   ;;  %v24208_v30 = vld [vmem:[#allocation4 + $0x5e0] sm:$0xff]  }
 0xc29   : > { %20847 = vmatprep.subr.bf16.mxu1 %v24161_v44  ;;  %v24209_v44 = vld [vmem:[#allocation4 + $0x618] sm:$0xff]  }
 0xc2b   : > { %17718 = vmatmul.mubr.bf16.vlgmr.msra.gmra.mrb[0].mxu1 %v27926_v8  ;;  %20840 = vmatpush3.bf16.msra.mxu0 %v24160_v32  ;;  %v24206_v8 = vld [vmem:[#allocation4 + $0x598] sm:$0xff]   ;;  %v24210_v32 = vld [vmem:[#allocation4 + $0x5a0] sm:$0xff]  }
 0xc2c   : > { %20848 = vmatpush3.bf16.msra.mxu1 %v24162_v25  ;;  %17797 = vmatprep.mubr.bf16.mxu1 %v15062_v42  ;;  %v24211_v25 = vld [vmem:[#allocation4 + $0x660] sm:$0xff]   ;;  %v24214_v42 = vld [vmem:[#allocation4 + $0x5a8] sm:$0xff]  }
 0xc2d   : > { %20869 = vmatprep.subr.bf16.mxu0 %v24163_v61  ;;  %20849 = vmatprep.subr.bf16.mxu1 %v24164_v13  ;;  %v24212_v61 = vld [vmem:[#allocation4 + $0x5e8] sm:$0xff]   ;;  %v24213_v13 = vld [vmem:[#allocation4 + $0x620] sm:$0xff]  }
 0xc2e   : > { %17758 = vmatmul.mubr.bf16.vlgmr.msra.gmra.mrb[136].mxu0 %v15056_v62  ;;  %v24216_v62 = vld [vmem:[#allocation4 + $0x5f0] sm:$0xff]  }
 0xc2f   : > { %20870 = vmatpush3.bf16.msra.mxu0 %v24165_v31  ;;  %17837 = vmatprep.mubr.bf16.mxu0 %v15067_v40  ;;  %v24215_v31 = vld [vmem:[#allocation4 + $0x668] sm:$0xff]   ;;  %v24219_v40 = vld [vmem:[#allocation4 + $0x670] sm:$0xff]  }
 0xc30   : > { %20850 = vmatpush3.bf16.msra.mxu1 %v24166_v3  ;;  %20871 = vmatprep.subr.bf16.mxu0 %v24167_v14  ;;  %v24217_v3 = vld [vmem:[#allocation4 + $0x628] sm:$0xff]   ;;  %v24218_v14 = vld [vmem:[#allocation4 + $0x5b0] sm:$0xff]  }
 0xc31   : > { %20851 = vmatprep.subr.bf16.mxu1 %v24168_v47  ;;  %v24220_v47 = vld [vmem:[#allocation4 + $0x5f8] sm:$0xff]  }
 0xc33   : > { %20872 = vmatpush3.bf16.msra.mxu0 %v24169_v50  ;;  %v24221_v50 = vld [vmem:[#allocation4 + $0x630] sm:$0xff]  }
 0xc34   : > { %20852 = vmatpush3.bf16.msra.mxu1 %v24170_v28  ;;  %20873 = vmatprep.subr.bf16.mxu0 %v24171_v36  ;;  %v24222_v28 = vld [vmem:[#allocation4 + $0x5b8] sm:$0xff]  }
 0xc35   : > { %20853 = vmatprep.subr.bf16.mxu1 %v24172_v11  ;;  %v24223_v36 = vld [vmem:[#allocation4 + $0x678] sm:$0xff]   ;;  %v24225_v11 = vld [vmem:[#allocation4 + $0x6c0] sm:$0xff]  }
 0xc37   : > { %20874 = vmatpush3.bf16.msra.mxu0 %v24173_v1  ;;  %v24224_v1 = vld [vmem:[#allocation4 + $0x638] sm:$0xff]  }
 0xc38   : > { %20854 = vmatpush3.bf16.msra.mxu1 %v24174_v22  ;;  %20875 = vmatprep.subr.bf16.mxu0 %v24175_v9  ;;  %v24226_v22 = vld [vmem:[#allocation4 + $0x680] sm:$0xff]   ;;  %v15068_v9 = vrot.slane %v27905_v29, 6  ;;  %v24233_v29 = vld [vmem:[#allocation4 + $0x708] sm:$0xff]  }
 0xc39   : > { %20855 = vmatprep.subr.bf16.mxu1 %v24176_v27  ;;  %v24227_v27 = vld [vmem:[#allocation4 + $0x740] sm:$0xff]  }
 0xc3b   : > { %20876 = vmatpush3.bf16.msra.mxu0 %v24177_v20  ;;  %v20665_v54 = vpop.f32.mrb[120].mxu0  ;;  %v24228_v20 = vld [vmem:[#allocation4 + $0x6c8] sm:$0xff]  }
 0xc3c   : > { %20856 = vmatpush3.bf16.msra.mxu1 %v24178_v39  ;;  %v20666_v35 = vpop.f32.mrb[121].mxu0  ;;  %20877 = vmatprep.subr.bf16.mxu0 %v24179_v51  ;;  %v15076_v39 = vrot.slane %v27911_v21, 2  ;;  %v24229_v51 = vld [vmem:[#allocation4 + $0x700] sm:$0xff]  }
 0xc3d   : > { %v27944_v33 = vadd.f32 %v20666_v35, %v20665_v54  ;;  %v20668_v38 = vpop.f32.mrb[122].mxu0  ;;  %20857 = vmatprep.subr.bf16.mxu1 %v24180_v56  ;;  %v24230_v56 = vld [vmem:[#allocation4 + $0x688] sm:$0xff]   ;;  %v24232_v35 = vld [vmem:[#allocation4 + $0x6d0] sm:$0xff]  }
 0xc3e   : > { %v20669_v26 = vpop.f32.mrb[123].mxu0  ;;  %v24231_v54 = vld [vmem:[#allocation4 + $0x748] sm:$0xff]   ;;  %v24236_v38 = vld [vmem:[#allocation4 + $0x6d8] sm:$0xff]  }
 0xc3f   : > { %20878 = vmatpush3.bf16.msra.mxu0 %v24181_v37  ;;  %v15078_v37 = vrot.slane %v27930_v52, 2  ;;  %v24238_v26 = vld [vmem:[#allocation4 + $0x698] sm:$0xff]  }
 0xc40   : > { %20858 = vmatpush3.bf16.msra.mxu1 %v24182_v59  ;;  %20879 = vmatprep.subr.bf16.mxu0 %v24183_v49  ;;  %v24234_v59 = vld [vmem:[#allocation4 + $0x690] sm:$0xff]  }
 0xc41   : > { %20859 = vmatprep.subr.bf16.mxu1 %v24184_v58  ;;  %v24235_v49 = vld [vmem:[#allocation4 + $0x750] sm:$0xff]  }
 0xc42   : > { %v24237_v58 = vld [vmem:[#allocation4 + $0x710] sm:$0xff]  }
 0xc43   : > { %20880 = vmatpush3.bf16.msra.mxu0 %v24185_v57  ;;  %v24239_v57 = vld [vmem:[#allocation4 + $0x758] sm:$0xff]  }
 0xc44   : > { %20860 = vmatpush3.bf16.msra.mxu1 %v24186_v2  ;;  %20881 = vmatprep.subr.bf16.mxu0 %v24187_v43  ;;  %v24240_v2 = vld [vmem:[#allocation4 + $0x6e0] sm:$0xff]   ;;  %v24241_v43 = vld [vmem:[#allocation4 + $0x718] sm:$0xff]  }
 0xc45   : > { %20861 = vmatprep.subr.bf16.mxu1 %v24188_v41  ;;  %v24242_v41 = vld [vmem:[#allocation4 + $0x6a0] sm:$0xff]  }
 0xc47   : > { %20882 = vmatpush3.bf16.msra.mxu0 %v24189_v7  ;;  %v24243_v7 = vld [vmem:[#allocation4 + $0x760] sm:$0xff]  }
 0xc48   : > { %20862 = vmatpush3.bf16.msra.mxu1 %v24190_v10  ;;  %20883 = vmatprep.subr.bf16.mxu0 %v24191_v63  ;;  %v24244_v10 = vld [vmem:[#allocation4 + $0x6e8] sm:$0xff]   ;;  %v24245_v63 = vld [vmem:[#allocation4 + $0x720] sm:$0xff]  }
 0xc49   : > { %20891 = vmatprep.subr.bf16.mxu1 %v24193_v6  ;;  %v24246_v6 = vld [vmem:[#allocation4 + $0x6a8] sm:$0xff]  }
 0xc4b   : > { %17798 = vmatmul.mubr.bf16.vlgmr.msra.gmra.mrb[4].mxu1 %v15061_v15  ;;  %20884 = vmatpush3.bf16.msra.mxu0 %v24192_v46  ;;  %v24247_v46 = vld [vmem:[#allocation4 + $0x768] sm:$0xff]  }
 0xc4c   : > { %20892 = vmatpush3.bf16.msra.mxu1 %v24194_v48  ;;  %17877 = vmatprep.mubr.bf16.mxu1 %v15069_v4  ;;  %v24248_v48 = vld [vmem:[#allocation4 + $0x6f0] sm:$0xff]   ;;  %v24249_v15 = vld [vmem:[#allocation4 + $0x728] sm:$0xff]   ;;  %v24252_v4 = vld [vmem:[#allocation4 + $0x6f8] sm:$0xff]  }
 0xc4d   : > { %20913 = vmatprep.subr.bf16.mxu0 %v24195_v55  ;;  %20893 = vmatprep.subr.bf16.mxu1 %v24196_v17  ;;  %v24250_v55 = vld [vmem:[#allocation4 + $0x6b0] sm:$0xff]  }
 0xc4e   : > { %17838 = vmatmul.mubr.bf16.vlgmr.msra.gmra.mrb[140].mxu0 %v15063_v12  ;;  %v24251_v17 = vld [vmem:[#allocation4 + $0x770] sm:$0xff]   ;;  %v24254_v12 = vld [vmem:[#allocation4 + $0x6b8] sm:$0xff]  }
 0xc4f   : > { %20914 = vmatpush3.bf16.msra.mxu0 %v24197_v19  ;;  %17917 = vmatprep.mubr.bf16.mxu0 %v27913_v60  ;;  %v24253_v19 = vld [vmem:[#allocation4 + $0x730] sm:$0xff]  }
 0xc50   : > { %20894 = vmatpush3.bf16.msra.mxu1 %v24198_v16  ;;  %20915 = vmatprep.subr.bf16.mxu0 %v24199_v34  ;;  %v24255_v16 = vld [vmem:[#allocation4 + $0x778] sm:$0xff]   ;;  %v24257_v34 = vld [vmem:[#allocation4 + $0x7c0] sm:$0xff]  }
 0xc51   : > { %20895 = vmatprep.subr.bf16.mxu1 %v24200_v0  ;;  %v24256_v0 = vld [vmem:[#allocation4 + $0x738] sm:$0xff]  }
 0xc53   : > { %20916 = vmatpush3.bf16.msra.mxu0 %v24201_v24  ;;  %v24258_v24 = vld [vmem:[#allocation4 + $0x780] sm:$0xff]  }
 0xc54   : > { %20896 = vmatpush3.bf16.msra.mxu1 %v24202_v45  ;;  %20917 = vmatprep.subr.bf16.mxu0 %v24203_v53  ;;  %v24259_v45 = vld [vmem:[#allocation4 + $0x840] sm:$0xff]   ;;  %v24260_v53 = vld [vmem:[#allocation4 + $0x7c8] sm:$0xff]  }
 0xc55   : > { %20897 = vmatprep.subr.bf16.mxu1 %v24204_v5  ;;  %v15083_v5 = vrot.slane %v27913_v60, 4 }
 0xc57   : > { %20918 = vmatpush3.bf16.msra.mxu0 %v24205_v18  ;;  %v24261_v18 = vld [vmem:[#allocation4 + $0x800] sm:$0xff]  }
 0xc58   : > { %20898 = vmatpush3.bf16.msra.mxu1 %v24206_v8  ;;  %20919 = vmatprep.subr.bf16.mxu0 %v24207_v23  ;;  %v15077_v8 = vrot.slane %v27913_v60, 2  ;;  %v24262_v23 = vld [vmem:[#allocation4 + $0x788] sm:$0xff]  }
 0xc59   : > { %20899 = vmatprep.subr.bf16.mxu1 %v24208_v30  ;;  %v24263_v30 = vld [vmem:[#allocation4 + $0x848] sm:$0xff]  }
 0xc5b   : > { %20920 = vmatpush3.bf16.msra.mxu0 %v24209_v44  ;;  %v15088_v44 = vrot.slane %v27911_v21, 6 }
 0xc5c   : > { %20900 = vmatpush3.bf16.msra.mxu1 %v24210_v32  ;;  %20921 = vmatprep.subr.bf16.mxu0 %v24211_v25  ;;  %v24264_v32 = vld [vmem:[#allocation4 + $0x7d0] sm:$0xff]   ;;  %v24265_v25 = vld [vmem:[#allocation4 + $0x808] sm:$0xff]  }
 0xc5d   : > { %20901 = vmatprep.subr.bf16.mxu1 %v24212_v61  ;;  %v24266_v61 = vld [vmem:[#allocation4 + $0x790] sm:$0xff]  }
 0xc5f   : > { %20922 = vmatpush3.bf16.msra.mxu0 %v24213_v13  ;;  %v24267_v13 = vld [vmem:[#allocation4 + $0x850] sm:$0xff]  }
 0xc60   : > { %20902 = vmatpush3.bf16.msra.mxu1 %v24214_v42  ;;  %20923 = vmatprep.subr.bf16.mxu0 %v24215_v31  ;;  %v24268_v42 = vld [vmem:[#allocation4 + $0x7d8] sm:$0xff]   ;;  %v24269_v31 = vld [vmem:[#allocation4 + $0x810] sm:$0xff]  }
 0xc61   : > { %20903 = vmatprep.subr.bf16.mxu1 %v24216_v62  ;;  %v24270_v62 = vld [vmem:[#allocation4 + $0x798] sm:$0xff]  }
 0xc63   : > { %20924 = vmatpush3.bf16.msra.mxu0 %v24217_v3  ;;  %v24271_v3 = vld [vmem:[#allocation4 + $0x858] sm:$0xff]  }
 0xc64   : > { %20904 = vmatpush3.bf16.msra.mxu1 %v24218_v14  ;;  %20925 = vmatprep.subr.bf16.mxu0 %v24219_v40  ;;  %v24272_v14 = vld [vmem:[#allocation4 + $0x7e0] sm:$0xff]   ;;  %v24273_v40 = vld [vmem:[#allocation4 + $0x818] sm:$0xff]  }
 0xc65   : > { %20905 = vmatprep.subr.bf16.mxu1 %v24220_v47  ;;  %v24274_v47 = vld [vmem:[#allocation4 + $0x7a0] sm:$0xff]  }
 0xc67   : > { %20926 = vmatpush3.bf16.msra.mxu0 %v24221_v50  ;;  %v24275_v50 = vld [vmem:[#allocation4 + $0x860] sm:$0xff]  }
 0xc68   : > { %20906 = vmatpush3.bf16.msra.mxu1 %v24222_v28  ;;  %20927 = vmatprep.subr.bf16.mxu0 %v24223_v36  ;;  %v24276_v28 = vld [vmem:[#allocation4 + $0x7e8] sm:$0xff]   ;;  %v24277_v36 = vld [vmem:[#allocation4 + $0x820] sm:$0xff]  }
 0xc69   : > { %20935 = vmatprep.subr.bf16.mxu1 %v24225_v11  ;;  %v24278_v11 = vld [vmem:[#allocation4 + $0x7a8] sm:$0xff]  }
 0xc6b   : > { %17878 = vmatmul.mubr.bf16.vlgmr.msra.gmra.mrb[8].mxu1 %v15068_v9  ;;  %20928 = vmatpush3.bf16.msra.mxu0 %v24224_v1  ;;  %v24279_v1 = vld [vmem:[#allocation4 + $0x868] sm:$0xff]   ;;  %v24280_v9 = vld [vmem:[#allocation4 + $0x7f0] sm:$0xff]  }
 0xc6c   : > { %20936 = vmatpush3.bf16.msra.mxu1 %v24226_v22  ;;  %17957 = vmatprep.mubr.bf16.mxu1 %v15076_v39  ;;  %v20116_v22 = vld [vmem:[%s28077_s8] ss:$0 sm:$0xff]  ;;  %v24281_v39 = vld [vmem:[#allocation4 + $0x828] sm:$0xff]  }
 0xc6d   : > { %20957 = vmatprep.subr.bf16.mxu0 %v24227_v27  ;;  %20937 = vmatprep.subr.bf16.mxu1 %v24228_v20 }
 0xc6e   : > { %17918 = vmatmul.mubr.bf16.vlgmr.msra.gmra.mrb[144].mxu0 %v27911_v21 }
 0xc6f   : > { %20958 = vmatpush3.bf16.msra.mxu0 %v24229_v51  ;;  %17997 = vmatprep.mubr.bf16.mxu0 %v15078_v37  ;;  %v17440_v51 = vadd.f32 %v27944_v33, %v20116_v22  ;;  %v24282_v37 = vld [vmem:[#allocation4 + $0x7b0] sm:$0xff]   ;;  %v24286_v33 = vld [vmem:[#allocation4 + $0x7b8] sm:$0xff]  }
 0xc70   : > { %20938 = vmatpush3.bf16.msra.mxu1 %v24230_v56  ;;  %20959 = vmatprep.subr.bf16.mxu0 %v24231_v54 }
 0xc71   : > { %20939 = vmatprep.subr.bf16.mxu1 %v24232_v35  ;;  %v24283_v35 = vld [vmem:[#allocation4 + $0x870] sm:$0xff]  }
 0xc73   : > { %20960 = vmatpush3.bf16.msra.mxu0 %v24233_v29 }
 0xc74   : > { %20940 = vmatpush3.bf16.msra.mxu1 %v24234_v59  ;;  %20961 = vmatprep.subr.bf16.mxu0 %v24235_v49  ;;  %v24284_v49 = vld [vmem:[#allocation4 + $0x7f8] sm:$0xff]  }
 0xc75   : > { %20941 = vmatprep.subr.bf16.mxu1 %v24236_v38 }
 0xc77   : > { %20962 = vmatpush3.bf16.msra.mxu0 %v24237_v58 }
 0xc78   : > { %20942 = vmatpush3.bf16.msra.mxu1 %v24238_v26  ;;  %20963 = vmatprep.subr.bf16.mxu0 %v24239_v57 }
 0xc79   : > { %20943 = vmatprep.subr.bf16.mxu1 %v24240_v2  ;;  %v24285_v2 = vld [vmem:[#allocation4 + $0x830] sm:$0xff]  }
 0xc7b   : > { %20964 = vmatpush3.bf16.msra.mxu0 %v24241_v43 }
 0xc7c   : > { %20944 = vmatpush3.bf16.msra.mxu1 %v24242_v41  ;;  %20965 = vmatprep.subr.bf16.mxu0 %v24243_v7  ;;  %v24287_v41 = vld [vmem:[#allocation4 + $0x878] sm:$0xff]  }
 0xc7d   : > { %20945 = vmatprep.subr.bf16.mxu1 %v24244_v10  ;;  %v24289_v10 = vld [vmem:[#allocation4 + $0x8c0] sm:$0xff]  }
 0xc7f   : > { %20966 = vmatpush3.bf16.msra.mxu0 %v24245_v63  ;;  %v24288_v63 = vld [vmem:[#allocation4 + $0x838] sm:$0xff]  }
 0xc80   : > { %20946 = vmatpush3.bf16.msra.mxu1 %v24246_v6  ;;  %20967 = vmatprep.subr.bf16.mxu0 %v24247_v46  ;;  %v24290_v6 = vld [vmem:[#allocation4 + $0x880] sm:$0xff]   ;;  %v15082_v46 = vrot.slane %v27911_v21, 4  ;;  %v24296_v21 = vld [vmem:[#allocation4 + $0x898] sm:$0xff]  }
 0xc81   : > { %20947 = vmatprep.subr.bf16.mxu1 %v24248_v48  ;;  %v24291_v48 = vld [vmem:[#allocation4 + $0x8c8] sm:$0xff]  }
 0xc83   : > { %20968 = vmatpush3.bf16.msra.mxu0 %v24249_v15  ;;  %v15090_v15 = vrot.slane %v27930_v52, 6 }
 0xc84   : > { %20948 = vmatpush3.bf16.msra.mxu1 %v24250_v55  ;;  %20969 = vmatprep.subr.bf16.mxu0 %v24251_v17  ;;  %v15084_v55 = vrot.slane %v27930_v52, 4  ;;  %v24292_v17 = vld [vmem:[#allocation4 + $0x888] sm:$0xff]  }
 0xc85   : > { %20949 = vmatprep.subr.bf16.mxu1 %v24252_v4  ;;  %v24293_v4 = vld [vmem:[#allocation4 + $0x8d0] sm:$0xff]  }
 0xc87   : > { %20970 = vmatpush3.bf16.msra.mxu0 %v24253_v19  ;;  %v24294_v19 = vld [vmem:[#allocation4 + $0x890] sm:$0xff]  }
 0xc88   : > { %20950 = vmatpush3.bf16.msra.mxu1 %v24254_v12  ;;  %20971 = vmatprep.subr.bf16.mxu0 %v24255_v16  ;;  %v24295_v12 = vld [vmem:[#allocation4 + $0x8d8] sm:$0xff]   ;;  %v24297_v16 = vld [vmem:[#allocation4 + $0x8e0] sm:$0xff]  }
 0xc89   : > { %20979 = vmatprep.subr.bf16.mxu1 %v24257_v34  ;;  %v24298_v34 = vld [vmem:[#allocation4 + $0x8a0] sm:$0xff]  }
 0xc8b   : > { %17958 = vmatmul.mubr.bf16.vlgmr.msra.gmra.mrb[12].mxu1 %v27930_v52  ;;  %20972 = vmatpush3.bf16.msra.mxu0 %v24256_v0  ;;  %v24299_v0 = vld [vmem:[#allocation4 + $0x8e8] sm:$0xff]   ;;  %v24301_v52 = vld [vmem:[#allocation4 + $0x8f0] sm:$0xff]  }
 0xc8c   : > { %20980 = vmatpush3.bf16.msra.mxu1 %v24258_v24  ;;  %18037 = vmatprep.mubr.bf16.mxu1 %v15083_v5  ;;  %v24300_v24 = vld [vmem:[#allocation4 + $0x8a8] sm:$0xff]  }
 0xc8d   : > { %21001 = vmatprep.subr.bf16.mxu0 %v24259_v45  ;;  %20981 = vmatprep.subr.bf16.mxu1 %v24260_v53 }
 0xc8e   : > { %17998 = vmatmul.mubr.bf16.vlgmr.msra.gmra.mrb[148].mxu0 %v15077_v8  ;;  %v24302_v8 = vld [vmem:[#allocation4 + $0x8b0] sm:$0xff]  }
 0xc8f   : > { %21002 = vmatpush3.bf16.msra.mxu0 %v24261_v18  ;;  %18077 = vmatprep.mubr.bf16.mxu0 %v15088_v44  ;;  %v24303_v44 = vld [vmem:[#allocation4 + $0x8f8] sm:$0xff]  }
 0xc90   : > { %20982 = vmatpush3.bf16.msra.mxu1 %v24262_v23  ;;  %21003 = vmatprep.subr.bf16.mxu0 %v24263_v30 }
 0xc91   : > { %20983 = vmatprep.subr.bf16.mxu1 %v24264_v32 }
 0xc93   : > { %21004 = vmatpush3.bf16.msra.mxu0 %v24265_v25 }
 0xc94   : > { %20984 = vmatpush3.bf16.msra.mxu1 %v24266_v61  ;;  %21005 = vmatprep.subr.bf16.mxu0 %v24267_v13 }
 0xc95   : > { %20985 = vmatprep.subr.bf16.mxu1 %v24268_v42 }
 0xc97   : > { %21006 = vmatpush3.bf16.msra.mxu0 %v24269_v31  ;;  %v24304_v31 = vld [vmem:[#allocation4 + $0x8b8] sm:$0xff]  }
 0xc98   : > { %20986 = vmatpush3.bf16.msra.mxu1 %v24270_v62  ;;  %21007 = vmatprep.subr.bf16.mxu0 %v24271_v3  ;;  %v15089_v3 = vrot.slane %v27913_v60, 6 }
 0xc99   : > { %20987 = vmatprep.subr.bf16.mxu1 %v24272_v14 }
 0xc9b   : > { %21008 = vmatpush3.bf16.msra.mxu0 %v24273_v40 }
 0xc9c   : > { %20988 = vmatpush3.bf16.msra.mxu1 %v24274_v47  ;;  %21009 = vmatprep.subr.bf16.mxu0 %v24275_v50 }
 0xc9d   : > { %20989 = vmatprep.subr.bf16.mxu1 %v24276_v28 }
 0xc9e   : > { %v20687_v27 = vpop.f32.mrb[244].mxu1 }
 0xc9f   : > { %21010 = vmatpush3.bf16.msra.mxu0 %v24277_v36  ;;  %v20688_v20 = vpop.f32.mrb[245].mxu1 }
 0xca0   : > { %v20689_v56 = vadd.f32 %v20688_v20, %v20687_v27  ;;  %20990 = vmatpush3.bf16.msra.mxu1 %v24278_v11  ;;  %v20690_v54 = vpop.f32.mrb[246].mxu1  ;;  %21011 = vmatprep.subr.bf16.mxu0 %v24279_v1 }
 0xca1   : > { %v20691_v29 = vpop.f32.mrb[247].mxu1  ;;  %v20709_v59 = vpop.f32.mrb[124].mxu0  ;;  %20991 = vmatprep.subr.bf16.mxu1 %v24280_v9 }
 0xca2   : > { %v17480_v38 = vadd.f32 %v20689_v56, %v17440_v51  ;;  %v20710_v58 = vpop.f32.mrb[125].mxu0 }
 0xca3   : > { %v20711_v26 = vadd.f32 %v20710_v58, %v20709_v59  ;;  %21012 = vmatpush3.bf16.msra.mxu0 %v24281_v39  ;;  %v20712_v57 = vpop.f32.mrb[126].mxu0 }
 0xca4   : > { %20992 = vmatpush3.bf16.msra.mxu1 %v24282_v37  ;;  %v20713_v43 = vpop.f32.mrb[127].mxu0  ;;  %21013 = vmatprep.subr.bf16.mxu0 %v24283_v35  ;;  %v24406_v57 = vmov 0.0  }
 0xca5   : > { %v17520_v7 = vadd.f32 %v20711_v26, %v17480_v38  ;;  %20993 = vmatprep.subr.bf16.mxu1 %v24284_v49  ;;  %v24305_v26 = vld [vmem:[%s28078_s9] sm:$0xff]   ;;  %v24307_v43 = vld [vmem:[%s28078_s9 + $0x10] sm:$0xff]  }
 0xca7   : > { %21014 = vmatpush3.bf16.msra.mxu0 %v24285_v2  ;;  %v24306_v2 = vld [vmem:[%s28078_s9 + $0x8] sm:$0xff]  }
 0xca8   : > { %20994 = vmatpush3.bf16.msra.mxu1 %v24286_v33  ;;  %21015 = vmatprep.subr.bf16.mxu0 %v24287_v41  ;;  %v24308_v33 = vld [vmem:[%s28078_s9 + $0x18] sm:$0xff]   ;;  %v24309_v41 = vld [vmem:[%s28078_s9 + $0x20] sm:$0xff]  }
 0xca9   : > { %21023 = vmatprep.subr.bf16.mxu1 %v24289_v10 }
 0xcab   : > { %18038 = vmatmul.mubr.bf16.vlgmr.msra.gmra.mrb[16].mxu1 %v15082_v46  ;;  %21016 = vmatpush3.bf16.msra.mxu0 %v24288_v63 }
 0xcac   : > { %21024 = vmatpush3.bf16.msra.mxu1 %v24290_v6  ;;  %18117 = vmatprep.mubr.bf16.mxu1 %v15090_v15 }
 0xcad   : > { %21025 = vmatprep.subr.bf16.mxu1 %v24291_v48  ;;  %21096 = vmatprep.subr.bf16.mxu0 %v24406_v57 }
 0xcae   : > { %18078 = vmatmul.mubr.bf16.vlgmr.msra.gmra.mrb[152].mxu0 %v15084_v55 }
 0xcaf   : > { %21097 = vmatpush3.bf16.msra.mxu0 %v24305_v26  ;;  %21112 = vmatprep.mubr.msk.bf16.mxu0 %vm24407_vm6, %v24406_v57 }
 0xcb0   : > { %21026 = vmatpush3.bf16.msra.mxu1 %v24292_v17  ;;  %21098 = vmatprep.subr.bf16.mxu0 %v24406_v57 }
 0xcb1   : > { %21027 = vmatprep.subr.bf16.mxu1 %v24293_v4 }
 0xcb3   : > { %21099 = vmatpush3.bf16.msra.mxu0 %v24306_v2 }
 0xcb4   : > { %21028 = vmatpush3.bf16.msra.mxu1 %v24294_v19  ;;  %21100 = vmatprep.subr.bf16.mxu0 %v24406_v57 }
 0xcb5   : > { %21029 = vmatprep.subr.bf16.mxu1 %v24295_v12 }
 0xcb7   : > { %21101 = vmatpush3.bf16.msra.mxu0 %v24307_v43 }
 0xcb8   : > { %21030 = vmatpush3.bf16.msra.mxu1 %v24296_v21  ;;  %21102 = vmatprep.subr.bf16.mxu0 %v24406_v57 }
 0xcb9   : > { %21031 = vmatprep.subr.bf16.mxu1 %v24297_v16  ;;  %v24311_v16 = vld [vmem:[%s28078_s9 + $0x30] sm:$0xff]  }
 0xcbb   : > { %21103 = vmatpush3.bf16.msra.mxu0 %v24308_v33 }
 0xcbc   : > { %21032 = vmatpush3.bf16.msra.mxu1 %v24298_v34  ;;  %21104 = vmatprep.subr.bf16.mxu0 %v24406_v57  ;;  %v24312_v34 = vld [vmem:[%s28078_s9 + $0x38] sm:$0xff]  }
 0xcbd   : > { %21033 = vmatprep.subr.bf16.mxu1 %v24299_v0  ;;  %v24313_v0 = vld [vmem:[%s28080_s11] sm:$0xff]  }
 0xcbe   : > { %v20731_v45 = vpop.f32.mrb[248].mxu1 }
 0xcbf   : > { %v20732_v53 = vpop.f32.mrb[249].mxu1  ;;  %21105 = vmatpush3.bf16.msra.mxu0 %v24309_v41 }
 0xcc0   : > { %v20733_v5 = vadd.f32 %v20732_v53, %v20731_v45  ;;  %v20734_v18 = vpop.f32.mrb[250].mxu1  ;;  %21034 = vmatpush3.bf16.msra.mxu1 %v24300_v24  ;;  %21106 = vmatprep.subr.bf16.mxu0 %v24406_v57  ;;  %v24314_v24 = vld [vmem:[%s28080_s11 + $0x8] sm:$0xff]   ;;  %v24316_v45 = vld [vmem:[%s28080_s11 + $0x18] sm:$0xff]   ;;  %v24317_v53 = vld [vmem:[%s28080_s11 + $0x20] sm:$0xff]  }
 0xcc1   : > { %v20735_v23 = vpop.f32.mrb[251].mxu1  ;;  %v20753_v30 = vpop.f32.mrb[128].mxu0  ;;  %21035 = vmatprep.subr.bf16.mxu1 %v24301_v52  ;;  %v24315_v52 = vld [vmem:[%s28080_s11 + $0x10] sm:$0xff]  }
 0xcc2   : > { %v17560_v32 = vadd.f32 %v20733_v5, %v17520_v7  ;;  %v20754_v25 = vpop.f32.mrb[129].mxu0  ;;  %v24310_v7 = vld [vmem:[%s28078_s9 + $0x28] sm:$0xff]  }
 0xcc3   : > { %v20755_v61 = vadd.f32 %v20754_v25, %v20753_v30  ;;  %v20756_v13 = vpop.f32.mrb[130].mxu0  ;;  %21107 = vmatpush3.bf16.msra.mxu0 %v24310_v7  ;;  %v24318_v5 = vld [vmem:[%s28080_s11 + $0x28] sm:$0xff]  }
 0xcc4   : > { %v20757_v42 = vpop.f32.mrb[131].mxu0  ;;  %21036 = vmatpush3.bf16.msra.mxu1 %v24302_v8  ;;  %21108 = vmatprep.subr.bf16.mxu0 %v24406_v57 }
 0xcc5   : > { %v17600_v62 = vadd.f32 %v20755_v61, %v17560_v32  ;;  %21037 = vmatprep.subr.bf16.mxu1 %v24303_v44 }
 0xcc7   : > { %21109 = vmatpush3.bf16.msra.mxu0 %v24311_v16 }
 0xcc8   : > { %21038 = vmatpush3.bf16.msra.mxu1 %v24304_v31  ;;  %21110 = vmatprep.subr.bf16.mxu0 %v24406_v57 }
 0xcc9   : > { %21116 = vmatprep.subr.bf16.mxu1 %v24406_v57 }
 0xccb   : > { %18118 = vmatmul.mubr.bf16.vlgmr.msra.gmra.mrb[20].mxu1 %v15089_v3  ;;  %21111 = vmatpush3.bf16.msra.mxu0 %v24312_v34  ;;  %v24323_v34 = vld [vmem:[%s28082_s13 + $0x10] sm:$0xff]  }
 0xccc   : > { %21132 = vmatprep.mubr.msk.bf16.mxu1 %vm24407_vm6, %v24406_v57  ;;  %21117 = vmatpush3.bf16.msra.mxu1 %v24313_v0  ;;  %v24324_v0 = vld [vmem:[%s28082_s13 + $0x18] sm:$0xff]  }
 0xccd   : > { %21118 = vmatprep.subr.bf16.mxu1 %v24406_v57  ;;  %21136 = vmatprep.subr.bf16.mxu0 %v24406_v57 }
 0xcd0   : > { %21119 = vmatpush3.bf16.msra.mxu1 %v24314_v24  ;;  %v20414_v24 = vld [vmem:[%s28081_s12] ss:$0 sm:$0xff] }
 0xcd1   : > { %21120 = vmatprep.subr.bf16.mxu1 %v24406_v57 }
 0xcd4   : > { %21121 = vmatpush3.bf16.msra.mxu1 %v24315_v52 }
 0xcd5   : > { %21122 = vmatprep.subr.bf16.mxu1 %v24406_v57 }
 0xcd8   : > { %21123 = vmatpush3.bf16.msra.mxu1 %v24316_v45 }
 0xcd9   : > { %21124 = vmatprep.subr.bf16.mxu1 %v24406_v57 }
 0xcdc   : > { %21125 = vmatpush3.bf16.msra.mxu1 %v24317_v53 }
 0xcdd   : > { %21126 = vmatprep.subr.bf16.mxu1 %v24406_v57 }
 0xcde   : > { %v20775_v14 = vpop.f32.mrb[252].mxu1 }
 0xcdf   : > { %v20776_v40 = vpop.f32.mrb[253].mxu1 }
 0xce0   : > { %v20777_v47 = vadd.f32 %v20776_v40, %v20775_v14  ;;  %v20778_v50 = vpop.f32.mrb[254].mxu1  ;;  %21127 = vmatpush3.bf16.msra.mxu1 %v24318_v5 }
 0xce1   : > { %v20779_v28 = vpop.f32.mrb[255].mxu1  ;;  %v20797_v36 = vpop.f32.mrb[132].mxu0  ;;  %21128 = vmatprep.subr.bf16.mxu1 %v24406_v57 }
 0xce2   : > { %v17640_v11 = vadd.f32 %v20777_v47, %v17600_v62  ;;  %v20798_v1 = vpop.f32.mrb[133].mxu0 }
 0xce3   : > { %v20799_v22 = vadd.f32 %v20798_v1, %v20797_v36  ;;  %v20800_v9 = vpop.f32.mrb[134].mxu0 }
 0xce4   : > { %v20801_v27 = vpop.f32.mrb[135].mxu0 }
 0xce5   : > { %v17680_v20 = vadd.f32 %v20799_v22, %v17640_v11 }
 0xcfe   : > { %v20819_v39 = vpop.f32.mrb[0].mxu1 }
 0xcff   : > { %v20820_v51 = vpop.f32.mrb[1].mxu1 }
 0xd00   : > { %v20821_v56 = vadd.f32 %v20820_v51, %v20819_v39  ;;  %v20822_v54 = vpop.f32.mrb[2].mxu1 }
 0xd01   : > { %v20823_v37 = vpop.f32.mrb[3].mxu1  ;;  %v20841_v35 = vpop.f32.mrb[136].mxu0 }
 0xd02   : > { %v17720_v60 = vadd.f32 %v20821_v56, %v17680_v20  ;;  %v20842_v29 = vpop.f32.mrb[137].mxu0 }
 0xd03   : > { %v20843_v59 = vadd.f32 %v20842_v29, %v20841_v35  ;;  %v20844_v49 = vpop.f32.mrb[138].mxu0 }
 0xd04   : > { %v20845_v38 = vpop.f32.mrb[139].mxu0 }
 0xd05   : > { %v17760_v58 = vadd.f32 %v20843_v59, %v17720_v60 }
 0xd1e   : > { %v20863_v10 = vpop.f32.mrb[4].mxu1 }
 0xd1f   : > { %v20864_v63 = vpop.f32.mrb[5].mxu1 }
 0xd20   : > { %v20865_v6 = vadd.f32 %v20864_v63, %v20863_v10  ;;  %v20866_v46 = vpop.f32.mrb[6].mxu1  ;;  %v24319_v63 = vld [vmem:[%s28080_s11 + $0x30] sm:$0xff]  }
 0xd21   : > { %v20867_v48 = vpop.f32.mrb[7].mxu1  ;;  %v20885_v15 = vpop.f32.mrb[140].mxu0  ;;  %21129 = vmatpush3.bf16.msra.mxu1 %v24319_v63  ;;  %v24321_v46 = vld [vmem:[%s28082_s13] sm:$0xff]  }
 0xd22   : > { %v17800_v55 = vadd.f32 %v20865_v6, %v17760_v58  ;;  %v20886_v17 = vpop.f32.mrb[141].mxu0  ;;  %v24320_v6 = vld [vmem:[%s28080_s11 + $0x38] sm:$0xff]   ;;  %21130 = vmatprep.subr.bf16.mxu1 %v24406_v57  ;;  %v24322_v48 = vld [vmem:[%s28082_s13 + $0x8] sm:$0xff]  }
 0xd23   : > { %v20887_v4 = vadd.f32 %v20886_v17, %v20885_v15  ;;  %v20888_v19 = vpop.f32.mrb[142].mxu0  ;;  %v20405_v15 = vld [vmem:[%s28079_s10] ss:$0 sm:$0xff] }
 0xd24   : > { %v20889_v12 = vpop.f32.mrb[143].mxu0 }
 0xd25   : > { %v17840_v21 = vadd.f32 %v20887_v4, %v17800_v55  ;;  %21131 = vmatpush3.bf16.msra.mxu1 %v24320_v6 }
 0xd3e   : > { %v20907_v18 = vpop.f32.mrb[8].mxu1 }
 0xd3f   : > { %v20908_v8 = vpop.f32.mrb[9].mxu1 }
 0xd40   : > { %v20909_v23 = vadd.f32 %v20908_v8, %v20907_v18  ;;  %v20910_v30 = vpop.f32.mrb[10].mxu1 }
 0xd41   : > { %v20911_v44 = vpop.f32.mrb[11].mxu1  ;;  %v20929_v32 = vpop.f32.mrb[144].mxu0  ;;  %v20423_v30 = vld [vmem:[%s28083_s14] ss:$0 sm:$0xff] }
 0xd42   : > { %v17880_v25 = vadd.f32 %v20909_v23, %v17840_v21  ;;  %v20930_v61 = vpop.f32.mrb[145].mxu0 }
 0xd43   : > { %v20931_v13 = vadd.f32 %v20930_v61, %v20929_v32  ;;  %v20932_v42 = vpop.f32.mrb[146].mxu0 }
 0xd44   : > { %v20933_v31 = vpop.f32.mrb[147].mxu0 }
 0xd45   : > { %v17920_v62 = vadd.f32 %v20931_v13, %v17880_v25 }
 0xd5e   : > { %v20951_v3 = vpop.f32.mrb[12].mxu1 }
 0xd5f   : > { %v20952_v14 = vpop.f32.mrb[13].mxu1 }
 0xd60   : > { %v20953_v40 = vadd.f32 %v20952_v14, %v20951_v3  ;;  %v20954_v47 = vpop.f32.mrb[14].mxu1 }
 0xd61   : > { %v20955_v50 = vpop.f32.mrb[15].mxu1  ;;  %v20973_v28 = vpop.f32.mrb[148].mxu0 }
 0xd62   : > { %v17960_v36 = vadd.f32 %v20953_v40, %v17920_v62  ;;  %v20974_v11 = vpop.f32.mrb[149].mxu0 }
 0xd63   : > { %v20975_v1 = vadd.f32 %v20974_v11, %v20973_v28  ;;  %v20976_v22 = vpop.f32.mrb[150].mxu0 }
 0xd64   : > { %v20977_v9 = vpop.f32.mrb[151].mxu0 }
 0xd65   : > { %v18000_v27 = vadd.f32 %v20975_v1, %v17960_v36 }
 0xd7e   : > { %v20995_v20 = vpop.f32.mrb[16].mxu1 }
 0xd7f   : > { %v20996_v39 = vpop.f32.mrb[17].mxu1 }
 0xd80   : > { %v20997_v51 = vadd.f32 %v20996_v39, %v20995_v20  ;;  %v20998_v56 = vpop.f32.mrb[18].mxu1 }
 0xd81   : > { %v20999_v54 = vpop.f32.mrb[19].mxu1  ;;  %v21017_v37 = vpop.f32.mrb[152].mxu0 }
 0xd82   : > { %v18040_v35 = vadd.f32 %v20997_v51, %v18000_v27  ;;  %v21018_v60 = vpop.f32.mrb[153].mxu0 }
 0xd83   : > { %v21019_v29 = vadd.f32 %v21018_v60, %v21017_v37  ;;  %v21020_v59 = vpop.f32.mrb[154].mxu0 }
 0xd84   : > { %v21021_v49 = vpop.f32.mrb[155].mxu0 }
 0xd85   : > { %v18080_v38 = vadd.f32 %v21019_v29, %v18040_v35 }
 0xd9e   : > { %v21039_v58 = vpop.f32.mrb[20].mxu1 }
 0xd9f   : > { %v21040_v26 = vpop.f32.mrb[21].mxu1 }
 0xda0   : > { %v21041_v2 = vadd.f32 %v21040_v26, %v21039_v58  ;;  %v21042_v43 = vpop.f32.mrb[22].mxu1 }
 0xda1   : > { %v21043_v33 = vpop.f32.mrb[23].mxu1 }
 0xda2   : > { %v18120_v41 = vadd.f32 %v21041_v2, %v18080_v38 }
 0xda4   : > { %v18125_v7 = vmax.f32 %v18120_v41, 0.0 }
 0xda6   : > { %v18126_v10 = vpack.c.bf16 %v18125_v7, %v18125_v7 }
 0xda8   : > { %21113 = vmatmul.mubr.bf16.vlgmr.msra.gmra.mrb[156].mxu0 %v18126_v10 }
 0xda9   : > { %21144 = vmatprep.mubr.msk.bf16.mxu0 %vm24407_vm6, %v24406_v57  ;;  %21137 = vmatpush3.bf16.msra.mxu0 %v24321_v46 }
 0xdaa   : > { %21138 = vmatprep.subr.bf16.mxu0 %v24406_v57 }
 0xdad   : > { %21139 = vmatpush3.bf16.msra.mxu0 %v24322_v48 }
 0xdae   : > { %21140 = vmatprep.subr.bf16.mxu0 %v24406_v57 }
 0xdb1   : > { %21141 = vmatpush3.bf16.msra.mxu0 %v24323_v34 }
 0xdb2   : > { %21142 = vmatprep.subr.bf16.mxu0 %v24406_v57 }
 0xdb5   : > { %21143 = vmatpush3.bf16.msra.mxu0 %v24324_v0 }
 0xe7b   : > { %v18232_v55 = vpop.f32.mrb[156].mxu0 }
 0xe7c   : > { %v18233_v17 = vadd.f32 %v20405_v15, %v18232_v55  ;;  %v21114_v4 = vpop.f32.mrb[157].mxu0 }
 0xe7d   : > { %v18235_v19 = vpop.f32.mrb[158].mxu0 }
 0xe7e   : > { %v18238_v12 = vmax.f32 %v18233_v17, 0.0  ;;  %v21115_v21 = vpop.f32.mrb[159].mxu0 }
 0xe80   : > { %v18239_v16 = vpack.c.bf16 %v18238_v12, %v18238_v12 }
 0xe82   : > { %21133 = vmatmul.mubr.bf16.vlgmr.msra.gmra.mrb[24].mxu1 %v18239_v16 }
 0xf55   : > { %v18345_v52 = vpop.f32.mrb[24].mxu1 }
 0xf56   : > { %v18346_v45 = vadd.f32 %v20414_v24, %v18345_v52  ;;  %v21134_v53 = vpop.f32.mrb[25].mxu1 }
 0xf57   : > { %v18348_v5 = vpop.f32.mrb[26].mxu1 }
 0xf58   : > { %v18351_v18 = vmax.f32 %v18346_v45, 0.0  ;;  %v21135_v8 = vpop.f32.mrb[27].mxu1 }
 0xf5a   : > { %v18352_v23 = vpack.c.bf16 %v18351_v18, %v18351_v18 }
 0xf5c   : > { %21145 = vmatmul.mubr.msk.bf16.vlgmr.msra.gmra.mrb[160].mxu0 %vm4141_vm3, %v18352_v23 }
0x102f   : > { %v18429_v57 = vpop.f32.mrb[160].mxu0 }
0x1030   : > { %v18430_v44 = vadd.f32 %v20423_v30, %v18429_v57  ;;  %v21146_v32 = vpop.f32.mrb[161].mxu0 }
0x1031   : > { %v18432_v25 = vpop.f32.mrb[162].mxu0 }
0x1032   : > { %18435 = vst [vmem:[%s522_s26] sm:$0xf] %v18430_v44  ;;  %v21147_v61 = vpop.f32.mrb[163].mxu0 }
0x1033 PF: > { %s28661_s22 = sld [smem:[#allocation8_spill]] }
0x1039   : > { %s27_s18 = sadd.s32 1, %s28661_s22  }
0x103a   : > { %p24_p9 = scmp.ge.s32.totalorder %s27_s18, 4  }
0x103c   :  { %26 = sbr.rel (!%p24_p9) target bundleno = 4 (0x4), region = 123 }
0x1043   :  { %18455 = vsyncpa [#allocation3], 1 }
0x1044   :  { %18457 = vsyncpa [#allocation3 + $0x1], 1 }
0x1045   :  { %18458 = vsyncpa [#allocation5], 1 }

</bundles_post_ra>
